<compile_context>
chip_gen: v7x
topology: tpu7x:2x2x1
jax: 0.10.0
libtpu: 0.0.40
codegen_flags: <defaults>
</compile_context>

<pallas_src>
import functools

import numpy as np
import jax
import jax.numpy as jnp
from jax import lax
from jax.experimental import pallas as pl
from jax.experimental.pallas import tpu as pltpu

EPS = 1e-5
MXU_DTYPE = jnp.bfloat16     # native MXU dtype on v5e/v6e/v7x; f32 accumulation


def _encoder_kernel(xcat_ref, masks_ref,
                    w1_ref, g1_ref, be1_ref,
                    w2_ref, g2_ref, be2_ref,
                    out_ref,
                    y1_ref, y1cat_ref, y2_ref,
                    *, N, H, W, Ws):
    """Fused Conv3x3 -> BN(train) -> ReLU -> Conv3x3 -> BN(train) -> ReLU -> MaxPool2x2.

    xcat_ref : (M + 2*Ws, 3*Cin) bf16  kw-folded, flattened (padded-stride) input
    masks_ref: (M, 2) f32              col0: conv1-valid, col1: conv2-valid
    w*_ref   : (3, 3*C_in_layer, Cout) kw-folded conv weights (bf16)
    g*/be*   : (1, Cout) f32           BN gamma / beta
    out_ref  : (M//2, Cout) f32        w-decimated 2x2-max plane (one store)
    y1_ref   : (M + 8, Cout) f32       staging plane for the +1/+2 kw shifts
    y1cat_ref: (M + 2*Ws, 3*Cout) bf16 kw-folded relu(bn(conv1)) plane
    y2_ref   : (M + Ws, Cout) f32      relu(bn(conv2)) plane
    """
    Cout = w1_ref.shape[2]
    Ho, Wo = H - 2, W - 2          # conv1 valid extent (original, unpadded W)
    H2, W2 = H - 4, W - 4          # conv2 valid extent
    M = N * H * Ws
    M2 = M // 2
    f32 = jnp.float32

    # Zero the scratch tails: they are read by shifted taps of *invalid* output
    # rows, which are masked out of the BN sums — they only need to be finite
    # (uninitialized VMEM could hold NaN bit patterns and NaN*0 = NaN).
    y1_ref[pl.ds(M, 8), :] = jnp.zeros((8, Cout), f32)
    y1cat_ref[pl.ds(M, 2 * Ws), :] = jnp.zeros((2 * Ws, 3 * Cout), y1cat_ref.dtype)
    y2_ref[pl.ds(M, Ws), :] = jnp.zeros((Ws, Cout), f32)

    def bn_relu(acc, mask, count, g_ref, be_ref):
        # Train-mode BatchNorm over the *valid* positions only, two-pass
        # (centered) biased variance, then ReLU.  Conv bias is omitted: it
        # cancels exactly under train-mode BN.
        mean = jnp.sum(acc * mask, axis=0, keepdims=True) / count
        centered = (acc - mean) * mask
        var = jnp.sum(centered * centered, axis=0, keepdims=True) / count
        scale = g_ref[...] * lax.rsqrt(var + EPS)
        shift = be_ref[...] - mean * scale
        return jnp.maximum(acc * scale + shift, 0.0)

    masks = masks_ref[...]
    m1 = masks[:, 0:1]
    m2 = masks[:, 1:2]

    # ---- conv1: 3 matmuls with K = 3*Cin (kw folded by the wrapper); the kh
    #      tap offsets kh*Ws are static multiples of 16 -> aligned plane reads.
    acc1 = jnp.zeros((M, Cout), f32)
    for kh in range(3):
        patch = xcat_ref[pl.ds(kh * Ws, M), :]                      # (M, 3*Cin) bf16
        acc1 = acc1 + jnp.dot(patch, w1_ref[kh], preferred_element_type=f32)
    y1 = bn_relu(acc1, m1, float(N * Ho * Wo), g1_ref, be1_ref)     # (M, Cout) f32

    # ---- build the kw-folded y1 plane once: y1cat[m] = [y1[m], y1[m+1], y1[m+2]]
    #      (two +1/+2 shifted re-reads of the f32 staging plane, one lane concat,
    #       one bf16 write; conv2 then only does aligned reads).
    y1_ref[pl.ds(0, M), :] = y1
    c1 = y1_ref[pl.ds(1, M), :]
    c2 = y1_ref[pl.ds(2, M), :]
    y1cat_ref[pl.ds(0, M), :] = jnp.concatenate(
        [y1, c1, c2], axis=-1).astype(y1cat_ref.dtype)

    # ---- conv2: 3 matmuls with K = 3*Cout on the bf16 kw-folded plane --------
    acc2 = jnp.zeros((M, Cout), f32)
    for kh in range(3):
        patch = y1cat_ref[pl.ds(kh * Ws, M), :]                     # (M, 3*Cout) bf16
        acc2 = acc2 + jnp.dot(patch, w2_ref[kh], preferred_element_type=f32)
    y2_ref[pl.ds(0, M), :] = bn_relu(acc2, m2, float(N * H2 * W2), g2_ref, be2_ref)

    # ---- MaxPool 2x2 stride 2, fully vectorized: for every even flat position
    #      2k the window max is max(y2[2k], y2[2k+1], y2[2k+Ws], y2[2k+Ws+1]).
    #      Four whole-plane stride-2 reads + 3 maxes + ONE store; the wrapper
    #      drops the odd-h rows and the padded columns with a cheap XLA slice.
    t00 = y2_ref[pl.ds(0, M2, stride=2), :]
    t01 = y2_ref[pl.ds(1, M2, stride=2), :]
    t10 = y2_ref[pl.ds(Ws, M2, stride=2), :]
    t11 = y2_ref[pl.ds(Ws + 1, M2, stride=2), :]
    out_ref[...] = jnp.maximum(jnp.maximum(t00, t01),
                               jnp.maximum(t10, t11)).astype(out_ref.dtype)


def _padded_vmem_bytes(shape, dtype):
    """Approximate VMEM footprint of an array: last dim padded to 128 lanes,
    second-to-last to the dtype's sublane tile (8 rows * 32bit packing)."""
    itemsize = np.dtype(dtype).itemsize
    sub = 8 * (4 // itemsize)
    r = shape[-2] if len(shape) >= 2 else 1
    c = shape[-1]
    lead = int(np.prod(shape[:-2])) if len(shape) > 2 else 1
    return lead * pl.cdiv(r, sub) * sub * pl.cdiv(c, 128) * 128 * itemsize


def encoder_block_forward(x_nchw, params):
    """PyTorch-semantics _EncoderBlock forward. Input/output in NCHW."""
    x = jnp.transpose(x_nchw, (0, 2, 3, 1)).astype(jnp.float32)     # NCHW -> NHWC
    N, H, W, Cin = x.shape
    Cout = params["w1"].shape[-1]
    Ho, Wo = H - 2, W - 2
    H2, W2 = H - 4, W - 4
    Hp, Wp = H2 // 2, W2 // 2
    assert Hp >= 1 and Wp >= 1, "spatial size too small for two VALID 3x3 convs + pool"

    # Padded row stride: multiple of 16 so every kh*Ws tap offset (and the pool
    # +Ws offset) is sublane-aligned, also for bf16 (16,128) tiles.
    Ws = ((W + 15) // 16) * 16
    M = N * H * Ws
    M2 = M // 2
    Ws2 = Ws // 2

    # Flattened channels-last plane with padded row stride, then fold the kw
    # taps into the lane dim: row m = [x[m], x[m+1], x[m+2]]  -> (M+2*Ws, 3*Cin)
    x_flat = jnp.pad(x, ((0, 0), (0, 0), (0, Ws - W), (0, 0))).reshape(M, Cin)
    xf = jnp.pad(x_flat, ((0, 2 * Ws + 2), (0, 0)))
    R = M + 2 * Ws
    x_cat = jnp.concatenate([xf[0:R], xf[1:R + 1], xf[2:R + 2]],
                            axis=-1).astype(MXU_DTYPE)

    # Validity masks for the BN statistics (static, built once on the host).
    h_idx = np.arange(H)[:, None]
    w_idx = np.arange(Ws)[None, :]
    mk1 = ((h_idx < Ho) & (w_idx < Wo)).astype(np.float32).reshape(1, H * Ws)
    mk2 = ((h_idx < H2) & (w_idx < W2)).astype(np.float32).reshape(1, H * Ws)
    masks = jnp.asarray(np.stack(
        [np.tile(mk1, (N, 1)).reshape(M), np.tile(mk2, (N, 1)).reshape(M)],
        axis=-1))                                                   # (M, 2) f32

    # kw-folded weights: contraction index = kw*C_in_layer + c_in.
    w1f = params["w1"].reshape(3, 3 * Cin, Cout).astype(MXU_DTYPE)
    w2f = params["w2"].reshape(3, 3 * Cout, Cout).astype(MXU_DTYPE)

    def fullspec(shape):
        nd = len(shape)
        return pl.BlockSpec(shape, lambda i, nd=nd: (0,) * nd)

    kernel = functools.partial(_encoder_kernel, N=N, H=H, W=W, Ws=Ws)

    scratch_shapes = [
        pltpu.VMEM((M + 8, Cout), jnp.float32),          # y1 staging (f32, +1/+2 reads)
        pltpu.VMEM((M + 2 * Ws, 3 * Cout), MXU_DTYPE),   # kw-folded y1 (bf16)
        pltpu.VMEM((M + Ws, Cout), jnp.float32),         # y2
    ]

    # Right-sized VMEM limit from the padded buffer sizes (x2 for I/O double
    # buffering) plus headroom for in-kernel temporaries; capped well below the
    # v7x 64 MiB physical budget.
    io_arrays = [(x_cat.shape, MXU_DTYPE), (masks.shape, jnp.float32),
                 (w1f.shape, MXU_DTYPE), ((1, Cout), jnp.float32),
                 ((1, Cout), jnp.float32), (w2f.shape, MXU_DTYPE),
                 ((1, Cout), jnp.float32), ((1, Cout), jnp.float32),
                 ((M2, Cout), jnp.float32)]
    scratch_arrays = [((M + 8, Cout), jnp.float32),
                      ((M + 2 * Ws, 3 * Cout), MXU_DTYPE),
                      ((M + Ws, Cout), jnp.float32)]
    est = (2 * sum(_padded_vmem_bytes(s, d) for s, d in io_arrays)
           + sum(_padded_vmem_bytes(s, d) for s, d in scratch_arrays))
    vmem_limit = int(min(48 << 20, max(8 << 20, 4 * est)))

    pooled_flat = pl.pallas_call(
        kernel,
        out_shape=jax.ShapeDtypeStruct((M2, Cout), jnp.float32),
        grid_spec=pltpu.PrefetchScalarGridSpec(
            num_scalar_prefetch=0,
            grid=(1,),
            in_specs=[
                fullspec(x_cat.shape),
                fullspec(masks.shape),
                fullspec(w1f.shape),
                fullspec((1, Cout)), fullspec((1, Cout)),
                fullspec(w2f.shape),
                fullspec((1, Cout)), fullspec((1, Cout)),
            ],
            out_specs=fullspec((M2, Cout)),
            scratch_shapes=scratch_shapes,
        ),
        compiler_params=pltpu.CompilerParams(
            dimension_semantics=("arbitrary",),
            vmem_limit_bytes=vmem_limit),
    )(x_cat, masks,
      w1f, params["g1"], params["beta1"],
      w2f, params["g2"], params["beta2"])

    # h-decimation + crop of the padded columns (cheap XLA slice), NHWC -> NCHW.
    pooled = pooled_flat.reshape(N, H, Ws2, Cout)[:, 0:2 * Hp:2, 0:Wp, :]
    return jnp.transpose(pooled, (0, 3, 1, 2))


# ----------------------------- pure-JAX reference ---------------------------
def ref_forward(x_nchw, params, eps=EPS):
    """Faithful PyTorch-style reference (includes the conv bias, which cancels
    under train-mode BN — the kernel omits it)."""
    def conv(x, w_hwio, b):
        w = jnp.transpose(w_hwio, (3, 2, 0, 1))  # HWIO -> OIHW
        y = lax.conv_general_dilated(
            x, w, (1, 1), "VALID",
            dimension_numbers=("NCHW", "OIHW", "NCHW"),
            precision=lax.Precision.HIGHEST)
        return y + b.reshape(1, -1, 1, 1)

    def bn_train(x, gamma, beta):
        mean = jnp.mean(x, axis=(0, 2, 3), keepdims=True)
        var = jnp.mean((x - mean) ** 2, axis=(0, 2, 3), keepdims=True)
        return ((x - mean) * lax.rsqrt(var + eps)
                * gamma.reshape(1, -1, 1, 1) + beta.reshape(1, -1, 1, 1))

    y = jax.nn.relu(bn_train(conv(x_nchw, params["w1"], params["b1"][0]),
                             params["g1"][0], params["beta1"][0]))
    y = jax.nn.relu(bn_train(conv(y, params["w2"], params["b2"][0]),
                             params["g2"][0], params["beta2"][0]))
    N, C, Hh, Ww = y.shape
    y = y[:, :, :(Hh // 2) * 2, :(Ww // 2) * 2]
    y = y.reshape(N, C, Hh // 2, 2, Ww // 2, 2).max(axis=(3, 5))
    return y


if __name__ == "__main__":
    key = jax.random.PRNGKey(0)
    ks = jax.random.split(key, 9)

    N, Cin, Cout, S = 2, 4, 8, 16   # batch=2, in_ch=4, out_ch=8, spatial=16

    params = {
        "w1":    0.1 * jax.random.normal(ks[0], (3, 3, Cin, Cout), jnp.float32),
        "b1":    0.1 * jax.random.normal(ks[1], (1, Cout), jnp.float32),  # ref only
        "g1":    1.0 + 0.1 * jax.random.normal(ks[2], (1, Cout), jnp.float32),
        "beta1": 0.1 * jax.random.normal(ks[3], (1, Cout), jnp.float32),
        "w2":    0.1 * jax.random.normal(ks[4], (3, 3, Cout, Cout), jnp.float32),
        "b2":    0.1 * jax.random.normal(ks[5], (1, Cout), jnp.float32),  # ref only
        "g2":    1.0 + 0.1 * jax.random.normal(ks[6], (1, Cout), jnp.float32),
        "beta2": 0.1 * jax.random.normal(ks[7], (1, Cout), jnp.float32),
    }
    x = jax.random.normal(ks[8], (N, Cin, S, S), jnp.float32)     # NCHW like PyTorch

    out = jax.block_until_ready(encoder_block_forward(x, params))
    ref = jax.block_until_ready(ref_forward(x, params))

    assert out.shape == (N, Cout, 6, 6), out.shape
    # Tolerance loosened vs. the f32 kernel: conv inputs/weights and the y1
    # plane are bf16 (f32 accumulation), so two chained convs carry ~1e-2
    # worst-case rounding against the f32 HIGHEST reference.
    if not np.allclose(np.asarray(out), np.asarray(ref), atol=5e-2, rtol=5e-2):
        raise AssertionError(
            "Pallas kernel deviates from reference; max abs err = "
            f"{float(np.max(np.abs(np.asarray(out) - np.asarray(ref))))}")

    print("KERNEL_OK")
</pallas_src>

<mosaic_0001>
module attributes {stable_mosaic.version = 11 : i64} {
  func.func @_encoder_kernel(%arg0: i32, %arg1: memref<544x12xbf16, #tpu.memory_space<vmem>>, %arg2: memref<512x2xf32, #tpu.memory_space<vmem>>, %arg3: memref<3x12x8xbf16, #tpu.memory_space<vmem>>, %arg4: memref<1x8xf32, #tpu.memory_space<vmem>>, %arg5: memref<1x8xf32, #tpu.memory_space<vmem>>, %arg6: memref<3x24x8xbf16, #tpu.memory_space<vmem>>, %arg7: memref<1x8xf32, #tpu.memory_space<vmem>>, %arg8: memref<1x8xf32, #tpu.memory_space<vmem>>, %arg9: memref<256x8xf32, #tpu.memory_space<vmem>>, %arg10: memref<520x8xf32, #tpu.memory_space<vmem>>, %arg11: memref<544x24xbf16, #tpu.memory_space<vmem>>, %arg12: memref<528x8xf32, #tpu.memory_space<vmem>>) attributes {dimension_semantics = [#tpu.dimension_semantics<arbitrary>], iteration_bounds = array<i64: 1>, scalar_prefetch = 0 : i64, scratch_operands = 3 : i64, tpu.core_type = #tpu.core_type<tc>, window_params = [{pipeline_mode = #tpu.pipeline_mode<synchronous>, transform_indices = @transform_0, window_bounds = array<i64: 544, 12>}, {pipeline_mode = #tpu.pipeline_mode<synchronous>, transform_indices = @transform_1, window_bounds = array<i64: 512, 2>}, {pipeline_mode = #tpu.pipeline_mode<synchronous>, transform_indices = @transform_2, window_bounds = array<i64: 3, 12, 8>}, {pipeline_mode = #tpu.pipeline_mode<synchronous>, transform_indices = @transform_3, window_bounds = array<i64: 1, 8>}, {pipeline_mode = #tpu.pipeline_mode<synchronous>, transform_indices = @transform_4, window_bounds = array<i64: 1, 8>}, {pipeline_mode = #tpu.pipeline_mode<synchronous>, transform_indices = @transform_5, window_bounds = array<i64: 3, 24, 8>}, {pipeline_mode = #tpu.pipeline_mode<synchronous>, transform_indices = @transform_6, window_bounds = array<i64: 1, 8>}, {pipeline_mode = #tpu.pipeline_mode<synchronous>, transform_indices = @transform_7, window_bounds = array<i64: 1, 8>}, {pipeline_mode = #tpu.pipeline_mode<synchronous>, transform_indices = @transform_8, window_bounds = array<i64: 256, 8>}]} {
    %cst = arith.constant 0.000000e+00 : f32
    %0 = vector.broadcast %cst : f32 to vector<8x8xf32>
    %c512 = arith.constant 512 : index
    %c0 = arith.constant 0 : index
    %1 = vector.load %arg10[%c512, %c0] : memref<520x8xf32, #tpu.memory_space<vmem>>, vector<8x8xf32>
    tpu.vector_store %arg10[%c512, %c0], %0 {strides = array<i32>} : memref<520x8xf32, #tpu.memory_space<vmem>>, vector<8x8xf32>,
    %cst_0 = arith.constant 0.000000e+00 : bf16
    %2 = vector.broadcast %cst_0 : bf16 to vector<32x24xbf16>
    %c512_1 = arith.constant 512 : index
    %c0_2 = arith.constant 0 : index
    %3 = vector.load %arg11[%c512_1, %c0_2] : memref<544x24xbf16, #tpu.memory_space<vmem>>, vector<32x24xbf16>
    tpu.vector_store %arg11[%c512_1, %c0_2], %2 {strides = array<i32>} : memref<544x24xbf16, #tpu.memory_space<vmem>>, vector<32x24xbf16>,
    %cst_3 = arith.constant 0.000000e+00 : f32
    %4 = vector.broadcast %cst_3 : f32 to vector<16x8xf32>
    %c512_4 = arith.constant 512 : index
    %c0_5 = arith.constant 0 : index
    %5 = vector.load %arg12[%c512_4, %c0_5] : memref<528x8xf32, #tpu.memory_space<vmem>>, vector<16x8xf32>
    tpu.vector_store %arg12[%c512_4, %c0_5], %4 {strides = array<i32>} : memref<528x8xf32, #tpu.memory_space<vmem>>, vector<16x8xf32>,
    %c0_6 = arith.constant 0 : index
    %c0_7 = arith.constant 0 : index
    %6 = vector.load %arg2[%c0_6, %c0_7] : memref<512x2xf32, #tpu.memory_space<vmem>>, vector<512x2xf32>
    %7 = vector.extract_strided_slice %6 {offsets = [0, 0], sizes = [512, 1], strides = [1, 1]} : vector<512x2xf32> to vector<512x1xf32>
    %8 = vector.extract_strided_slice %6 {offsets = [0, 1], sizes = [512, 1], strides = [1, 1]} : vector<512x2xf32> to vector<512x1xf32>
    %cst_8 = arith.constant 0.000000e+00 : f32
    %9 = vector.broadcast %cst_8 : f32 to vector<512x8xf32>
    %c0_9 = arith.constant 0 : index
    %c0_10 = arith.constant 0 : index
    %10 = vector.load %arg1[%c0_9, %c0_10] : memref<544x12xbf16, #tpu.memory_space<vmem>>, vector<512x12xbf16>
    %c0_11 = arith.constant 0 : index
    %c0_12 = arith.constant 0 : index
    %c0_13 = arith.constant 0 : index
    %11 = vector.load %arg3[%c0_11, %c0_12, %c0_13] : memref<3x12x8xbf16, #tpu.memory_space<vmem>>, vector<1x12x8xbf16>
    %12 = vector.shape_cast %11 : vector<1x12x8xbf16> to vector<12x8xbf16>
    %cst_14 = arith.constant dense<0.000000e+00> : vector<512x8xf32>
    %13 = tpu.matmul %10, %12, %cst_14 {dimension_numbers = #tpu.dot_dimension_numbers<[1], [0], [0], [1], [0, 0, 1, 1], [], []>} : vector<512x12xbf16>, vector<12x8xbf16>, vector<512x8xf32> -> vector<512x8xf32>
    %14 = arith.addf %9, %13 : vector<512x8xf32>
    %c16 = arith.constant 16 : index
    %c0_15 = arith.constant 0 : index
    %15 = vector.load %arg1[%c16, %c0_15] : memref<544x12xbf16, #tpu.memory_space<vmem>>, vector<512x12xbf16>
    %c1 = arith.constant 1 : index
    %c0_16 = arith.constant 0 : index
    %c0_17 = arith.constant 0 : index
    %16 = vector.load %arg3[%c1, %c0_16, %c0_17] : memref<3x12x8xbf16, #tpu.memory_space<vmem>>, vector<1x12x8xbf16>
    %17 = vector.shape_cast %16 : vector<1x12x8xbf16> to vector<12x8xbf16>
    %cst_18 = arith.constant dense<0.000000e+00> : vector<512x8xf32>
    %18 = tpu.matmul %15, %17, %cst_18 {dimension_numbers = #tpu.dot_dimension_numbers<[1], [0], [0], [1], [0, 0, 1, 1], [], []>} : vector<512x12xbf16>, vector<12x8xbf16>, vector<512x8xf32> -> vector<512x8xf32>
    %19 = arith.addf %14, %18 : vector<512x8xf32>
    %c32 = arith.constant 32 : index
    %c0_19 = arith.constant 0 : index
    %20 = vector.load %arg1[%c32, %c0_19] : memref<544x12xbf16, #tpu.memory_space<vmem>>, vector<512x12xbf16>
    %c2 = arith.constant 2 : index
    %c0_20 = arith.constant 0 : index
    %c0_21 = arith.constant 0 : index
    %21 = vector.load %arg3[%c2, %c0_20, %c0_21] : memref<3x12x8xbf16, #tpu.memory_space<vmem>>, vector<1x12x8xbf16>
    %22 = vector.shape_cast %21 : vector<1x12x8xbf16> to vector<12x8xbf16>
    %cst_22 = arith.constant dense<0.000000e+00> : vector<512x8xf32>
    %23 = tpu.matmul %20, %22, %cst_22 {dimension_numbers = #tpu.dot_dimension_numbers<[1], [0], [0], [1], [0, 0, 1, 1], [], []>} : vector<512x12xbf16>, vector<12x8xbf16>, vector<512x8xf32> -> vector<512x8xf32>
    %24 = arith.addf %19, %23 : vector<512x8xf32>
    %25 = vector.broadcast %7 : vector<512x1xf32> to vector<512x8xf32>
    %26 = arith.mulf %24, %25 : vector<512x8xf32>
    %cst_23 = arith.constant dense<0.000000e+00> : vector<8xf32>
    %27 = vector.multi_reduction <add>, %26, %cst_23 [0] : vector<512x8xf32> to vector<8xf32>
    %28 = vector.shape_cast %27 : vector<8xf32> to vector<1x8xf32>
    %cst_24 = arith.constant 3.920000e+02 : f32
    %29 = vector.broadcast %cst_24 : f32 to vector<1x8xf32>
    %30 = arith.divf %28, %29 : vector<1x8xf32>
    %31 = vector.broadcast %30 : vector<1x8xf32> to vector<512x8xf32>
    %32 = arith.subf %24, %31 : vector<512x8xf32>
    %33 = vector.broadcast %7 : vector<512x1xf32> to vector<512x8xf32>
    %34 = arith.mulf %32, %33 : vector<512x8xf32>
    %35 = arith.mulf %34, %34 : vector<512x8xf32>
    %cst_25 = arith.constant dense<0.000000e+00> : vector<8xf32>
    %36 = vector.multi_reduction <add>, %35, %cst_25 [0] : vector<512x8xf32> to vector<8xf32>
    %37 = vector.shape_cast %36 : vector<8xf32> to vector<1x8xf32>
    %cst_26 = arith.constant 3.920000e+02 : f32
    %38 = vector.broadcast %cst_26 : f32 to vector<1x8xf32>
    %39 = arith.divf %37, %38 : vector<1x8xf32>
    %c0_27 = arith.constant 0 : index
    %c0_28 = arith.constant 0 : index
    %40 = vector.load %arg4[%c0_27, %c0_28] : memref<1x8xf32, #tpu.memory_space<vmem>>, vector<1x8xf32>
    %cst_29 = arith.constant 9.99999974E-6 : f32
    %41 = vector.broadcast %cst_29 : f32 to vector<1x8xf32>
    %42 = arith.addf %39, %41 : vector<1x8xf32>
    %43 = math.rsqrt %42 : vector<1x8xf32>
    %44 = arith.mulf %40, %43 : vector<1x8xf32>
    %c0_30 = arith.constant 0 : index
    %c0_31 = arith.constant 0 : index
    %45 = vector.load %arg5[%c0_30, %c0_31] : memref<1x8xf32, #tpu.memory_space<vmem>>, vector<1x8xf32>
    %46 = arith.mulf %30, %44 : vector<1x8xf32>
    %47 = arith.subf %45, %46 : vector<1x8xf32>
    %48 = vector.broadcast %44 : vector<1x8xf32> to vector<512x8xf32>
    %49 = arith.mulf %24, %48 : vector<512x8xf32>
    %50 = vector.broadcast %47 : vector<1x8xf32> to vector<512x8xf32>
    %51 = arith.addf %49, %50 : vector<512x8xf32>
    %cst_32 = arith.constant 0.000000e+00 : f32
    %52 = vector.broadcast %cst_32 : f32 to vector<512x8xf32>
    %53 = arith.maximumf %51, %52 : vector<512x8xf32>
    %c0_33 = arith.constant 0 : index
    %c0_34 = arith.constant 0 : index
    %54 = vector.load %arg10[%c0_33, %c0_34] : memref<520x8xf32, #tpu.memory_space<vmem>>, vector<512x8xf32>
    tpu.vector_store %arg10[%c0_33, %c0_34], %53 {strides = array<i32>} : memref<520x8xf32, #tpu.memory_space<vmem>>, vector<512x8xf32>,
    %c1_35 = arith.constant 1 : index
    %c0_36 = arith.constant 0 : index
    %55 = vector.load %arg10[%c1_35, %c0_36] : memref<520x8xf32, #tpu.memory_space<vmem>>, vector<512x8xf32>
    %c2_37 = arith.constant 2 : index
    %c0_38 = arith.constant 0 : index
    %56 = vector.load %arg10[%c2_37, %c0_38] : memref<520x8xf32, #tpu.memory_space<vmem>>, vector<512x8xf32>
    %57 = tpu.concatenate %53, %55, %56 in 1 : vector<512x8xf32>, vector<512x8xf32>, vector<512x8xf32> -> vector<512x24xf32>
    %58 = arith.truncf %57 : vector<512x24xf32> to vector<512x24xbf16>
    %c0_39 = arith.constant 0 : index
    %c0_40 = arith.constant 0 : index
    %59 = vector.load %arg11[%c0_39, %c0_40] : memref<544x24xbf16, #tpu.memory_space<vmem>>, vector<512x24xbf16>
    tpu.vector_store %arg11[%c0_39, %c0_40], %58 {strides = array<i32>} : memref<544x24xbf16, #tpu.memory_space<vmem>>, vector<512x24xbf16>,
    %cst_41 = arith.constant 0.000000e+00 : f32
    %60 = vector.broadcast %cst_41 : f32 to vector<512x8xf32>
    %c0_42 = arith.constant 0 : index
    %c0_43 = arith.constant 0 : index
    %61 = vector.load %arg11[%c0_42, %c0_43] : memref<544x24xbf16, #tpu.memory_space<vmem>>, vector<512x24xbf16>
    %c0_44 = arith.constant 0 : index
    %c0_45 = arith.constant 0 : index
    %c0_46 = arith.constant 0 : index
    %62 = vector.load %arg6[%c0_44, %c0_45, %c0_46] : memref<3x24x8xbf16, #tpu.memory_space<vmem>>, vector<1x24x8xbf16>
    %63 = vector.shape_cast %62 : vector<1x24x8xbf16> to vector<24x8xbf16>
    %cst_47 = arith.constant dense<0.000000e+00> : vector<512x8xf32>
    %64 = tpu.matmul %61, %63, %cst_47 {dimension_numbers = #tpu.dot_dimension_numbers<[1], [0], [0], [1], [0, 0, 1, 1], [], []>} : vector<512x24xbf16>, vector<24x8xbf16>, vector<512x8xf32> -> vector<512x8xf32>
    %65 = arith.addf %60, %64 : vector<512x8xf32>
    %c16_48 = arith.constant 16 : index
    %c0_49 = arith.constant 0 : index
    %66 = vector.load %arg11[%c16_48, %c0_49] : memref<544x24xbf16, #tpu.memory_space<vmem>>, vector<512x24xbf16>
    %c1_50 = arith.constant 1 : index
    %c0_51 = arith.constant 0 : index
    %c0_52 = arith.constant 0 : index
    %67 = vector.load %arg6[%c1_50, %c0_51, %c0_52] : memref<3x24x8xbf16, #tpu.memory_space<vmem>>, vector<1x24x8xbf16>
    %68 = vector.shape_cast %67 : vector<1x24x8xbf16> to vector<24x8xbf16>
    %cst_53 = arith.constant dense<0.000000e+00> : vector<512x8xf32>
    %69 = tpu.matmul %66, %68, %cst_53 {dimension_numbers = #tpu.dot_dimension_numbers<[1], [0], [0], [1], [0, 0, 1, 1], [], []>} : vector<512x24xbf16>, vector<24x8xbf16>, vector<512x8xf32> -> vector<512x8xf32>
    %70 = arith.addf %65, %69 : vector<512x8xf32>
    %c32_54 = arith.constant 32 : index
    %c0_55 = arith.constant 0 : index
    %71 = vector.load %arg11[%c32_54, %c0_55] : memref<544x24xbf16, #tpu.memory_space<vmem>>, vector<512x24xbf16>
    %c2_56 = arith.constant 2 : index
    %c0_57 = arith.constant 0 : index
    %c0_58 = arith.constant 0 : index
    %72 = vector.load %arg6[%c2_56, %c0_57, %c0_58] : memref<3x24x8xbf16, #tpu.memory_space<vmem>>, vector<1x24x8xbf16>
    %73 = vector.shape_cast %72 : vector<1x24x8xbf16> to vector<24x8xbf16>
    %cst_59 = arith.constant dense<0.000000e+00> : vector<512x8xf32>
    %74 = tpu.matmul %71, %73, %cst_59 {dimension_numbers = #tpu.dot_dimension_numbers<[1], [0], [0], [1], [0, 0, 1, 1], [], []>} : vector<512x24xbf16>, vector<24x8xbf16>, vector<512x8xf32> -> vector<512x8xf32>
    %75 = arith.addf %70, %74 : vector<512x8xf32>
    %76 = vector.broadcast %8 : vector<512x1xf32> to vector<512x8xf32>
    %77 = arith.mulf %75, %76 : vector<512x8xf32>
    %cst_60 = arith.constant dense<0.000000e+00> : vector<8xf32>
    %78 = vector.multi_reduction <add>, %77, %cst_60 [0] : vector<512x8xf32> to vector<8xf32>
    %79 = vector.shape_cast %78 : vector<8xf32> to vector<1x8xf32>
    %cst_61 = arith.constant 2.880000e+02 : f32
    %80 = vector.broadcast %cst_61 : f32 to vector<1x8xf32>
    %81 = arith.divf %79, %80 : vector<1x8xf32>
    %82 = vector.broadcast %81 : vector<1x8xf32> to vector<512x8xf32>
    %83 = arith.subf %75, %82 : vector<512x8xf32>
    %84 = vector.broadcast %8 : vector<512x1xf32> to vector<512x8xf32>
    %85 = arith.mulf %83, %84 : vector<512x8xf32>
    %86 = arith.mulf %85, %85 : vector<512x8xf32>
    %cst_62 = arith.constant dense<0.000000e+00> : vector<8xf32>
    %87 = vector.multi_reduction <add>, %86, %cst_62 [0] : vector<512x8xf32> to vector<8xf32>
    %88 = vector.shape_cast %87 : vector<8xf32> to vector<1x8xf32>
    %cst_63 = arith.constant 2.880000e+02 : f32
    %89 = vector.broadcast %cst_63 : f32 to vector<1x8xf32>
    %90 = arith.divf %88, %89 : vector<1x8xf32>
    %c0_64 = arith.constant 0 : index
    %c0_65 = arith.constant 0 : index
    %91 = vector.load %arg7[%c0_64, %c0_65] : memref<1x8xf32, #tpu.memory_space<vmem>>, vector<1x8xf32>
    %cst_66 = arith.constant 9.99999974E-6 : f32
    %92 = vector.broadcast %cst_66 : f32 to vector<1x8xf32>
    %93 = arith.addf %90, %92 : vector<1x8xf32>
    %94 = math.rsqrt %93 : vector<1x8xf32>
    %95 = arith.mulf %91, %94 : vector<1x8xf32>
    %c0_67 = arith.constant 0 : index
    %c0_68 = arith.constant 0 : index
    %96 = vector.load %arg8[%c0_67, %c0_68] : memref<1x8xf32, #tpu.memory_space<vmem>>, vector<1x8xf32>
    %97 = arith.mulf %81, %95 : vector<1x8xf32>
    %98 = arith.subf %96, %97 : vector<1x8xf32>
    %99 = vector.broadcast %95 : vector<1x8xf32> to vector<512x8xf32>
    %100 = arith.mulf %75, %99 : vector<512x8xf32>
    %101 = vector.broadcast %98 : vector<1x8xf32> to vector<512x8xf32>
    %102 = arith.addf %100, %101 : vector<512x8xf32>
    %cst_69 = arith.constant 0.000000e+00 : f32
    %103 = vector.broadcast %cst_69 : f32 to vector<512x8xf32>
    %104 = arith.maximumf %102, %103 : vector<512x8xf32>
    %c0_70 = arith.constant 0 : index
    %c0_71 = arith.constant 0 : index
    %105 = vector.load %arg12[%c0_70, %c0_71] : memref<528x8xf32, #tpu.memory_space<vmem>>, vector<512x8xf32>
    tpu.vector_store %arg12[%c0_70, %c0_71], %104 {strides = array<i32>} : memref<528x8xf32, #tpu.memory_space<vmem>>, vector<512x8xf32>,
    %c0_72 = arith.constant 0 : index
    %c0_73 = arith.constant 0 : index
    %106 = tpu.strided_load %arg12[%c0_72, %c0_73] {strides = array<i32: 2, 1>} : memref<528x8xf32, #tpu.memory_space<vmem>>, vector<256x8xf32>
    %c1_74 = arith.constant 1 : index
    %c0_75 = arith.constant 0 : index
    %107 = tpu.strided_load %arg12[%c1_74, %c0_75] {strides = array<i32: 2, 1>} : memref<528x8xf32, #tpu.memory_space<vmem>>, vector<256x8xf32>
    %c16_76 = arith.constant 16 : index
    %c0_77 = arith.constant 0 : index
    %108 = tpu.strided_load %arg12[%c16_76, %c0_77] {strides = array<i32: 2, 1>} : memref<528x8xf32, #tpu.memory_space<vmem>>, vector<256x8xf32>
    %c17 = arith.constant 17 : index
    %c0_78 = arith.constant 0 : index
    %109 = tpu.strided_load %arg12[%c17, %c0_78] {strides = array<i32: 2, 1>} : memref<528x8xf32, #tpu.memory_space<vmem>>, vector<256x8xf32>
    %110 = arith.maximumf %106, %107 : vector<256x8xf32>
    %111 = arith.maximumf %108, %109 : vector<256x8xf32>
    %112 = arith.maximumf %110, %111 : vector<256x8xf32>
    %c0_79 = arith.constant 0 : index
    %c0_80 = arith.constant 0 : index
    %113 = vector.load %arg9[%c0_79, %c0_80] : memref<256x8xf32, #tpu.memory_space<vmem>>, vector<256x8xf32>
    tpu.vector_store %arg9[%c0_79, %c0_80], %112 {strides = array<i32>} : memref<256x8xf32, #tpu.memory_space<vmem>>, vector<256x8xf32>,
    return
  }
  func.func @transform_0(%arg0: i32) -> (i32, i32) {
    %c0_i32 = arith.constant 0 : i32
    %c0_i32_0 = arith.constant 0 : i32
    %c0_i32_1 = arith.constant 0 : i32
    return %c0_i32, %c0_i32_0 : i32, i32
  }
  func.func @transform_1(%arg0: i32) -> (i32, i32) {
    %c0_i32 = arith.constant 0 : i32
    %c0_i32_0 = arith.constant 0 : i32
    %c0_i32_1 = arith.constant 0 : i32
    return %c0_i32, %c0_i32_0 : i32, i32
  }
  func.func @transform_2(%arg0: i32) -> (i32, i32, i32) {
    %c0_i32 = arith.constant 0 : i32
    %c0_i32_0 = arith.constant 0 : i32
    %c0_i32_1 = arith.constant 0 : i32
    %c0_i32_2 = arith.constant 0 : i32
    return %c0_i32, %c0_i32_0, %c0_i32_1 : i32, i32, i32
  }
  func.func @transform_3(%arg0: i32) -> (i32, i32) {
    %c0_i32 = arith.constant 0 : i32
    %c0_i32_0 = arith.constant 0 : i32
    %c0_i32_1 = arith.constant 0 : i32
    return %c0_i32, %c0_i32_0 : i32, i32
  }
  func.func @transform_4(%arg0: i32) -> (i32, i32) {
    %c0_i32 = arith.constant 0 : i32
    %c0_i32_0 = arith.constant 0 : i32
    %c0_i32_1 = arith.constant 0 : i32
    return %c0_i32, %c0_i32_0 : i32, i32
  }
  func.func @transform_5(%arg0: i32) -> (i32, i32, i32) {
    %c0_i32 = arith.constant 0 : i32
    %c0_i32_0 = arith.constant 0 : i32
    %c0_i32_1 = arith.constant 0 : i32
    %c0_i32_2 = arith.constant 0 : i32
    return %c0_i32, %c0_i32_0, %c0_i32_1 : i32, i32, i32
  }
  func.func @transform_6(%arg0: i32) -> (i32, i32) {
    %c0_i32 = arith.constant 0 : i32
    %c0_i32_0 = arith.constant 0 : i32
    %c0_i32_1 = arith.constant 0 : i32
    return %c0_i32, %c0_i32_0 : i32, i32
  }
  func.func @transform_7(%arg0: i32) -> (i32, i32) {
    %c0_i32 = arith.constant 0 : i32
    %c0_i32_0 = arith.constant 0 : i32
    %c0_i32_1 = arith.constant 0 : i32
    return %c0_i32, %c0_i32_0 : i32, i32
  }
  func.func @transform_8(%arg0: i32) -> (i32, i32) {
    %c0_i32 = arith.constant 0 : i32
    %c0_i32_0 = arith.constant 0 : i32
    %c0_i32_1 = arith.constant 0 : i32
    return %c0_i32, %c0_i32_0 : i32, i32
  }
}

</mosaic_0001>

<bundles_post_ra>
// kernel: tpu_custom_call.1
= control target key start
LH: loop header
LB: loop body
LE: loop exit
PB: predicated region body
PF: predicated region fallthrough
CT: control target
= control target key end

     0   :  { %vm434_vm0 = vcmask 1045504   ;;  %vm337_vm1 = vcmask 97280   ;;  %vm32_vm2 = vcmask 195584   ;;  %v7808_v29 = vmov 0   ;;  %s12378_s2 = inlined_call_operand.vmem [shape: bf16[3,12,8], index: 2, kind: input, shape index: {}]   ;;  %s12379_s0 = inlined_call_operand.vmem [shape: bf16[544,12], index: 0, kind: input, shape index: {}]   ;;  %s12380_s1 = inlined_call_operand.vmem [shape: f32[512,2], index: 1, kind: input, shape index: {}]   ;;  %s12381_s3 = inlined_call_operand.vmem [shape: f32[1,8], index: 3, kind: input, shape index: {}]   ;;  %s12382_s4 = inlined_call_operand.vmem [shape: f32[1,8], index: 4, kind: input, shape index: {}]   ;;  %s12383_s5 = inlined_call_operand.vmem [shape: bf16[3,24,8], index: 5, kind: input, shape index: {}]   ;;  %s12384_s6 = inlined_call_operand.vmem [shape: f32[1,8], index: 6, kind: input, shape index: {}]   ;;  %s12385_s7 = inlined_call_operand.vmem [shape: f32[1,8], index: 7, kind: input, shape index: {}]   ;;  %s12386_s8 = inlined_call_operand.vmem [shape: f32[256,8], index: 8, kind: output, shape index: {}]  }
   0x1   :  { %v7666_v0 = vld [vmem:[%s12378_s2 + $0x8] sm:$0x3f]   ;;  %v7871_v3 = vld [vmem:[%s12379_s0 + $0x10] sm:$0xff]   ;;  %v7669_v4 = vld [vmem:[%s12378_s2] sm:$0x3f]   ;;  %7342 = vset.pattern.permute.xlu0 %v7808_v29  ;;  %33 = vst.msk [vmem:[#allocation3 + $0x100] sm:$0xff] %vm32_vm2, %v7808_v29  ;;  %7343 = vset.pattern.permute.xlu1 %v7808_v29 }
   0x2   :  { %v7864_v1 = vld [vmem:[%s12379_s0 + $0x8] sm:$0xff]   ;;  %7331 = vmatprep.subr.msk.bf16.mxu0 %vm434_vm0, %v7666_v0  ;;  %v436_v2 = vsel %vm434_vm0, %v7666_v0, 0  ;;  %v7881_v5 = vld [vmem:[%s12379_s0 + $0x18] sm:$0xff]   ;;  %v741_v6 = vsel %vm434_vm0, %v7669_v4, 0  ;;  %v7892_v7 = vld [vmem:[%s12379_s0 + $0x20] sm:$0xff]   ;;  %34 = vst.msk [vmem:[#allocation3 + $0x108] sm:$0xff] %vm32_vm2, %v7808_v29 }
   0x3   :  { %6674 = vmatpush3.bf16.msra.mxu0 %v436_v2  ;;  %6675 = vmatprep.mubr.msk.bf16.mxu0 %vm337_vm1, %v7864_v1  ;;  %v7897_v8 = vld [vmem:[%s12379_s0 + $0x28] sm:$0xff]   ;;  %v7906_v9 = vld [vmem:[%s12379_s0 + $0x30] sm:$0xff]   ;;  %v7911_v10 = vld [vmem:[%s12379_s0 + $0x38] sm:$0xff]   ;;  %vm30_vm3 = vcmask 64512   ;;  %vm3814_vm4 = vcmask 1043456   ;;  %vm3540_vm5 = vcmask 130048  }
   0x4   :  { %7332 = vmatprep.subr.msk.bf16.mxu0 %vm434_vm0, %v7669_v4  ;;  %v7920_v11 = vld [vmem:[%s12379_s0 + $0x40] sm:$0xff]   ;;  %v7925_v12 = vld [vmem:[%s12379_s0 + $0x48] sm:$0xff]   ;;  %v7934_v13 = vld [vmem:[%s12379_s0 + $0x50] sm:$0xff]  }
   0x5   :  { %v7939_v14 = vld [vmem:[%s12379_s0 + $0x58] sm:$0xff]   ;;  %v7701_v15 = vld [vmem:[%s12378_s2 + $0x10] sm:$0x3f]   ;;  %v7955_v17 = vld [vmem:[%s12379_s0 + $0x60] sm:$0xff]  }
   0x6   :  { %6676 = vmatmul.mubr.msk.bf16.vlgmr.msra.gmra.mrb[0].mxu0 %vm337_vm1, %v7871_v3  ;;  %v7946_v16 = vsel %vm434_vm0, %v7701_v15, 0  ;;  %v7960_v18 = vld [vmem:[%s12379_s0 + $0x68] sm:$0xff]   ;;  %v7969_v19 = vld [vmem:[%s12379_s0 + $0x70] sm:$0xff]   ;;  %v7974_v20 = vld [vmem:[%s12379_s0 + $0x78] sm:$0xff]  }
   0x7   :  { %6740 = vmatpush3.bf16.msra.mxu0 %v741_v6  ;;  %6679 = vmatprep.mubr.msk.bf16.mxu0 %vm337_vm1, %v7881_v5  ;;  %v7983_v21 = vld [vmem:[%s12379_s0 + $0x80] sm:$0xff]   ;;  %v7988_v22 = vld [vmem:[%s12379_s0 + $0x88] sm:$0xff]   ;;  %v7997_v23 = vld [vmem:[%s12379_s0 + $0x90] sm:$0xff]  }
   0x8   :  { %7333 = vmatprep.subr.msk.bf16.mxu0 %vm434_vm0, %v7701_v15  ;;  %v8002_v24 = vld [vmem:[%s12379_s0 + $0x98] sm:$0xff]   ;;  %v8011_v25 = vld [vmem:[%s12379_s0 + $0xa0] sm:$0xff]   ;;  %v8016_v26 = vld [vmem:[%s12379_s0 + $0xa8] sm:$0xff]  }
   0x9   :  { %v8025_v27 = vld [vmem:[%s12379_s0 + $0xb0] sm:$0xff]   ;;  %v8030_v28 = vld [vmem:[%s12379_s0 + $0xb8] sm:$0xff]   ;;  %v37_v30 = vld [vmem:[%s12380_s1] sm:$0xff] }
   0xa   :  { %1718 = vperm.xlu0 %7342, %v37_v30   ;;  %v8044_v31 = vld [vmem:[%s12379_s0 + $0xc0] sm:$0xff]   ;;  %v8049_v32 = vld [vmem:[%s12379_s0 + $0xc8] sm:$0xff]   ;;  %v39_v33 = vld [vmem:[%s12380_s1 + $0x10] sm:$0xff] }
   0xb   :  { %v38_v34 = vld [vmem:[%s12380_s1 + $0x8] sm:$0xff]  ;;  %1728 = vperm.xlu1 %7343, %v39_v33   ;;  %v40_v35 = vld [vmem:[%s12380_s1 + $0x18] sm:$0xff]  ;;  %v41_v36 = vld [vmem:[%s12380_s1 + $0x20] sm:$0xff] }
   0xc   :  { %v8070_v37 = vld [vmem:[%s12379_s0 + $0xd0] sm:$0xff]   ;;  %v8075_v38 = vld [vmem:[%s12379_s0 + $0xd8] sm:$0xff]   ;;  %v42_v39 = vld [vmem:[%s12380_s1 + $0x28] sm:$0xff] }
   0xd   :  { %v43_v40 = vld [vmem:[%s12380_s1 + $0x30] sm:$0xff]  ;;  %v44_v41 = vld [vmem:[%s12380_s1 + $0x38] sm:$0xff]  ;;  %v45_v42 = vld [vmem:[%s12380_s1 + $0x40] sm:$0xff] }
   0xe   :  { %6680 = vmatmul.mubr.msk.bf16.gmra.mrb[4].mxu0 %vm337_vm1, %v7892_v7  ;;  %1723 = vperm.xlu0 %7342, %v38_v34   ;;  %v8096_v43 = vld [vmem:[%s12379_s0 + $0xe0] sm:$0xff]   ;;  %v8101_v44 = vld [vmem:[%s12379_s0 + $0xe8] sm:$0xff]   ;;  %v47_v46 = vld [vmem:[%s12380_s1 + $0x50] sm:$0xff] }
   0xf   :  { %6683 = vmatprep.mubr.msk.bf16.mxu0 %vm337_vm1, %v7897_v8  ;;  %1733 = vperm.xlu1 %7343, %v40_v35   ;;  %v46_v45 = vld [vmem:[%s12380_s1 + $0x48] sm:$0xff]  ;;  %v48_v47 = vld [vmem:[%s12380_s1 + $0x58] sm:$0xff]  ;;  %v49_v48 = vld [vmem:[%s12380_s1 + $0x60] sm:$0xff] }
  0x10   :  { %v8122_v49 = vld [vmem:[%s12379_s0 + $0xf0] sm:$0xff]   ;;  %v8127_v50 = vld [vmem:[%s12379_s0 + $0xf8] sm:$0xff]   ;;  %v50_v51 = vld [vmem:[%s12380_s1 + $0x68] sm:$0xff] }
  0x11   :  { %v51_v52 = vld [vmem:[%s12380_s1 + $0x70] sm:$0xff]  ;;  %v52_v53 = vld [vmem:[%s12380_s1 + $0x78] sm:$0xff]  ;;  %v53_v54 = vld [vmem:[%s12380_s1 + $0x80] sm:$0xff] }
  0x12   :  { %1738 = vperm.xlu0 %7342, %v41_v36   ;;  %v7699_v55 = vld [vmem:[%s12379_s0 + $0x100] sm:$0xff]   ;;  %v54_v57 = vld [vmem:[%s12380_s1 + $0x88] sm:$0xff]  ;;  %v55_v58 = vld [vmem:[%s12380_s1 + $0x90] sm:$0xff] }
  0x13   :  { %1743 = vperm.xlu1 %7343, %v42_v39   ;;  %v7700_v56 = vld [vmem:[%s12379_s0] sm:$0xff]   ;;  %v56_v59 = vld [vmem:[%s12380_s1 + $0x98] sm:$0xff]  ;;  %v58_v61 = vld [vmem:[%s12380_s1 + $0xa8] sm:$0xff] }
  0x14   :  { %v57_v60 = vld [vmem:[%s12380_s1 + $0xa0] sm:$0xff]  ;;  %v59_v62 = vld [vmem:[%s12380_s1 + $0xb0] sm:$0xff]  ;;  %v60_v63 = vld [vmem:[%s12380_s1 + $0xb8] sm:$0xff] }
  0x15   :  { %v61_v0 = vld [vmem:[%s12380_s1 + $0xc0] sm:$0xff]  ;;  %v63_v2 = vld [vmem:[%s12380_s1 + $0xd0] sm:$0xff]  ;;  %v70_v15 = vld [vmem:[%s12380_s1 + $0x108] sm:$0xff] }
  0x16   :  { %6684 = vmatmul.mubr.msk.bf16.gmra.mrb[8].mxu0 %vm337_vm1, %v7906_v9  ;;  %1748 = vperm.xlu0 %7342, %v43_v40   ;;  %v65_v4 = vld [vmem:[%s12380_s1 + $0xe0] sm:$0xff]  ;;  %v67_v6 = vld [vmem:[%s12380_s1 + $0xf0] sm:$0xff]  ;;  %v74_v29 = vld [vmem:[%s12380_s1 + $0x128] sm:$0xff] }
  0x17   :  { %6687 = vmatprep.mubr.msk.bf16.mxu0 %vm337_vm1, %v7911_v10  ;;  %1753 = vperm.xlu1 %7343, %v44_v41   ;;  %v76_v30 = vld [vmem:[%s12380_s1 + $0x138] sm:$0xff]  ;;  %v78_v33 = vld [vmem:[%s12380_s1 + $0x148] sm:$0xff] }
  0x18   :  { %v80_v34 = vld [vmem:[%s12380_s1 + $0x158] sm:$0xff]  ;;  %v82_v35 = vld [vmem:[%s12380_s1 + $0x168] sm:$0xff] }
  0x19   :  { %v84_v36 = vld [vmem:[%s12380_s1 + $0x178] sm:$0xff]  ;;  %v86_v39 = vld [vmem:[%s12380_s1 + $0x188] sm:$0xff] }
  0x1a   :  { %1758 = vperm.xlu0 %7342, %v45_v42   ;;  %v88_v40 = vld [vmem:[%s12380_s1 + $0x198] sm:$0xff]  ;;  %v90_v41 = vld [vmem:[%s12380_s1 + $0x1a8] sm:$0xff] }
  0x1b   :  { %1763 = vperm.xlu1 %7343, %v46_v45   ;;  %v92_v42 = vld [vmem:[%s12380_s1 + $0x1b8] sm:$0xff]  ;;  %v94_v45 = vld [vmem:[%s12380_s1 + $0x1c8] sm:$0xff] }
  0x1e   :  { %6688 = vmatmul.mubr.msk.bf16.gmra.mrb[12].mxu0 %vm337_vm1, %v7920_v11  ;;  %1768 = vperm.xlu0 %7342, %v47_v46   ;;  %v96_v46 = vld [vmem:[%s12380_s1 + $0x1d8] sm:$0xff] }
  0x1f   :  { %6691 = vmatprep.mubr.msk.bf16.mxu0 %vm337_vm1, %v7925_v12  ;;  %1773 = vperm.xlu1 %7343, %v48_v47   ;;  %v98_v47 = vld [vmem:[%s12380_s1 + $0x1e8] sm:$0xff] }
  0x22   :  { %1778 = vperm.xlu0 %7342, %v49_v48   ;;  %v100_v48 = vld [vmem:[%s12380_s1 + $0x1f8] sm:$0xff] }
  0x23   :  { %1783 = vperm.xlu1 %7343, %v50_v51   ;;  %v7713_v51 = vld [vmem:[%s12379_s0 + $0x68] sm:$0xff]  }
  0x26   :  { %6692 = vmatmul.mubr.msk.bf16.gmra.mrb[16].mxu0 %vm337_vm1, %v7934_v13  ;;  %1788 = vperm.xlu0 %7342, %v51_v52   ;;  %v7714_v52 = vld [vmem:[%s12379_s0 + $0x70] sm:$0xff]  }
  0x27   :  { %6695 = vmatprep.mubr.msk.bf16.mxu0 %vm337_vm1, %v7939_v14  ;;  %1793 = vperm.xlu1 %7343, %v52_v53   ;;  %v7715_v53 = vld [vmem:[%s12379_s0 + $0x78] sm:$0xff]  }
  0x2a   :  { %1798 = vperm.xlu0 %7342, %v53_v54   ;;  %v7716_v54 = vld [vmem:[%s12379_s0 + $0x80] sm:$0xff]  }
  0x2b   :  { %1803 = vperm.xlu1 %7343, %v54_v57   ;;  %v7719_v57 = vld [vmem:[%s12379_s0 + $0x98] sm:$0xff]  }
  0x2e   :  { %6696 = vmatmul.mubr.msk.bf16.gmra.mrb[20].mxu0 %vm337_vm1, %v7955_v17  ;;  %1808 = vperm.xlu0 %7342, %v55_v58   ;;  %v7720_v58 = vld [vmem:[%s12379_s0 + $0xa0] sm:$0xff]  }
  0x2f   :  { %6699 = vmatprep.mubr.msk.bf16.mxu0 %vm337_vm1, %v7960_v18  ;;  %1813 = vperm.xlu1 %7343, %v56_v59   ;;  %v7721_v59 = vld [vmem:[%s12379_s0 + $0xa8] sm:$0xff]  }
  0x32   :  { %1818 = vperm.xlu0 %7342, %v57_v60   ;;  %v7722_v60 = vld [vmem:[%s12379_s0 + $0xb0] sm:$0xff]  }
  0x33   :  { %1823 = vperm.xlu1 %7343, %v58_v61   ;;  %v7723_v61 = vld [vmem:[%s12379_s0 + $0xb8] sm:$0xff]  }
  0x36   :  { %6700 = vmatmul.mubr.msk.bf16.gmra.mrb[24].mxu0 %vm337_vm1, %v7969_v19  ;;  %1828 = vperm.xlu0 %7342, %v59_v62   ;;  %v7724_v62 = vld [vmem:[%s12379_s0 + $0xc0] sm:$0xff]  }
  0x37   :  { %6703 = vmatprep.mubr.msk.bf16.mxu0 %vm337_vm1, %v7974_v20  ;;  %1833 = vperm.xlu1 %7343, %v60_v63   ;;  %v7725_v63 = vld [vmem:[%s12379_s0 + $0xc8] sm:$0xff]  }
  0x3a   :  { %1838 = vperm.xlu0 %7342, %v61_v0   ;;  %v7726_v0 = vld [vmem:[%s12379_s0 + $0xd0] sm:$0xff]  }
  0x3e   :  { %6704 = vmatmul.mubr.msk.bf16.gmra.mrb[28].mxu0 %vm337_vm1, %v7983_v21  ;;  %1848 = vperm.xlu0 %7342, %v63_v2   ;;  %v7728_v2 = vld [vmem:[%s12379_s0 + $0xe0] sm:$0xff]  }
  0x3f   :  { %6707 = vmatprep.mubr.msk.bf16.mxu0 %vm337_vm1, %v7988_v22 }
  0x42   :  { %1858 = vperm.xlu0 %7342, %v65_v4   ;;  %v7730_v4 = vld [vmem:[%s12379_s0 + $0xf0] sm:$0xff]  }
  0x46   :  { %6708 = vmatmul.mubr.msk.bf16.gmra.mrb[32].mxu0 %vm337_vm1, %v7997_v23  ;;  %1868 = vperm.xlu0 %7342, %v67_v6   ;;  %v7732_v6 = vld [vmem:[%s12379_s0 + $0x100] sm:$0xff]  }
  0x47   :  { %6711 = vmatprep.mubr.msk.bf16.mxu0 %vm337_vm1, %v8002_v24 }
  0x4e   :  { %6712 = vmatmul.mubr.msk.bf16.gmra.mrb[36].mxu0 %vm337_vm1, %v8011_v25 }
  0x4f   :  { %6715 = vmatprep.mubr.msk.bf16.mxu0 %vm337_vm1, %v8016_v26 }
  0x56   :  { %6716 = vmatmul.mubr.msk.bf16.gmra.mrb[40].mxu0 %vm337_vm1, %v8025_v27 }
  0x57   :  { %6719 = vmatprep.mubr.msk.bf16.mxu0 %vm337_vm1, %v8030_v28 }
  0x5e   :  { %6720 = vmatmul.mubr.msk.bf16.gmra.mrb[44].mxu0 %vm337_vm1, %v8044_v31 }
  0x5f   :  { %6723 = vmatprep.mubr.msk.bf16.mxu0 %vm337_vm1, %v8049_v32 }
  0x66   :  { %6724 = vmatmul.mubr.msk.bf16.gmra.mrb[48].mxu0 %vm337_vm1, %v8070_v37 }
  0x67   :  { %6727 = vmatprep.mubr.msk.bf16.mxu0 %vm337_vm1, %v8075_v38 }
  0x6e   :  { %6728 = vmatmul.mubr.msk.bf16.gmra.mrb[52].mxu0 %vm337_vm1, %v8096_v43 }
  0x6f   :  { %6731 = vmatprep.mubr.msk.bf16.mxu0 %vm337_vm1, %v8101_v44 }
  0x76   :  { %6732 = vmatmul.mubr.msk.bf16.gmra.mrb[56].mxu0 %vm337_vm1, %v8122_v49 }
  0x77   :  { %6735 = vmatprep.mubr.msk.bf16.mxu0 %vm337_vm1, %v8127_v50 }
  0x7e   :  { %6736 = vmatmul.mubr.msk.bf16.gmra.mrb[60].mxu0 %vm337_vm1, %v7699_v55  ;;  %v7717_v55 = vld [vmem:[%s12379_s0 + $0x88] sm:$0xff]  }
  0x7f   :  { %6741 = vmatprep.mubr.msk.bf16.mxu0 %vm337_vm1, %v7700_v56  ;;  %v7718_v56 = vld [vmem:[%s12379_s0 + $0x90] sm:$0xff]  }
  0x86   :  { %6742 = vmatmul.mubr.msk.bf16.vlgmr.msra.gmra.mrb[0].mxu0 %vm337_vm1, %v7864_v1  ;;  %v62_v1 = vld [vmem:[%s12380_s1 + $0xc8] sm:$0xff] }
  0x87   :  { %6806 = vmatpush3.bf16.msra.mxu0 %v7946_v16  ;;  %6745 = vmatprep.mubr.msk.bf16.mxu0 %vm337_vm1, %v7871_v3  ;;  %v64_v3 = vld [vmem:[%s12380_s1 + $0xd8] sm:$0xff] }
  0x88   :  { %1843 = vperm.xlu1 %7343, %v62_v1   ;;  %v72_v16 = vld [vmem:[%s12380_s1 + $0x118] sm:$0xff] }
  0x89   :  { %v7727_v1 = vld [vmem:[%s12379_s0 + $0xd8] sm:$0xff]  }
  0x8c   :  { %1853 = vperm.xlu1 %7343, %v64_v3   ;;  %v7729_v3 = vld [vmem:[%s12379_s0 + $0xe8] sm:$0xff]  }
  0x8e   :  { %6746 = vmatmul.mubr.msk.bf16.gmra.mrb[4].mxu0 %vm337_vm1, %v7881_v5  ;;  %v66_v5 = vld [vmem:[%s12380_s1 + $0xe8] sm:$0xff] }
  0x8f   :  { %6749 = vmatprep.mubr.msk.bf16.mxu0 %vm337_vm1, %v7892_v7  ;;  %v68_v7 = vld [vmem:[%s12380_s1 + $0xf8] sm:$0xff] }
  0x90   :  { %1863 = vperm.xlu1 %7343, %v66_v5   ;;  %v7731_v5 = vld [vmem:[%s12379_s0 + $0xf8] sm:$0xff]  }
  0x94   :  { %1873 = vperm.xlu1 %7343, %v68_v7   ;;  %v7733_v7 = vld [vmem:[%s12379_s0 + $0x108] sm:$0xff]  }
  0x96   :  { %6750 = vmatmul.mubr.msk.bf16.gmra.mrb[8].mxu0 %vm337_vm1, %v7897_v8  ;;  %v69_v8 = vld [vmem:[%s12380_s1 + $0x100] sm:$0xff] }
  0x97   :  { %6753 = vmatprep.mubr.msk.bf16.mxu0 %vm337_vm1, %v7906_v9  ;;  %1878 = vperm.xlu0 %7342, %v69_v8   ;;  %v71_v9 = vld [vmem:[%s12380_s1 + $0x110] sm:$0xff]  ;;  %v8485_v8 = vpop.permute.xlu0 %1718 }
  0x98   :  { %1883 = vperm.xlu1 %7343, %v70_v15   ;;  %v8487_v15 = vpop.permute.xlu1 %1728 }
  0x9b   :  { %1888 = vperm.xlu0 %7342, %v71_v9   ;;  %v8489_v9 = vpop.permute.xlu0 %1723 }
  0x9c   :  { %1893 = vperm.xlu1 %7343, %v72_v16   ;;  %v8491_v16 = vpop.permute.xlu1 %1733 }
  0x9e   :  { %6754 = vmatmul.mubr.msk.bf16.gmra.mrb[12].mxu0 %vm337_vm1, %v7911_v10  ;;  %v73_v10 = vld [vmem:[%s12380_s1 + $0x120] sm:$0xff] }
  0x9f   :  { %6757 = vmatprep.mubr.msk.bf16.mxu0 %vm337_vm1, %v7920_v11  ;;  %1898 = vperm.xlu0 %7342, %v73_v10   ;;  %v75_v11 = vld [vmem:[%s12380_s1 + $0x130] sm:$0xff]  ;;  %v8493_v10 = vpop.permute.xlu0 %1738 }
  0xa0   :  { %1903 = vperm.xlu1 %7343, %v74_v29   ;;  %v8495_v29 = vpop.permute.xlu1 %1743 }
  0xa3   :  { %1908 = vperm.xlu0 %7342, %v75_v11   ;;  %v8497_v11 = vpop.permute.xlu0 %1748 }
  0xa4   :  { %1913 = vperm.xlu1 %7343, %v76_v30   ;;  %v8499_v30 = vpop.permute.xlu1 %1753 }
  0xa6   :  { %6758 = vmatmul.mubr.msk.bf16.gmra.mrb[16].mxu0 %vm337_vm1, %v7925_v12  ;;  %v77_v12 = vld [vmem:[%s12380_s1 + $0x140] sm:$0xff] }
  0xa7   :  { %6761 = vmatprep.mubr.msk.bf16.mxu0 %vm337_vm1, %v7934_v13  ;;  %1918 = vperm.xlu0 %7342, %v77_v12   ;;  %v79_v13 = vld [vmem:[%s12380_s1 + $0x150] sm:$0xff]  ;;  %v8501_v12 = vpop.permute.xlu0 %1758 }
  0xa8   :  { %1923 = vperm.xlu1 %7343, %v78_v33   ;;  %v8503_v33 = vpop.permute.xlu1 %1763 }
  0xab   :  { %1928 = vperm.xlu0 %7342, %v79_v13   ;;  %v8505_v13 = vpop.permute.xlu0 %1768 }
  0xac   :  { %1933 = vperm.xlu1 %7343, %v80_v34   ;;  %v8507_v34 = vpop.permute.xlu1 %1773 }
  0xae   :  { %6762 = vmatmul.mubr.msk.bf16.gmra.mrb[20].mxu0 %vm337_vm1, %v7939_v14  ;;  %v81_v14 = vld [vmem:[%s12380_s1 + $0x160] sm:$0xff] }
  0xaf   :  { %6765 = vmatprep.mubr.msk.bf16.mxu0 %vm337_vm1, %v7955_v17  ;;  %1938 = vperm.xlu0 %7342, %v81_v14   ;;  %v83_v17 = vld [vmem:[%s12380_s1 + $0x170] sm:$0xff]  ;;  %v8509_v14 = vpop.permute.xlu0 %1778 }
  0xb0   :  { %1943 = vperm.xlu1 %7343, %v82_v35   ;;  %v8511_v35 = vpop.permute.xlu1 %1783 }
  0xb3   :  { %1948 = vperm.xlu0 %7342, %v83_v17   ;;  %v8513_v17 = vpop.permute.xlu0 %1788 }
  0xb4   :  { %1953 = vperm.xlu1 %7343, %v84_v36   ;;  %12679 = vst [vmem:[#allocation5_spill] sm:$0xff] %v8513_v17  ;;  %v8515_v36 = vpop.permute.xlu1 %1793 }
  0xb5   :  { %12680 = vst [vmem:[#allocation6_spill] sm:$0xff] %v8515_v36 }
  0xb6   :  { %6766 = vmatmul.mubr.msk.bf16.gmra.mrb[24].mxu0 %vm337_vm1, %v7960_v18  ;;  %v85_v18 = vld [vmem:[%s12380_s1 + $0x180] sm:$0xff] }
  0xb7   :  { %6769 = vmatprep.mubr.msk.bf16.mxu0 %vm337_vm1, %v7969_v19  ;;  %1958 = vperm.xlu0 %7342, %v85_v18   ;;  %v87_v19 = vld [vmem:[%s12380_s1 + $0x190] sm:$0xff]  ;;  %v8517_v18 = vpop.permute.xlu0 %1798 }
  0xb8   :  { %1963 = vperm.xlu1 %7343, %v86_v39   ;;  %12681 = vst [vmem:[#allocation7_spill] sm:$0xff] %v8517_v18  ;;  %v8519_v39 = vpop.permute.xlu1 %1803 }
  0xb9   :  { %12682 = vst [vmem:[#allocation8_spill] sm:$0xff] %v8519_v39 }
  0xbb   :  { %1968 = vperm.xlu0 %7342, %v87_v19   ;;  %v8521_v19 = vpop.permute.xlu0 %1808 }
  0xbc   :  { %1973 = vperm.xlu1 %7343, %v88_v40   ;;  %12683 = vst [vmem:[#allocation9_spill] sm:$0xff] %v8521_v19  ;;  %v8523_v40 = vpop.permute.xlu1 %1813 }
  0xbd   :  { %12684 = vst [vmem:[#allocation10_spill] sm:$0xff] %v8523_v40 }
  0xbe   :  { %6770 = vmatmul.mubr.msk.bf16.gmra.mrb[28].mxu0 %vm337_vm1, %v7974_v20  ;;  %v89_v20 = vld [vmem:[%s12380_s1 + $0x1a0] sm:$0xff] }
  0xbf   :  { %6773 = vmatprep.mubr.msk.bf16.mxu0 %vm337_vm1, %v7983_v21  ;;  %1978 = vperm.xlu0 %7342, %v89_v20   ;;  %v91_v21 = vld [vmem:[%s12380_s1 + $0x1b0] sm:$0xff]  ;;  %v8525_v20 = vpop.permute.xlu0 %1818 }
  0xc0   :  { %1983 = vperm.xlu1 %7343, %v90_v41   ;;  %12685 = vst [vmem:[#allocation11_spill] sm:$0xff] %v8525_v20  ;;  %v8527_v41 = vpop.permute.xlu1 %1823 }
  0xc1   :  { %12686 = vst [vmem:[#allocation12_spill] sm:$0xff] %v8527_v41 }
  0xc3   :  { %1988 = vperm.xlu0 %7342, %v91_v21  }
  0xc4   :  { %1993 = vperm.xlu1 %7343, %v92_v42  }
  0xc6   :  { %6774 = vmatmul.mubr.msk.bf16.gmra.mrb[32].mxu0 %vm337_vm1, %v7988_v22  ;;  %v93_v22 = vld [vmem:[%s12380_s1 + $0x1c0] sm:$0xff] }
  0xc7   :  { %6777 = vmatprep.mubr.msk.bf16.mxu0 %vm337_vm1, %v7997_v23  ;;  %1998 = vperm.xlu0 %7342, %v93_v22   ;;  %v95_v23 = vld [vmem:[%s12380_s1 + $0x1d0] sm:$0xff] }
  0xc8   :  { %2003 = vperm.xlu1 %7343, %v94_v45  }
  0xcb   :  { %2008 = vperm.xlu0 %7342, %v95_v23   ;;  %v8537_v23 = vpop.permute.xlu0 %1828 }
  0xcc   :  { %2013 = vperm.xlu1 %7343, %v96_v46   ;;  %12687 = vst [vmem:[#allocation13_spill] sm:$0xff] %v8537_v23 }
  0xce   :  { %6778 = vmatmul.mubr.msk.bf16.gmra.mrb[36].mxu0 %vm337_vm1, %v8002_v24  ;;  %v97_v24 = vld [vmem:[%s12380_s1 + $0x1e0] sm:$0xff] }
  0xcf   :  { %6781 = vmatprep.mubr.msk.bf16.mxu0 %vm337_vm1, %v8011_v25  ;;  %2018 = vperm.xlu0 %7342, %v97_v24   ;;  %v99_v25 = vld [vmem:[%s12380_s1 + $0x1f0] sm:$0xff] }
  0xd0   :  { %2023 = vperm.xlu1 %7343, %v98_v47  }
  0xd3   :  { %2028 = vperm.xlu0 %7342, %v99_v25   ;;  %v8545_v25 = vpop.permute.xlu1 %1833 }
  0xd4   :  { %2033 = vperm.xlu1 %7343, %v100_v48   ;;  %12688 = vst [vmem:[#allocation14_spill] sm:$0xff] %v8545_v25 }
  0xd6   :  { %6782 = vmatmul.mubr.msk.bf16.gmra.mrb[40].mxu0 %vm337_vm1, %v8016_v26  ;;  %v7702_v26 = vld [vmem:[%s12379_s0 + $0x10] sm:$0xff]  }
  0xd7   :  { %6785 = vmatprep.mubr.msk.bf16.mxu0 %vm337_vm1, %v8025_v27  ;;  %v7703_v27 = vld [vmem:[%s12379_s0 + $0x18] sm:$0xff]  }
  0xde   :  { %6786 = vmatmul.mubr.msk.bf16.gmra.mrb[44].mxu0 %vm337_vm1, %v8030_v28  ;;  %v7704_v28 = vld [vmem:[%s12379_s0 + $0x20] sm:$0xff]  }
  0xdf   :  { %6789 = vmatprep.mubr.msk.bf16.mxu0 %vm337_vm1, %v8044_v31  ;;  %v7705_v31 = vld [vmem:[%s12379_s0 + $0x28] sm:$0xff]  }
  0xe6   :  { %6790 = vmatmul.mubr.msk.bf16.gmra.mrb[48].mxu0 %vm337_vm1, %v8049_v32  ;;  %v7706_v32 = vld [vmem:[%s12379_s0 + $0x30] sm:$0xff]  }
  0xe7   :  { %6793 = vmatprep.mubr.msk.bf16.mxu0 %vm337_vm1, %v8070_v37  ;;  %v7707_v37 = vld [vmem:[%s12379_s0 + $0x38] sm:$0xff]  }
  0xee   :  { %6794 = vmatmul.mubr.msk.bf16.gmra.mrb[52].mxu0 %vm337_vm1, %v8075_v38  ;;  %v7708_v38 = vld [vmem:[%s12379_s0 + $0x40] sm:$0xff]  }
  0xef   :  { %6797 = vmatprep.mubr.msk.bf16.mxu0 %vm337_vm1, %v8096_v43  ;;  %v7709_v43 = vld [vmem:[%s12379_s0 + $0x48] sm:$0xff]  }
  0xf6   :  { %6798 = vmatmul.mubr.msk.bf16.gmra.mrb[56].mxu0 %vm337_vm1, %v8101_v44  ;;  %v7710_v44 = vld [vmem:[%s12379_s0 + $0x50] sm:$0xff]  }
  0xf7   :  { %6801 = vmatprep.mubr.msk.bf16.mxu0 %vm337_vm1, %v8122_v49  ;;  %v7711_v49 = vld [vmem:[%s12379_s0 + $0x58] sm:$0xff]  }
  0xfe   :  { %6802 = vmatmul.mubr.msk.bf16.gmra.mrb[60].mxu0 %vm337_vm1, %v8127_v50  ;;  %v7712_v50 = vld [vmem:[%s12379_s0 + $0x60] sm:$0xff]  }
  0xff   :  { %6807 = vmatprep.mubr.msk.bf16.mxu0 %vm337_vm1, %v7702_v26 }
 0x106   :  { %6808 = vmatmul.mubr.msk.bf16.vlgmr.msra.gmra.mrb[0].mxu0 %vm337_vm1, %v7703_v27 }
 0x107   :  { %6811 = vmatprep.mubr.msk.bf16.mxu0 %vm337_vm1, %v7704_v28 }
 0x10e   :  { %6812 = vmatmul.mubr.msk.bf16.gmra.mrb[4].mxu0 %vm337_vm1, %v7705_v31 }
 0x10f   :  { %6815 = vmatprep.mubr.msk.bf16.mxu0 %vm337_vm1, %v7706_v32 }
 0x116   :  { %6816 = vmatmul.mubr.msk.bf16.gmra.mrb[8].mxu0 %vm337_vm1, %v7707_v37  ;;  %v8554_v37 = vpop.permute.xlu0 %1838 }
 0x117   :  { %6819 = vmatprep.mubr.msk.bf16.mxu0 %vm337_vm1, %v7708_v38  ;;  %12689 = vst [vmem:[#allocation15_spill] sm:$0xff] %v8554_v37 }
 0x11e   :  { %6820 = vmatmul.mubr.msk.bf16.gmra.mrb[12].mxu0 %vm337_vm1, %v7709_v43 }
 0x11f   :  { %6823 = vmatprep.mubr.msk.bf16.mxu0 %vm337_vm1, %v7710_v44 }
 0x126   :  { %6824 = vmatmul.mubr.msk.bf16.gmra.mrb[16].mxu0 %vm337_vm1, %v7711_v49 }
 0x127   :  { %6827 = vmatprep.mubr.msk.bf16.mxu0 %vm337_vm1, %v7712_v50 }
 0x12e   :  { %6828 = vmatmul.mubr.msk.bf16.gmra.mrb[20].mxu0 %vm337_vm1, %v7713_v51  ;;  %v8563_v51 = vpop.permute.xlu1 %1843 }
 0x12f   :  { %6831 = vmatprep.mubr.msk.bf16.mxu0 %vm337_vm1, %v7714_v52  ;;  %12690 = vst [vmem:[#allocation16_spill] sm:$0xff] %v8563_v51 }
 0x136   :  { %6832 = vmatmul.mubr.msk.bf16.gmra.mrb[24].mxu0 %vm337_vm1, %v7715_v53 }
 0x137   :  { %6835 = vmatprep.mubr.msk.bf16.mxu0 %vm337_vm1, %v7716_v54 }
 0x13e   :  { %6836 = vmatmul.mubr.msk.bf16.gmra.mrb[28].mxu0 %vm337_vm1, %v7717_v55 }
 0x13f   :  { %6839 = vmatprep.mubr.msk.bf16.mxu0 %vm337_vm1, %v7718_v56 }
 0x146   :  { %6840 = vmatmul.mubr.msk.bf16.gmra.mrb[32].mxu0 %vm337_vm1, %v7719_v57 }
 0x147   :  { %6843 = vmatprep.mubr.msk.bf16.mxu0 %vm337_vm1, %v7720_v58 }
 0x14e   :  { %6844 = vmatmul.mubr.msk.bf16.gmra.mrb[36].mxu0 %vm337_vm1, %v7721_v59 }
 0x14f   :  { %6847 = vmatprep.mubr.msk.bf16.mxu0 %vm337_vm1, %v7722_v60  ;;  %v8575_v60 = vpop.permute.xlu0 %1848 }
 0x150   :  { %12691 = vst [vmem:[#allocation17_spill] sm:$0xff] %v8575_v60 }
 0x156   :  { %6848 = vmatmul.mubr.msk.bf16.gmra.mrb[40].mxu0 %vm337_vm1, %v7723_v61 }
 0x157   :  { %6851 = vmatprep.mubr.msk.bf16.mxu0 %vm337_vm1, %v7724_v62 }
 0x15e   :  { %6852 = vmatmul.mubr.msk.bf16.gmra.mrb[44].mxu0 %vm337_vm1, %v7725_v63 }
 0x15f   :  { %6855 = vmatprep.mubr.msk.bf16.mxu0 %vm337_vm1, %v7726_v0  ;;  %v8580_v0 = vpop.permute.xlu1 %1853 }
 0x160   :  { %12692 = vst [vmem:[#allocation18_spill] sm:$0xff] %v8580_v0 }
 0x166   :  { %6856 = vmatmul.mubr.msk.bf16.gmra.mrb[48].mxu0 %vm337_vm1, %v7727_v1 }
 0x167   :  { %6859 = vmatprep.mubr.msk.bf16.mxu0 %vm337_vm1, %v7728_v2 }
 0x16e   :  { %6860 = vmatmul.mubr.msk.bf16.gmra.mrb[52].mxu0 %vm337_vm1, %v7729_v3 }
 0x16f   :  { %6863 = vmatprep.mubr.msk.bf16.mxu0 %vm337_vm1, %v7730_v4 }
 0x176   :  { %6864 = vmatmul.mubr.msk.bf16.gmra.mrb[56].mxu0 %vm337_vm1, %v7731_v5 }
 0x177   :  { %6867 = vmatprep.mubr.msk.bf16.mxu0 %vm337_vm1, %v7732_v6 }
 0x17e   :  { %6868 = vmatmul.mubr.msk.bf16.gmra.mrb[60].mxu0 %vm337_vm1, %v7733_v7 }
 0x1d9   :  { %v8529_v21 = vpop.f32.mrb[0].mxu0 }
 0x1da   :  { %v8531_v42 = vpop.f32.mrb[1].mxu0  ;;  %v2038_v24 = vmul.f32 %v8529_v21, %v8487_v15 }
 0x1db   :  { %v2036_v22 = vmul.f32 %v8485_v8, %v8531_v42  ;;  %v8535_v45 = vpop.f32.mrb[2].mxu0 }
 0x1dc   :  { %v8539_v46 = vpop.f32.mrb[3].mxu0  ;;  %v2039_v26 = vmul.f32 %v8535_v45, %v8491_v16  ;;  %v2103_v31 = vsel %vm30_vm3, %v2038_v24, 0.0 }
 0x1dd   :  { %v2037_v47 = vmul.f32 %v8489_v9, %v8539_v46  ;;  %v2100_v48 = vsel %vm30_vm3, %v2036_v22, 0.0 }
 0x1de   :  { %v2105_v44 = vsel %vm30_vm3, %v2039_v26, 0.0 }
 0x1df   :  { %v2101_v27 = vsel %vm30_vm3, %v2037_v47, 0.0 }
 0x1e0   :  { %v2102_v28 = vadd.f32 %v2101_v27, %v2100_v48  ;;  %v8596_v48 = vpop.permute.xlu0 %1858 }
 0x1e1   :  { %v8552_v32 = vpop.f32.mrb[4].mxu0  ;;  %12693 = vst [vmem:[#allocation19_spill] sm:$0xff] %v8596_v48 }
 0x1e2   :  { %v2104_v38 = vadd.f32 %v2103_v31, %v2102_v28  ;;  %v8556_v43 = vpop.f32.mrb[5].mxu0  ;;  %v2042_v54 = vmul.f32 %v8552_v32, %v8497_v11  ;;  %v8601_v31 = vpop.permute.xlu1 %1863 }
 0x1e3   :  { %v2040_v49 = vmul.f32 %v8493_v10, %v8556_v43  ;;  %v8561_v50 = vpop.f32.mrb[6].mxu0  ;;  %12694 = vst [vmem:[#allocation20_spill] sm:$0xff] %v8601_v31 }
 0x1e4   :  { %v2106_v52 = vadd.f32 %v2105_v44, %v2104_v38  ;;  %v8565_v53 = vpop.f32.mrb[7].mxu0  ;;  %v2043_v58 = vmul.f32 %v8561_v50, %v8499_v30  ;;  %v2111_v62 = vsel %vm30_vm3, %v2042_v54, 0.0 }
 0x1e5   :  { %v2107_v55 = vsel %vm30_vm3, %v2040_v49, 0.0  ;;  %v2041_v56 = vmul.f32 %v8495_v29, %v8565_v53 }
 0x1e6   :  { %v2108_v57 = vadd.f32 %v2107_v55, %v2106_v52  ;;  %v2113_v3 = vsel %vm30_vm3, %v2043_v58, 0.0  ;;  %v8613_v58 = vpop.permute.xlu0 %1868 }
 0x1e7   :  { %v2109_v59 = vsel %vm30_vm3, %v2041_v56, 0.0  ;;  %12695 = vst [vmem:[#allocation21_spill] sm:$0xff] %v8613_v58 }
 0x1e8   :  { %v2110_v61 = vadd.f32 %v2109_v59, %v2108_v57 }
 0x1e9   :  { %v8578_v63 = vpop.f32.mrb[8].mxu0 }
 0x1ea   :  { %v2112_v1 = vadd.f32 %v2111_v62, %v2110_v61  ;;  %v8582_v2 = vpop.f32.mrb[9].mxu0  ;;  %v2046_v22 = vmul.f32 %v8578_v63, %v8505_v13 }
 0x1eb   :  { %v2044_v4 = vmul.f32 %v8501_v12, %v8582_v2  ;;  %v8587_v5 = vpop.f32.mrb[10].mxu0 }
 0x1ec   :  { %v2114_v6 = vadd.f32 %v2113_v3, %v2112_v1  ;;  %v8589_v7 = vpop.f32.mrb[11].mxu0  ;;  %v2047_v27 = vmul.f32 %v8587_v5, %v8507_v34  ;;  %v2119_v44 = vsel %vm30_vm3, %v2046_v22, 0.0 }
 0x1ed   :  { %v2115_v24 = vsel %vm30_vm3, %v2044_v4, 0.0  ;;  %v2045_v47 = vmul.f32 %v8503_v33, %v8589_v7  ;;  %v8622_v4 = vpop.permute.xlu1 %1873 }
 0x1ee   :  { %v2116_v26 = vadd.f32 %v2115_v24, %v2114_v6  ;;  %v2121_v55 = vsel %vm30_vm3, %v2047_v27, 0.0  ;;  %12696 = vst [vmem:[#allocation22_spill] sm:$0xff] %v8622_v4 }
 0x1ef   :  { %v2117_v28 = vsel %vm30_vm3, %v2045_v47, 0.0 }
 0x1f0   :  { %v2118_v38 = vadd.f32 %v2117_v28, %v2116_v26  ;;  %v8630_v28 = vpop.permute.xlu0 %1878 }
 0x1f1   :  { %v8604_v49 = vpop.f32.mrb[12].mxu0  ;;  %12697 = vst [vmem:[#allocation23_spill] sm:$0xff] %v8630_v28 }
 0x1f2   :  { %v2120_v52 = vadd.f32 %v2119_v44, %v2118_v38  ;;  %v8606_v54 = vpop.f32.mrb[13].mxu0  ;;  %v2050_v62 = vmul.f32 %v8604_v49, %v8513_v17 }
 0x1f3   :  { %v2048_v56 = vmul.f32 %v8509_v14, %v8606_v54  ;;  %v8611_v57 = vpop.f32.mrb[14].mxu0 }
 0x1f4   :  { %v2122_v59 = vadd.f32 %v2121_v55, %v2120_v52  ;;  %v8615_v61 = vpop.f32.mrb[15].mxu0  ;;  %v2051_v22 = vmul.f32 %v8611_v57, %v8515_v36  ;;  %v2127_v26 = vsel %vm30_vm3, %v2050_v62, 0.0 }
 0x1f5   :  { %v2123_v1 = vsel %vm30_vm3, %v2048_v56, 0.0  ;;  %v2049_v3 = vmul.f32 %v8511_v35, %v8615_v61 }
 0x1f6   :  { %v2124_v6 = vadd.f32 %v2123_v1, %v2122_v59  ;;  %v2129_v52 = vsel %vm30_vm3, %v2051_v22, 0.0  ;;  %v8639_v59 = vpop.permute.xlu1 %1883 }
 0x1f7   :  { %v2125_v24 = vsel %vm30_vm3, %v2049_v3, 0.0  ;;  %12699 = vst [vmem:[#allocation25_spill] sm:$0xff] %v8639_v59 }
 0x1f8   :  { %v2126_v47 = vadd.f32 %v2125_v24, %v2124_v6 }
 0x1f9   :  { %v8628_v27 = vpop.f32.mrb[16].mxu0 }
 0x1fa   :  { %v2128_v38 = vadd.f32 %v2127_v26, %v2126_v47  ;;  %v8632_v44 = vpop.f32.mrb[17].mxu0  ;;  %v2054_v62 = vmul.f32 %v8628_v27, %v8521_v19  ;;  %v8656_v17 = vpop.permute.xlu1 %1893 }
 0x1fb   :  { %v2052_v55 = vmul.f32 %v8517_v18, %v8632_v44  ;;  %v8637_v56 = vpop.f32.mrb[18].mxu0  ;;  %v8651_v18 = vpop.permute.xlu0 %1888  ;;  %12702 = vst [vmem:[#allocation28_spill] sm:$0xff] %v8656_v17 }
 0x1fc   :  { %12698 = vst [vmem:[#allocation24_spill] sm:$0xff] %v8637_v56  ;;  %v2130_v1 = vadd.f32 %v2129_v52, %v2128_v38  ;;  %v8641_v3 = vpop.f32.mrb[19].mxu0  ;;  %v2055_v22 = vmul.f32 %v8637_v56, %v8523_v40  ;;  %12700 = vst [vmem:[#allocation26_spill] sm:$0xff] %v8651_v18  ;;  %v2135_v38 = vsel %vm30_vm3, %v2054_v62, 0.0 }
 0x1fd   :  { %v2131_v6 = vsel %vm30_vm3, %v2052_v55, 0.0  ;;  %v2053_v24 = vmul.f32 %v8519_v39, %v8641_v3 }
 0x1fe   :  { %v2132_v47 = vadd.f32 %v2131_v6, %v2130_v1  ;;  %v2137_v39 = vsel %vm30_vm3, %v2055_v22, 0.0 }
 0x1ff   :  { %v2133_v26 = vsel %vm30_vm3, %v2053_v24, 0.0 }
 0x200   :  { %v2134_v36 = vadd.f32 %v2133_v26, %v2132_v47  ;;  %v8672_v26 = vpop.permute.xlu0 %1898 }
 0x201   :  { %v8654_v52 = vpop.f32.mrb[20].mxu0  ;;  %12705 = vst [vmem:[#allocation31_spill] sm:$0xff] %v8672_v26 }
 0x202   :  { %12701 = vst [vmem:[#allocation27_spill] sm:$0xff] %v8654_v52  ;;  %v2136_v19 = vadd.f32 %v2135_v38, %v2134_v36  ;;  %v8658_v55 = vpop.f32.mrb[21].mxu0  ;;  %v2058_v62 = vmul.f32 %v8654_v52, %v8537_v23 }
 0x203   :  { %12703 = vst [vmem:[#allocation29_spill] sm:$0xff] %v8658_v55  ;;  %v2056_v1 = vmul.f32 %v8525_v20, %v8658_v55  ;;  %v8663_v6 = vpop.f32.mrb[22].mxu0  ;;  %v8677_v55 = vpop.permute.xlu1 %1903 }
 0x204   :  { %12704 = vst [vmem:[#allocation30_spill] sm:$0xff] %v8663_v6  ;;  %v2138_v24 = vadd.f32 %v2137_v39, %v2136_v19  ;;  %v8665_v40 = vpop.f32.mrb[23].mxu0  ;;  %v2059_v22 = vmul.f32 %v8663_v6, %v8545_v25  ;;  %12706 = vst [vmem:[#allocation32_spill] sm:$0xff] %v8677_v55  ;;  %v2143_v19 = vsel %vm30_vm3, %v2058_v62, 0.0  ;;  %v8689_v25 = vpop.permute.xlu0 %1908 }
 0x205   :  { %v2139_v47 = vsel %vm30_vm3, %v2056_v1, 0.0  ;;  %v2057_v36 = vmul.f32 %v8527_v41, %v8665_v40  ;;  %12710 = vst [vmem:[#allocation36_spill] sm:$0xff] %v8689_v25 }
 0x206   :  { %v2140_v38 = vadd.f32 %v2139_v47, %v2138_v24  ;;  %v2145_v41 = vsel %vm30_vm3, %v2059_v22, 0.0 }
 0x207   :  { %v2141_v20 = vsel %vm30_vm3, %v2057_v36, 0.0 }
 0x208   :  { %v2142_v39 = vadd.f32 %v2141_v20, %v2140_v38  ;;  %v8706_v52 = vpop.permute.xlu0 %1918 }
 0x209   :  { %v8680_v56 = vpop.f32.mrb[24].mxu0  ;;  %12713 = vst [vmem:[#allocation39_spill] sm:$0xff] %v8706_v52 }
 0x20a   :  { %12707 = vst [vmem:[#allocation33_spill] sm:$0xff] %v8680_v56  ;;  %v2144_v23 = vadd.f32 %v2143_v19, %v2142_v39  ;;  %v8682_v1 = vpop.f32.mrb[25].mxu0  ;;  %v2062_v20 = vmul.f32 %v8680_v56, %v8575_v60  ;;  %v8698_v39 = vpop.permute.xlu1 %1913 }
 0x20b   :  { %12708 = vst [vmem:[#allocation34_spill] sm:$0xff] %v8682_v1  ;;  %v2060_v24 = vmul.f32 %v8554_v37, %v8682_v1  ;;  %v8687_v47 = vpop.f32.mrb[26].mxu0  ;;  %12711 = vst [vmem:[#allocation37_spill] sm:$0xff] %v8698_v39 }
 0x20c   :  { %12709 = vst [vmem:[#allocation35_spill] sm:$0xff] %v8687_v47  ;;  %v2146_v36 = vadd.f32 %v2145_v41, %v2144_v23  ;;  %v8691_v6 = vpop.f32.mrb[27].mxu0  ;;  %v2063_v19 = vmul.f32 %v8687_v47, %v8580_v0  ;;  %v2151_v41 = vsel %vm30_vm3, %v2062_v20, 0.0 }
 0x20d   :  { %v2147_v62 = vsel %vm30_vm3, %v2060_v24, 0.0  ;;  %v2061_v38 = vmul.f32 %v8563_v51, %v8691_v6 }
 0x20e   :  { %v2148_v22 = vadd.f32 %v2147_v62, %v2146_v36  ;;  %v2153_v51 = vsel %vm30_vm3, %v2063_v19, 0.0  ;;  %v8715_v0 = vpop.permute.xlu1 %1923 }
 0x20f   :  { %v2149_v37 = vsel %vm30_vm3, %v2061_v38, 0.0  ;;  %12716 = vst [vmem:[#allocation42_spill] sm:$0xff] %v8715_v0 }
 0x210   :  { %v2150_v1 = vadd.f32 %v2149_v37, %v2148_v22 }
 0x211   :  { %v8704_v23 = vpop.f32.mrb[28].mxu0 }
 0x212   :  { %12712 = vst [vmem:[#allocation38_spill] sm:$0xff] %v8704_v23  ;;  %v2152_v60 = vadd.f32 %v2151_v41, %v2150_v1  ;;  %v8708_v24 = vpop.f32.mrb[29].mxu0  ;;  %v2066_v20 = vmul.f32 %v8704_v23, %v8613_v58  ;;  %v8732_v56 = vpop.permute.xlu1 %1933 }
 0x213   :  { %12714 = vst [vmem:[#allocation40_spill] sm:$0xff] %v8708_v24  ;;  %v2064_v36 = vmul.f32 %v8596_v48, %v8708_v24  ;;  %v8713_v62 = vpop.f32.mrb[30].mxu0  ;;  %v8727_v24 = vpop.permute.xlu0 %1928  ;;  %12719 = vst [vmem:[#allocation45_spill] sm:$0xff] %v8732_v56 }
 0x214   :  { %12715 = vst [vmem:[#allocation41_spill] sm:$0xff] %v8713_v62  ;;  %v2154_v38 = vadd.f32 %v2153_v51, %v2152_v60  ;;  %v8717_v37 = vpop.f32.mrb[31].mxu0  ;;  %v2067_v19 = vmul.f32 %v8713_v62, %v8622_v4  ;;  %12717 = vst [vmem:[#allocation43_spill] sm:$0xff] %v8727_v24  ;;  %v2159_v51 = vsel %vm30_vm3, %v2066_v20, 0.0 }
 0x215   :  { %v2155_v22 = vsel %vm30_vm3, %v2064_v36, 0.0  ;;  %v2065_v1 = vmul.f32 %v8601_v31, %v8717_v37 }
 0x216   :  { %v2156_v41 = vadd.f32 %v2155_v22, %v2154_v38  ;;  %v2161_v31 = vsel %vm30_vm3, %v2067_v19, 0.0 }
 0x217   :  { %v2157_v48 = vsel %vm30_vm3, %v2065_v1, 0.0 }
 0x218   :  { %v2158_v47 = vadd.f32 %v2157_v48, %v2156_v41  ;;  %v8748_v41 = vpop.permute.xlu0 %1938 }
 0x219   :  { %v8730_v60 = vpop.f32.mrb[32].mxu0  ;;  %12723 = vst [vmem:[#allocation49_spill] sm:$0xff] %v8748_v41 }
 0x21a   :  { %12718 = vst [vmem:[#allocation44_spill] sm:$0xff] %v8730_v60  ;;  %v2160_v58 = vadd.f32 %v2159_v51, %v2158_v47  ;;  %v8734_v36 = vpop.f32.mrb[33].mxu0  ;;  %v2070_v48 = vmul.f32 %v8730_v60, %v8651_v18 }
 0x21b   :  { %12720 = vst [vmem:[#allocation46_spill] sm:$0xff] %v8734_v36  ;;  %v2068_v38 = vmul.f32 %v8630_v28, %v8734_v36  ;;  %v8739_v22 = vpop.f32.mrb[34].mxu0  ;;  %v8753_v36 = vpop.permute.xlu1 %1943 }
 0x21c   :  { %12721 = vst [vmem:[#allocation47_spill] sm:$0xff] %v8739_v22  ;;  %v2162_v1 = vadd.f32 %v2161_v31, %v2160_v58  ;;  %v8741_v4 = vpop.f32.mrb[35].mxu0  ;;  %v2071_v19 = vmul.f32 %v8739_v22, %v8656_v17  ;;  %12724 = vst [vmem:[#allocation50_spill] sm:$0xff] %v8753_v36  ;;  %v2167_v58 = vsel %vm30_vm3, %v2070_v48, 0.0  ;;  %v8765_v17 = vpop.permute.xlu0 %1948 }
 0x21d   :  { %12722 = vst [vmem:[#allocation48_spill] sm:$0xff] %v8741_v4  ;;  %v2163_v20 = vsel %vm30_vm3, %v2068_v38, 0.0  ;;  %v2069_v47 = vmul.f32 %v8639_v59, %v8741_v4  ;;  %12728 = vst [vmem:[#allocation54_spill] sm:$0xff] %v8765_v17 }
 0x21e   :  { %v2164_v51 = vadd.f32 %v2163_v20, %v2162_v1  ;;  %v2169_v59 = vsel %vm30_vm3, %v2071_v19, 0.0 }
 0x21f   :  { %v2165_v28 = vsel %vm30_vm3, %v2069_v47, 0.0 }
 0x220   :  { %v2166_v31 = vadd.f32 %v2165_v28, %v2164_v51  ;;  %v8782_v60 = vpop.permute.xlu0 %1958 }
 0x221   :  { %v8756_v62 = vpop.f32.mrb[36].mxu0  ;;  %12732 = vst [vmem:[#allocation58_spill] sm:$0xff] %v8782_v60 }
 0x222   :  { %12725 = vst [vmem:[#allocation51_spill] sm:$0xff] %v8756_v62  ;;  %v2168_v18 = vadd.f32 %v2167_v58, %v2166_v31  ;;  %v8758_v38 = vpop.f32.mrb[37].mxu0  ;;  %v2074_v28 = vmul.f32 %v8756_v62, %v8689_v25  ;;  %v8774_v31 = vpop.permute.xlu1 %1953 }
 0x223   :  { %12726 = vst [vmem:[#allocation52_spill] sm:$0xff] %v8758_v38  ;;  %v2072_v1 = vmul.f32 %v8672_v26, %v8758_v38  ;;  %v8763_v20 = vpop.f32.mrb[38].mxu0  ;;  %12730 = vst [vmem:[#allocation56_spill] sm:$0xff] %v8774_v31 }
 0x224   :  { %12727 = vst [vmem:[#allocation53_spill] sm:$0xff] %v8763_v20  ;;  %v2170_v47 = vadd.f32 %v2169_v59, %v2168_v18  ;;  %v8767_v22 = vpop.f32.mrb[39].mxu0  ;;  %v2075_v58 = vmul.f32 %v8763_v20, %v8698_v39  ;;  %v2175_v18 = vsel %vm30_vm3, %v2074_v28, 0.0 }
 0x225   :  { %12729 = vst [vmem:[#allocation55_spill] sm:$0xff] %v8767_v22  ;;  %v2171_v48 = vsel %vm30_vm3, %v2072_v1, 0.0  ;;  %v2073_v51 = vmul.f32 %v8677_v55, %v8767_v22 }
 0x226   :  { %v2172_v19 = vadd.f32 %v2171_v48, %v2170_v47  ;;  %v2177_v55 = vsel %vm30_vm3, %v2075_v58, 0.0  ;;  %v8791_v39 = vpop.permute.xlu1 %1963 }
 0x227   :  { %v2173_v26 = vsel %vm30_vm3, %v2073_v51, 0.0  ;;  %12735 = vst [vmem:[#allocation61_spill] sm:$0xff] %v8791_v39 }
 0x228   :  { %v2174_v38 = vadd.f32 %v2173_v26, %v2172_v19 }
 0x229   :  { %v8780_v59 = vpop.f32.mrb[40].mxu0 }
 0x22a   :  { %12731 = vst [vmem:[#allocation57_spill] sm:$0xff] %v8780_v59  ;;  %v2176_v25 = vadd.f32 %v2175_v18, %v2174_v38  ;;  %v8784_v1 = vpop.f32.mrb[41].mxu0  ;;  %v2078_v28 = vmul.f32 %v8780_v59, %v8727_v24  ;;  %v8808_v62 = vpop.permute.xlu1 %1973 }
 0x22b   :  { %12733 = vst [vmem:[#allocation59_spill] sm:$0xff] %v8784_v1  ;;  %v2076_v47 = vmul.f32 %v8706_v52, %v8784_v1  ;;  %v8789_v48 = vpop.f32.mrb[42].mxu0  ;;  %v8803_v1 = vpop.permute.xlu0 %1968  ;;  %12739 = vst [vmem:[#allocation65_spill] sm:$0xff] %v8808_v62 }
 0x22c   :  { %12734 = vst [vmem:[#allocation60_spill] sm:$0xff] %v8789_v48  ;;  %v2178_v51 = vadd.f32 %v2177_v55, %v2176_v25  ;;  %v8793_v26 = vpop.f32.mrb[43].mxu0  ;;  %v2079_v58 = vmul.f32 %v8789_v48, %v8732_v56  ;;  %12737 = vst [vmem:[#allocation63_spill] sm:$0xff] %v8803_v1  ;;  %v2183_v25 = vsel %vm30_vm3, %v2078_v28, 0.0 }
 0x22d   :  { %12736 = vst [vmem:[#allocation62_spill] sm:$0xff] %v8793_v26  ;;  %v2179_v19 = vsel %vm30_vm3, %v2076_v47, 0.0  ;;  %v2077_v38 = vmul.f32 %v8715_v0, %v8793_v26 }
 0x22e   :  { %v2180_v18 = vadd.f32 %v2179_v19, %v2178_v51  ;;  %v2185_v0 = vsel %vm30_vm3, %v2079_v58, 0.0 }
 0x22f   :  { %v2181_v52 = vsel %vm30_vm3, %v2077_v38, 0.0 }
 0x230   :  { %v2182_v20 = vadd.f32 %v2181_v52, %v2180_v18  ;;  %v8824_v18 = vpop.permute.xlu0 %1978 }
 0x231   :  { %v8806_v55 = vpop.f32.mrb[44].mxu0  ;;  %12743 = vst [vmem:[#allocation69_spill] sm:$0xff] %v8824_v18 }
 0x232   :  { %12738 = vst [vmem:[#allocation64_spill] sm:$0xff] %v8806_v55  ;;  %v2184_v24 = vadd.f32 %v2183_v25, %v2182_v20  ;;  %v8810_v47 = vpop.f32.mrb[45].mxu0  ;;  %v2082_v52 = vmul.f32 %v8806_v55, %v8765_v17 }
 0x233   :  { %12740 = vst [vmem:[#allocation66_spill] sm:$0xff] %v8810_v47  ;;  %v2080_v51 = vmul.f32 %v8748_v41, %v8810_v47  ;;  %v8815_v19 = vpop.f32.mrb[46].mxu0  ;;  %v8829_v47 = vpop.permute.xlu1 %1983 }
 0x234   :  { %12741 = vst [vmem:[#allocation67_spill] sm:$0xff] %v8815_v19  ;;  %v2186_v38 = vadd.f32 %v2185_v0, %v2184_v24  ;;  %v8817_v56 = vpop.f32.mrb[47].mxu0  ;;  %v2083_v58 = vmul.f32 %v8815_v19, %v8774_v31  ;;  %12744 = vst [vmem:[#allocation70_spill] sm:$0xff] %v8829_v47  ;;  %v2191_v24 = vsel %vm30_vm3, %v2082_v52, 0.0  ;;  %v8841_v31 = vpop.permute.xlu0 %1988 }
 0x235   :  { %12742 = vst [vmem:[#allocation68_spill] sm:$0xff] %v8817_v56  ;;  %v2187_v28 = vsel %vm30_vm3, %v2080_v51, 0.0  ;;  %v2081_v20 = vmul.f32 %v8753_v36, %v8817_v56  ;;  %12748 = vst [vmem:[#allocation74_spill] sm:$0xff] %v8841_v31 }
 0x236   :  { %v2188_v25 = vadd.f32 %v2187_v28, %v2186_v38  ;;  %v2193_v36 = vsel %vm30_vm3, %v2083_v58, 0.0 }
 0x237   :  { %v2189_v41 = vsel %vm30_vm3, %v2081_v20, 0.0 }
 0x238   :  { %v2190_v0 = vadd.f32 %v2189_v41, %v2188_v25  ;;  %v8858_v55 = vpop.permute.xlu0 %1998 }
 0x239   :  { %v8832_v48 = vpop.f32.mrb[48].mxu0  ;;  %12752 = vst [vmem:[#allocation78_spill] sm:$0xff] %v8858_v55 }
 0x23a   :  { %12745 = vst [vmem:[#allocation71_spill] sm:$0xff] %v8832_v48  ;;  %v2192_v17 = vadd.f32 %v2191_v24, %v2190_v0  ;;  %v8834_v51 = vpop.f32.mrb[49].mxu0  ;;  %v2086_v41 = vmul.f32 %v8832_v48, %v8803_v1  ;;  %v8850_v0 = vpop.permute.xlu1 %1993 }
 0x23b   :  { %12746 = vst [vmem:[#allocation72_spill] sm:$0xff] %v8834_v51  ;;  %v2084_v38 = vmul.f32 %v8782_v60, %v8834_v51  ;;  %v8839_v28 = vpop.f32.mrb[50].mxu0  ;;  %12750 = vst [vmem:[#allocation76_spill] sm:$0xff] %v8850_v0 }
 0x23c   :  { %12747 = vst [vmem:[#allocation73_spill] sm:$0xff] %v8839_v28  ;;  %v2194_v20 = vadd.f32 %v2193_v36, %v2192_v17  ;;  %v8843_v19 = vpop.f32.mrb[51].mxu0  ;;  %v2087_v24 = vmul.f32 %v8839_v28, %v8808_v62  ;;  %v2199_v17 = vsel %vm30_vm3, %v2086_v41, 0.0 }
 0x23d   :  { %12749 = vst [vmem:[#allocation75_spill] sm:$0xff] %v8843_v19  ;;  %v2195_v52 = vsel %vm30_vm3, %v2084_v38, 0.0  ;;  %v2085_v25 = vmul.f32 %v8791_v39, %v8843_v19 }
 0x23e   :  { %v2196_v58 = vadd.f32 %v2195_v52, %v2194_v20  ;;  %v2201_v39 = vsel %vm30_vm3, %v2087_v24, 0.0  ;;  %v8867_v62 = vpop.permute.xlu1 %2003 }
 0x23f   :  { %v2197_v60 = vsel %vm30_vm3, %v2085_v25, 0.0  ;;  %12755 = vst [vmem:[#allocation81_spill] sm:$0xff] %v8867_v62 }
 0x240   :  { %v2198_v51 = vadd.f32 %v2197_v60, %v2196_v58 }
 0x241   :  { %v8856_v36 = vpop.f32.mrb[52].mxu0 }
 0x242   :  { %12751 = vst [vmem:[#allocation77_spill] sm:$0xff] %v8856_v36  ;;  %v2200_v1 = vadd.f32 %v2199_v17, %v2198_v51  ;;  %v8860_v38 = vpop.f32.mrb[53].mxu0  ;;  %v2090_v41 = vmul.f32 %v8856_v36, %v8841_v31  ;;  %v8884_v48 = vpop.permute.xlu1 %2013 }
 0x243   :  { %12753 = vst [vmem:[#allocation79_spill] sm:$0xff] %v8860_v38  ;;  %v2088_v20 = vmul.f32 %v8824_v18, %v8860_v38  ;;  %v8865_v52 = vpop.f32.mrb[54].mxu0  ;;  %v8879_v38 = vpop.permute.xlu0 %2008  ;;  %12759 = vst [vmem:[#allocation85_spill] sm:$0xff] %v8884_v48 }
 0x244   :  { %12754 = vst [vmem:[#allocation80_spill] sm:$0xff] %v8865_v52  ;;  %v2202_v25 = vadd.f32 %v2201_v39, %v2200_v1  ;;  %v8869_v60 = vpop.f32.mrb[55].mxu0  ;;  %v2091_v24 = vmul.f32 %v8865_v52, %v8850_v0  ;;  %12757 = vst [vmem:[#allocation83_spill] sm:$0xff] %v8879_v38  ;;  %v2207_v39 = vsel %vm30_vm3, %v2090_v41, 0.0 }
 0x245   :  { %12756 = vst [vmem:[#allocation82_spill] sm:$0xff] %v8869_v60  ;;  %v2203_v58 = vsel %vm30_vm3, %v2088_v20, 0.0  ;;  %v2089_v51 = vmul.f32 %v8829_v47, %v8869_v60 }
 0x246   :  { %v2204_v17 = vadd.f32 %v2203_v58, %v2202_v25  ;;  %v2209_v47 = vsel %vm30_vm3, %v2091_v24, 0.0 }
 0x247   :  { %v2205_v18 = vsel %vm30_vm3, %v2089_v51, 0.0 }
 0x248   :  { %v2206_v28 = vadd.f32 %v2205_v18, %v2204_v17  ;;  %v8900_v17 = vpop.permute.xlu0 %2018 }
 0x249   :  { %v8882_v1 = vpop.f32.mrb[56].mxu0  ;;  %12763 = vst [vmem:[#allocation89_spill] sm:$0xff] %v8900_v17 }
 0x24a   :  { %12758 = vst [vmem:[#allocation84_spill] sm:$0xff] %v8882_v1  ;;  %v2208_v31 = vadd.f32 %v2207_v39, %v2206_v28  ;;  %v8886_v20 = vpop.f32.mrb[57].mxu0  ;;  %v2094_v18 = vmul.f32 %v8882_v1, %v8879_v38 }
 0x24b   :  { %12760 = vst [vmem:[#allocation86_spill] sm:$0xff] %v8886_v20  ;;  %v2092_v25 = vmul.f32 %v8858_v55, %v8886_v20  ;;  %v8891_v58 = vpop.f32.mrb[58].mxu0  ;;  %v8905_v20 = vpop.permute.xlu1 %2023 }
 0x24c   :  { %12761 = vst [vmem:[#allocation87_spill] sm:$0xff] %v8891_v58  ;;  %v2210_v51 = vadd.f32 %v2209_v47, %v2208_v31  ;;  %v8893_v0 = vpop.f32.mrb[59].mxu0  ;;  %v2095_v24 = vmul.f32 %v8891_v58, %v8884_v48  ;;  %12764 = vst [vmem:[#allocation90_spill] sm:$0xff] %v8905_v20  ;;  %v2215_v47 = vsel %vm30_vm3, %v2094_v18, 0.0  ;;  %v8917_v48 = vpop.permute.xlu0 %2028 }
 0x24d   :  { %12762 = vst [vmem:[#allocation88_spill] sm:$0xff] %v8893_v0  ;;  %v2211_v41 = vsel %vm30_vm3, %v2092_v25, 0.0  ;;  %v2093_v28 = vmul.f32 %v8867_v62, %v8893_v0  ;;  %12767 = vst [vmem:[#allocation93_spill] sm:$0xff] %v8917_v48 }
 0x24e   :  { %v2212_v39 = vadd.f32 %v2211_v41, %v2210_v51  ;;  %v2217_v62 = vsel %vm30_vm3, %v2095_v24, 0.0 }
 0x24f   :  { %v2213_v55 = vsel %vm30_vm3, %v2093_v28, 0.0 }
 0x250   :  { %v2214_v31 = vadd.f32 %v2213_v55, %v2212_v39 }
 0x251   :  { %v8908_v52 = vpop.f32.mrb[60].mxu0 }
 0x252   :  { %12765 = vst [vmem:[#allocation91_spill] sm:$0xff] %v8908_v52  ;;  %v2216_v38 = vadd.f32 %v2215_v47, %v2214_v31  ;;  %v8910_v25 = vpop.f32.mrb[61].mxu0  ;;  %v2098_v55 = vmul.f32 %v8908_v52, %v8917_v48  ;;  %v8926_v31 = vpop.permute.xlu1 %2033 }
 0x253   :  { %12766 = vst [vmem:[#allocation92_spill] sm:$0xff] %v8910_v25  ;;  %v2096_v51 = vmul.f32 %v8900_v17, %v8910_v25  ;;  %v8915_v41 = vpop.f32.mrb[62].mxu0 }
 0x254   :  { %v2218_v28 = vadd.f32 %v2217_v62, %v2216_v38  ;;  %v8919_v58 = vpop.f32.mrb[63].mxu0  ;;  %v2099_v47 = vmul.f32 %v8915_v41, %v8926_v31  ;;  %v2223_v62 = vsel %vm30_vm3, %v2098_v55, 0.0 }
 0x255   :  { %12768 = vst [vmem:[#allocation94_spill] sm:$0xff] %v8919_v58  ;;  %v2219_v18 = vsel %vm30_vm3, %v2096_v51, 0.0  ;;  %v2097_v39 = vmul.f32 %v8905_v20, %v8919_v58 }
 0x256   :  { %v2220_v24 = vadd.f32 %v2219_v18, %v2218_v28  ;;  %v2225_v1 = vsel %vm30_vm3, %v2099_v47, 0.0 }
 0x257   :  { %v2221_v17 = vsel %vm30_vm3, %v2097_v39, 0.0 }
 0x258   :  { %v2222_v25 = vadd.f32 %v2221_v17, %v2220_v24 }
 0x25a   :  { %v2224_v38 = vadd.f32 %v2223_v62, %v2222_v25 }
 0x25c   :  { %v2226_v48 = vadd.f32 %v2225_v1, %v2224_v38 }
 0x25e   :  { %v2227_v52 = vrot.slane %v2226_v48, 4 }
 0x260   :  { %v2228_v51 = vadd.f32 %v2227_v52, %v2226_v48 }
 0x262   :  { %v2229_v0 = vrot.slane %v2228_v51, 2 }
 0x264   :  { %v2230_v36 = vadd.f32 %v2229_v0, %v2228_v51 }
 0x266   :  { %v2231_v20 = vrot.slane %v2230_v36, 1 }
 0x268   :  { %v2232_v58 = vadd.f32 %v2231_v20, %v2230_v36 }
 0x26a   :  { %v8933_v60 = vmul.f32 0.0025510204, %v2232_v58 }
 0x26c   :  { %v2235_v28 = vsub.f32 %v8531_v42, %v8933_v60  ;;  %v2236_v17 = vsub.f32 %v8539_v46, %v8933_v60  ;;  %v2237_v25 = vsub.f32 %v8529_v21, %v8933_v60  ;;  %v2238_v1 = vsub.f32 %v8535_v45, %v8933_v60 }
 0x26d   :  { %v2239_v36 = vsub.f32 %v8556_v43, %v8933_v60  ;;  %v2240_v20 = vsub.f32 %v8565_v53, %v8933_v60  ;;  %v2241_v39 = vsub.f32 %v8552_v32, %v8933_v60 }
 0x26e   :  { %v2299_v48 = vmul.f32 %v2235_v28, %v8485_v8  ;;  %v2300_v0 = vmul.f32 %v2236_v17, %v8489_v9  ;;  %v2301_v52 = vmul.f32 %v2237_v25, %v8487_v15  ;;  %v2302_v58 = vmul.f32 %v2238_v1, %v8491_v16 }
 0x26f   :  { %v2303_v24 = vmul.f32 %v2239_v36, %v8493_v10  ;;  %v2242_v9 = vsub.f32 %v8561_v50, %v8933_v60  ;;  %v2304_v47 = vmul.f32 %v2240_v20, %v8495_v29  ;;  %v2243_v16 = vsub.f32 %v8582_v2, %v8933_v60 }
 0x270   :  { %v2363_v55 = vmul.f32 %v2299_v48, %v2299_v48  ;;  %v2364_v18 = vmul.f32 %v2300_v0, %v2300_v0  ;;  %v2365_v8 = vmul.f32 %v2301_v52, %v2301_v52  ;;  %v2366_v62 = vmul.f32 %v2302_v58, %v2302_v58 }
 0x271   :  { %v2305_v28 = vmul.f32 %v2241_v39, %v8497_v11  ;;  %v2367_v17 = vmul.f32 %v2303_v24, %v2303_v24  ;;  %v2244_v1 = vsub.f32 %v8589_v7, %v8933_v60  ;;  %v2306_v29 = vmul.f32 %v2242_v9, %v8499_v30 }
 0x272   :  { %v2427_v15 = vsel %vm30_vm3, %v2363_v55, 0.0  ;;  %v2428_v38 = vsel %vm30_vm3, %v2364_v18, 0.0  ;;  %v2430_v10 = vsel %vm30_vm3, %v2365_v8, 0.0  ;;  %v2368_v48 = vmul.f32 %v2304_v47, %v2304_v47 }
 0x273   :  { %v2429_v51 = vadd.f32 %v2428_v38, %v2427_v15  ;;  %v2432_v0 = vsel %vm30_vm3, %v2366_v62, 0.0  ;;  %v2245_v52 = vsub.f32 %v8578_v63, %v8933_v60  ;;  %v2307_v20 = vmul.f32 %v2243_v16, %v8501_v12 }
 0x274   :  { %v2369_v58 = vmul.f32 %v2305_v28, %v2305_v28  ;;  %v2434_v11 = vsel %vm30_vm3, %v2367_v17, 0.0  ;;  %v2246_v18 = vsub.f32 %v8587_v5, %v8933_v60  ;;  %v2308_v39 = vmul.f32 %v2244_v1, %v8503_v33 }
 0x275   :  { %v2431_v25 = vadd.f32 %v2430_v10, %v2429_v51  ;;  %v2370_v24 = vmul.f32 %v2306_v29, %v2306_v29  ;;  %v2436_v30 = vsel %vm30_vm3, %v2368_v48, 0.0  ;;  %v2247_v9 = vsub.f32 %v8606_v54, %v8933_v60 }
 0x276   :  { %v2309_v47 = vmul.f32 %v2245_v52, %v8505_v13  ;;  %v2371_v62 = vmul.f32 %v2307_v20, %v2307_v20  ;;  %v2438_v12 = vsel %vm30_vm3, %v2369_v58, 0.0  ;;  %v2248_v38 = vsub.f32 %v8615_v61, %v8933_v60  ;;  %v12769_v20 = vld [vmem:[#allocation5_spill] sm:$0xff] }
 0x277   :  { %v2433_v36 = vadd.f32 %v2432_v0, %v2431_v25  ;;  %v2310_v51 = vmul.f32 %v2246_v18, %v8507_v34  ;;  %v2372_v16 = vmul.f32 %v2308_v39, %v2308_v39  ;;  %v2440_v33 = vsel %vm30_vm3, %v2370_v24, 0.0  ;;  %v12770_v39 = vld [vmem:[#allocation6_spill] sm:$0xff] }
 0x278   :  { %v2249_v17 = vsub.f32 %v8604_v49, %v8933_v60  ;;  %v2311_v10 = vmul.f32 %v2247_v9, %v8509_v14  ;;  %v2373_v25 = vmul.f32 %v2309_v47, %v2309_v47  ;;  %v2442_v13 = vsel %vm30_vm3, %v2371_v62, 0.0  ;;  %v12771_v47 = vld [vmem:[#allocation7_spill] sm:$0xff] }
 0x279   :  { %v2435_v55 = vadd.f32 %v2434_v11, %v2433_v36  ;;  %v2250_v29 = vsub.f32 %v8611_v57, %v8933_v60  ;;  %v2312_v48 = vmul.f32 %v2248_v38, %v8511_v35  ;;  %v2374_v0 = vmul.f32 %v2310_v51, %v2310_v51  ;;  %v12772_v51 = vld [vmem:[#allocation24_spill] sm:$0xff] }
 0x27a   :  { %v2444_v34 = vsel %vm30_vm3, %v2372_v16, 0.0  ;;  %v2251_v52 = vsub.f32 %v8632_v44, %v8933_v60  ;;  %v2313_v58 = vmul.f32 %v2249_v17, %v12769_v20  ;;  %v2375_v11 = vmul.f32 %v2311_v10, %v2311_v10  ;;  %v12776_v20 = vld [vmem:[#allocation10_spill] sm:$0xff] }
 0x27b   :  { %v2437_v8 = vadd.f32 %v2436_v30, %v2435_v55  ;;  %v2446_v14 = vsel %vm30_vm3, %v2373_v25, 0.0  ;;  %v2252_v18 = vsub.f32 %v8641_v3, %v8933_v60  ;;  %v2314_v24 = vmul.f32 %v2250_v29, %v12770_v39  ;;  %v12775_v29 = vld [vmem:[#allocation9_spill] sm:$0xff] }
 0x27c   :  { %v2376_v30 = vmul.f32 %v2312_v48, %v2312_v48  ;;  %v2448_v35 = vsel %vm30_vm3, %v2374_v0, 0.0  ;;  %v2253_v9 = vsub.f32 %v8628_v27, %v8933_v60  ;;  %v2315_v62 = vmul.f32 %v2251_v52, %v12771_v47  ;;  %v12779_v47 = vld [vmem:[#allocation30_spill] sm:$0xff] }
 0x27d   :  { %v2439_v15 = vadd.f32 %v2438_v12, %v2437_v8  ;;  %v2377_v12 = vmul.f32 %v2313_v58, %v2313_v58  ;;  %v2254_v16 = vsub.f32 %v12772_v51, %v8933_v60  ;;  %v2378_v17 = vmul.f32 %v2314_v24, %v2314_v24  ;;  %v12778_v24 = vld [vmem:[#allocation11_spill] sm:$0xff] }
 0x27e   :  { %v2452_v10 = vsel %vm30_vm3, %v2376_v30, 0.0  ;;  %v2317_v48 = vmul.f32 %v2253_v9, %v12775_v29  ;;  %v2379_v0 = vmul.f32 %v2315_v62, %v2315_v62  ;;  %v2256_v52 = vsub.f32 %v8665_v40, %v8933_v60 }
 0x27f   :  { %v2441_v28 = vadd.f32 %v2440_v33, %v2439_v15  ;;  %v2450_v15 = vsel %vm30_vm3, %v2375_v11, 0.0  ;;  %v12773_v33 = vld [vmem:[#allocation8_spill] sm:$0xff]  ;;  %v2318_v58 = vmul.f32 %v2254_v16, %v12776_v20  ;;  %v2258_v62 = vsub.f32 %v12779_v47, %v8933_v60 }
 0x281   :  { %v2443_v1 = vadd.f32 %v2442_v13, %v2441_v28  ;;  %v2316_v28 = vmul.f32 %v2252_v18, %v12773_v33  ;;  %v12774_v13 = vld [vmem:[#allocation29_spill] sm:$0xff]  ;;  %v12777_v18 = vld [vmem:[#allocation27_spill] sm:$0xff] }
 0x282   :  { %v2257_v39 = vsub.f32 %v12777_v18, %v8933_v60 }
 0x283   :  { %v2445_v36 = vadd.f32 %v2444_v34, %v2443_v1  ;;  %v2255_v1 = vsub.f32 %v12774_v13, %v8933_v60  ;;  %v2454_v34 = vsel %vm30_vm3, %v2377_v12, 0.0  ;;  %v2380_v11 = vmul.f32 %v2316_v28, %v2316_v28  ;;  %v12780_v12 = vld [vmem:[#allocation12_spill] sm:$0xff]  ;;  %v12781_v28 = vld [vmem:[#allocation34_spill] sm:$0xff] }
 0x285   :  { %v2447_v55 = vadd.f32 %v2446_v14, %v2445_v36  ;;  %v2456_v14 = vsel %vm30_vm3, %v2378_v17, 0.0  ;;  %v2319_v30 = vmul.f32 %v2255_v1, %v12778_v24  ;;  %v2460_v16 = vsel %vm30_vm3, %v2380_v11, 0.0  ;;  %v12784_v11 = vld [vmem:[#allocation33_spill] sm:$0xff] }
 0x286   :  { %v2259_v17 = vsub.f32 %v12781_v28, %v8933_v60 }
 0x287   :  { %v2449_v8 = vadd.f32 %v2448_v35, %v2447_v55  ;;  %v2381_v35 = vmul.f32 %v2317_v48, %v2317_v48  ;;  %v2383_v29 = vmul.f32 %v2319_v30, %v2319_v30 }
 0x289   :  { %v2451_v38 = vadd.f32 %v2450_v15, %v2449_v8  ;;  %v2458_v8 = vsel %vm30_vm3, %v2379_v0, 0.0  ;;  %v2320_v15 = vmul.f32 %v2256_v52, %v12780_v12  ;;  %v2462_v1 = vsel %vm30_vm3, %v2381_v35, 0.0  ;;  %v12786_v35 = vld [vmem:[#allocation35_spill] sm:$0xff]  ;;  %v12787_v12 = vld [vmem:[#allocation16_spill] sm:$0xff] }
 0x28a   :  { %v2260_v0 = vsub.f32 %v8691_v6, %v8933_v60 }
 0x28b   :  { %v2453_v25 = vadd.f32 %v2452_v10, %v2451_v38  ;;  %v2382_v38 = vmul.f32 %v2318_v58, %v2318_v58  ;;  %v12782_v10 = vld [vmem:[#allocation13_spill] sm:$0xff]  ;;  %v2384_v20 = vmul.f32 %v2320_v15, %v2320_v15 }
 0x28d   :  { %v2455_v36 = vadd.f32 %v2454_v34, %v2453_v25  ;;  %v2321_v25 = vmul.f32 %v2257_v39, %v12782_v10  ;;  %v12783_v34 = vld [vmem:[#allocation14_spill] sm:$0xff]  ;;  %v2464_v52 = vsel %vm30_vm3, %v2382_v38, 0.0  ;;  %v2466_v39 = vsel %vm30_vm3, %v2383_v29, 0.0  ;;  %v12788_v38 = vld [vmem:[#allocation40_spill] sm:$0xff] }
 0x28e   :  { %v2263_v10 = vsub.f32 %v12788_v38, %v8933_v60  ;;  %v2264_v29 = vsub.f32 %v8717_v37, %v8933_v60 }
 0x28f   :  { %v2457_v55 = vadd.f32 %v2456_v14, %v2455_v36  ;;  %v2322_v36 = vmul.f32 %v2258_v62, %v12783_v34  ;;  %v2261_v14 = vsub.f32 %v12784_v11, %v8933_v60  ;;  %v2468_v62 = vsel %vm30_vm3, %v2384_v20, 0.0 }
 0x290   :  { %v2265_v20 = vsub.f32 %v8704_v23, %v8933_v60 }
 0x291   :  { %v2459_v9 = vadd.f32 %v2458_v8, %v2457_v55  ;;  %v12785_v55 = vld [vmem:[#allocation15_spill] sm:$0xff]  ;;  %v2385_v8 = vmul.f32 %v2321_v25, %v2321_v25 }
 0x292   :  { %v2323_v24 = vmul.f32 %v2259_v17, %v12785_v55 }
 0x293   :  { %v2461_v33 = vadd.f32 %v2460_v16, %v2459_v9  ;;  %v2262_v9 = vsub.f32 %v12786_v35, %v8933_v60  ;;  %v2324_v16 = vmul.f32 %v2260_v0, %v12787_v12  ;;  %v2470_v17 = vsel %vm30_vm3, %v2385_v8, 0.0  ;;  %v12792_v8 = vld [vmem:[#allocation41_spill] sm:$0xff] }
 0x294   :  { %v2387_v34 = vmul.f32 %v2323_v24, %v2323_v24 }
 0x295   :  { %v2463_v48 = vadd.f32 %v2462_v1, %v2461_v33  ;;  %v2386_v33 = vmul.f32 %v2322_v36, %v2322_v36  ;;  %v12789_v1 = vld [vmem:[#allocation17_spill] sm:$0xff]  ;;  %v2388_v55 = vmul.f32 %v2324_v16, %v2324_v16 }
 0x297   :  { %v2465_v58 = vadd.f32 %v2464_v52, %v2463_v48  ;;  %v2325_v48 = vmul.f32 %v2261_v14, %v12789_v1  ;;  %v12790_v52 = vld [vmem:[#allocation18_spill] sm:$0xff]  ;;  %v2472_v0 = vsel %vm30_vm3, %v2386_v33, 0.0  ;;  %v2474_v14 = vsel %vm30_vm3, %v2387_v34, 0.0 }
 0x298   :  { %v12794_v33 = vld [vmem:[#allocation46_spill] sm:$0xff]  ;;  %v2268_v34 = vsub.f32 %v8741_v4, %v8933_v60 }
 0x299   :  { %v2467_v30 = vadd.f32 %v2466_v39, %v2465_v58  ;;  %v2326_v58 = vmul.f32 %v2262_v9, %v12790_v52  ;;  %v12791_v39 = vld [vmem:[#allocation19_spill] sm:$0xff]  ;;  %v2389_v12 = vmul.f32 %v2325_v48, %v2325_v48  ;;  %v2476_v9 = vsel %vm30_vm3, %v2388_v55, 0.0  ;;  %v12795_v52 = vld [vmem:[#allocation21_spill] sm:$0xff]  ;;  %v12797_v55 = vld [vmem:[#allocation44_spill] sm:$0xff] }
 0x29b   :  { %v2469_v15 = vadd.f32 %v2468_v62, %v2467_v30  ;;  %v2327_v30 = vmul.f32 %v2263_v10, %v12791_v39  ;;  %v2266_v62 = vsub.f32 %v12792_v8, %v8933_v60  ;;  %v2478_v10 = vsel %vm30_vm3, %v2389_v12, 0.0  ;;  %v12799_v12 = vld [vmem:[#allocation47_spill] sm:$0xff] }
 0x29d   :  { %v2471_v25 = vadd.f32 %v2470_v17, %v2469_v15  ;;  %v12793_v15 = vld [vmem:[#allocation20_spill] sm:$0xff]  ;;  %v2390_v17 = vmul.f32 %v2326_v58, %v2326_v58  ;;  %v2391_v23 = vmul.f32 %v2327_v30, %v2327_v30 }
 0x29e   :  { %v2328_v1 = vmul.f32 %v2264_v29, %v12793_v15  ;;  %v12798_v15 = vld [vmem:[#allocation23_spill] sm:$0xff] }
 0x29f   :  { %v2473_v36 = vadd.f32 %v2472_v0, %v2471_v25  ;;  %v2267_v25 = vsub.f32 %v12794_v33, %v8933_v60  ;;  %v2329_v0 = vmul.f32 %v2265_v20, %v12795_v52  ;;  %v2480_v29 = vsel %vm30_vm3, %v2390_v17, 0.0  ;;  %v12800_v52 = vld [vmem:[#allocation25_spill] sm:$0xff]  ;;  %v12801_v17 = vld [vmem:[#allocation52_spill] sm:$0xff] }
 0x2a0   :  { %v2482_v20 = vsel %vm30_vm3, %v2391_v23, 0.0  ;;  %v2272_v23 = vsub.f32 %v8767_v22, %v8933_v60 }
 0x2a1   :  { %v2475_v24 = vadd.f32 %v2474_v14, %v2473_v36  ;;  %v12796_v36 = vld [vmem:[#allocation22_spill] sm:$0xff]  ;;  %v2392_v14 = vmul.f32 %v2328_v1, %v2328_v1  ;;  %v2393_v33 = vmul.f32 %v2329_v0, %v2329_v0 }
 0x2a2   :  { %v2330_v39 = vmul.f32 %v2266_v62, %v12796_v36  ;;  %v12802_v36 = vld [vmem:[#allocation26_spill] sm:$0xff] }
 0x2a3   :  { %v2477_v16 = vadd.f32 %v2476_v9, %v2475_v24  ;;  %v2269_v24 = vsub.f32 %v12797_v55, %v8933_v60  ;;  %v2331_v9 = vmul.f32 %v2267_v25, %v12798_v15  ;;  %v2484_v62 = vsel %vm30_vm3, %v2392_v14, 0.0  ;;  %v12804_v14 = vld [vmem:[#allocation51_spill] sm:$0xff] }
 0x2a4   :  { %v2394_v4 = vmul.f32 %v2330_v39, %v2330_v39  ;;  %v2486_v25 = vsel %vm30_vm3, %v2393_v33, 0.0  ;;  %v12806_v33 = vld [vmem:[#allocation53_spill] sm:$0xff] }
 0x2a5   :  { %v2479_v48 = vadd.f32 %v2478_v10, %v2477_v16  ;;  %v2270_v16 = vsub.f32 %v12799_v12, %v8933_v60  ;;  %v2332_v10 = vmul.f32 %v2268_v34, %v12800_v52  ;;  %v2395_v55 = vmul.f32 %v2331_v9, %v2331_v9  ;;  %v12805_v52 = vld [vmem:[#allocation31_spill] sm:$0xff] }
 0x2a6   :  { %v2488_v34 = vsel %vm30_vm3, %v2394_v4, 0.0  ;;  %v12808_v4 = vld [vmem:[#allocation59_spill] sm:$0xff] }
 0x2a7   :  { %v2481_v58 = vadd.f32 %v2480_v29, %v2479_v48  ;;  %v2271_v48 = vsub.f32 %v12801_v17, %v8933_v60  ;;  %v2333_v29 = vmul.f32 %v2269_v24, %v12802_v36  ;;  %v2490_v24 = vsel %vm30_vm3, %v2395_v55, 0.0  ;;  %v12807_v36 = vld [vmem:[#allocation32_spill] sm:$0xff] }
 0x2a8   :  { %v2276_v55 = vsub.f32 %v8793_v26, %v8933_v60 }
 0x2a9   :  { %v2483_v30 = vadd.f32 %v2482_v20, %v2481_v58  ;;  %v12803_v58 = vld [vmem:[#allocation28_spill] sm:$0xff]  ;;  %v2396_v20 = vmul.f32 %v2332_v10, %v2332_v10  ;;  %v2397_v17 = vmul.f32 %v2333_v29, %v2333_v29 }
 0x2aa   :  { %v2334_v15 = vmul.f32 %v2270_v16, %v12803_v58  ;;  %v12809_v58 = vld [vmem:[#allocation36_spill] sm:$0xff] }
 0x2ab   :  { %v2485_v1 = vadd.f32 %v2484_v62, %v2483_v30  ;;  %v2273_v30 = vsub.f32 %v12804_v14, %v8933_v60  ;;  %v2335_v62 = vmul.f32 %v2271_v48, %v12805_v52  ;;  %v2492_v16 = vsel %vm30_vm3, %v2396_v20, 0.0 }
 0x2ac   :  { %v2398_v22 = vmul.f32 %v2334_v15, %v2334_v15  ;;  %v2494_v48 = vsel %vm30_vm3, %v2397_v17, 0.0  ;;  %v2277_v20 = vsub.f32 %v8780_v59, %v8933_v60  ;;  %v12812_v17 = vld [vmem:[#allocation60_spill] sm:$0xff] }
 0x2ad   :  { %v2487_v0 = vadd.f32 %v2486_v25, %v2485_v1  ;;  %v2274_v1 = vsub.f32 %v12806_v33, %v8933_v60  ;;  %v2336_v25 = vmul.f32 %v2272_v23, %v12807_v36  ;;  %v2399_v14 = vmul.f32 %v2335_v62, %v2335_v62 }
 0x2ae   :  { %v2496_v23 = vsel %vm30_vm3, %v2398_v22, 0.0  ;;  %v12814_v22 = vld [vmem:[#allocation66_spill] sm:$0xff] }
 0x2af   :  { %v2489_v39 = vadd.f32 %v2488_v34, %v2487_v0  ;;  %v2275_v0 = vsub.f32 %v12808_v4, %v8933_v60  ;;  %v2337_v34 = vmul.f32 %v2273_v30, %v12809_v58  ;;  %v2498_v30 = vsel %vm30_vm3, %v2399_v14, 0.0  ;;  %v12813_v58 = vld [vmem:[#allocation42_spill] sm:$0xff] }
 0x2b0   :  { %v2280_v14 = vsub.f32 %v8817_v56, %v8933_v60 }
 0x2b1   :  { %v2491_v9 = vadd.f32 %v2490_v24, %v2489_v39  ;;  %v12810_v39 = vld [vmem:[#allocation37_spill] sm:$0xff]  ;;  %v2400_v24 = vmul.f32 %v2336_v25, %v2336_v25 }
 0x2b2   :  { %v2338_v52 = vmul.f32 %v2274_v1, %v12810_v39  ;;  %v12815_v39 = vld [vmem:[#allocation43_spill] sm:$0xff] }
 0x2b3   :  { %v2493_v10 = vadd.f32 %v2492_v16, %v2491_v9  ;;  %v12811_v9 = vld [vmem:[#allocation39_spill] sm:$0xff]  ;;  %v2401_v16 = vmul.f32 %v2337_v34, %v2337_v34  ;;  %v2500_v1 = vsel %vm30_vm3, %v2400_v24, 0.0  ;;  %v12817_v24 = vld [vmem:[#allocation64_spill] sm:$0xff] }
 0x2b4   :  { %v2339_v36 = vmul.f32 %v2275_v0, %v12811_v9  ;;  %v2402_v26 = vmul.f32 %v2338_v52, %v2338_v52 }
 0x2b5   :  { %v2495_v29 = vadd.f32 %v2494_v48, %v2493_v10  ;;  %v2278_v10 = vsub.f32 %v12812_v17, %v8933_v60  ;;  %v2340_v48 = vmul.f32 %v2276_v55, %v12813_v58  ;;  %v2502_v0 = vsel %vm30_vm3, %v2401_v16, 0.0  ;;  %v12818_v58 = vld [vmem:[#allocation49_spill] sm:$0xff]  ;;  %v12819_v16 = vld [vmem:[#allocation67_spill] sm:$0xff] }
 0x2b6   :  { %v2403_v59 = vmul.f32 %v2339_v36, %v2339_v36  ;;  %v2504_v55 = vsel %vm30_vm3, %v2402_v26, 0.0  ;;  %v12821_v26 = vld [vmem:[#allocation72_spill] sm:$0xff] }
 0x2b7   :  { %v2497_v15 = vadd.f32 %v2496_v23, %v2495_v29  ;;  %v2279_v29 = vsub.f32 %v12814_v22, %v8933_v60  ;;  %v2341_v23 = vmul.f32 %v2277_v20, %v12815_v39  ;;  %v12820_v39 = vld [vmem:[#allocation50_spill] sm:$0xff] }
 0x2b8   :  { %v2506_v20 = vsel %vm30_vm3, %v2403_v59, 0.0  ;;  %v2284_v59 = vsub.f32 %v8843_v19, %v8933_v60 }
 0x2b9   :  { %v2499_v62 = vadd.f32 %v2498_v30, %v2497_v15  ;;  %v12816_v15 = vld [vmem:[#allocation45_spill] sm:$0xff]  ;;  %v2404_v30 = vmul.f32 %v2340_v48, %v2340_v48  ;;  %v2405_v22 = vmul.f32 %v2341_v23, %v2341_v23 }
 0x2ba   :  { %v2342_v9 = vmul.f32 %v2278_v10, %v12816_v15  ;;  %v12822_v15 = vld [vmem:[#allocation54_spill] sm:$0xff] }
 0x2bb   :  { %v2501_v25 = vadd.f32 %v2500_v1, %v2499_v62  ;;  %v2281_v62 = vsub.f32 %v12817_v24, %v8933_v60  ;;  %v2343_v1 = vmul.f32 %v2279_v29, %v12818_v58  ;;  %v2508_v10 = vsel %vm30_vm3, %v2404_v30, 0.0  ;;  %v12824_v30 = vld [vmem:[#allocation71_spill] sm:$0xff] }
 0x2bc   :  { %v2406_v56 = vmul.f32 %v2342_v9, %v2342_v9  ;;  %v2510_v29 = vsel %vm30_vm3, %v2405_v22, 0.0  ;;  %v12826_v22 = vld [vmem:[#allocation73_spill] sm:$0xff] }
 0x2bd   :  { %v2503_v34 = vadd.f32 %v2502_v0, %v2501_v25  ;;  %v2282_v25 = vsub.f32 %v12819_v16, %v8933_v60  ;;  %v2344_v0 = vmul.f32 %v2280_v14, %v12820_v39  ;;  %v2407_v24 = vmul.f32 %v2343_v1, %v2343_v1  ;;  %v12825_v39 = vld [vmem:[#allocation58_spill] sm:$0xff] }
 0x2be   :  { %v2512_v14 = vsel %vm30_vm3, %v2406_v56, 0.0  ;;  %v12828_v56 = vld [vmem:[#allocation79_spill] sm:$0xff] }
 0x2bf   :  { %v2505_v52 = vadd.f32 %v2504_v55, %v2503_v34  ;;  %v2283_v34 = vsub.f32 %v12821_v26, %v8933_v60  ;;  %v2345_v55 = vmul.f32 %v2281_v62, %v12822_v15  ;;  %v2514_v62 = vsel %vm30_vm3, %v2407_v24, 0.0  ;;  %v12827_v15 = vld [vmem:[#allocation61_spill] sm:$0xff]  ;;  %v12830_v24 = vld [vmem:[#allocation82_spill] sm:$0xff] }
 0x2c1   :  { %v2507_v36 = vadd.f32 %v2506_v20, %v2505_v52  ;;  %v12823_v52 = vld [vmem:[#allocation56_spill] sm:$0xff]  ;;  %v2408_v20 = vmul.f32 %v2344_v0, %v2344_v0  ;;  %v2409_v26 = vmul.f32 %v2345_v55, %v2345_v55 }
 0x2c2   :  { %v2346_v58 = vmul.f32 %v2282_v25, %v12823_v52  ;;  %v12829_v52 = vld [vmem:[#allocation63_spill] sm:$0xff] }
 0x2c3   :  { %v2509_v48 = vadd.f32 %v2508_v10, %v2507_v36  ;;  %v2285_v36 = vsub.f32 %v12824_v30, %v8933_v60  ;;  %v2347_v10 = vmul.f32 %v2283_v34, %v12825_v39  ;;  %v2516_v25 = vsel %vm30_vm3, %v2408_v20, 0.0  ;;  %v12831_v39 = vld [vmem:[#allocation65_spill] sm:$0xff] }
 0x2c4   :  { %v2410_v19 = vmul.f32 %v2346_v58, %v2346_v58  ;;  %v2518_v34 = vsel %vm30_vm3, %v2409_v26, 0.0  ;;  %v12832_v20 = vld [vmem:[#allocation77_spill] sm:$0xff]  ;;  %v12834_v26 = vld [vmem:[#allocation80_spill] sm:$0xff] }
 0x2c5   :  { %v2511_v23 = vadd.f32 %v2510_v29, %v2509_v48  ;;  %v2286_v48 = vsub.f32 %v12826_v22, %v8933_v60  ;;  %v2348_v29 = vmul.f32 %v2284_v59, %v12827_v15  ;;  %v2411_v30 = vmul.f32 %v2347_v10, %v2347_v10  ;;  %v12833_v15 = vld [vmem:[#allocation69_spill] sm:$0xff] }
 0x2c6   :  { %v2520_v59 = vsel %vm30_vm3, %v2410_v19, 0.0  ;;  %v12836_v19 = vld [vmem:[#allocation86_spill] sm:$0xff] }
 0x2c7   :  { %v2513_v9 = vadd.f32 %v2512_v14, %v2511_v23  ;;  %v2287_v23 = vsub.f32 %v12828_v56, %v8933_v60  ;;  %v2349_v14 = vmul.f32 %v2285_v36, %v12829_v52  ;;  %v2412_v22 = vmul.f32 %v2348_v29, %v2348_v29  ;;  %v12835_v52 = vld [vmem:[#allocation70_spill] sm:$0xff] }
 0x2c8   :  { %v2522_v36 = vsel %vm30_vm3, %v2411_v30, 0.0  ;;  %v12838_v30 = vld [vmem:[#allocation88_spill] sm:$0xff] }
 0x2c9   :  { %v2515_v1 = vadd.f32 %v2514_v62, %v2513_v9  ;;  %v2288_v9 = vsub.f32 %v12830_v24, %v8933_v60  ;;  %v2350_v62 = vmul.f32 %v2286_v48, %v12831_v39  ;;  %v2413_v56 = vmul.f32 %v2349_v14, %v2349_v14  ;;  %v12837_v39 = vld [vmem:[#allocation74_spill] sm:$0xff] }
 0x2ca   :  { %v2524_v48 = vsel %vm30_vm3, %v2412_v22, 0.0  ;;  %v12840_v22 = vld [vmem:[#allocation84_spill] sm:$0xff] }
 0x2cb   :  { %v2517_v0 = vadd.f32 %v2516_v25, %v2515_v1  ;;  %v2289_v1 = vsub.f32 %v12832_v20, %v8933_v60  ;;  %v2351_v25 = vmul.f32 %v2287_v23, %v12833_v15  ;;  %v2414_v24 = vmul.f32 %v2350_v62, %v2350_v62  ;;  %v12839_v15 = vld [vmem:[#allocation76_spill] sm:$0xff] }
 0x2cc   :  { %v2526_v23 = vsel %vm30_vm3, %v2413_v56, 0.0  ;;  %v12842_v56 = vld [vmem:[#allocation87_spill] sm:$0xff] }
 0x2cd   :  { %v2519_v55 = vadd.f32 %v2518_v34, %v2517_v0  ;;  %v2290_v0 = vsub.f32 %v12834_v26, %v8933_v60  ;;  %v2352_v34 = vmul.f32 %v2288_v9, %v12835_v52  ;;  %v2415_v20 = vmul.f32 %v2351_v25, %v2351_v25  ;;  %v12841_v52 = vld [vmem:[#allocation78_spill] sm:$0xff] }
 0x2ce   :  { %v2528_v9 = vsel %vm30_vm3, %v2414_v24, 0.0  ;;  %v12844_v24 = vld [vmem:[#allocation92_spill] sm:$0xff] }
 0x2cf   :  { %v2521_v58 = vadd.f32 %v2520_v59, %v2519_v55  ;;  %v2291_v55 = vsub.f32 %v12836_v19, %v8933_v60  ;;  %v2353_v59 = vmul.f32 %v2289_v1, %v12837_v39  ;;  %v2416_v26 = vmul.f32 %v2352_v34, %v2352_v34  ;;  %v12843_v39 = vld [vmem:[#allocation81_spill] sm:$0xff] }
 0x2d0   :  { %v2530_v1 = vsel %vm30_vm3, %v2415_v20, 0.0 }
 0x2d1   :  { %v2523_v10 = vadd.f32 %v2522_v36, %v2521_v58  ;;  %v2292_v58 = vsub.f32 %v12838_v30, %v8933_v60  ;;  %v2354_v36 = vmul.f32 %v2290_v0, %v12839_v15  ;;  %v2417_v19 = vmul.f32 %v2353_v59, %v2353_v59  ;;  %v12845_v15 = vld [vmem:[#allocation83_spill] sm:$0xff] }
 0x2d2   :  { %v2532_v0 = vsel %vm30_vm3, %v2416_v26, 0.0  ;;  %v7809_v59 = vmov 0.0  }
 0x2d3   :  { %v2525_v29 = vadd.f32 %v2524_v48, %v2523_v10  ;;  %v2293_v10 = vsub.f32 %v12840_v22, %v8933_v60  ;;  %v2355_v48 = vmul.f32 %v2291_v55, %v12841_v52  ;;  %v2418_v30 = vmul.f32 %v2354_v36, %v2354_v36  ;;  %31 = vst.msk [vmem:[#allocation2 + $0x200] sm:$0xff] %vm30_vm3, %v7809_v59  ;;  %v12847_v36 = vld [vmem:[#allocation85_spill] sm:$0xff] }
 0x2d4   :  { %v2534_v55 = vsel %vm30_vm3, %v2417_v19, 0.0  ;;  %35 = vst.msk [vmem:[#allocation4 + $0x200] sm:$0xff] %vm30_vm3, %v7809_v59  ;;  %36 = vst.msk [vmem:[#allocation4 + $0x208] sm:$0xff] %vm30_vm3, %v7809_v59 }
 0x2d5   :  { %v2527_v14 = vadd.f32 %v2526_v23, %v2525_v29  ;;  %v2294_v29 = vsub.f32 %v12842_v56, %v8933_v60  ;;  %v2356_v23 = vmul.f32 %v2292_v58, %v12843_v39  ;;  %v2419_v22 = vmul.f32 %v2355_v48, %v2355_v48  ;;  %v12846_v58 = vld [vmem:[#allocation94_spill] sm:$0xff]  ;;  %v12848_v48 = vld [vmem:[#allocation91_spill] sm:$0xff] }
 0x2d6   :  { %v2296_v26 = vsub.f32 %v12846_v58, %v8933_v60  ;;  %v2297_v19 = vsub.f32 %v12848_v48, %v8933_v60 }
 0x2d7   :  { %v2529_v62 = vadd.f32 %v2528_v9, %v2527_v14  ;;  %v2295_v14 = vsub.f32 %v12844_v24, %v8933_v60  ;;  %v2357_v9 = vmul.f32 %v2293_v10, %v12845_v15  ;;  %v2420_v52 = vmul.f32 %v2356_v23, %v2356_v23 }
 0x2d8   :  { %v2538_v15 = vsel %vm30_vm3, %v2419_v22, 0.0 }
 0x2d9   :  { %v2531_v25 = vadd.f32 %v2530_v1, %v2529_v62  ;;  %v2358_v62 = vmul.f32 %v2294_v29, %v12847_v36  ;;  %v2536_v1 = vsel %vm30_vm3, %v2418_v30, 0.0  ;;  %v2540_v29 = vsel %vm30_vm3, %v2420_v52, 0.0  ;;  %v12851_v30 = vld [vmem:[#allocation93_spill] sm:$0xff] }
 0x2db   :  { %v2533_v34 = vadd.f32 %v2532_v0, %v2531_v25  ;;  %v12849_v25 = vld [vmem:[#allocation89_spill] sm:$0xff]  ;;  %v2421_v0 = vmul.f32 %v2357_v9, %v2357_v9  ;;  %v2422_v56 = vmul.f32 %v2358_v62, %v2358_v62 }
 0x2dc   :  { %v2359_v39 = vmul.f32 %v2295_v14, %v12849_v25 }
 0x2dd   :  { %v2535_v20 = vadd.f32 %v2534_v55, %v2533_v34  ;;  %v2298_v34 = vsub.f32 %v8915_v41, %v8933_v60  ;;  %v12850_v55 = vld [vmem:[#allocation90_spill] sm:$0xff]  ;;  %v2544_v22 = vsel %vm30_vm3, %v2422_v56, 0.0 }
 0x2de   :  { %v2360_v59 = vmul.f32 %v2296_v26, %v12850_v55  ;;  %v2423_v36 = vmul.f32 %v2359_v39, %v2359_v39 }
 0x2df   :  { %v2537_v10 = vadd.f32 %v2536_v1, %v2535_v20  ;;  %v2361_v20 = vmul.f32 %v2297_v19, %v12851_v30  ;;  %v2542_v1 = vsel %vm30_vm3, %v2421_v0, 0.0  ;;  %v2362_v14 = vmul.f32 %v2298_v34, %v8926_v31 }
 0x2e0   :  { %v2424_v9 = vmul.f32 %v2360_v59, %v2360_v59 }
 0x2e1   :  { %v2539_v24 = vadd.f32 %v2538_v15, %v2537_v10  ;;  %v2425_v25 = vmul.f32 %v2361_v20, %v2361_v20  ;;  %v2546_v15 = vsel %vm30_vm3, %v2423_v36, 0.0  ;;  %v2426_v62 = vmul.f32 %v2362_v14, %v2362_v14 }
 0x2e2   :  { %v2548_v52 = vsel %vm30_vm3, %v2424_v9, 0.0  ;;  %v2569_v20 = vlaneseq }
 0x2e3   :  { %v2541_v23 = vadd.f32 %v2540_v29, %v2539_v24  ;;  %v2550_v19 = vsel %vm30_vm3, %v2425_v25, 0.0  ;;  %v2552_v0 = vsel %vm30_vm3, %v2426_v62, 0.0 }
 0x2e4   :  { %v2570_v36 = vshrl.u32 %v2569_v20, 7  ;;  %v12860_v20 = vld [vmem:[#allocation51_spill] sm:$0xff] }
 0x2e5   :  { %v2543_v48 = vadd.f32 %v2542_v1, %v2541_v23  ;;  %v2561_v1 = vld [vmem:[%s12381_s3] sm:$0x1]  ;;  %s7810_s3 = smov 8  }
 0x2e6   :  { %v9197_v14 = vsub.s32 0, %v2570_v36 }
 0x2e7   :  { %v2545_v10 = vadd.f32 %v2544_v22, %v2543_v48 }
 0x2e8   :  { %12852 = vst [vmem:[#allocation5_spill] sm:$0xff] %v9197_v14 }
 0x2e9   :  { %v2547_v26 = vadd.f32 %v2546_v15, %v2545_v10  ;;  %v2565_v10 = vld [vmem:[%s12382_s4] sm:$0x1]  ;;  %s7811_s4 = smov 16  }
 0x2eb   :  { %v2549_v24 = vadd.f32 %v2548_v52, %v2547_v26 }
 0x2ed   :  { %v2551_v39 = vadd.f32 %v2550_v19, %v2549_v24 }
 0x2ef   :  { %v2553_v55 = vadd.f32 %v2552_v0, %v2551_v39 }
 0x2f1   :  { %v2554_v29 = vrot.slane %v2553_v55, 4 }
 0x2f3   :  { %v2555_v31 = vadd.f32 %v2554_v29, %v2553_v55 }
 0x2f5   :  { %v2556_v34 = vrot.slane %v2555_v31, 2 }
 0x2f7   :  { %v2557_v59 = vadd.f32 %v2556_v34, %v2555_v31  ;;  %v12855_v31 = vld [vmem:[#allocation46_spill] sm:$0xff]  ;;  %v12856_v34 = vld [vmem:[#allocation48_spill] sm:$0xff] }
 0x2f9   :  { %v2558_v56 = vrot.slane %v2557_v59, 1 }
 0x2fb   :  { %v2559_v48 = vadd.f32 %v2558_v56, %v2557_v59  ;;  %v12857_v59 = vld [vmem:[#allocation44_spill] sm:$0xff] }
 0x2fd   :  { %v2560_v23 = vmul.f32 0.0025510204, %v2559_v48  ;;  %v12858_v48 = vld [vmem:[#allocation52_spill] sm:$0xff] }
 0x2ff   :  { %v2562_v30 = vadd.f32 1e-05, %v2560_v23  ;;  %v12859_v23 = vld [vmem:[#allocation55_spill] sm:$0xff] }
 0x301   :  { %7740 = vrsqrt.f32 %v2562_v30 }
 0x30b   :  { %v7741_v9 = vpop.eup %7740 }
 0x30c   :  { %v2564_v22 = vmul.f32 %v7741_v9, %v2561_v1  ;;  %v12861_v9 = vld [vmem:[#allocation62_spill] sm:$0xff] }
 0x30e   :  { %v2566_v25 = vmul.f32 %v2564_v22, %v8933_v60  ;;  %v9204_v15 = vrot.slane %v2564_v22, %v9197_v14 }
 0x310   :  { %v2567_v26 = vsub.f32 %v2565_v10, %v2566_v25  ;;  %v2635_v62 = vmul.f32 %v9204_v15, %v12846_v58  ;;  %v9210_v52 = vmul.f32 %v9204_v15, %v8531_v42  ;;  %v9214_v24 = vmul.f32 %v9204_v15, %v8539_v46  ;;  %v12862_v10 = vld [vmem:[#allocation57_spill] sm:$0xff] }
 0x311   :  { %v9218_v19 = vmul.f32 %v8529_v21, %v9204_v15  ;;  %v9222_v60 = vmul.f32 %v8535_v45, %v9204_v15  ;;  %v9226_v39 = vmul.f32 %v9204_v15, %v8556_v43  ;;  %v9230_v42 = vmul.f32 %v9204_v15, %v8565_v53 }
 0x312   :  { %v9233_v58 = vrot.slane %v2567_v26, %v9197_v14  ;;  %v2580_v46 = vmul.f32 %v8552_v32, %v9204_v15  ;;  %v9239_v21 = vmul.f32 %v8561_v50, %v9204_v15  ;;  %v9243_v45 = vmul.f32 %v9204_v15, %v8582_v2  ;;  %v12876_v14 = vld [vmem:[#allocation77_spill] sm:$0xff] }
 0x313   :  { %v9247_v43 = vmul.f32 %v9204_v15, %v8589_v7  ;;  %v9251_v53 = vmul.f32 %v8578_v63, %v9204_v15  ;;  %v9255_v0 = vmul.f32 %v8587_v5, %v9204_v15  ;;  %v9259_v32 = vmul.f32 %v9204_v15, %v8606_v54 }
 0x314   :  { %v9262_v50 = vadd.f32 %v9233_v58, %v2635_v62  ;;  %v9266_v2 = vmul.f32 %v9204_v15, %v8615_v61  ;;  %v9270_v7 = vmul.f32 %v8604_v49, %v9204_v15  ;;  %v9274_v63 = vmul.f32 %v8611_v57, %v9204_v15  ;;  %v12863_v62 = vld [vmem:[#allocation66_spill] sm:$0xff] }
 0x315   :  { %v9278_v5 = vmul.f32 %v9204_v15, %v8632_v44  ;;  %v9282_v54 = vmul.f32 %v9204_v15, %v8641_v3  ;;  %v9286_v61 = vmul.f32 %v8628_v27, %v9204_v15  ;;  %v9290_v49 = vmul.f32 %v12772_v51, %v9204_v15 }
 0x316   :  { %12853 = vst [vmem:[#allocation6_spill] sm:$0xff] %v9262_v50  ;;  %v12511_v55 = vmax.f32 %v9262_v50, 0.0  ;;  %v9295_v57 = vmul.f32 %v9204_v15, %v12774_v13  ;;  %v9299_v44 = vmul.f32 %v9204_v15, %v8665_v40  ;;  %v9303_v3 = vmul.f32 %v12777_v18, %v9204_v15  ;;  %v12878_v50 = vld [vmem:[#allocation80_spill] sm:$0xff] }
 0x317   :  { %v9307_v27 = vmul.f32 %v12779_v47, %v9204_v15  ;;  %v9311_v51 = vmul.f32 %v9204_v15, %v12781_v28  ;;  %v9315_v13 = vmul.f32 %v9204_v15, %v8691_v6  ;;  %v9319_v40 = vmul.f32 %v12784_v11, %v9204_v15  ;;  %v12854_v28 = vld [vmem:[#allocation38_spill] sm:$0xff] }
 0x318   :  { %2833 = vst.msk [vmem:[#allocation2 + $0x1e8] sm:$0xff] %vm30_vm3, %v12511_v55  ;;  %v9326_v18 = vmul.f32 %v12786_v35, %v9204_v15  ;;  %v9330_v47 = vmul.f32 %v9204_v15, %v12788_v38  ;;  %v9334_v6 = vmul.f32 %v9204_v15, %v8717_v37  ;;  %v9338_v11 = vmul.f32 %v12854_v28, %v9204_v15  ;;  %v12864_v28 = vld [vmem:[#allocation68_spill] sm:$0xff]  ;;  %v12874_v55 = vld [vmem:[#allocation82_spill] sm:$0xff] }
 0x319   :  { %v9342_v29 = vmul.f32 %v12792_v8, %v9204_v15  ;;  %v9346_v35 = vmul.f32 %v9204_v15, %v12855_v31  ;;  %v9350_v38 = vmul.f32 %v9204_v15, %v12856_v34  ;;  %v9354_v37 = vmul.f32 %v12857_v59, %v9204_v15  ;;  %v12865_v31 = vld [vmem:[#allocation64_spill] sm:$0xff] }
 0x31a   :  { %v9358_v56 = vmul.f32 %v12799_v12, %v9204_v15  ;;  %v9362_v8 = vmul.f32 %v9204_v15, %v12858_v48  ;;  %v9366_v30 = vmul.f32 %v9204_v15, %v12859_v23  ;;  %v9370_v36 = vmul.f32 %v12860_v20, %v9204_v15  ;;  %v12866_v48 = vld [vmem:[#allocation72_spill] sm:$0xff]  ;;  %v12867_v23 = vld [vmem:[#allocation75_spill] sm:$0xff] }
 0x31b   :  { %v9374_v1 = vmul.f32 %v12806_v33, %v9204_v15  ;;  %v9378_v12 = vmul.f32 %v9204_v15, %v12808_v4  ;;  %v9382_v22 = vmul.f32 %v9204_v15, %v12861_v9  ;;  %v9386_v25 = vmul.f32 %v12862_v10, %v9204_v15  ;;  %v12868_v9 = vld [vmem:[#allocation71_spill] sm:$0xff] }
 0x31c   :  { %v9390_v26 = vmul.f32 %v12812_v17, %v9204_v15  ;;  %v9394_v33 = vmul.f32 %v9204_v15, %v12863_v62  ;;  %v9398_v4 = vmul.f32 %v9204_v15, %v12864_v28  ;;  %v9402_v34 = vmul.f32 %v12865_v31, %v9204_v15  ;;  %v12870_v62 = vld [vmem:[#allocation73_spill] sm:$0xff]  ;;  %v12872_v31 = vld [vmem:[#allocation79_spill] sm:$0xff] }
 0x31d   :  { %v9406_v59 = vmul.f32 %v12819_v16, %v9204_v15  ;;  %v9410_v17 = vmul.f32 %v9204_v15, %v12866_v48  ;;  %v9414_v20 = vmul.f32 %v9204_v15, %v12867_v23  ;;  %v9418_v10 = vmul.f32 %v12868_v9, %v9204_v15 }
 0x31e   :  { %v9422_v28 = vmul.f32 %v12870_v62, %v9204_v15  ;;  %v9426_v16 = vmul.f32 %v9204_v15, %v12872_v31  ;;  %v9430_v48 = vmul.f32 %v9204_v15, %v12874_v55  ;;  %v9434_v23 = vmul.f32 %v12876_v14, %v9204_v15 }
 0x31f   :  { %12869 = vst [vmem:[#allocation7_spill] sm:$0xff] %v9418_v10  ;;  %v9438_v9 = vmul.f32 %v12878_v50, %v9204_v15  ;;  %v12880_v10 = vld [vmem:[#allocation86_spill] sm:$0xff] }
 0x320   :  { %12871 = vst [vmem:[#allocation24_spill] sm:$0xff] %v9422_v28  ;;  %12873 = vst [vmem:[#allocation8_spill] sm:$0xff] %v9426_v16  ;;  %v9442_v62 = vmul.f32 %v9204_v15, %v12880_v10  ;;  %v12881_v28 = vld [vmem:[#allocation88_spill] sm:$0xff] }
 0x321   :  { %12875 = vst [vmem:[#allocation29_spill] sm:$0xff] %v9430_v48  ;;  %12877 = vst [vmem:[#allocation9_spill] sm:$0xff] %v9434_v23  ;;  %v9446_v31 = vmul.f32 %v9204_v15, %v12881_v28  ;;  %v12882_v16 = vld [vmem:[#allocation84_spill] sm:$0xff]  ;;  %v12883_v48 = vld [vmem:[#allocation87_spill] sm:$0xff]  ;;  %v9466_v28 = vmul.f32 %v8915_v41, %v9204_v15  ;;  %v9489_v41 = vadd.f32 %v9233_v58, %v9218_v19 }
 0x322   :  { %12879 = vst [vmem:[#allocation10_spill] sm:$0xff] %v9438_v9  ;;  %v9450_v55 = vmul.f32 %v12882_v16, %v9204_v15  ;;  %v9454_v14 = vmul.f32 %v12883_v48, %v9204_v15  ;;  %v12885_v23 = vld [vmem:[#allocation92_spill] sm:$0xff]  ;;  %v12886_v9 = vld [vmem:[#allocation91_spill] sm:$0xff]  ;;  %v9470_v16 = vadd.f32 %v9233_v58, %v9226_v39  ;;  %v9474_v48 = vadd.f32 %v9233_v58, %v9230_v42 }
 0x323   :  { %v9458_v50 = vmul.f32 %v9204_v15, %v12885_v23  ;;  %v9462_v10 = vmul.f32 %v12886_v9, %v9204_v15  ;;  %v9481_v23 = vadd.f32 %v9233_v58, %v9210_v52  ;;  %v9485_v9 = vadd.f32 %v9233_v58, %v9214_v24 }
 0x324   :  { %12884 = vst [vmem:[#allocation27_spill] sm:$0xff] %v9454_v14  ;;  %12887 = vst [vmem:[#allocation11_spill] sm:$0xff] %v9470_v16  ;;  %v9477_v14 = vadd.f32 %v9233_v58, %v2580_v46  ;;  %v9493_v15 = vadd.f32 %v9233_v58, %v9222_v60  ;;  %v9497_v39 = vadd.f32 %v9233_v58, %v9239_v21  ;;  %v12516_v42 = vmax.f32 %v9470_v16, 0.0 }
 0x325   :  { %12888 = vst [vmem:[#allocation30_spill] sm:$0xff] %v9474_v48  ;;  %12890 = vst [vmem:[#allocation34_spill] sm:$0xff] %v9481_v23  ;;  %v9504_v24 = vadd.f32 %v9233_v58, %v9243_v45  ;;  %v9508_v19 = vadd.f32 %v9233_v58, %v9247_v43  ;;  %v9512_v60 = vadd.f32 %v9233_v58, %v9251_v53  ;;  %v12892_v45 = vmax.f32 %v9474_v48, 0.0 }
 0x326   :  { %12889 = vst [vmem:[#allocation12_spill] sm:$0xff] %v9477_v14  ;;  %12891 = vst [vmem:[#allocation13_spill] sm:$0xff] %v9485_v9  ;;  %v12515_v46 = vmax.f32 %v9477_v14, 0.0  ;;  %v9516_v21 = vadd.f32 %v9233_v58, %v9255_v0  ;;  %v9520_v52 = vadd.f32 %v9233_v58, %v9259_v32  ;;  %v9533_v43 = vadd.f32 %v9233_v58, %v9266_v2 }
 0x327   :  { %2776 = vst.msk [vmem:[#allocation2 + $0x20] sm:$0xff] %vm30_vm3, %v12516_v42  ;;  %2777 = vst.msk [vmem:[#allocation2 + $0x28] sm:$0xff] %vm30_vm3, %v12892_v45  ;;  %v9537_v53 = vadd.f32 %v9233_v58, %v9270_v7  ;;  %v9541_v0 = vadd.f32 %v9233_v58, %v9274_v63  ;;  %v9545_v32 = vadd.f32 %v9233_v58, %v9278_v5 }
 0x328   :  { %2778 = vst.msk [vmem:[#allocation2 + $0x30] sm:$0xff] %vm30_vm3, %v12515_v46  ;;  %v9549_v45 = vadd.f32 %v9233_v58, %v9282_v54  ;;  %v9553_v2 = vadd.f32 %v9233_v58, %v9286_v61  ;;  %v9557_v7 = vadd.f32 %v9233_v58, %v9290_v49  ;;  %v9561_v63 = vadd.f32 %v9233_v58, %v9295_v57 }
 0x329   :  { %v9565_v5 = vadd.f32 %v9233_v58, %v9299_v44  ;;  %v9569_v54 = vadd.f32 %v9233_v58, %v9303_v3  ;;  %v9573_v61 = vadd.f32 %v9233_v58, %v9307_v27  ;;  %v9577_v49 = vadd.f32 %v9233_v58, %v9311_v51 }
 0x32a   :  { %v9581_v57 = vadd.f32 %v9233_v58, %v9315_v13  ;;  %v9585_v44 = vadd.f32 %v9233_v58, %v9319_v40  ;;  %v9589_v3 = vadd.f32 %v9233_v58, %v9326_v18  ;;  %v9593_v27 = vadd.f32 %v9233_v58, %v9330_v47 }
 0x32b   :  { %v9597_v51 = vadd.f32 %v9233_v58, %v9334_v6  ;;  %v9601_v13 = vadd.f32 %v9233_v58, %v9338_v11  ;;  %v9605_v40 = vadd.f32 %v9233_v58, %v9342_v29  ;;  %v9609_v18 = vadd.f32 %v9233_v58, %v9346_v35 }
 0x32c   :  { %v9613_v47 = vadd.f32 %v9233_v58, %v9350_v38  ;;  %v9617_v6 = vadd.f32 %v9233_v58, %v9354_v37  ;;  %v9621_v11 = vadd.f32 %v9233_v58, %v9358_v56  ;;  %v9625_v29 = vadd.f32 %v9233_v58, %v9362_v8 }
 0x32d   :  { %v9629_v35 = vadd.f32 %v9233_v58, %v9366_v30  ;;  %v9633_v38 = vadd.f32 %v9233_v58, %v9370_v36  ;;  %v9637_v37 = vadd.f32 %v9233_v58, %v9374_v1  ;;  %v9641_v56 = vadd.f32 %v9233_v58, %v9378_v12 }
 0x32e   :  { %12893 = vst [vmem:[#allocation14_spill] sm:$0xff] %v9617_v6  ;;  %v2840_v46 = vld [vmem:[#allocation2 + $0x21] sm:$0xff]  ;;  %v9645_v8 = vadd.f32 %v9233_v58, %v9382_v22  ;;  %v9649_v30 = vadd.f32 %v9233_v58, %v9386_v25  ;;  %v9653_v36 = vadd.f32 %v9233_v58, %v9390_v26  ;;  %v9657_v1 = vadd.f32 %v9233_v58, %v9394_v33 }
 0x32f   :  { %v2841_v42 = vld [vmem:[#allocation2 + $0x29] sm:$0xff]  ;;  %v9661_v14 = vadd.f32 %v9233_v58, %v9398_v4  ;;  %v9665_v22 = vadd.f32 %v9233_v58, %v9402_v34  ;;  %v9669_v25 = vadd.f32 %v9233_v58, %v9406_v59  ;;  %v9673_v26 = vadd.f32 %v9233_v58, %v9410_v17  ;;  %v12905_v59 = vld [vmem:[#allocation8_spill] sm:$0xff] }
 0x330   :  { %12894 = vst [vmem:[#allocation33_spill] sm:$0xff] %v9649_v30  ;;  %12895 = vst [vmem:[#allocation15_spill] sm:$0xff] %v9653_v36  ;;  %v7349_v12 = vpack.i.bf16 %v2841_v42, %v2840_v46  ;;  %v9677_v33 = vadd.f32 %v9233_v58, %v9414_v20  ;;  %v12901_v42 = vld [vmem:[#allocation7_spill] sm:$0xff]  ;;  %v12903_v46 = vld [vmem:[#allocation24_spill] sm:$0xff]  ;;  %v9690_v16 = vadd.f32 %v9233_v58, %v12905_v59 }
 0x331   :  { %12896 = vst [vmem:[#allocation35_spill] sm:$0xff] %v9657_v1  ;;  %12897 = vst [vmem:[#allocation16_spill] sm:$0xff] %v9665_v22  ;;  %v9681_v4 = vadd.f32 %v9233_v58, %v12901_v42  ;;  %v9685_v34 = vadd.f32 %v9233_v58, %v12903_v46  ;;  %v12907_v17 = vld [vmem:[#allocation29_spill] sm:$0xff]  ;;  %v12911_v42 = vld [vmem:[#allocation10_spill] sm:$0xff]  ;;  %v9706_v46 = vadd.f32 %v9233_v58, %v9442_v62 }
 0x332   :  { %12898 = vst [vmem:[#allocation40_spill] sm:$0xff] %v9669_v25  ;;  %12899 = vst [vmem:[#allocation17_spill] sm:$0xff] %v9673_v26  ;;  %7350 = vrot.lane.b32.xlu1 %v7349_v12, %s7810_s3  ;;  %v9694_v48 = vadd.f32 %v9233_v58, %v12907_v17  ;;  %v12909_v20 = vld [vmem:[#allocation9_spill] sm:$0xff]  ;;  %v9710_v12 = vadd.f32 %v9233_v58, %v9446_v31  ;;  %v9714_v59 = vadd.f32 %v9233_v58, %v9450_v55  ;;  %v12916_v17 = vld [vmem:[#allocation27_spill] sm:$0xff] }
 0x333   :  { %12900 = vst [vmem:[#allocation18_spill] sm:$0xff] %v9677_v33  ;;  %12902 = vst [vmem:[#allocation19_spill] sm:$0xff] %v9681_v4  ;;  %v9698_v33 = vadd.f32 %v9233_v58, %v12909_v20  ;;  %v9702_v4 = vadd.f32 %v9233_v58, %v12911_v42  ;;  %v9718_v20 = vadd.f32 %v9233_v58, %v12916_v17  ;;  %v12526_v55 = vmax.f32 %v9493_v15, 0.0 }
 0x334   :  { %12904 = vst [vmem:[#allocation41_spill] sm:$0xff] %v9685_v34  ;;  %12906 = vst [vmem:[#allocation20_spill] sm:$0xff] %v9690_v16  ;;  %v9722_v42 = vadd.f32 %v9233_v58, %v9458_v50  ;;  %v9726_v62 = vadd.f32 %v9233_v58, %v9462_v10  ;;  %v9730_v31 = vadd.f32 %v9233_v58, %v9466_v28  ;;  %v12527_v10 = vmax.f32 %v9508_v19, 0.0 }
 0x335   :  { %12908 = vst [vmem:[#allocation21_spill] sm:$0xff] %v9694_v48  ;;  %12910 = vst [vmem:[#allocation22_spill] sm:$0xff] %v9698_v33  ;;  %v12921_v50 = vmax.f32 %v9481_v23, 0.0  ;;  %v12922_v58 = vmax.f32 %v9485_v9, 0.0  ;;  %v12923_v28 = vmax.f32 %v9497_v39, 0.0  ;;  %v12924_v17 = vmax.f32 %v9504_v24, 0.0 }
 0x336   :  { %12912 = vst [vmem:[#allocation23_spill] sm:$0xff] %v9702_v4  ;;  %12913 = vst [vmem:[#allocation47_spill] sm:$0xff] %v9706_v46  ;;  %v2904_v9 = vld [vmem:[#allocation2 + $0x22] sm:$0xff] }
 0x337   :  { %12914 = vst [vmem:[#allocation25_spill] sm:$0xff] %v9710_v12  ;;  %12915 = vst [vmem:[#allocation26_spill] sm:$0xff] %v9714_v59  ;;  %v12525_v12 = vmax.f32 %v9489_v41, 0.0  ;;  %v12530_v59 = vmax.f32 %v9577_v49, 0.0 }
 0x338   :  { %12917 = vst [vmem:[#allocation28_spill] sm:$0xff] %v9718_v20  ;;  %12918 = vst [vmem:[#allocation31_spill] sm:$0xff] %v9722_v42  ;;  %v12927_v20 = vmax.f32 %v9520_v52, 0.0 }
 0x339   :  { %12919 = vst [vmem:[#allocation53_spill] sm:$0xff] %v9726_v62  ;;  %12920 = vst [vmem:[#allocation32_spill] sm:$0xff] %v9730_v31 }
 0x33a   :  { %2774 = vst.msk [vmem:[#allocation2 + $0x10] sm:$0xff] %vm30_vm3, %v12525_v12  ;;  %2775 = vst.msk [vmem:[#allocation2 + $0x18] sm:$0xff] %vm30_vm3, %v12526_v55  ;;  %v12528_v55 = vmax.f32 %v9545_v32, 0.0  ;;  %v12531_v12 = vmax.f32 %v9593_v27, 0.0  ;;  %v12951_v23 = vld [vmem:[#allocation18_spill] sm:$0xff] }
 0x33b   :  { %2772 = vst.msk [vmem:[#allocation2] sm:$0xff] %vm30_vm3, %v12921_v50  ;;  %2773 = vst.msk [vmem:[#allocation2 + $0x8] sm:$0xff] %vm30_vm3, %v12922_v58  ;;  %v12925_v50 = vmax.f32 %v9512_v60, 0.0  ;;  %v12926_v58 = vmax.f32 %v9516_v21, 0.0 }
 0x33c   :  { %2779 = vst.msk [vmem:[#allocation2 + $0x38] sm:$0xff] %vm30_vm3, %v12923_v28  ;;  %2780 = vst.msk [vmem:[#allocation2 + $0x40] sm:$0xff] %vm30_vm3, %v12924_v17  ;;  %v12529_v28 = vmax.f32 %v9561_v63, 0.0 }
 0x33d   :  { %2781 = vst.msk [vmem:[#allocation2 + $0x48] sm:$0xff] %vm30_vm3, %v12527_v10  ;;  %2782 = vst.msk [vmem:[#allocation2 + $0x50] sm:$0xff] %vm30_vm3, %v12925_v50  ;;  %v12928_v10 = vmax.f32 %v9533_v43, 0.0  ;;  %v12929_v50 = vmax.f32 %v9537_v53, 0.0 }
 0x33e   :  { %2783 = vst.msk [vmem:[#allocation2 + $0x58] sm:$0xff] %vm30_vm3, %v12926_v58  ;;  %2784 = vst.msk [vmem:[#allocation2 + $0x60] sm:$0xff] %vm30_vm3, %v12927_v20  ;;  %v12930_v58 = vmax.f32 %v9541_v0, 0.0 }
 0x33f   :  { %2785 = vst.msk [vmem:[#allocation2 + $0x68] sm:$0xff] %vm30_vm3, %v12928_v10  ;;  %2786 = vst.msk [vmem:[#allocation2 + $0x70] sm:$0xff] %vm30_vm3, %v12929_v50  ;;  %v12931_v10 = vmax.f32 %v9549_v45, 0.0  ;;  %v12932_v50 = vmax.f32 %v9553_v2, 0.0 }
 0x340   :  { %2787 = vst.msk [vmem:[#allocation2 + $0x78] sm:$0xff] %vm30_vm3, %v12930_v58  ;;  %2788 = vst.msk [vmem:[#allocation2 + $0x80] sm:$0xff] %vm30_vm3, %v12528_v55  ;;  %v12933_v58 = vmax.f32 %v9557_v7, 0.0 }
 0x341   :  { %2789 = vst.msk [vmem:[#allocation2 + $0x88] sm:$0xff] %vm30_vm3, %v12931_v10  ;;  %2790 = vst.msk [vmem:[#allocation2 + $0x90] sm:$0xff] %vm30_vm3, %v12932_v50  ;;  %v12934_v10 = vmax.f32 %v9565_v5, 0.0  ;;  %v12935_v50 = vmax.f32 %v9569_v54, 0.0  ;;  %v2839_v55 = vld [vmem:[#allocation2 + $0x19] sm:$0xff] }
 0x342   :  { %2791 = vst.msk [vmem:[#allocation2 + $0x98] sm:$0xff] %vm30_vm3, %v12933_v58  ;;  %2792 = vst.msk [vmem:[#allocation2 + $0xa0] sm:$0xff] %vm30_vm3, %v12529_v28  ;;  %v12936_v58 = vmax.f32 %v9573_v61, 0.0  ;;  %v2838_v28 = vld [vmem:[#allocation2 + $0x11] sm:$0xff] }
 0x343   :  { %2793 = vst.msk [vmem:[#allocation2 + $0xa8] sm:$0xff] %vm30_vm3, %v12934_v10  ;;  %2794 = vst.msk [vmem:[#allocation2 + $0xb0] sm:$0xff] %vm30_vm3, %v12935_v50  ;;  %v12937_v10 = vmax.f32 %v9581_v57, 0.0  ;;  %v12938_v50 = vmax.f32 %v9585_v44, 0.0  ;;  %v7344_v20 = vpack.i.bf16 %v2839_v55, %v2838_v28  ;;  %v12956_v28 = vmax.f32 %v9653_v36, 0.0  ;;  %v12961_v36 = vld [vmem:[#allocation26_spill] sm:$0xff] }
 0x344   :  { %2795 = vst.msk [vmem:[#allocation2 + $0xb8] sm:$0xff] %vm30_vm3, %v12936_v58  ;;  %2796 = vst.msk [vmem:[#allocation2 + $0xc0] sm:$0xff] %vm30_vm3, %v12530_v59  ;;  %v12939_v58 = vmax.f32 %v9589_v3, 0.0  ;;  %v12946_v59 = vmax.f32 %v9621_v11, 0.0  ;;  %v2844_v55 = vld [vmem:[#allocation2 + $0x41] sm:$0xff] }
 0x345   :  { %2797 = vst.msk [vmem:[#allocation2 + $0xc8] sm:$0xff] %vm30_vm3, %v12937_v10  ;;  %2798 = vst.msk [vmem:[#allocation2 + $0xd0] sm:$0xff] %vm30_vm3, %v12938_v50  ;;  %v12940_v10 = vmax.f32 %v9597_v51, 0.0  ;;  %v12941_v50 = vmax.f32 %v9601_v13, 0.0  ;;  %7345 = vrot.lane.b32.xlu0 %v7344_v20, %s7810_s3  ;;  %v2902_v20 = vld [vmem:[#allocation2 + $0x12] sm:$0xff] }
 0x346   :  { %2799 = vst.msk [vmem:[#allocation2 + $0xd8] sm:$0xff] %vm30_vm3, %v12939_v58  ;;  %2800 = vst.msk [vmem:[#allocation2 + $0xe0] sm:$0xff] %vm30_vm3, %v12531_v12  ;;  %v12942_v58 = vmax.f32 %v9605_v40, 0.0  ;;  %v12952_v12 = vld [vmem:[#allocation19_spill] sm:$0xff] }
 0x347   :  { %2801 = vst.msk [vmem:[#allocation2 + $0xe8] sm:$0xff] %vm30_vm3, %v12940_v10  ;;  %2802 = vst.msk [vmem:[#allocation2 + $0xf0] sm:$0xff] %vm30_vm3, %v12941_v50  ;;  %v12943_v10 = vmax.f32 %v9609_v18, 0.0  ;;  %v12944_v50 = vmax.f32 %v9613_v47, 0.0  ;;  %v12965_v17 = vmax.f32 %v12952_v12, 0.0 }
 0x348   :  { %2803 = vst.msk [vmem:[#allocation2 + $0xf8] sm:$0xff] %vm30_vm3, %v12942_v58  ;;  %v12945_v58 = vmax.f32 %v9617_v6, 0.0  ;;  %2807 = vst.msk [vmem:[#allocation2 + $0x118] sm:$0xff] %vm30_vm3, %v12946_v59  ;;  %v12950_v59 = vmax.f32 %v9637_v37, 0.0  ;;  %v2905_v6 = vld [vmem:[#allocation2 + $0x2a] sm:$0xff] }
 0x349   :  { %2804 = vst.msk [vmem:[#allocation2 + $0x100] sm:$0xff] %vm30_vm3, %v12943_v10  ;;  %2805 = vst.msk [vmem:[#allocation2 + $0x108] sm:$0xff] %vm30_vm3, %v12944_v50  ;;  %v12947_v10 = vmax.f32 %v9625_v29, 0.0  ;;  %v12948_v50 = vmax.f32 %v9629_v35, 0.0 }
 0x34a   :  { %2806 = vst.msk [vmem:[#allocation2 + $0x110] sm:$0xff] %vm30_vm3, %v12945_v58  ;;  %v12949_v58 = vmax.f32 %v9633_v38, 0.0  ;;  %2811 = vst.msk [vmem:[#allocation2 + $0x138] sm:$0xff] %vm30_vm3, %v12950_v59  ;;  %v12955_v59 = vmax.f32 %v9649_v30, 0.0  ;;  %v12960_v30 = vld [vmem:[#allocation25_spill] sm:$0xff] }
 0x34b   :  { %2808 = vst.msk [vmem:[#allocation2 + $0x120] sm:$0xff] %vm30_vm3, %v12947_v10  ;;  %2809 = vst.msk [vmem:[#allocation2 + $0x128] sm:$0xff] %vm30_vm3, %v12948_v50  ;;  %v12953_v50 = vmax.f32 %v9641_v56, 0.0  ;;  %v2903_v10 = vld [vmem:[#allocation2 + $0x1a] sm:$0xff] }
 0x34c   :  { %2810 = vst.msk [vmem:[#allocation2 + $0x130] sm:$0xff] %vm30_vm3, %v12949_v58  ;;  %v12954_v58 = vmax.f32 %v9645_v8, 0.0  ;;  %2814 = vst.msk [vmem:[#allocation2 + $0x150] sm:$0xff] %vm30_vm3, %v12955_v59  ;;  %v12958_v59 = vmax.f32 %v9661_v14, 0.0 }
 0x34d   :  { %2812 = vst.msk [vmem:[#allocation2 + $0x140] sm:$0xff] %vm30_vm3, %v12953_v50  ;;  %2815 = vst.msk [vmem:[#allocation2 + $0x158] sm:$0xff] %vm30_vm3, %v12956_v28  ;;  %v12959_v28 = vmax.f32 %v9665_v22, 0.0  ;;  %v12966_v50 = vld [vmem:[#allocation28_spill] sm:$0xff]  ;;  %v12971_v22 = vmax.f32 %v9702_v4, 0.0 }
 0x34e   :  { %2813 = vst.msk [vmem:[#allocation2 + $0x148] sm:$0xff] %vm30_vm3, %v12954_v58  ;;  %v12957_v58 = vmax.f32 %v9657_v1, 0.0  ;;  %2817 = vst.msk [vmem:[#allocation2 + $0x168] sm:$0xff] %vm30_vm3, %v12958_v59  ;;  %v12963_v59 = vmax.f32 %v9673_v26, 0.0  ;;  %v7359_v1 = vpack.i.bf16 %v2905_v6, %v2904_v9  ;;  %v12975_v9 = vmax.f32 %v12966_v50, 0.0  ;;  %v2849_v50 = vld [vmem:[#allocation2 + $0x69] sm:$0xff] }
 0x34f   :  { %2818 = vst.msk [vmem:[#allocation2 + $0x170] sm:$0xff] %vm30_vm3, %v12959_v28  ;;  %v12964_v28 = vmax.f32 %v12951_v23, 0.0  ;;  %2822 = vst.msk [vmem:[#allocation2 + $0x190] sm:$0xff] %vm30_vm3, %v12965_v17  ;;  %v12970_v17 = vmax.f32 %v9698_v33, 0.0  ;;  %v12976_v6 = vmax.f32 %v9722_v42, 0.0  ;;  %v2846_v42 = vld [vmem:[#allocation2 + $0x51] sm:$0xff] }
 0x350   :  { %2816 = vst.msk [vmem:[#allocation2 + $0x160] sm:$0xff] %vm30_vm3, %v12957_v58  ;;  %v12962_v58 = vmax.f32 %v9669_v25, 0.0  ;;  %2820 = vst.msk [vmem:[#allocation2 + $0x180] sm:$0xff] %vm30_vm3, %v12963_v59  ;;  %v12967_v25 = vmax.f32 %v9685_v34, 0.0  ;;  %v12968_v59 = vmax.f32 %v9690_v16, 0.0  ;;  %7360 = vrot.lane.b32.xlu1 %v7359_v1, %s7811_s4  ;;  %v2847_v33 = vld [vmem:[#allocation2 + $0x59] sm:$0xff] }
 0x351   :  { %2821 = vst.msk [vmem:[#allocation2 + $0x188] sm:$0xff] %vm30_vm3, %v12964_v28  ;;  %v12969_v28 = vmax.f32 %v9694_v48, 0.0  ;;  %2826 = vst.msk [vmem:[#allocation2 + $0x1b0] sm:$0xff] %vm30_vm3, %v12970_v17  ;;  %v2845_v17 = vld [vmem:[#allocation2 + $0x49] sm:$0xff]  ;;  %v2867_v4 = vld [vmem:[#allocation2 + $0xf9] sm:$0xff] }
 0x352   :  { %2819 = vst.msk [vmem:[#allocation2 + $0x178] sm:$0xff] %vm30_vm3, %v12962_v58  ;;  %2823 = vst.msk [vmem:[#allocation2 + $0x198] sm:$0xff] %vm30_vm3, %v12967_v25  ;;  %v12972_v58 = vmax.f32 %v9706_v46, 0.0  ;;  %v12973_v25 = vmax.f32 %v12960_v30, 0.0  ;;  %v2901_v48 = vld [vmem:[#allocation2 + $0xa] sm:$0xff] }
 0x353   :  { %2824 = vst.msk [vmem:[#allocation2 + $0x1a0] sm:$0xff] %vm30_vm3, %v12968_v59  ;;  %2825 = vst.msk [vmem:[#allocation2 + $0x1a8] sm:$0xff] %vm30_vm3, %v12969_v28  ;;  %v12974_v59 = vmax.f32 %v12961_v36, 0.0  ;;  %v7354_v28 = vpack.i.bf16 %v2903_v10, %v2902_v20  ;;  %v2843_v10 = vld [vmem:[#allocation2 + $0x39] sm:$0xff]  ;;  %v7369_v20 = vpack.i.bf16 %v2845_v17, %v2844_v55  ;;  %v7384_v55 = vpack.i.bf16 %v2847_v33, %v2846_v42  ;;  %v2913_v17 = vld [vmem:[#allocation2 + $0x6a] sm:$0xff] }
 0x354   :  { %2827 = vst.msk [vmem:[#allocation2 + $0x1b8] sm:$0xff] %vm30_vm3, %v12971_v22  ;;  %2828 = vst.msk [vmem:[#allocation2 + $0x1c0] sm:$0xff] %vm30_vm3, %v12972_v58  ;;  %v12977_v22 = vmax.f32 %v9726_v62, 0.0  ;;  %v12978_v58 = vmax.f32 %v9730_v31, 0.0  ;;  %v2906_v36 = vld [vmem:[#allocation2 + $0x32] sm:$0xff]  ;;  %v2907_v62 = vld [vmem:[#allocation2 + $0x3a] sm:$0xff] }
 0x355   :  { %2829 = vst.msk [vmem:[#allocation2 + $0x1c8] sm:$0xff] %vm30_vm3, %v12973_v25  ;;  %2830 = vst.msk [vmem:[#allocation2 + $0x1d0] sm:$0xff] %vm30_vm3, %v12974_v59  ;;  %v2842_v25 = vld [vmem:[#allocation2 + $0x31] sm:$0xff]  ;;  %7355 = vrot.lane.b32.xlu0 %v7354_v28, %s7811_s4  ;;  %7370 = vrot.lane.b32.xlu1 %v7369_v20, %s7810_s3  ;;  %v2848_v31 = vld [vmem:[#allocation2 + $0x61] sm:$0xff] }
 0x356   :  { %2831 = vst.msk [vmem:[#allocation2 + $0x1d8] sm:$0xff] %vm30_vm3, %v12975_v9  ;;  %2832 = vst.msk [vmem:[#allocation2 + $0x1e0] sm:$0xff] %vm30_vm3, %v12976_v6  ;;  %v7364_v59 = vpack.i.bf16 %v2843_v10, %v2842_v25  ;;  %v2908_v9 = vld [vmem:[#allocation2 + $0x42] sm:$0xff]  ;;  %v2909_v6 = vld [vmem:[#allocation2 + $0x4a] sm:$0xff]  ;;  %v7389_v1 = vpack.i.bf16 %v2849_v50, %v2848_v31 }
 0x357   :  { %2834 = vst.msk [vmem:[#allocation2 + $0x1f0] sm:$0xff] %vm30_vm3, %v12977_v22  ;;  %2835 = vst.msk [vmem:[#allocation2 + $0x1f8] sm:$0xff] %vm30_vm3, %v12978_v58  ;;  %v7379_v22 = vpack.i.bf16 %v2909_v6, %v2908_v9  ;;  %v7374_v58 = vpack.i.bf16 %v2907_v62, %v2906_v36  ;;  %v2912_v28 = vld [vmem:[#allocation2 + $0x62] sm:$0xff]  ;;  %v2910_v25 = vld [vmem:[#allocation2 + $0x52] sm:$0xff] }
 0x358   :  { %v2911_v10 = vld [vmem:[#allocation2 + $0x5a] sm:$0xff]  ;;  %v7399_v20 = vpack.i.bf16 %v2913_v17, %v2912_v28  ;;  %v2850_v9 = vld [vmem:[#allocation2 + $0x71] sm:$0xff]  ;;  %v2916_v42 = vld [vmem:[#allocation2 + $0x82] sm:$0xff] }
 0x359   :  { %7365 = vrot.lane.b32.xlu0 %v7364_v59, %s7810_s3  ;;  %7380 = vrot.lane.b32.xlu1 %v7379_v22, %s7811_s4  ;;  %v7394_v36 = vpack.i.bf16 %v2911_v10, %v2910_v25  ;;  %v2852_v62 = vld [vmem:[#allocation2 + $0x81] sm:$0xff]  ;;  %v2853_v59 = vld [vmem:[#allocation2 + $0x89] sm:$0xff]  ;;  %v2851_v6 = vld [vmem:[#allocation2 + $0x79] sm:$0xff] }
 0x35a   :  { %v7409_v31 = vpack.i.bf16 %v2853_v59, %v2852_v62  ;;  %v7404_v33 = vpack.i.bf16 %v2851_v6, %v2850_v9  ;;  %v2917_v50 = vld [vmem:[#allocation2 + $0x8a] sm:$0xff]  ;;  %v2914_v22 = vld [vmem:[#allocation2 + $0x72] sm:$0xff]  ;;  %v2856_v28 = vld [vmem:[#allocation2 + $0xa1] sm:$0xff] }
 0x35b   :  { %v2857_v17 = vld [vmem:[#allocation2 + $0xa9] sm:$0xff]  ;;  %v2854_v25 = vld [vmem:[#allocation2 + $0x91] sm:$0xff]  ;;  %v2855_v10 = vld [vmem:[#allocation2 + $0x99] sm:$0xff] }
 0x35c   :  { %v2920_v62 = vld [vmem:[#allocation2 + $0xa2] sm:$0xff]  ;;  %v2921_v59 = vld [vmem:[#allocation2 + $0xaa] sm:$0xff]  ;;  %v2918_v9 = vld [vmem:[#allocation2 + $0x92] sm:$0xff] }
 0x35d   :  { %7375 = vrot.lane.b32.xlu0 %v7374_v58, %s7811_s4  ;;  %7390 = vrot.lane.b32.xlu1 %v7389_v1, %s7810_s3  ;;  %v2915_v58 = vld [vmem:[#allocation2 + $0x7a] sm:$0xff]  ;;  %v7419_v1 = vpack.i.bf16 %v2917_v50, %v2916_v42  ;;  %v2861_v50 = vld [vmem:[#allocation2 + $0xc9] sm:$0xff] }
 0x35e   :  { %v2919_v6 = vld [vmem:[#allocation2 + $0x9a] sm:$0xff]  ;;  %v2837_v26 = vld [vmem:[#allocation2 + $0x9] sm:$0xff] }
 0x35f   :  { %v2860_v42 = vld [vmem:[#allocation2 + $0xc1] sm:$0xff]  ;;  %v2899_v30 = vld [vmem:[#allocation2 + $0x1f9] sm:$0xff] }
 0x360   :  { %v2959_v46 = vld [vmem:[#allocation2 + $0x1da] sm:$0xff] }
 0x361   :  { %7385 = vrot.lane.b32.xlu0 %v7384_v55, %s7810_s3  ;;  %7400 = vrot.lane.b32.xlu1 %v7399_v20, %s7811_s4  ;;  %v7414_v55 = vpack.i.bf16 %v2915_v58, %v2914_v22  ;;  %v7429_v20 = vpack.i.bf16 %v2857_v17, %v2856_v28  ;;  %v2858_v22 = vld [vmem:[#allocation2 + $0xb1] sm:$0xff]  ;;  %v2859_v58 = vld [vmem:[#allocation2 + $0xb9] sm:$0xff] }
 0x362   :  { %v7444_v28 = vpack.i.bf16 %v2859_v58, %v2858_v22  ;;  %v2925_v17 = vld [vmem:[#allocation2 + $0xca] sm:$0xff] }
 0x365   :  { %7395 = vrot.lane.b32.xlu0 %v7394_v36, %s7811_s4  ;;  %7410 = vrot.lane.b32.xlu1 %v7409_v31, %s7810_s3  ;;  %v7424_v36 = vpack.i.bf16 %v2855_v10, %v2854_v25  ;;  %v7439_v31 = vpack.i.bf16 %v2921_v59, %v2920_v62  ;;  %v2922_v25 = vld [vmem:[#allocation2 + $0xb2] sm:$0xff]  ;;  %v2923_v10 = vld [vmem:[#allocation2 + $0xba] sm:$0xff]  ;;  %v2865_v59 = vld [vmem:[#allocation2 + $0xe9] sm:$0xff] }
 0x366   :  { %v2864_v62 = vld [vmem:[#allocation2 + $0xe1] sm:$0xff] }
 0x367   :  { %v7469_v22 = vpack.i.bf16 %v2865_v59, %v2864_v62 }
 0x369   :  { %7405 = vrot.lane.b32.xlu0 %v7404_v33, %s7810_s3  ;;  %7420 = vrot.lane.b32.xlu1 %v7419_v1, %s7811_s4  ;;  %v7434_v33 = vpack.i.bf16 %v2919_v6, %v2918_v9  ;;  %v2924_v1 = vld [vmem:[#allocation2 + $0xc2] sm:$0xff]  ;;  %v2862_v9 = vld [vmem:[#allocation2 + $0xd1] sm:$0xff] }
 0x36a   :  { %v7459_v6 = vpack.i.bf16 %v2925_v17, %v2924_v1  ;;  %v2929_v1 = vld [vmem:[#allocation2 + $0xea] sm:$0xff]  ;;  %v2927_v17 = vld [vmem:[#allocation2 + $0xda] sm:$0xff] }
 0x36d   :  { %7415 = vrot.lane.b32.xlu0 %v7414_v55, %s7811_s4  ;;  %7430 = vrot.lane.b32.xlu1 %v7429_v20, %s7810_s3  ;;  %v7449_v55 = vpack.i.bf16 %v2861_v50, %v2860_v42  ;;  %v7734_v20 = vld [vmem:[%s12383_s5 + $0xc] sm:$0xff]   ;;  %v10004_v50 = vld [vmem:[%s12383_s5] sm:$0xff]  }
 0x36e   :  { %6871 = vmatprep.subr.bf16.mxu1 %v7734_v20 }
 0x36f   :  { %6872 = vmatpush3.bf16.msra.mxu1 %v7734_v20  ;;  %v2868_v20 = vld [vmem:[#allocation2 + $0x101] sm:$0xff] }
 0x371   :  { %7425 = vrot.lane.b32.xlu0 %v7424_v36, %s7810_s3  ;;  %7440 = vrot.lane.b32.xlu1 %v7439_v31, %s7811_s4  ;;  %v7735_v36 = vld [vmem:[%s12383_s5 + $0x14] ss:$0 sps:$4 sm:$0xff]   ;;  %v7454_v31 = vpack.i.bf16 %v2923_v10, %v2922_v25 }
 0x372   :  { %7334 = vmatprep.subr.msk.bf16.mxu1 %vm3814_vm4, %v7735_v36  ;;  %v3816_v42 = vsel %vm3814_vm4, %v7735_v36, 0  ;;  %v2869_v36 = vld [vmem:[#allocation2 + $0x109] sm:$0xff] }
 0x373   :  { %6874 = vmatpush3.bf16.msra.mxu1 %v3816_v42  ;;  %v7489_v62 = vpack.i.bf16 %v2869_v36, %v2868_v20  ;;  %v2931_v42 = vld [vmem:[#allocation2 + $0xfa] sm:$0xff]  ;;  %v2937_v20 = vld [vmem:[#allocation2 + $0x12a] sm:$0xff]  ;;  %v2934_v36 = vld [vmem:[#allocation2 + $0x112] sm:$0xff] }
 0x374   :  { %6939 = vmatprep.subr.bf16.mxu1 %v10004_v50 }
 0x375   :  { %7435 = vrot.lane.b32.xlu0 %v7434_v33, %s7811_s4  ;;  %7450 = vrot.lane.b32.xlu1 %v7449_v55, %s7810_s3  ;;  %v2863_v33 = vld [vmem:[#allocation2 + $0xd9] sm:$0xff]  ;;  %v2928_v55 = vld [vmem:[#allocation2 + $0xe2] sm:$0xff] }
 0x376   :  { %v7464_v58 = vpack.i.bf16 %v2863_v33, %v2862_v9  ;;  %v7479_v25 = vpack.i.bf16 %v2929_v1, %v2928_v55  ;;  %v2932_v9 = vld [vmem:[#allocation2 + $0x102] sm:$0xff]  ;;  %v2930_v33 = vld [vmem:[#allocation2 + $0xf2] sm:$0xff] }
 0x377   :  { %v2872_v55 = vld [vmem:[#allocation2 + $0x121] sm:$0xff]  ;;  %v2873_v1 = vld [vmem:[#allocation2 + $0x129] sm:$0xff] }
 0x379   :  { %7445 = vrot.lane.b32.xlu0 %v7444_v28, %s7810_s3  ;;  %7460 = vrot.lane.b32.xlu1 %v7459_v6, %s7811_s4  ;;  %v2926_v28 = vld [vmem:[#allocation2 + $0xd2] sm:$0xff] }
 0x37a   :  { %v7474_v10 = vpack.i.bf16 %v2927_v17, %v2926_v28  ;;  %v2866_v6 = vld [vmem:[#allocation2 + $0xf1] sm:$0xff]  ;;  %v2871_v17 = vld [vmem:[#allocation2 + $0x119] sm:$0xff] }
 0x37b   :  { %v7484_v59 = vpack.i.bf16 %v2867_v4, %v2866_v6  ;;  %v2870_v28 = vld [vmem:[#allocation2 + $0x111] sm:$0xff]  ;;  %v2935_v6 = vld [vmem:[#allocation2 + $0x11a] sm:$0xff] }
 0x37c   :  { %v7504_v4 = vpack.i.bf16 %v2871_v17, %v2870_v28  ;;  %v2938_v28 = vld [vmem:[#allocation2 + $0x132] sm:$0xff]  ;;  %v2939_v17 = vld [vmem:[#allocation2 + $0x13a] sm:$0xff] }
 0x37d   :  { %7455 = vrot.lane.b32.xlu0 %v7454_v31, %s7811_s4  ;;  %7470 = vrot.lane.b32.xlu1 %v7469_v22, %s7810_s3  ;;  %v2933_v31 = vld [vmem:[#allocation2 + $0x10a] sm:$0xff] }
 0x37e   :  { %v7499_v22 = vpack.i.bf16 %v2933_v31, %v2932_v9  ;;  %v2876_v9 = vld [vmem:[#allocation2 + $0x141] sm:$0xff]  ;;  %v2877_v31 = vld [vmem:[#allocation2 + $0x149] sm:$0xff] }
 0x381   :  { %7465 = vrot.lane.b32.xlu0 %v7464_v58, %s7810_s3  ;;  %7480 = vrot.lane.b32.xlu1 %v7479_v25, %s7811_s4  ;;  %v7494_v58 = vpack.i.bf16 %v2931_v42, %v2930_v33  ;;  %v7509_v25 = vpack.i.bf16 %v2873_v1, %v2872_v55  ;;  %v2874_v33 = vld [vmem:[#allocation2 + $0x131] sm:$0xff]  ;;  %v2875_v42 = vld [vmem:[#allocation2 + $0x139] sm:$0xff]  ;;  %v2940_v55 = vld [vmem:[#allocation2 + $0x142] sm:$0xff] }
 0x382   :  { %v2941_v1 = vld [vmem:[#allocation2 + $0x14a] sm:$0xff] }
 0x385   :  { %7475 = vrot.lane.b32.xlu0 %v7474_v10, %s7811_s4  ;;  %7490 = vrot.lane.b32.xlu1 %v7489_v62, %s7810_s3  ;;  %v2936_v10 = vld [vmem:[#allocation2 + $0x122] sm:$0xff] }
 0x386   :  { %v7519_v62 = vpack.i.bf16 %v2937_v20, %v2936_v10  ;;  %v2880_v10 = vld [vmem:[#allocation2 + $0x161] sm:$0xff]  ;;  %v2881_v20 = vld [vmem:[#allocation2 + $0x169] sm:$0xff] }
 0x389   :  { %7485 = vrot.lane.b32.xlu0 %v7484_v59, %s7810_s3  ;;  %7500 = vrot.lane.b32.xlu1 %v7499_v22, %s7811_s4  ;;  %v7514_v59 = vpack.i.bf16 %v2935_v6, %v2934_v36  ;;  %v7529_v22 = vpack.i.bf16 %v2877_v31, %v2876_v9  ;;  %v2878_v36 = vld [vmem:[#allocation2 + $0x151] sm:$0xff]  ;;  %v2879_v6 = vld [vmem:[#allocation2 + $0x159] sm:$0xff]  ;;  %v2944_v9 = vld [vmem:[#allocation2 + $0x162] sm:$0xff] }
 0x38a   :  { %v2945_v31 = vld [vmem:[#allocation2 + $0x16a] sm:$0xff] }
 0x38d   :  { %7495 = vrot.lane.b32.xlu0 %v7494_v58, %s7811_s4  ;;  %7510 = vrot.lane.b32.xlu1 %v7509_v25, %s7810_s3  ;;  %v7524_v58 = vpack.i.bf16 %v2875_v42, %v2874_v33  ;;  %v7539_v25 = vpack.i.bf16 %v2941_v1, %v2940_v55  ;;  %v2942_v33 = vld [vmem:[#allocation2 + $0x152] sm:$0xff]  ;;  %v2943_v42 = vld [vmem:[#allocation2 + $0x15a] sm:$0xff]  ;;  %v2885_v1 = vld [vmem:[#allocation2 + $0x189] sm:$0xff] }
 0x38e   :  { %v2884_v55 = vld [vmem:[#allocation2 + $0x181] sm:$0xff] }
 0x391   :  { %7505 = vrot.lane.b32.xlu0 %v7504_v4, %s7810_s3  ;;  %7520 = vrot.lane.b32.xlu1 %v7519_v62, %s7811_s4  ;;  %v7534_v4 = vpack.i.bf16 %v2939_v17, %v2938_v28  ;;  %v7549_v62 = vpack.i.bf16 %v2881_v20, %v2880_v10  ;;  %v2882_v28 = vld [vmem:[#allocation2 + $0x171] sm:$0xff]  ;;  %v2883_v17 = vld [vmem:[#allocation2 + $0x179] sm:$0xff]  ;;  %v2948_v10 = vld [vmem:[#allocation2 + $0x182] sm:$0xff] }
 0x392   :  { %v2949_v20 = vld [vmem:[#allocation2 + $0x18a] sm:$0xff] }
 0x395   :  { %7515 = vrot.lane.b32.xlu0 %v7514_v59, %s7811_s4  ;;  %7530 = vrot.lane.b32.xlu1 %v7529_v22, %s7810_s3  ;;  %v7544_v59 = vpack.i.bf16 %v2879_v6, %v2878_v36  ;;  %v7559_v22 = vpack.i.bf16 %v2945_v31, %v2944_v9  ;;  %v2946_v36 = vld [vmem:[#allocation2 + $0x172] sm:$0xff]  ;;  %v2947_v6 = vld [vmem:[#allocation2 + $0x17a] sm:$0xff]  ;;  %v2889_v31 = vld [vmem:[#allocation2 + $0x1a9] sm:$0xff] }
 0x396   :  { %v2888_v9 = vld [vmem:[#allocation2 + $0x1a1] sm:$0xff] }
 0x399   :  { %7525 = vrot.lane.b32.xlu0 %v7524_v58, %s7810_s3  ;;  %7540 = vrot.lane.b32.xlu1 %v7539_v25, %s7811_s4  ;;  %v7554_v58 = vpack.i.bf16 %v2943_v42, %v2942_v33  ;;  %v7569_v25 = vpack.i.bf16 %v2885_v1, %v2884_v55  ;;  %v2886_v33 = vld [vmem:[#allocation2 + $0x191] sm:$0xff]  ;;  %v2887_v42 = vld [vmem:[#allocation2 + $0x199] sm:$0xff]  ;;  %v2952_v55 = vld [vmem:[#allocation2 + $0x1a2] sm:$0xff] }
 0x39a   :  { %v2953_v1 = vld [vmem:[#allocation2 + $0x1aa] sm:$0xff] }
 0x39d   :  { %7535 = vrot.lane.b32.xlu0 %v7534_v4, %s7811_s4  ;;  %7550 = vrot.lane.b32.xlu1 %v7549_v62, %s7810_s3  ;;  %v7564_v4 = vpack.i.bf16 %v2883_v17, %v2882_v28  ;;  %v7579_v62 = vpack.i.bf16 %v2949_v20, %v2948_v10  ;;  %v2950_v28 = vld [vmem:[#allocation2 + $0x192] sm:$0xff]  ;;  %v2951_v17 = vld [vmem:[#allocation2 + $0x19a] sm:$0xff]  ;;  %v2893_v20 = vld [vmem:[#allocation2 + $0x1c9] sm:$0xff] }
 0x39e   :  { %v2892_v10 = vld [vmem:[#allocation2 + $0x1c1] sm:$0xff] }
 0x3a1   :  { %7545 = vrot.lane.b32.xlu0 %v7544_v59, %s7810_s3  ;;  %7560 = vrot.lane.b32.xlu1 %v7559_v22, %s7811_s4  ;;  %v7574_v59 = vpack.i.bf16 %v2947_v6, %v2946_v36  ;;  %v7589_v22 = vpack.i.bf16 %v2889_v31, %v2888_v9  ;;  %v2890_v36 = vld [vmem:[#allocation2 + $0x1b1] sm:$0xff]  ;;  %v2891_v6 = vld [vmem:[#allocation2 + $0x1b9] sm:$0xff]  ;;  %v2956_v9 = vld [vmem:[#allocation2 + $0x1c2] sm:$0xff] }
 0x3a2   :  { %v2957_v31 = vld [vmem:[#allocation2 + $0x1ca] sm:$0xff] }
 0x3a5   :  { %7555 = vrot.lane.b32.xlu0 %v7554_v58, %s7811_s4  ;;  %7570 = vrot.lane.b32.xlu1 %v7569_v25, %s7810_s3  ;;  %v7584_v58 = vpack.i.bf16 %v2887_v42, %v2886_v33  ;;  %v7599_v25 = vpack.i.bf16 %v2953_v1, %v2952_v55  ;;  %v2954_v33 = vld [vmem:[#allocation2 + $0x1b2] sm:$0xff]  ;;  %v2955_v42 = vld [vmem:[#allocation2 + $0x1ba] sm:$0xff]  ;;  %v2897_v1 = vld [vmem:[#allocation2 + $0x1e9] sm:$0xff] }
 0x3a6   :  { %v2896_v55 = vld [vmem:[#allocation2 + $0x1e1] sm:$0xff] }
 0x3a9   :  { %7565 = vrot.lane.b32.xlu0 %v7564_v4, %s7810_s3  ;;  %7580 = vrot.lane.b32.xlu1 %v7579_v62, %s7811_s4  ;;  %v7594_v4 = vpack.i.bf16 %v2951_v17, %v2950_v28  ;;  %v7609_v62 = vpack.i.bf16 %v2893_v20, %v2892_v10  ;;  %v2894_v28 = vld [vmem:[#allocation2 + $0x1d1] sm:$0xff]  ;;  %v2895_v17 = vld [vmem:[#allocation2 + $0x1d9] sm:$0xff]  ;;  %v2960_v10 = vld [vmem:[#allocation2 + $0x1e2] sm:$0xff]  ;;  %v7351_v20 = vpop.permute.xlu1 %7350 }
 0x3ad   :  { %7575 = vrot.lane.b32.xlu0 %v7574_v59, %s7811_s4  ;;  %7590 = vrot.lane.b32.xlu1 %v7589_v22, %s7810_s3  ;;  %v7604_v59 = vpack.i.bf16 %v2891_v6, %v2890_v36  ;;  %v7619_v22 = vpack.i.bf16 %v2957_v31, %v2956_v9  ;;  %v2961_v36 = vld [vmem:[#allocation2 + $0x1ea] sm:$0xff]  ;;  %v2958_v6 = vld [vmem:[#allocation2 + $0x1d2] sm:$0xff] }
 0x3ae   :  { %v7639_v9 = vpack.i.bf16 %v2961_v36, %v2960_v10  ;;  %v7634_v31 = vpack.i.bf16 %v2959_v46, %v2958_v6  ;;  %v2900_v36 = vld [vmem:[#allocation2 + $0x2] sm:$0xff] }
 0x3b1   :  { %7585 = vrot.lane.b32.xlu0 %v7584_v58, %s7810_s3  ;;  %7600 = vrot.lane.b32.xlu1 %v7599_v25, %s7811_s4  ;;  %v7614_v58 = vpack.i.bf16 %v2955_v42, %v2954_v33  ;;  %v7629_v25 = vpack.i.bf16 %v2897_v1, %v2896_v55  ;;  %v2962_v33 = vld [vmem:[#allocation2 + $0x1f2] sm:$0xff]  ;;  %v2963_v42 = vld [vmem:[#allocation2 + $0x1fa] sm:$0xff] }
 0x3b2   :  { %v7649_v10 = vpack.i.bf16 %v2963_v42, %v2962_v33 }
 0x3b5   :  { %7595 = vrot.lane.b32.xlu0 %v7594_v4, %s7811_s4  ;;  %7610 = vrot.lane.b32.xlu1 %v7609_v62, %s7810_s3  ;;  %v7624_v4 = vpack.i.bf16 %v2895_v17, %v2894_v28  ;;  %v12979_v28 = vld [vmem:[#allocation30_spill] sm:$0xff] }
 0x3b6   :  { %v12980_v17 = vmax.f32 %v12979_v28, 0.0  ;;  %v12983_v28 = vmax.f32 %v9493_v15, 0.0 }
 0x3b7   :  { %v7346_v62 = vpop.permute.xlu0 %7345 }
 0x3b8   :  { %v7348_v55 = vunpack.i.h.bf16 %v7346_v62  ;;  %v7347_v1 = vunpack.i.l.bf16 %v7346_v62  ;;  %v2836_v62 = vld [vmem:[#allocation2 + $0x1] sm:$0xff] }
 0x3b9   :  { %7605 = vrot.lane.b32.xlu0 %v7604_v59, %s7810_s3  ;;  %7620 = vrot.lane.b32.xlu1 %v7619_v22, %s7811_s4  ;;  %v7353_v59 = vunpack.i.h.bf16 %v7351_v20  ;;  %v2898_v22 = vld [vmem:[#allocation2 + $0x1f1] sm:$0xff] }
 0x3ba   :  { %v7644_v46 = vpack.i.bf16 %v2899_v30, %v2898_v22 }
 0x3bd   :  { %7615 = vrot.lane.b32.xlu0 %v7614_v58, %s7811_s4  ;;  %7630 = vrot.lane.b32.xlu1 %v7629_v25, %s7810_s3  ;;  %v7352_v58 = vunpack.i.l.bf16 %v7351_v20  ;;  %v3481_v25 = vsel %vm30_vm3, %v12980_v17, %v7353_v59  ;;  %v3479_v59 = vsel %vm30_vm3, %v12983_v28, %v7348_v55  ;;  %v12984_v17 = vmax.f32 %v9489_v41, 0.0 }
 0x3be   :  { %v7654_v41 = vpack.i.bf16 %v2837_v26, %v2836_v62  ;;  %v12987_v28 = vmax.f32 %v9497_v39, 0.0  ;;  %v7737_v39 = vld [vmem:[%s12383_s5 + $0x8] ss:$0 sps:$4 sm:$0xff]  }
 0x3bf   :  { %v3478_v30 = vsel %vm30_vm3, %v12984_v17, %v7347_v1  ;;  %v12988_v17 = vld [vmem:[#allocation12_spill] sm:$0xff] }
 0x3c1   :  { %7625 = vrot.lane.b32.xlu0 %v7624_v4, %s7810_s3  ;;  %7640 = vrot.lane.b32.xlu1 %v7639_v9, %s7811_s4  ;;  %v12981_v9 = vld [vmem:[#allocation11_spill] sm:$0xff] }
 0x3c2   :  { %v7361_v4 = vpop.permute.xlu1 %7360  ;;  %v12982_v23 = vmax.f32 %v12981_v9, 0.0 }
 0x3c3   :  { %v7363_v6 = vunpack.i.h.bf16 %v7361_v4  ;;  %v7362_v34 = vunpack.i.l.bf16 %v7361_v4  ;;  %v7659_v4 = vpack.i.bf16 %v2901_v48, %v2900_v36  ;;  %v12985_v48 = vmax.f32 %v9508_v19, 0.0 }
 0x3c4   :  { %v12986_v36 = vmax.f32 %v9504_v24, 0.0 }
 0x3c5   :  { %7635 = vrot.lane.b32.xlu0 %v7634_v31, %s7811_s4  ;;  %v3480_v31 = vsel %vm30_vm3, %v12982_v23, %v7352_v58  ;;  %7650 = vrot.lane.b32.xlu1 %v7649_v10, %s7811_s4  ;;  %v3546_v33 = vsel %vm3540_vm5, %v3481_v25, %v7363_v6 }
 0x3c7   :  { %v7356_v12 = vpop.permute.xlu0 %7355  ;;  %v7371_v58 = vpop.permute.xlu1 %7370 }
 0x3c8   :  { %v7358_v16 = vunpack.i.h.bf16 %v7356_v12  ;;  %v7357_v20 = vunpack.i.l.bf16 %v7356_v12  ;;  %v3545_v12 = vsel %vm3540_vm5, %v3480_v31, %v7362_v34  ;;  %v7373_v1 = vunpack.i.h.bf16 %v7371_v58 }
 0x3c9   :  { %7645 = vrot.lane.b32.xlu0 %v7644_v46, %s7810_s3  ;;  %v3607_v22 = vpack.c.bf16 %v3546_v33, %v3545_v12  ;;  %v7372_v10 = vunpack.i.l.bf16 %v7371_v58  ;;  %7660 = vrot.lane.b32.xlu1 %v7659_v4, %s7811_s4 }
 0x3ca   :  { %v3543_v42 = vsel %vm3540_vm5, %v3478_v30, %v7357_v20  ;;  %v3544_v23 = vsel %vm3540_vm5, %v3479_v59, %v7358_v16  ;;  %v3485_v26 = vsel %vm30_vm3, %v12985_v48, %v7373_v1  ;;  %v12989_v30 = vmax.f32 %v12988_v17, 0.0  ;;  %v10102_v48 = vld [vmem:[%s12383_s5 + $0x18] sm:$0xff]  }
 0x3cb   :  { %v3606_v15 = vpack.c.bf16 %v3544_v23, %v3543_v42  ;;  %v7366_v55 = vpop.permute.xlu0 %7365  ;;  %3639 = vst.msk [vmem:[#allocation3 + $0x10] sm:$0xff] %vm32_vm2, %v3607_v22  ;;  %v7381_v25 = vpop.permute.xlu1 %7380  ;;  %v3484_v62 = vsel %vm30_vm3, %v12986_v36, %v7372_v10  ;;  %v12993_v17 = vmax.f32 %v9512_v60, 0.0 }
 0x3cc   :  { %v7368_v46 = vunpack.i.h.bf16 %v7366_v55  ;;  %v7367_v34 = vunpack.i.l.bf16 %v7366_v55  ;;  %v7383_v6 = vunpack.i.h.bf16 %v7381_v25  ;;  %v7382_v20 = vunpack.i.l.bf16 %v7381_v25 }
 0x3cd   :  { %3638 = vst.msk [vmem:[#allocation3 + $0x8] sm:$0xff] %vm32_vm2, %v3606_v15  ;;  %7655 = vrot.lane.b32.xlu0 %v7654_v41, %s7810_s3 }
 0x3ce   :  { %v3483_v59 = vsel %vm30_vm3, %v12987_v28, %v7368_v46  ;;  %v3482_v12 = vsel %vm30_vm3, %v12989_v30, %v7367_v34  ;;  %v3549_v33 = vsel %vm3540_vm5, %v3484_v62, %v7382_v20  ;;  %v3550_v42 = vsel %vm3540_vm5, %v3485_v26, %v7383_v6 }
 0x3cf   :  { %v7376_v16 = vpop.permute.xlu0 %7375  ;;  %v3609_v22 = vpack.c.bf16 %v3550_v42, %v3549_v33  ;;  %v7391_v15 = vpop.permute.xlu1 %7390  ;;  %v12990_v26 = vmax.f32 %v9533_v43, 0.0  ;;  %v12991_v62 = vmax.f32 %v9520_v52, 0.0  ;;  %v12992_v28 = vmax.f32 %v9516_v21, 0.0 }
 0x3d0   :  { %v7378_v9 = vunpack.i.h.bf16 %v7376_v16  ;;  %v7377_v31 = vunpack.i.l.bf16 %v7376_v16  ;;  %v7393_v41 = vunpack.i.h.bf16 %v7391_v15  ;;  %v7392_v1 = vunpack.i.l.bf16 %v7391_v15 }
 0x3d1   :  { %3641 = vst.msk [vmem:[#allocation3 + $0x20] sm:$0xff] %vm32_vm2, %v3609_v22  ;;  %v4120_v16 = vsel %vm3814_vm4, %v7737_v39, 0 }
 0x3d2   :  { %v3547_v19 = vsel %vm3540_vm5, %v3482_v12, %v7377_v31  ;;  %v3548_v23 = vsel %vm3540_vm5, %v3483_v59, %v7378_v9  ;;  %v10088_v4 = vld [vmem:[#allocation3 + $0x10] sm:$0xff]  ;;  %v3489_v36 = vsel %vm30_vm3, %v12990_v26, %v7393_v41 }
 0x3d3   :  { %v3608_v24 = vpack.c.bf16 %v3548_v23, %v3547_v19  ;;  %v7386_v58 = vpop.permute.xlu0 %7385  ;;  %v7401_v34 = vpop.permute.xlu1 %7400 }
 0x3d4   :  { %v10086_v55 = vld [vmem:[#allocation3 + $0x8] sm:$0xff]  ;;  %v7388_v10 = vunpack.i.h.bf16 %v7386_v58  ;;  %v7387_v46 = vunpack.i.l.bf16 %v7386_v58  ;;  %v7403_v6 = vunpack.i.h.bf16 %v7401_v34  ;;  %v7402_v20 = vunpack.i.l.bf16 %v7401_v34 }
 0x3d5   :  { %3640 = vst.msk [vmem:[#allocation3 + $0x18] sm:$0xff] %vm32_vm2, %v3608_v24  ;;  %6875 = vmatprep.mubr.msk.bf16.mxu1 %vm32_vm2, %v10086_v55 }
 0x3d6   :  { %6876 = vmatmul.mubr.msk.bf16.vlgmr.msra.gmra.mrb[0].mxu1 %vm32_vm2, %v10088_v4  ;;  %v3487_v59 = vsel %vm30_vm3, %v12992_v28, %v7388_v10  ;;  %v3486_v30 = vsel %vm30_vm3, %v12993_v17, %v7387_v46  ;;  %v3554_v33 = vsel %vm3540_vm5, %v3489_v36, %v7403_v6  ;;  %v12997_v36 = vmax.f32 %v9537_v53, 0.0 }
 0x3d7   :  { %v7396_v25 = vpop.permute.xlu0 %7395  ;;  %6940 = vmatpush3.bf16.msra.mxu1 %v10004_v50  ;;  %v3488_v50 = vsel %vm30_vm3, %v12991_v62, %v7392_v1  ;;  %v7411_v23 = vpop.permute.xlu1 %7410 }
 0x3d8   :  { %v7398_v9 = vunpack.i.h.bf16 %v7396_v25  ;;  %v7397_v31 = vunpack.i.l.bf16 %v7396_v25  ;;  %7335 = vmatprep.subr.msk.bf16.mxu1 %vm3814_vm4, %v7737_v39  ;;  %v3553_v12 = vsel %vm3540_vm5, %v3488_v50, %v7402_v20  ;;  %v10122_v24 = vld [vmem:[#allocation3 + $0x20] sm:$0xff]  ;;  %v7413_v60 = vunpack.i.h.bf16 %v7411_v23 }
 0x3d9   :  { %v3611_v19 = vpack.c.bf16 %v3554_v33, %v3553_v12  ;;  %v7412_v15 = vunpack.i.l.bf16 %v7411_v23  ;;  %v12995_v20 = vmax.f32 %v9545_v32, 0.0 }
 0x3da   :  { %v3551_v43 = vsel %vm3540_vm5, %v3486_v30, %v7397_v31  ;;  %v3552_v42 = vsel %vm3540_vm5, %v3487_v59, %v7398_v9  ;;  %v12996_v31 = vmax.f32 %v9541_v0, 0.0 }
 0x3db   :  { %v3610_v52 = vpack.c.bf16 %v3552_v42, %v3551_v43  ;;  %v7406_v22 = vpop.permute.xlu0 %7405  ;;  %6942 = vmatpush3.bf16.msra.mxu1 %v4120_v16  ;;  %3643 = vst.msk [vmem:[#allocation3 + $0x30] sm:$0xff] %vm32_vm2, %v3611_v19  ;;  %v7421_v41 = vpop.permute.xlu1 %7420  ;;  %v12994_v16 = vmax.f32 %v9549_v45, 0.0  ;;  %v3492_v9 = vsel %vm30_vm3, %v12995_v20, %v7412_v15 }
 0x3dc   :  { %v10120_v21 = vld [vmem:[#allocation3 + $0x18] sm:$0xff]  ;;  %7007 = vmatprep.subr.bf16.mxu1 %v10102_v48  ;;  %v7408_v58 = vunpack.i.h.bf16 %v7406_v22  ;;  %v7407_v39 = vunpack.i.l.bf16 %v7406_v22  ;;  %v7423_v10 = vunpack.i.h.bf16 %v7421_v41  ;;  %v7422_v46 = vunpack.i.l.bf16 %v7421_v41 }
 0x3dd   :  { %3642 = vst.msk [vmem:[#allocation3 + $0x28] sm:$0xff] %vm32_vm2, %v3610_v52  ;;  %6879 = vmatprep.mubr.msk.bf16.mxu1 %vm32_vm2, %v10120_v21  ;;  %v3493_v6 = vsel %vm30_vm3, %v12994_v16, %v7413_v60 }
 0x3de   :  { %6880 = vmatmul.mubr.msk.bf16.gmra.mrb[4].mxu1 %vm32_vm2, %v10122_v24  ;;  %v3491_v26 = vsel %vm30_vm3, %v12996_v31, %v7408_v58  ;;  %v3490_v62 = vsel %vm30_vm3, %v12997_v36, %v7407_v39  ;;  %v3557_v50 = vsel %vm3540_vm5, %v3492_v9, %v7422_v46  ;;  %v3558_v28 = vsel %vm3540_vm5, %v3493_v6, %v7423_v10 }
 0x3df   :  { %v7416_v1 = vpop.permute.xlu0 %7415  ;;  %v3613_v17 = vpack.c.bf16 %v3558_v28, %v3557_v50  ;;  %v7431_v30 = vpop.permute.xlu1 %7430  ;;  %v12998_v39 = vmax.f32 %v9565_v5, 0.0  ;;  %v13000_v46 = vmax.f32 %v9557_v7, 0.0 }
 0x3e0   :  { %v7418_v34 = vunpack.i.h.bf16 %v7416_v1  ;;  %v7417_v25 = vunpack.i.l.bf16 %v7416_v1  ;;  %v7433_v53 = vunpack.i.h.bf16 %v7431_v30  ;;  %v7432_v43 = vunpack.i.l.bf16 %v7431_v30 }
 0x3e1   :  { %3645 = vst.msk [vmem:[#allocation3 + $0x40] sm:$0xff] %vm32_vm2, %v3613_v17  ;;  %v12999_v1 = vmax.f32 %v9561_v63, 0.0 }
 0x3e2   :  { %v3555_v45 = vsel %vm3540_vm5, %v3490_v62, %v7417_v25  ;;  %v3556_v59 = vsel %vm3540_vm5, %v3491_v26, %v7418_v34  ;;  %v10149_v0 = vld [vmem:[#allocation3 + $0x30] sm:$0xff]  ;;  %v3497_v41 = vsel %vm30_vm3, %v12998_v39, %v7433_v53  ;;  %v13001_v25 = vmax.f32 %v9553_v2, 0.0 }
 0x3e3   :  { %v3612_v32 = vpack.c.bf16 %v3556_v59, %v3555_v45  ;;  %v7426_v12 = vpop.permute.xlu0 %7425  ;;  %v7441_v52 = vpop.permute.xlu1 %7440  ;;  %v3496_v10 = vsel %vm30_vm3, %v12999_v1, %v7432_v43  ;;  %v13002_v43 = vmax.f32 %v9581_v57, 0.0 }
 0x3e4   :  { %v10147_v33 = vld [vmem:[#allocation3 + $0x28] sm:$0xff]  ;;  %v7428_v42 = vunpack.i.h.bf16 %v7426_v12  ;;  %v7427_v19 = vunpack.i.l.bf16 %v7426_v12  ;;  %v7443_v22 = vunpack.i.h.bf16 %v7441_v52  ;;  %v7442_v60 = vunpack.i.l.bf16 %v7441_v52 }
 0x3e5   :  { %3644 = vst.msk [vmem:[#allocation3 + $0x38] sm:$0xff] %vm32_vm2, %v3612_v32  ;;  %6883 = vmatprep.mubr.msk.bf16.mxu1 %vm32_vm2, %v10147_v33 }
 0x3e6   :  { %6884 = vmatmul.mubr.msk.bf16.gmra.mrb[8].mxu1 %vm32_vm2, %v10149_v0  ;;  %v3495_v34 = vsel %vm30_vm3, %v13000_v46, %v7428_v42  ;;  %v3494_v16 = vsel %vm30_vm3, %v13001_v25, %v7427_v19  ;;  %v3561_v6 = vsel %vm3540_vm5, %v3496_v10, %v7442_v60  ;;  %v3562_v20 = vsel %vm3540_vm5, %v3497_v41, %v7443_v22 }
 0x3e7   :  { %v7436_v23 = vpop.permute.xlu0 %7435  ;;  %v3615_v31 = vpack.c.bf16 %v3562_v20, %v3561_v6  ;;  %v7451_v26 = vpop.permute.xlu1 %7450  ;;  %v13003_v19 = vmax.f32 %v9577_v49, 0.0  ;;  %v13005_v60 = vmax.f32 %v9569_v54, 0.0 }
 0x3e8   :  { %v7438_v15 = vunpack.i.h.bf16 %v7436_v23  ;;  %v7437_v58 = vunpack.i.l.bf16 %v7436_v23  ;;  %v10175_v7 = vld [vmem:[#allocation3 + $0x40] sm:$0xff]  ;;  %v7453_v2 = vunpack.i.h.bf16 %v7451_v26  ;;  %v7452_v50 = vunpack.i.l.bf16 %v7451_v26 }
 0x3e9   :  { %3647 = vst.msk [vmem:[#allocation3 + $0x50] sm:$0xff] %vm32_vm2, %v3615_v31  ;;  %v13004_v23 = vmax.f32 %v9573_v61, 0.0 }
 0x3ea   :  { %v3559_v5 = vsel %vm3540_vm5, %v3494_v16, %v7437_v58  ;;  %v3560_v9 = vsel %vm3540_vm5, %v3495_v34, %v7438_v15  ;;  %v3501_v42 = vsel %vm30_vm3, %v13002_v43, %v7453_v2  ;;  %v3500_v52 = vsel %vm30_vm3, %v13003_v19, %v7452_v50 }
 0x3eb   :  { %v3614_v63 = vpack.c.bf16 %v3560_v9, %v3559_v5  ;;  %v7446_v36 = vpop.permute.xlu0 %7445  ;;  %v7461_v59 = vpop.permute.xlu1 %7460  ;;  %v13007_v50 = vmax.f32 %v9593_v27, 0.0 }
 0x3ec   :  { %v10173_v62 = vld [vmem:[#allocation3 + $0x38] sm:$0xff]  ;;  %v7448_v28 = vunpack.i.h.bf16 %v7446_v36  ;;  %v7447_v45 = vunpack.i.l.bf16 %v7446_v36  ;;  %v7463_v32 = vunpack.i.h.bf16 %v7461_v59  ;;  %v7462_v30 = vunpack.i.l.bf16 %v7461_v59 }
 0x3ed   :  { %3646 = vst.msk [vmem:[#allocation3 + $0x48] sm:$0xff] %vm32_vm2, %v3614_v63  ;;  %6887 = vmatprep.mubr.msk.bf16.mxu1 %vm32_vm2, %v10173_v62  ;;  %v13006_v36 = vmax.f32 %v9597_v51, 0.0 }
 0x3ee   :  { %6888 = vmatmul.mubr.msk.bf16.gmra.mrb[12].mxu1 %vm32_vm2, %v10175_v7  ;;  %v3499_v22 = vsel %vm30_vm3, %v13004_v23, %v7448_v28  ;;  %v3498_v15 = vsel %vm30_vm3, %v13005_v60, %v7447_v45  ;;  %v3565_v58 = vsel %vm3540_vm5, %v3500_v52, %v7462_v30  ;;  %v3566_v39 = vsel %vm3540_vm5, %v3501_v42, %v7463_v32 }
 0x3ef   :  { %v7456_v17 = vpop.permute.xlu0 %7455  ;;  %v3617_v1 = vpack.c.bf16 %v3566_v39, %v3565_v58  ;;  %v7471_v10 = vpop.permute.xlu1 %7470  ;;  %v13008_v45 = vmax.f32 %v9589_v3, 0.0 }
 0x3f0   :  { %v7458_v12 = vunpack.i.h.bf16 %v7456_v17  ;;  %v7457_v53 = vunpack.i.l.bf16 %v7456_v17  ;;  %v10201_v61 = vld [vmem:[#allocation3 + $0x50] sm:$0xff]  ;;  %v7473_v54 = vunpack.i.h.bf16 %v7471_v10  ;;  %v7472_v25 = vunpack.i.l.bf16 %v7471_v10 }
 0x3f1   :  { %3649 = vst.msk [vmem:[#allocation3 + $0x60] sm:$0xff] %vm32_vm2, %v3617_v1  ;;  %v13009_v17 = vmax.f32 %v9585_v44, 0.0 }
 0x3f2   :  { %v3563_v57 = vsel %vm3540_vm5, %v3498_v15, %v7457_v53  ;;  %v3564_v41 = vsel %vm3540_vm5, %v3499_v22, %v7458_v12  ;;  %v3505_v2 = vsel %vm30_vm3, %v13006_v36, %v7473_v54  ;;  %v3504_v28 = vsel %vm30_vm3, %v13007_v50, %v7472_v25 }
 0x3f3   :  { %v3616_v49 = vpack.c.bf16 %v3564_v41, %v3563_v57  ;;  %v7466_v46 = vpop.permute.xlu0 %7465  ;;  %v7481_v20 = vpop.permute.xlu1 %7480  ;;  %v13012_v25 = vmax.f32 %v9605_v40, 0.0 }
 0x3f4   :  { %v10199_v34 = vld [vmem:[#allocation3 + $0x48] sm:$0xff]  ;;  %v7468_v16 = vunpack.i.h.bf16 %v7466_v46  ;;  %v7467_v6 = vunpack.i.l.bf16 %v7466_v46  ;;  %v7483_v9 = vunpack.i.h.bf16 %v7481_v20  ;;  %v7482_v31 = vunpack.i.l.bf16 %v7481_v20 }
 0x3f5   :  { %3648 = vst.msk [vmem:[#allocation3 + $0x58] sm:$0xff] %vm32_vm2, %v3616_v49  ;;  %6891 = vmatprep.mubr.msk.bf16.mxu1 %vm32_vm2, %v10199_v34  ;;  %v13010_v49 = vmax.f32 %v9613_v47, 0.0  ;;  %v13011_v46 = vmax.f32 %v9609_v18, 0.0 }
 0x3f6   :  { %6892 = vmatmul.mubr.msk.bf16.gmra.mrb[16].mxu1 %vm32_vm2, %v10201_v61  ;;  %v3503_v59 = vsel %vm30_vm3, %v13008_v45, %v7468_v16  ;;  %v3502_v32 = vsel %vm30_vm3, %v13009_v17, %v7467_v6  ;;  %v3569_v30 = vsel %vm3540_vm5, %v3504_v28, %v7482_v31  ;;  %v3570_v12 = vsel %vm3540_vm5, %v3505_v2, %v7483_v9 }
 0x3f7   :  { %v7476_v5 = vpop.permute.xlu0 %7475  ;;  %v3619_v43 = vpack.c.bf16 %v3570_v12, %v3569_v30  ;;  %v7491_v42 = vpop.permute.xlu1 %7490  ;;  %v13013_v6 = vmax.f32 %v9601_v13, 0.0 }
 0x3f8   :  { %v7478_v63 = vunpack.i.h.bf16 %v7476_v5  ;;  %v7477_v26 = vunpack.i.l.bf16 %v7476_v5  ;;  %v10227_v3 = vld [vmem:[#allocation3 + $0x60] sm:$0xff]  ;;  %v7493_v44 = vunpack.i.h.bf16 %v7491_v42  ;;  %v7492_v23 = vunpack.i.l.bf16 %v7491_v42 }
 0x3f9   :  { %3651 = vst.msk [vmem:[#allocation3 + $0x70] sm:$0xff] %vm32_vm2, %v3619_v43 }
 0x3fa   :  { %v3567_v51 = vsel %vm3540_vm5, %v3502_v32, %v7477_v26  ;;  %v3568_v53 = vsel %vm3540_vm5, %v3503_v59, %v7478_v63  ;;  %v3509_v10 = vsel %vm30_vm3, %v13010_v49, %v7493_v44  ;;  %v3508_v54 = vsel %vm30_vm3, %v13011_v46, %v7492_v23  ;;  %v13017_v23 = vld [vmem:[#allocation14_spill] sm:$0xff] }
 0x3fb   :  { %v3618_v27 = vpack.c.bf16 %v3568_v53, %v3567_v51  ;;  %v7486_v19 = vpop.permute.xlu0 %7485  ;;  %v7501_v15 = vpop.permute.xlu1 %7500  ;;  %v13014_v53 = vmax.f32 %v9629_v35, 0.0 }
 0x3fc   :  { %v10225_v52 = vld [vmem:[#allocation3 + $0x58] sm:$0xff]  ;;  %v7488_v22 = vunpack.i.h.bf16 %v7486_v19  ;;  %v7487_v60 = vunpack.i.l.bf16 %v7486_v19  ;;  %v7503_v39 = vunpack.i.h.bf16 %v7501_v15  ;;  %v7502_v57 = vunpack.i.l.bf16 %v7501_v15 }
 0x3fd   :  { %3650 = vst.msk [vmem:[#allocation3 + $0x68] sm:$0xff] %vm32_vm2, %v3618_v27  ;;  %6895 = vmatprep.mubr.msk.bf16.mxu1 %vm32_vm2, %v10225_v52  ;;  %v13015_v27 = vmax.f32 %v9625_v29, 0.0  ;;  %v13016_v19 = vmax.f32 %v9621_v11, 0.0 }
 0x3fe   :  { %6896 = vmatmul.mubr.msk.bf16.gmra.mrb[20].mxu1 %vm32_vm2, %v10227_v3  ;;  %v3507_v16 = vsel %vm30_vm3, %v13012_v25, %v7488_v22  ;;  %v3506_v20 = vsel %vm30_vm3, %v13013_v6, %v7487_v60  ;;  %v3573_v5 = vsel %vm3540_vm5, %v3508_v54, %v7502_v57  ;;  %v3574_v9 = vsel %vm3540_vm5, %v3509_v10, %v7503_v39 }
 0x3ff   :  { %v7496_v58 = vpop.permute.xlu0 %7495  ;;  %v3621_v63 = vpack.c.bf16 %v3574_v9, %v3573_v5  ;;  %v7511_v26 = vpop.permute.xlu1 %7510  ;;  %v13018_v22 = vmax.f32 %v13017_v23, 0.0 }
 0x400   :  { %v7498_v41 = vunpack.i.h.bf16 %v7496_v58  ;;  %v7497_v1 = vunpack.i.l.bf16 %v7496_v58  ;;  %v10253_v40 = vld [vmem:[#allocation3 + $0x70] sm:$0xff]  ;;  %v7513_v13 = vunpack.i.h.bf16 %v7511_v26  ;;  %v7512_v50 = vunpack.i.l.bf16 %v7511_v26 }
 0x401   :  { %3653 = vst.msk [vmem:[#allocation3 + $0x80] sm:$0xff] %vm32_vm2, %v3621_v63 }
 0x402   :  { %v3571_v47 = vsel %vm3540_vm5, %v3506_v20, %v7497_v1  ;;  %v3572_v31 = vsel %vm3540_vm5, %v3507_v16, %v7498_v41  ;;  %v3513_v43 = vsel %vm30_vm3, %v13014_v53, %v7513_v13  ;;  %v3512_v42 = vsel %vm30_vm3, %v13015_v27, %v7512_v50 }
 0x403   :  { %v3620_v18 = vpack.c.bf16 %v3572_v31, %v3571_v47  ;;  %v7506_v36 = vpop.permute.xlu0 %7505  ;;  %v7521_v59 = vpop.permute.xlu1 %7520  ;;  %v13019_v31 = vmax.f32 %v9645_v8, 0.0  ;;  %v13022_v50 = vmax.f32 %v9633_v38, 0.0 }
 0x404   :  { %v10251_v2 = vld [vmem:[#allocation3 + $0x68] sm:$0xff]  ;;  %v7508_v28 = vunpack.i.h.bf16 %v7506_v36  ;;  %v7507_v45 = vunpack.i.l.bf16 %v7506_v36  ;;  %v7523_v32 = vunpack.i.h.bf16 %v7521_v59  ;;  %v7522_v30 = vunpack.i.l.bf16 %v7521_v59 }
 0x405   :  { %3652 = vst.msk [vmem:[#allocation3 + $0x78] sm:$0xff] %vm32_vm2, %v3620_v18  ;;  %6899 = vmatprep.mubr.msk.bf16.mxu1 %vm32_vm2, %v10251_v2  ;;  %v13020_v18 = vmax.f32 %v9641_v56, 0.0  ;;  %v13021_v36 = vmax.f32 %v9637_v37, 0.0 }
 0x406   :  { %6900 = vmatmul.mubr.msk.bf16.gmra.mrb[24].mxu1 %vm32_vm2, %v10253_v40  ;;  %v3511_v44 = vsel %vm30_vm3, %v13016_v19, %v7508_v28  ;;  %v3510_v60 = vsel %vm30_vm3, %v13018_v22, %v7507_v45  ;;  %v3577_v15 = vsel %vm3540_vm5, %v3512_v42, %v7522_v30  ;;  %v3578_v58 = vsel %vm3540_vm5, %v3513_v43, %v7523_v32 }
 0x407   :  { %v7516_v17 = vpop.permute.xlu0 %7515  ;;  %v3623_v57 = vpack.c.bf16 %v3578_v58, %v3577_v15  ;;  %v7531_v41 = vpop.permute.xlu1 %7530  ;;  %v13023_v15 = vmax.f32 %v9661_v14, 0.0 }
 0x408   :  { %v7518_v12 = vunpack.i.h.bf16 %v7516_v17  ;;  %v7517_v51 = vunpack.i.l.bf16 %v7516_v17  ;;  %v10279_v11 = vld [vmem:[#allocation3 + $0x80] sm:$0xff]  ;;  %v7533_v10 = vunpack.i.h.bf16 %v7531_v41  ;;  %v7532_v46 = vunpack.i.l.bf16 %v7531_v41 }
 0x409   :  { %3655 = vst.msk [vmem:[#allocation3 + $0x90] sm:$0xff] %vm32_vm2, %v3623_v57 }
 0x40a   :  { %v3575_v35 = vsel %vm3540_vm5, %v3510_v60, %v7517_v51  ;;  %v3576_v39 = vsel %vm3540_vm5, %v3511_v44, %v7518_v12  ;;  %v3517_v63 = vsel %vm30_vm3, %v13019_v31, %v7533_v10  ;;  %v3516_v26 = vsel %vm30_vm3, %v13020_v18, %v7532_v46  ;;  %v13028_v10 = vld [vmem:[#allocation33_spill] sm:$0xff] }
 0x40b   :  { %v3622_v29 = vpack.c.bf16 %v3576_v39, %v3575_v35  ;;  %v7526_v1 = vpop.permute.xlu0 %7525  ;;  %v7541_v16 = vpop.permute.xlu1 %7540  ;;  %v13024_v35 = vld [vmem:[#allocation35_spill] sm:$0xff]  ;;  %v13029_v46 = vmax.f32 %v13028_v10, 0.0 }
 0x40c   :  { %v10277_v49 = vld [vmem:[#allocation3 + $0x78] sm:$0xff]  ;;  %v7528_v54 = vunpack.i.h.bf16 %v7526_v1  ;;  %v7527_v25 = vunpack.i.l.bf16 %v7526_v1  ;;  %v7543_v20 = vunpack.i.h.bf16 %v7541_v16  ;;  %v7542_v5 = vunpack.i.l.bf16 %v7541_v16 }
 0x40d   :  { %3654 = vst.msk [vmem:[#allocation3 + $0x88] sm:$0xff] %vm32_vm2, %v3622_v29  ;;  %6903 = vmatprep.mubr.msk.bf16.mxu1 %vm32_vm2, %v10277_v49  ;;  %v13025_v39 = vmax.f32 %v13024_v35, 0.0  ;;  %v13026_v29 = vld [vmem:[#allocation15_spill] sm:$0xff] }
 0x40e   :  { %6904 = vmatmul.mubr.msk.bf16.gmra.mrb[28].mxu1 %vm32_vm2, %v10279_v11  ;;  %v3515_v13 = vsel %vm30_vm3, %v13021_v36, %v7528_v54  ;;  %v3514_v28 = vsel %vm30_vm3, %v13022_v50, %v7527_v25  ;;  %v3581_v45 = vsel %vm3540_vm5, %v3516_v26, %v7542_v5  ;;  %v3582_v59 = vsel %vm3540_vm5, %v3517_v63, %v7543_v20 }
 0x40f   :  { %v7536_v6 = vpop.permute.xlu0 %7535  ;;  %v3625_v32 = vpack.c.bf16 %v3582_v59, %v3581_v45  ;;  %v7551_v30 = vpop.permute.xlu1 %7550  ;;  %v13027_v41 = vmax.f32 %v13026_v29, 0.0 }
 0x410   :  { %v7538_v9 = vunpack.i.h.bf16 %v7536_v6  ;;  %v7537_v47 = vunpack.i.l.bf16 %v7536_v6  ;;  %v10305_v37 = vld [vmem:[#allocation3 + $0x90] sm:$0xff]  ;;  %v7553_v38 = vunpack.i.h.bf16 %v7551_v30  ;;  %v7552_v53 = vunpack.i.l.bf16 %v7551_v30 }
 0x411   :  { %3657 = vst.msk [vmem:[#allocation3 + $0xa0] sm:$0xff] %vm32_vm2, %v3625_v32  ;;  %v13030_v32 = vld [vmem:[#allocation18_spill] sm:$0xff] }
 0x412   :  { %v3579_v8 = vsel %vm3540_vm5, %v3514_v28, %v7537_v47  ;;  %v3580_v17 = vsel %vm3540_vm5, %v3515_v13, %v7538_v9  ;;  %v3521_v58 = vsel %vm30_vm3, %v13023_v15, %v7553_v38  ;;  %v3520_v57 = vsel %vm30_vm3, %v13025_v39, %v7552_v53 }
 0x413   :  { %v3624_v56 = vpack.c.bf16 %v3580_v17, %v3579_v8  ;;  %v7546_v12 = vpop.permute.xlu0 %7545  ;;  %v7561_v42 = vpop.permute.xlu1 %7560 }
 0x414   :  { %v10303_v51 = vld [vmem:[#allocation3 + $0x88] sm:$0xff]  ;;  %v7548_v43 = vunpack.i.h.bf16 %v7546_v12  ;;  %v7547_v27 = vunpack.i.l.bf16 %v7546_v12  ;;  %v7563_v44 = vunpack.i.h.bf16 %v7561_v42  ;;  %v7562_v23 = vunpack.i.l.bf16 %v7561_v42  ;;  %v13032_v12 = vld [vmem:[#allocation17_spill] sm:$0xff] }
 0x415   :  { %3656 = vst.msk [vmem:[#allocation3 + $0x98] sm:$0xff] %vm32_vm2, %v3624_v56  ;;  %6907 = vmatprep.mubr.msk.bf16.mxu1 %vm32_vm2, %v10303_v51  ;;  %v13031_v56 = vmax.f32 %v13030_v32, 0.0  ;;  %v13033_v38 = vmax.f32 %v13032_v12, 0.0 }
 0x416   :  { %6908 = vmatmul.mubr.msk.bf16.gmra.mrb[32].mxu1 %vm32_vm2, %v10305_v37  ;;  %v3519_v1 = vsel %vm30_vm3, %v13027_v41, %v7548_v43  ;;  %v3518_v54 = vsel %vm30_vm3, %v13029_v46, %v7547_v27  ;;  %v3585_v25 = vsel %vm3540_vm5, %v3520_v57, %v7562_v23  ;;  %v3586_v16 = vsel %vm3540_vm5, %v3521_v58, %v7563_v44  ;;  %v13034_v43 = vld [vmem:[#allocation40_spill] sm:$0xff] }
 0x417   :  { %v7556_v19 = vpop.permute.xlu0 %7555  ;;  %v3627_v20 = vpack.c.bf16 %v3586_v16, %v3585_v25  ;;  %v7571_v9 = vpop.permute.xlu1 %7570  ;;  %v13035_v27 = vmax.f32 %v13034_v43, 0.0 }
 0x418   :  { %v7558_v22 = vunpack.i.h.bf16 %v7556_v19  ;;  %v7557_v60 = vunpack.i.l.bf16 %v7556_v19  ;;  %v10331_v63 = vld [vmem:[#allocation3 + $0xa0] sm:$0xff]  ;;  %v7573_v18 = vunpack.i.h.bf16 %v7571_v9  ;;  %v7572_v26 = vunpack.i.l.bf16 %v7571_v9  ;;  %v13036_v19 = vld [vmem:[#allocation16_spill] sm:$0xff] }
 0x419   :  { %3659 = vst.msk [vmem:[#allocation3 + $0xb0] sm:$0xff] %vm32_vm2, %v3627_v20  ;;  %v13037_v44 = vmax.f32 %v13036_v19, 0.0 }
 0x41a   :  { %v3583_v14 = vsel %vm3540_vm5, %v3518_v54, %v7557_v60  ;;  %v3584_v6 = vsel %vm3540_vm5, %v3519_v1, %v7558_v22  ;;  %v3525_v30 = vsel %vm30_vm3, %v13031_v56, %v7573_v18  ;;  %v3524_v53 = vsel %vm30_vm3, %v13033_v38, %v7572_v26 }
 0x41b   :  { %v3626_v5 = vpack.c.bf16 %v3584_v6, %v3583_v14  ;;  %v7566_v47 = vpop.permute.xlu0 %7565  ;;  %v7581_v50 = vpop.permute.xlu1 %7580 }
 0x41c   :  { %v10329_v31 = vld [vmem:[#allocation3 + $0x98] sm:$0xff]  ;;  %v7568_v36 = vunpack.i.h.bf16 %v7566_v47  ;;  %v7567_v13 = vunpack.i.l.bf16 %v7566_v47  ;;  %v7583_v45 = vunpack.i.h.bf16 %v7581_v50  ;;  %v7582_v59 = vunpack.i.l.bf16 %v7581_v50  ;;  %v13038_v47 = vld [vmem:[#allocation21_spill] sm:$0xff] }
 0x41d   :  { %3658 = vst.msk [vmem:[#allocation3 + $0xa8] sm:$0xff] %vm32_vm2, %v3626_v5  ;;  %6911 = vmatprep.mubr.msk.bf16.mxu1 %vm32_vm2, %v10329_v31  ;;  %v13039_v18 = vmax.f32 %v13038_v47, 0.0 }
 0x41e   :  { %6912 = vmatmul.mubr.msk.bf16.gmra.mrb[36].mxu1 %vm32_vm2, %v10331_v63  ;;  %v3523_v42 = vsel %vm30_vm3, %v13035_v27, %v7568_v36  ;;  %v3522_v23 = vsel %vm30_vm3, %v13037_v44, %v7567_v13  ;;  %v3589_v22 = vsel %vm3540_vm5, %v3524_v53, %v7582_v59  ;;  %v3590_v60 = vsel %vm3540_vm5, %v3525_v30, %v7583_v45  ;;  %v13040_v36 = vld [vmem:[#allocation20_spill] sm:$0xff] }
 0x41f   :  { %v7576_v28 = vpop.permute.xlu0 %7575  ;;  %v3629_v35 = vpack.c.bf16 %v3590_v60, %v3589_v22  ;;  %v7591_v57 = vpop.permute.xlu1 %7590  ;;  %v13041_v13 = vmax.f32 %v13040_v36, 0.0 }
 0x420   :  { %v7578_v8 = vunpack.i.h.bf16 %v7576_v28  ;;  %v7577_v17 = vunpack.i.l.bf16 %v7576_v28  ;;  %v10357_v1 = vld [vmem:[#allocation3 + $0xb0] sm:$0xff]  ;;  %v7593_v10 = vunpack.i.h.bf16 %v7591_v57  ;;  %v7592_v46 = vunpack.i.l.bf16 %v7591_v57  ;;  %v13042_v28 = vld [vmem:[#allocation41_spill] sm:$0xff] }
 0x421   :  { %3661 = vst.msk [vmem:[#allocation3 + $0xc0] sm:$0xff] %vm32_vm2, %v3629_v35  ;;  %v13043_v45 = vmax.f32 %v13042_v28, 0.0 }
 0x422   :  { %v3587_v15 = vsel %vm3540_vm5, %v3522_v23, %v7577_v17  ;;  %v3588_v58 = vsel %vm3540_vm5, %v3523_v42, %v7578_v8  ;;  %v3529_v26 = vsel %vm30_vm3, %v13039_v18, %v7593_v10  ;;  %v3528_v50 = vsel %vm30_vm3, %v13041_v13, %v7592_v46  ;;  %v13044_v8 = vld [vmem:[#allocation19_spill] sm:$0xff]  ;;  %v13052_v18 = vld [vmem:[#allocation22_spill] sm:$0xff]  ;;  %v7744_v13 = vld [vmem:[%s12380_s1 + $0x8] sm:$0xff] }
 0x423   :  { %v3628_v39 = vpack.c.bf16 %v3588_v58, %v3587_v15  ;;  %v7586_v29 = vpop.permute.xlu0 %7585  ;;  %v7601_v16 = vpop.permute.xlu1 %7600  ;;  %v13045_v17 = vmax.f32 %v13044_v8, 0.0  ;;  %v13046_v58 = vld [vmem:[#allocation25_spill] sm:$0xff] }
 0x424   :  { %v10355_v41 = vld [vmem:[#allocation3 + $0xa8] sm:$0xff]  ;;  %v7588_v54 = vunpack.i.h.bf16 %v7586_v29  ;;  %v7587_v25 = vunpack.i.l.bf16 %v7586_v29  ;;  %v7603_v6 = vunpack.i.h.bf16 %v7601_v16  ;;  %v7602_v20 = vunpack.i.l.bf16 %v7601_v16 }
 0x425   :  { %3660 = vst.msk [vmem:[#allocation3 + $0xb8] sm:$0xff] %vm32_vm2, %v3628_v39  ;;  %6915 = vmatprep.mubr.msk.bf16.mxu1 %vm32_vm2, %v10355_v41  ;;  %v13047_v35 = vmax.f32 %v13046_v58, 0.0  ;;  %v7812_v16 = vmov 1  }
 0x426   :  { %6916 = vmatmul.mubr.msk.bf16.gmra.mrb[40].mxu1 %vm32_vm2, %v10357_v1  ;;  %v3527_v59 = vsel %vm30_vm3, %v13043_v45, %v7588_v54  ;;  %v3526_v32 = vsel %vm30_vm3, %v13045_v17, %v7587_v25  ;;  %v3593_v56 = vsel %vm3540_vm5, %v3528_v50, %v7602_v20  ;;  %v3594_v30 = vsel %vm3540_vm5, %v3529_v26, %v7603_v6  ;;  %v7745_v50 = vld [vmem:[%s12380_s1] sm:$0xff] }
 0x427   :  { %v7596_v14 = vpop.permute.xlu0 %7595  ;;  %v3631_v53 = vpack.c.bf16 %v3594_v30, %v3593_v56  ;;  %v7611_v27 = vpop.permute.xlu1 %7610  ;;  %7665 = vset.pattern.permute.xlu1 %v7812_v16  ;;  %7664 = vset.pattern.permute.xlu0 %v7812_v16  ;;  %v13053_v26 = vmax.f32 %v13052_v18, 0.0  ;;  %v7748_v18 = vld [vmem:[%s12380_s1 + $0x20] sm:$0xff] }
 0x428   :  { %v7598_v5 = vunpack.i.h.bf16 %v7596_v14  ;;  %v7597_v9 = vunpack.i.l.bf16 %v7596_v14  ;;  %v7613_v19 = vunpack.i.h.bf16 %v7611_v27  ;;  %v10383_v23 = vld [vmem:[#allocation3 + $0xc0] sm:$0xff]  ;;  %v7612_v22 = vunpack.i.l.bf16 %v7611_v27  ;;  %v13048_v14 = vld [vmem:[#allocation47_spill] sm:$0xff]  ;;  %4913 = vperm.xlu1 %7665, %v7744_v13   ;;  %4909 = vperm.xlu0 %7664, %v7745_v50  }
 0x429   :  { %3663 = vst.msk [vmem:[#allocation3 + $0xd0] sm:$0xff] %vm32_vm2, %v3631_v53  ;;  %v13049_v6 = vmax.f32 %v13048_v14, 0.0  ;;  %v13058_v14 = vld [vmem:[#allocation28_spill] sm:$0xff] }
 0x42a   :  { %v3591_v12 = vsel %vm3540_vm5, %v3526_v32, %v7597_v9  ;;  %v3592_v38 = vsel %vm3540_vm5, %v3527_v59, %v7598_v5  ;;  %v3533_v39 = vsel %vm30_vm3, %v13047_v35, %v7613_v19  ;;  %v13050_v5 = vld [vmem:[#allocation23_spill] sm:$0xff]  ;;  %v7746_v19 = vld [vmem:[%s12380_s1 + $0x10] sm:$0xff] }
 0x42b   :  { %v3630_v43 = vpack.c.bf16 %v3592_v38, %v3591_v12  ;;  %v7606_v42 = vpop.permute.xlu0 %7605  ;;  %v7621_v57 = vpop.permute.xlu1 %7620  ;;  %v3532_v20 = vsel %vm30_vm3, %v13049_v6, %v7612_v22  ;;  %v13051_v9 = vmax.f32 %v13050_v5, 0.0  ;;  %v13059_v6 = vmax.f32 %v13058_v14, 0.0  ;;  %v13060_v5 = vld [vmem:[#allocation26_spill] sm:$0xff] }
 0x42c   :  { %v10381_v44 = vld [vmem:[#allocation3 + $0xb8] sm:$0xff]  ;;  %v7608_v60 = vunpack.i.h.bf16 %v7606_v42  ;;  %v7607_v15 = vunpack.i.l.bf16 %v7606_v42  ;;  %v7623_v10 = vunpack.i.h.bf16 %v7621_v57  ;;  %v7622_v46 = vunpack.i.l.bf16 %v7621_v57  ;;  %4917 = vperm.xlu1 %7665, %v7746_v19  }
 0x42d   :  { %3662 = vst.msk [vmem:[#allocation3 + $0xc8] sm:$0xff] %vm32_vm2, %v3630_v43  ;;  %6919 = vmatprep.mubr.msk.bf16.mxu1 %vm32_vm2, %v10381_v44  ;;  %v13062_v19 = vld [vmem:[#allocation32_spill] sm:$0xff] }
 0x42e   :  { %6920 = vmatmul.mubr.msk.bf16.gmra.mrb[44].mxu1 %vm32_vm2, %v10383_v23  ;;  %v3531_v47 = vsel %vm30_vm3, %v13051_v9, %v7608_v60  ;;  %v3530_v36 = vsel %vm30_vm3, %v13053_v26, %v7607_v15  ;;  %v3597_v28 = vsel %vm3540_vm5, %v3532_v20, %v7622_v46  ;;  %v3598_v45 = vsel %vm3540_vm5, %v3533_v39, %v7623_v10  ;;  %v7747_v15 = vld [vmem:[%s12380_s1 + $0x18] sm:$0xff] }
 0x42f   :  { %v7616_v29 = vpop.permute.xlu0 %7615  ;;  %v3633_v17 = vpack.c.bf16 %v3598_v45, %v3597_v28  ;;  %v7631_v56 = vpop.permute.xlu1 %7630  ;;  %4921 = vperm.xlu0 %7664, %v7747_v15   ;;  %v13061_v9 = vmax.f32 %v13060_v5, 0.0  ;;  %v13064_v15 = vld [vmem:[#allocation53_spill] sm:$0xff] }
 0x430   :  { %v7618_v54 = vunpack.i.h.bf16 %v7616_v29  ;;  %v7617_v25 = vunpack.i.l.bf16 %v7616_v29  ;;  %v10415_v38 = vld [vmem:[#allocation3 + $0xd0] sm:$0xff]  ;;  %v7633_v53 = vunpack.i.h.bf16 %v7631_v56  ;;  %v7632_v43 = vunpack.i.l.bf16 %v7631_v56  ;;  %v13054_v29 = vld [vmem:[#allocation6_spill] sm:$0xff]  ;;  %4925 = vperm.xlu1 %7665, %v7748_v18   ;;  %v13066_v5 = vld [vmem:[#allocation13_spill] sm:$0xff] }
 0x431   :  { %3665 = vst.msk [vmem:[#allocation3 + $0xe0] sm:$0xff] %vm32_vm2, %v3633_v17  ;;  %v13055_v10 = vmax.f32 %v13054_v29, 0.0  ;;  %v7749_v17 = vld [vmem:[%s12380_s1 + $0x28] sm:$0xff] }
 0x432   :  { %v3595_v59 = vsel %vm3540_vm5, %v3530_v36, %v7617_v25  ;;  %v3596_v8 = vsel %vm3540_vm5, %v3531_v47, %v7618_v54  ;;  %v13056_v54 = vld [vmem:[#allocation31_spill] sm:$0xff] }
 0x433   :  { %v3632_v32 = vpack.c.bf16 %v3596_v8, %v3595_v59  ;;  %v7626_v30 = vpop.permute.xlu0 %7625  ;;  %v7641_v22 = vpop.permute.xlu1 %7640  ;;  %v3537_v46 = vsel %vm30_vm3, %v13055_v10, %v7633_v53  ;;  %v13057_v25 = vmax.f32 %v13056_v54, 0.0  ;;  %4929 = vperm.xlu0 %7664, %v7749_v17   ;;  %v7754_v17 = vld [vmem:[%s12380_s1 + $0x50] sm:$0xff] }
 0x434   :  { %v10413_v12 = vld [vmem:[#allocation3 + $0xc8] sm:$0xff]  ;;  %v7628_v27 = vunpack.i.h.bf16 %v7626_v30  ;;  %v7627_v42 = vunpack.i.l.bf16 %v7626_v30  ;;  %v7643_v58 = vunpack.i.h.bf16 %v7641_v22  ;;  %v7642_v35 = vunpack.i.l.bf16 %v7641_v22 }
 0x435   :  { %3664 = vst.msk [vmem:[#allocation3 + $0xd8] sm:$0xff] %vm32_vm2, %v3632_v32  ;;  %6923 = vmatprep.mubr.msk.bf16.mxu1 %vm32_vm2, %v10413_v12  ;;  %v3536_v16 = vsel %vm30_vm3, %v13057_v25, %v7632_v43  ;;  %v13063_v22 = vmax.f32 %v13062_v19, 0.0  ;;  %v7758_v19 = vld [vmem:[%s12380_s1 + $0x70] sm:$0xff] }
 0x436   :  { %6924 = vmatmul.mubr.msk.bf16.gmra.mrb[48].mxu1 %vm32_vm2, %v10415_v38  ;;  %v3535_v20 = vsel %vm30_vm3, %v13059_v6, %v7628_v27  ;;  %v3534_v47 = vsel %vm30_vm3, %v13061_v9, %v7627_v42  ;;  %v3601_v26 = vsel %vm3540_vm5, %v3536_v16, %v7642_v35  ;;  %v3602_v36 = vsel %vm3540_vm5, %v3537_v46, %v7643_v58  ;;  %v7750_v42 = vld [vmem:[%s12380_s1 + $0x30] sm:$0xff]  ;;  %v7751_v46 = vld [vmem:[%s12380_s1 + $0x38] sm:$0xff] }
 0x437   :  { %v7636_v60 = vpop.permute.xlu0 %7635  ;;  %v3635_v28 = vpack.c.bf16 %v3602_v36, %v3601_v26  ;;  %v7651_v59 = vpop.permute.xlu1 %7650  ;;  %4933 = vperm.xlu1 %7665, %v7750_v42   ;;  %v13065_v58 = vmax.f32 %v13064_v15, 0.0  ;;  %4937 = vperm.xlu0 %7664, %v7751_v46   ;;  %v13067_v9 = vmax.f32 %v13066_v5, 0.0  ;;  %v13068_v26 = vld [vmem:[#allocation34_spill] sm:$0xff]  ;;  %v7757_v42 = vld [vmem:[%s12380_s1 + $0x68] sm:$0xff]  ;;  %v7760_v15 = vld [vmem:[%s12380_s1 + $0x80] sm:$0xff] }
 0x438   :  { %v7638_v39 = vunpack.i.h.bf16 %v7636_v60  ;;  %v7637_v57 = vunpack.i.l.bf16 %v7636_v60  ;;  %v7653_v32 = vunpack.i.h.bf16 %v7651_v59  ;;  %v7652_v56 = vunpack.i.l.bf16 %v7651_v59  ;;  %v10453_v27 = vld [vmem:[#allocation3 + $0xe0] sm:$0xff]  ;;  %v7767_v46 = vld [vmem:[%s12380_s1 + $0xb8] sm:$0xff]  ;;  %v7774_v5 = vld [vmem:[%s12380_s1 + $0xf0] sm:$0xff] }
 0x439   :  { %3667 = vst.msk [vmem:[#allocation3 + $0xf0] sm:$0xff] %vm32_vm2, %v3635_v28  ;;  %v13069_v36 = vmax.f32 %v13068_v26, 0.0  ;;  %v7778_v26 = vld [vmem:[%s12380_s1 + $0x110] sm:$0xff] }
 0x43a   :  { %v3599_v13 = vsel %vm3540_vm5, %v3534_v47, %v7637_v57  ;;  %v3600_v50 = vsel %vm3540_vm5, %v3535_v20, %v7638_v39  ;;  %v7752_v20 = vld [vmem:[%s12380_s1 + $0x40] sm:$0xff] }
 0x43b   :  { %v3634_v45 = vpack.c.bf16 %v3600_v50, %v3599_v13  ;;  %v7646_v8 = vpop.permute.xlu0 %7645  ;;  %v7661_v29 = vpop.permute.xlu1 %7660  ;;  %4941 = vperm.xlu1 %7665, %v7752_v20   ;;  %v7753_v50 = vld [vmem:[%s12380_s1 + $0x48] sm:$0xff] }
 0x43c   :  { %v7648_v30 = vunpack.i.h.bf16 %v7646_v8  ;;  %v7647_v53 = vunpack.i.l.bf16 %v7646_v8  ;;  %v10451_v43 = vld [vmem:[#allocation3 + $0xd8] sm:$0xff]  ;;  %v7663_v25 = vunpack.i.h.bf16 %v7661_v29  ;;  %v7662_v16 = vunpack.i.l.bf16 %v7661_v29  ;;  %4945 = vperm.xlu0 %7664, %v7753_v50   ;;  %v7763_v29 = vld [vmem:[%s12380_s1 + $0x98] sm:$0xff]  ;;  %v7773_v20 = vld [vmem:[%s12380_s1 + $0xe8] sm:$0xff] }
 0x43d   :  { %3666 = vst.msk [vmem:[#allocation3 + $0xe8] sm:$0xff] %vm32_vm2, %v3634_v45  ;;  %6927 = vmatprep.mubr.msk.bf16.mxu1 %vm32_vm2, %v10451_v43  ;;  %v7781_v50 = vld [vmem:[%s12380_s1 + $0x128] sm:$0xff] }
 0x43e   :  { %v3539_v60 = vsel %vm30_vm3, %v13063_v22, %v7648_v30  ;;  %v3538_v35 = vsel %vm30_vm3, %v13065_v58, %v7647_v53  ;;  %6928 = vmatmul.mubr.msk.bf16.gmra.mrb[52].mxu1 %vm32_vm2, %v10453_v27  ;;  %v7756_v30 = vld [vmem:[%s12380_s1 + $0x60] sm:$0xff]  ;;  %v10512_v53 = vld [vmem:[#allocation3 + $0x100] sm:$0xff] }
 0x43f   :  { %v3604_v39 = vsel %vm3540_vm5, %v3539_v60, %v7653_v32  ;;  %v3603_v57 = vsel %vm3540_vm5, %v3538_v35, %v7652_v56  ;;  %v7656_v10 = vpop.permute.xlu0 %7655  ;;  %4949 = vperm.xlu1 %7665, %v7754_v17   ;;  %v7755_v32 = vld [vmem:[%s12380_s1 + $0x58] sm:$0xff]  ;;  %v7761_v58 = vld [vmem:[%s12380_s1 + $0x88] sm:$0xff]  ;;  %v7739_v35 = vld [vmem:[%s12383_s5 + $0x20] ss:$0 sps:$4 sm:$0xff]  }
 0x440   :  { %v3636_v54 = vpack.c.bf16 %v3604_v39, %v3603_v57  ;;  %v7658_v14 = vunpack.i.h.bf16 %v7656_v10  ;;  %v7657_v6 = vunpack.i.l.bf16 %v7656_v10  ;;  %v10492_v59 = vld [vmem:[#allocation3 + $0xf0] sm:$0xff]  ;;  %4953 = vperm.xlu0 %7664, %v7755_v32   ;;  %v7762_v39 = vld [vmem:[%s12380_s1 + $0x90] sm:$0xff]  ;;  %v4553_v57 = vsel %vm3814_vm4, %v7739_v35, 0  ;;  %v7764_v10 = vld [vmem:[%s12380_s1 + $0xa0] sm:$0xff] }
 0x441   :  { %v7759_v60 = vld [vmem:[%s12380_s1 + $0x78] sm:$0xff]  ;;  %v7784_v17 = vld [vmem:[%s12380_s1 + $0x140] sm:$0xff]  ;;  %v7785_v32 = vld [vmem:[%s12380_s1 + $0x148] sm:$0xff] }
 0x442   :  { %3668 = vst.msk [vmem:[#allocation3 + $0xf8] sm:$0xff] %vm32_vm2, %v3636_v54  ;;  %v3477_v47 = vsel %vm30_vm3, %v13067_v9, %v7658_v14  ;;  %v3476_v13 = vsel %vm30_vm3, %v13069_v36, %v7657_v6  ;;  %v7768_v54 = vld [vmem:[%s12380_s1 + $0xc0] sm:$0xff]  ;;  %v7771_v14 = vld [vmem:[%s12380_s1 + $0xd8] sm:$0xff] }
 0x443   :  { %v3542_v18 = vsel %vm3540_vm5, %v3477_v47, %v7663_v25  ;;  %v3541_v28 = vsel %vm3540_vm5, %v3476_v13, %v7662_v16  ;;  %4957 = vperm.xlu1 %7665, %v7756_v30   ;;  %v7769_v25 = vld [vmem:[%s12380_s1 + $0xc8] sm:$0xff]  ;;  %v7770_v16 = vld [vmem:[%s12380_s1 + $0xd0] sm:$0xff]  ;;  %v7772_v6 = vld [vmem:[%s12380_s1 + $0xe0] sm:$0xff] }
 0x444   :  { %v10490_v45 = vld [vmem:[#allocation3 + $0xe8] sm:$0xff]  ;;  %v3605_v8 = vpack.c.bf16 %v3542_v18, %v3541_v28  ;;  %4961 = vperm.xlu0 %7664, %v7757_v42   ;;  %v7775_v9 = vld [vmem:[%s12380_s1 + $0xf8] sm:$0xff]  ;;  %v7776_v47 = vld [vmem:[%s12380_s1 + $0x100] sm:$0xff] }
 0x445   :  { %6931 = vmatprep.mubr.msk.bf16.mxu1 %vm32_vm2, %v10490_v45  ;;  %v7777_v18 = vld [vmem:[%s12380_s1 + $0x108] sm:$0xff]  ;;  %v7779_v36 = vld [vmem:[%s12380_s1 + $0x118] sm:$0xff]  ;;  %v7780_v13 = vld [vmem:[%s12380_s1 + $0x120] sm:$0xff] }
 0x446   :  { %6932 = vmatmul.mubr.msk.bf16.gmra.mrb[56].mxu1 %vm32_vm2, %v10492_v59  ;;  %3637 = vst.msk [vmem:[#allocation3] sm:$0xff] %vm32_vm2, %v3605_v8  ;;  %v7782_v28 = vld [vmem:[%s12380_s1 + $0x130] sm:$0xff]  ;;  %v7783_v8 = vld [vmem:[%s12380_s1 + $0x138] sm:$0xff] }
 0x447   :  { %4965 = vperm.xlu1 %7665, %v7758_v19   ;;  %v7786_v30 = vld [vmem:[%s12380_s1 + $0x150] sm:$0xff]  ;;  %v7787_v42 = vld [vmem:[%s12380_s1 + $0x158] sm:$0xff]  ;;  %v7788_v19 = vld [vmem:[%s12380_s1 + $0x160] sm:$0xff] }
 0x448   :  { %4969 = vperm.xlu0 %7664, %v7759_v60   ;;  %v7790_v60 = vld [vmem:[%s12380_s1 + $0x170] sm:$0xff] }
 0x449   :  { %v10505_v56 = vld [vmem:[#allocation3 + $0xf8] sm:$0xff] }
 0x44a   :  { %6935 = vmatprep.mubr.msk.bf16.mxu1 %vm32_vm2, %v10505_v56 }
 0x44b   :  { %4973 = vperm.xlu1 %7665, %v7760_v15   ;;  %v7791_v15 = vld [vmem:[%s12380_s1 + $0x178] sm:$0xff] }
 0x44c   :  { %4977 = vperm.xlu0 %7664, %v7761_v58   ;;  %v7792_v58 = vld [vmem:[%s12380_s1 + $0x180] sm:$0xff] }
 0x44d   :  { %v3669_v22 = vld [vmem:[#allocation3] sm:$0xff] }
 0x44e   :  { %6936 = vmatmul.mubr.msk.bf16.gmra.mrb[60].mxu1 %vm32_vm2, %v10512_v53 }
 0x44f   :  { %6943 = vmatprep.mubr.msk.bf16.mxu1 %vm32_vm2, %v3669_v22  ;;  %4981 = vperm.xlu1 %7665, %v7762_v39   ;;  %v7789_v22 = vld [vmem:[%s12380_s1 + $0x168] sm:$0xff]  ;;  %v7794_v39 = vld [vmem:[%s12380_s1 + $0x190] sm:$0xff] }
 0x450   :  { %4985 = vperm.xlu0 %7664, %v7763_v29   ;;  %v7796_v29 = vld [vmem:[%s12380_s1 + $0x1a0] sm:$0xff] }
 0x453   :  { %4989 = vperm.xlu1 %7665, %v7764_v10   ;;  %v7797_v10 = vld [vmem:[%s12380_s1 + $0x1a8] sm:$0xff] }
 0x456   :  { %6944 = vmatmul.mubr.msk.bf16.vlgmr.msra.gmra.mrb[0].mxu1 %vm32_vm2, %v10086_v55  ;;  %v7765_v55 = vld [vmem:[%s12380_s1 + $0xa8] sm:$0xff] }
 0x457   :  { %6947 = vmatprep.mubr.msk.bf16.mxu1 %vm32_vm2, %v10088_v4  ;;  %7008 = vmatpush3.bf16.msra.mxu1 %v10102_v48  ;;  %v7766_v48 = vld [vmem:[%s12380_s1 + $0xb0] sm:$0xff] }
 0x458   :  { %7336 = vmatprep.subr.msk.bf16.mxu1 %vm3814_vm4, %v7739_v35  ;;  %4993 = vperm.xlu0 %7664, %v7765_v55   ;;  %v7793_v35 = vld [vmem:[%s12380_s1 + $0x188] sm:$0xff]  ;;  %v7798_v55 = vld [vmem:[%s12380_s1 + $0x1b0] sm:$0xff] }
 0x459   :  { %4997 = vperm.xlu1 %7665, %v7766_v48   ;;  %v7799_v48 = vld [vmem:[%s12380_s1 + $0x1b8] sm:$0xff] }
 0x45b   :  { %7010 = vmatpush3.bf16.msra.mxu1 %v4553_v57  ;;  %v7795_v57 = vld [vmem:[%s12380_s1 + $0x198] sm:$0xff] }
 0x45c   :  { %5001 = vperm.xlu0 %7664, %v7767_v46   ;;  %v7800_v46 = vld [vmem:[%s12380_s1 + $0x1c0] sm:$0xff] }
 0x45d   :  { %5005 = vperm.xlu1 %7665, %v7768_v54   ;;  %v7801_v54 = vld [vmem:[%s12380_s1 + $0x1c8] sm:$0xff] }
 0x45e   :  { %6948 = vmatmul.mubr.msk.bf16.gmra.mrb[4].mxu1 %vm32_vm2, %v10120_v21 }
 0x45f   :  { %6951 = vmatprep.mubr.msk.bf16.mxu1 %vm32_vm2, %v10122_v24 }
 0x460   :  { %5009 = vperm.xlu0 %7664, %v7769_v25   ;;  %v7802_v25 = vld [vmem:[%s12380_s1 + $0x1d0] sm:$0xff] }
 0x461   :  { %5013 = vperm.xlu1 %7665, %v7770_v16   ;;  %v7803_v16 = vld [vmem:[%s12380_s1 + $0x1d8] sm:$0xff] }
 0x464   :  { %5017 = vperm.xlu0 %7664, %v7771_v14   ;;  %v7804_v14 = vld [vmem:[%s12380_s1 + $0x1e0] sm:$0xff] }
 0x465   :  { %5021 = vperm.xlu1 %7665, %v7772_v6   ;;  %v7805_v6 = vld [vmem:[%s12380_s1 + $0x1e8] sm:$0xff] }
 0x466   :  { %6952 = vmatmul.mubr.msk.bf16.gmra.mrb[8].mxu1 %vm32_vm2, %v10147_v33 }
 0x467   :  { %6955 = vmatprep.mubr.msk.bf16.mxu1 %vm32_vm2, %v10149_v0 }
 0x468   :  { %5025 = vperm.xlu0 %7664, %v7773_v20   ;;  %v7806_v20 = vld [vmem:[%s12380_s1 + $0x1f0] sm:$0xff] }
 0x469   :  { %5029 = vperm.xlu1 %7665, %v7774_v5   ;;  %v7807_v5 = vld [vmem:[%s12380_s1 + $0x1f8] sm:$0xff] }
 0x46c   :  { %5033 = vperm.xlu0 %7664, %v7775_v9  }
 0x46d   :  { %5037 = vperm.xlu1 %7665, %v7776_v47  }
 0x46e   :  { %6956 = vmatmul.mubr.msk.bf16.gmra.mrb[12].mxu1 %vm32_vm2, %v10173_v62 }
 0x46f   :  { %6959 = vmatprep.mubr.msk.bf16.mxu1 %vm32_vm2, %v10175_v7 }
 0x470   :  { %5041 = vperm.xlu0 %7664, %v7777_v18  }
 0x471   :  { %5045 = vperm.xlu1 %7665, %v7778_v26  }
 0x474   :  { %5049 = vperm.xlu0 %7664, %v7779_v36  }
 0x475   :  { %5053 = vperm.xlu1 %7665, %v7780_v13  }
 0x476   :  { %6960 = vmatmul.mubr.msk.bf16.gmra.mrb[16].mxu1 %vm32_vm2, %v10199_v34 }
 0x477   :  { %6963 = vmatprep.mubr.msk.bf16.mxu1 %vm32_vm2, %v10201_v61 }
 0x478   :  { %5057 = vperm.xlu0 %7664, %v7781_v50  }
 0x479   :  { %5061 = vperm.xlu1 %7665, %v7782_v28  }
 0x47c   :  { %5065 = vperm.xlu0 %7664, %v7783_v8  }
 0x47d   :  { %5069 = vperm.xlu1 %7665, %v7784_v17  }
 0x47e   :  { %6964 = vmatmul.mubr.msk.bf16.gmra.mrb[20].mxu1 %vm32_vm2, %v10225_v52 }
 0x47f   :  { %6967 = vmatprep.mubr.msk.bf16.mxu1 %vm32_vm2, %v10227_v3 }
 0x480   :  { %5073 = vperm.xlu0 %7664, %v7785_v32  }
 0x481   :  { %5077 = vperm.xlu1 %7665, %v7786_v30  }
 0x484   :  { %5081 = vperm.xlu0 %7664, %v7787_v42  }
 0x485   :  { %5085 = vperm.xlu1 %7665, %v7788_v19  }
 0x486   :  { %6968 = vmatmul.mubr.msk.bf16.gmra.mrb[24].mxu1 %vm32_vm2, %v10251_v2 }
 0x487   :  { %6971 = vmatprep.mubr.msk.bf16.mxu1 %vm32_vm2, %v10253_v40 }
 0x488   :  { %5089 = vperm.xlu0 %7664, %v7789_v22  }
 0x489   :  { %5093 = vperm.xlu1 %7665, %v7790_v60  }
 0x48c   :  { %5097 = vperm.xlu0 %7664, %v7791_v15  }
 0x48d   :  { %5101 = vperm.xlu1 %7665, %v7792_v58  }
 0x48e   :  { %6972 = vmatmul.mubr.msk.bf16.gmra.mrb[28].mxu1 %vm32_vm2, %v10277_v49 }
 0x48f   :  { %6975 = vmatprep.mubr.msk.bf16.mxu1 %vm32_vm2, %v10279_v11 }
 0x490   :  { %5105 = vperm.xlu0 %7664, %v7793_v35  }
 0x491   :  { %5109 = vperm.xlu1 %7665, %v7794_v39  }
 0x494   :  { %5113 = vperm.xlu0 %7664, %v7795_v57  }
 0x495   :  { %5117 = vperm.xlu1 %7665, %v7796_v29  }
 0x496   :  { %6976 = vmatmul.mubr.msk.bf16.gmra.mrb[32].mxu1 %vm32_vm2, %v10303_v51 }
 0x497   :  { %6979 = vmatprep.mubr.msk.bf16.mxu1 %vm32_vm2, %v10305_v37 }
 0x498   :  { %5121 = vperm.xlu0 %7664, %v7797_v10  }
 0x499   :  { %5125 = vperm.xlu1 %7665, %v7798_v55  }
 0x49c   :  { %5129 = vperm.xlu0 %7664, %v7799_v48  }
 0x49d   :  { %5133 = vperm.xlu1 %7665, %v7800_v46  }
 0x49e   :  { %6980 = vmatmul.mubr.msk.bf16.gmra.mrb[36].mxu1 %vm32_vm2, %v10329_v31 }
 0x49f   :  { %6983 = vmatprep.mubr.msk.bf16.mxu1 %vm32_vm2, %v10331_v63 }
 0x4a0   :  { %5137 = vperm.xlu0 %7664, %v7801_v54  }
 0x4a1   :  { %5141 = vperm.xlu1 %7665, %v7802_v25  }
 0x4a4   :  { %5145 = vperm.xlu0 %7664, %v7803_v16  }
 0x4a5   :  { %5149 = vperm.xlu1 %7665, %v7804_v14  }
 0x4a6   :  { %6984 = vmatmul.mubr.msk.bf16.gmra.mrb[40].mxu1 %vm32_vm2, %v10355_v41 }
 0x4a7   :  { %6987 = vmatprep.mubr.msk.bf16.mxu1 %vm32_vm2, %v10357_v1 }
 0x4a8   :  { %5153 = vperm.xlu0 %7664, %v7805_v6  }
 0x4a9   :  { %5157 = vperm.xlu1 %7665, %v7806_v20  }
 0x4ac   :  { %5161 = vperm.xlu0 %7664, %v7807_v5  }
 0x4ae   :  { %6988 = vmatmul.mubr.msk.bf16.gmra.mrb[44].mxu1 %vm32_vm2, %v10381_v44 }
 0x4af   :  { %6991 = vmatprep.mubr.msk.bf16.mxu1 %vm32_vm2, %v10383_v23 }
 0x4b6   :  { %6992 = vmatmul.mubr.msk.bf16.gmra.mrb[48].mxu1 %vm32_vm2, %v10413_v12 }
 0x4b7   :  { %6995 = vmatprep.mubr.msk.bf16.mxu1 %vm32_vm2, %v10415_v38 }
 0x4be   :  { %6996 = vmatmul.mubr.msk.bf16.gmra.mrb[52].mxu1 %vm32_vm2, %v10451_v43 }
 0x4bf   :  { %6999 = vmatprep.mubr.msk.bf16.mxu1 %vm32_vm2, %v10453_v27 }
 0x4c6   :  { %7000 = vmatmul.mubr.msk.bf16.gmra.mrb[56].mxu1 %vm32_vm2, %v10490_v45 }
 0x4c7   :  { %7003 = vmatprep.mubr.msk.bf16.mxu1 %vm32_vm2, %v10492_v59 }
 0x4ce   :  { %7004 = vmatmul.mubr.msk.bf16.gmra.mrb[60].mxu1 %vm32_vm2, %v10505_v56 }
 0x4cf   :  { %7011 = vmatprep.mubr.msk.bf16.mxu1 %vm32_vm2, %v10088_v4  ;;  %v4442_v4 = vld [vmem:[#allocation3 + $0x108] sm:$0xff] }
 0x4d6   :  { %7012 = vmatmul.mubr.msk.bf16.vlgmr.msra.gmra.mrb[0].mxu1 %vm32_vm2, %v10120_v21  ;;  %v10801_v21 = vpop.permute.xlu1 %4913 }
 0x4d7   :  { %7015 = vmatprep.mubr.msk.bf16.mxu1 %vm32_vm2, %v10122_v24  ;;  %v10803_v24 = vpop.permute.xlu0 %4909 }
 0x4de   :  { %7016 = vmatmul.mubr.msk.bf16.gmra.mrb[4].mxu1 %vm32_vm2, %v10147_v33  ;;  %v10805_v33 = vpop.permute.xlu1 %4917 }
 0x4df   :  { %7019 = vmatprep.mubr.msk.bf16.mxu1 %vm32_vm2, %v10149_v0  ;;  %v10807_v0 = vpop.permute.xlu0 %4921 }
 0x4e6   :  { %7020 = vmatmul.mubr.msk.bf16.gmra.mrb[8].mxu1 %vm32_vm2, %v10173_v62  ;;  %v10809_v62 = vpop.permute.xlu1 %4925 }
 0x4e7   :  { %7023 = vmatprep.mubr.msk.bf16.mxu1 %vm32_vm2, %v10175_v7  ;;  %v10811_v7 = vpop.permute.xlu0 %4929 }
 0x4ee   :  { %7024 = vmatmul.mubr.msk.bf16.gmra.mrb[12].mxu1 %vm32_vm2, %v10199_v34  ;;  %v10813_v34 = vpop.permute.xlu1 %4933 }
 0x4ef   :  { %7027 = vmatprep.mubr.msk.bf16.mxu1 %vm32_vm2, %v10201_v61  ;;  %v10815_v61 = vpop.permute.xlu0 %4937 }
 0x4f6   :  { %7028 = vmatmul.mubr.msk.bf16.gmra.mrb[16].mxu1 %vm32_vm2, %v10225_v52  ;;  %v10817_v52 = vpop.permute.xlu1 %4941 }
 0x4f7   :  { %7031 = vmatprep.mubr.msk.bf16.mxu1 %vm32_vm2, %v10227_v3  ;;  %v10819_v3 = vpop.permute.xlu0 %4945 }
 0x4fe   :  { %7032 = vmatmul.mubr.msk.bf16.gmra.mrb[20].mxu1 %vm32_vm2, %v10251_v2  ;;  %v10821_v2 = vpop.permute.xlu1 %4949 }
 0x4ff   :  { %7035 = vmatprep.mubr.msk.bf16.mxu1 %vm32_vm2, %v10253_v40  ;;  %v10823_v40 = vpop.permute.xlu0 %4953 }
 0x506   :  { %7036 = vmatmul.mubr.msk.bf16.gmra.mrb[24].mxu1 %vm32_vm2, %v10277_v49  ;;  %v10825_v49 = vpop.permute.xlu1 %4957 }
 0x507   :  { %7039 = vmatprep.mubr.msk.bf16.mxu1 %vm32_vm2, %v10279_v11  ;;  %v10827_v11 = vpop.permute.xlu0 %4961 }
 0x50e   :  { %7040 = vmatmul.mubr.msk.bf16.gmra.mrb[28].mxu1 %vm32_vm2, %v10303_v51  ;;  %v10829_v51 = vpop.permute.xlu1 %4965 }
 0x50f   :  { %7043 = vmatprep.mubr.msk.bf16.mxu1 %vm32_vm2, %v10305_v37  ;;  %13070 = vst [vmem:[#allocation59_spill] sm:$0xff] %v10829_v51  ;;  %v10831_v37 = vpop.permute.xlu0 %4969 }
 0x510   :  { %13071 = vst [vmem:[#allocation36_spill] sm:$0xff] %v10831_v37 }
 0x516   :  { %7044 = vmatmul.mubr.msk.bf16.gmra.mrb[32].mxu1 %vm32_vm2, %v10329_v31  ;;  %v10833_v31 = vpop.permute.xlu1 %4973 }
 0x517   :  { %7047 = vmatprep.mubr.msk.bf16.mxu1 %vm32_vm2, %v10331_v63  ;;  %13072 = vst [vmem:[#allocation37_spill] sm:$0xff] %v10833_v31  ;;  %v10835_v63 = vpop.permute.xlu0 %4977 }
 0x518   :  { %13073 = vst [vmem:[#allocation39_spill] sm:$0xff] %v10835_v63 }
 0x51e   :  { %7048 = vmatmul.mubr.msk.bf16.gmra.mrb[36].mxu1 %vm32_vm2, %v10355_v41  ;;  %v10837_v41 = vpop.permute.xlu1 %4981 }
 0x51f   :  { %7051 = vmatprep.mubr.msk.bf16.mxu1 %vm32_vm2, %v10357_v1  ;;  %13074 = vst [vmem:[#allocation60_spill] sm:$0xff] %v10837_v41  ;;  %v10839_v1 = vpop.permute.xlu0 %4985 }
 0x520   :  { %13075 = vst [vmem:[#allocation42_spill] sm:$0xff] %v10839_v1 }
 0x526   :  { %7052 = vmatmul.mubr.msk.bf16.gmra.mrb[40].mxu1 %vm32_vm2, %v10381_v44  ;;  %v10841_v44 = vpop.permute.xlu1 %4989 }
 0x527   :  { %7055 = vmatprep.mubr.msk.bf16.mxu1 %vm32_vm2, %v10383_v23  ;;  %13076 = vst [vmem:[#allocation43_spill] sm:$0xff] %v10841_v44  ;;  %v10843_v23 = vpop.permute.xlu0 %4993 }
 0x528   :  { %13077 = vst [vmem:[#allocation45_spill] sm:$0xff] %v10843_v23 }
 0x52b   :  { %v10861_v9 = vpop.permute.xlu0 %5001 }
 0x52c   :  { %13079 = vst [vmem:[#allocation67_spill] sm:$0xff] %v10861_v9 }
 0x52e   :  { %7056 = vmatmul.mubr.msk.bf16.gmra.mrb[44].mxu1 %vm32_vm2, %v10413_v12 }
 0x52f   :  { %7059 = vmatprep.mubr.msk.bf16.mxu1 %vm32_vm2, %v10415_v38  ;;  %v10879_v19 = vpop.permute.xlu0 %5009 }
 0x530   :  { %13081 = vst [vmem:[#allocation54_spill] sm:$0xff] %v10879_v19 }
 0x533   :  { %v10896_v54 = vpop.permute.xlu0 %5017 }
 0x534   :  { %13083 = vst [vmem:[#allocation58_spill] sm:$0xff] %v10896_v54 }
 0x536   :  { %7060 = vmatmul.mubr.msk.bf16.gmra.mrb[48].mxu1 %vm32_vm2, %v10451_v43 }
 0x537   :  { %7063 = vmatprep.mubr.msk.bf16.mxu1 %vm32_vm2, %v10453_v27 }
 0x53e   :  { %7064 = vmatmul.mubr.msk.bf16.gmra.mrb[52].mxu1 %vm32_vm2, %v10490_v45  ;;  %v10853_v45 = vpop.permute.xlu1 %4997 }
 0x53f   :  { %7067 = vmatprep.mubr.msk.bf16.mxu1 %vm32_vm2, %v10492_v59  ;;  %13078 = vst [vmem:[#allocation49_spill] sm:$0xff] %v10853_v45 }
 0x542   :  { %v10870_v28 = vpop.permute.xlu1 %5005 }
 0x543   :  { %13080 = vst [vmem:[#allocation50_spill] sm:$0xff] %v10870_v28 }
 0x546   :  { %7068 = vmatmul.mubr.msk.bf16.gmra.mrb[56].mxu1 %vm32_vm2, %v10505_v56  ;;  %v10891_v10 = vpop.permute.xlu1 %5013 }
 0x547   :  { %7071 = vmatprep.mubr.msk.bf16.mxu1 %vm32_vm2, %v10512_v53  ;;  %13082 = vst [vmem:[#allocation56_spill] sm:$0xff] %v10891_v10 }
 0x54e   :  { %7072 = vmatmul.mubr.msk.bf16.gmra.mrb[60].mxu1 %vm32_vm2, %v4442_v4 }
 0x5a9   :  { %v10845_v12 = vpop.f32.mrb[0].mxu1 }
 0x5aa   :  { %v10847_v38 = vpop.f32.mrb[1].mxu1  ;;  %v5166_v56 = vmul.f32 %v10845_v12, %v10805_v33 }
 0x5ab   :  { %v5164_v43 = vmul.f32 %v10803_v24, %v10847_v38  ;;  %v10851_v27 = vpop.f32.mrb[2].mxu1 }
 0x5ac   :  { %v10855_v59 = vpop.f32.mrb[3].mxu1  ;;  %v5167_v18 = vmul.f32 %v10851_v27, %v10807_v0  ;;  %v5231_v13 = vsel %vm30_vm3, %v5166_v56, 0.0 }
 0x5ad   :  { %v5165_v53 = vmul.f32 %v10801_v21, %v10855_v59  ;;  %v5228_v47 = vsel %vm30_vm3, %v5164_v43, 0.0 }
 0x5ae   :  { %v5233_v32 = vsel %vm30_vm3, %v5167_v18, 0.0 }
 0x5af   :  { %v5229_v26 = vsel %vm30_vm3, %v5165_v53, 0.0 }
 0x5b0   :  { %v5230_v36 = vadd.f32 %v5229_v26, %v5228_v47  ;;  %v10912_v47 = vpop.permute.xlu1 %5021 }
 0x5b1   :  { %v10868_v50 = vpop.f32.mrb[4].mxu1  ;;  %13084 = vst [vmem:[#allocation61_spill] sm:$0xff] %v10912_v47 }
 0x5b2   :  { %v5232_v8 = vadd.f32 %v5231_v13, %v5230_v36  ;;  %v10872_v17 = vpop.f32.mrb[5].mxu1  ;;  %v5170_v15 = vmul.f32 %v10868_v50, %v10813_v34  ;;  %v10917_v13 = vpop.permute.xlu0 %5025 }
 0x5b3   :  { %v5168_v30 = vmul.f32 %v10809_v62, %v10872_v17  ;;  %v10877_v42 = vpop.f32.mrb[6].mxu1  ;;  %13085 = vst [vmem:[#allocation63_spill] sm:$0xff] %v10917_v13 }
 0x5b4   :  { %v5234_v22 = vadd.f32 %v5233_v32, %v5232_v8  ;;  %v10881_v60 = vpop.f32.mrb[7].mxu1  ;;  %v5171_v57 = vmul.f32 %v10877_v42, %v10815_v61  ;;  %v5239_v48 = vsel %vm30_vm3, %v5170_v15, 0.0 }
 0x5b5   :  { %v5235_v58 = vsel %vm30_vm3, %v5168_v30, 0.0  ;;  %v5169_v35 = vmul.f32 %v10811_v7, %v10881_v60 }
 0x5b6   :  { %v5236_v39 = vadd.f32 %v5235_v58, %v5234_v22  ;;  %v5241_v14 = vsel %vm30_vm3, %v5171_v57, 0.0  ;;  %v10929_v57 = vpop.permute.xlu1 %5029 }
 0x5b7   :  { %v5237_v29 = vsel %vm30_vm3, %v5169_v35, 0.0  ;;  %13086 = vst [vmem:[#allocation65_spill] sm:$0xff] %v10929_v57 }
 0x5b8   :  { %v5238_v55 = vadd.f32 %v5237_v29, %v5236_v39 }
 0x5b9   :  { %v10894_v46 = vpop.f32.mrb[8].mxu1 }
 0x5ba   :  { %v5240_v25 = vadd.f32 %v5239_v48, %v5238_v55  ;;  %v10898_v16 = vpop.f32.mrb[9].mxu1  ;;  %v5174_v43 = vmul.f32 %v10894_v46, %v10821_v2 }
 0x5bb   :  { %v5172_v6 = vmul.f32 %v10817_v52, %v10898_v16  ;;  %v10903_v20 = vpop.f32.mrb[10].mxu1 }
 0x5bc   :  { %v5242_v5 = vadd.f32 %v5241_v14, %v5240_v25  ;;  %v10905_v4 = vpop.f32.mrb[11].mxu1  ;;  %v5175_v26 = vmul.f32 %v10903_v20, %v10823_v40  ;;  %v5247_v32 = vsel %vm30_vm3, %v5174_v43, 0.0 }
 0x5bd   :  { %v5243_v56 = vsel %vm30_vm3, %v5172_v6, 0.0  ;;  %v5173_v53 = vmul.f32 %v10819_v3, %v10905_v4  ;;  %v10938_v6 = vpop.permute.xlu0 %5033 }
 0x5be   :  { %v5244_v18 = vadd.f32 %v5243_v56, %v5242_v5  ;;  %v5249_v58 = vsel %vm30_vm3, %v5175_v26, 0.0  ;;  %13087 = vst [vmem:[#allocation69_spill] sm:$0xff] %v10938_v6 }
 0x5bf   :  { %v5245_v36 = vsel %vm30_vm3, %v5173_v53, 0.0 }
 0x5c0   :  { %v5246_v8 = vadd.f32 %v5245_v36, %v5244_v18  ;;  %v10946_v36 = vpop.permute.xlu1 %5037 }
 0x5c1   :  { %v10920_v30 = vpop.f32.mrb[12].mxu1  ;;  %13088 = vst [vmem:[#allocation70_spill] sm:$0xff] %v10946_v36 }
 0x5c2   :  { %v5248_v22 = vadd.f32 %v5247_v32, %v5246_v8  ;;  %v10922_v15 = vpop.f32.mrb[13].mxu1  ;;  %v5178_v48 = vmul.f32 %v10920_v30, %v10829_v51 }
 0x5c3   :  { %v5176_v35 = vmul.f32 %v10825_v49, %v10922_v15  ;;  %v10927_v39 = vpop.f32.mrb[14].mxu1 }
 0x5c4   :  { %v5250_v29 = vadd.f32 %v5249_v58, %v5248_v22  ;;  %v10931_v55 = vpop.f32.mrb[15].mxu1  ;;  %v5179_v43 = vmul.f32 %v10927_v39, %v10831_v37  ;;  %v5255_v18 = vsel %vm30_vm3, %v5178_v48, 0.0 }
 0x5c5   :  { %v5251_v25 = vsel %vm30_vm3, %v5176_v35, 0.0  ;;  %v5177_v14 = vmul.f32 %v10827_v11, %v10931_v55 }
 0x5c6   :  { %v5252_v5 = vadd.f32 %v5251_v25, %v5250_v29  ;;  %v5257_v22 = vsel %vm30_vm3, %v5179_v43, 0.0  ;;  %v10955_v29 = vpop.permute.xlu0 %5041 }
 0x5c7   :  { %v5253_v56 = vsel %vm30_vm3, %v5177_v14, 0.0  ;;  %13090 = vst [vmem:[#allocation76_spill] sm:$0xff] %v10955_v29 }
 0x5c8   :  { %v5254_v53 = vadd.f32 %v5253_v56, %v5252_v5 }
 0x5c9   :  { %v10944_v26 = vpop.f32.mrb[16].mxu1 }
 0x5ca   :  { %v5256_v8 = vadd.f32 %v5255_v18, %v5254_v53  ;;  %v10948_v32 = vpop.f32.mrb[17].mxu1  ;;  %v5182_v48 = vmul.f32 %v10944_v26, %v10837_v41  ;;  %v10972_v51 = vpop.permute.xlu0 %5049 }
 0x5cb   :  { %v5180_v58 = vmul.f32 %v10833_v31, %v10948_v32  ;;  %v10953_v35 = vpop.f32.mrb[18].mxu1  ;;  %v10967_v31 = vpop.permute.xlu1 %5045  ;;  %13093 = vst [vmem:[#allocation83_spill] sm:$0xff] %v10972_v51 }
 0x5cc   :  { %13089 = vst [vmem:[#allocation74_spill] sm:$0xff] %v10953_v35  ;;  %v5258_v25 = vadd.f32 %v5257_v22, %v5256_v8  ;;  %v10957_v14 = vpop.f32.mrb[19].mxu1  ;;  %v5183_v43 = vmul.f32 %v10953_v35, %v10839_v1  ;;  %13091 = vst [vmem:[#allocation78_spill] sm:$0xff] %v10967_v31  ;;  %v5263_v8 = vsel %vm30_vm3, %v5182_v48, 0.0 }
 0x5cd   :  { %v5259_v5 = vsel %vm30_vm3, %v5180_v58, 0.0  ;;  %v5181_v56 = vmul.f32 %v10835_v63, %v10957_v14 }
 0x5ce   :  { %v5260_v53 = vadd.f32 %v5259_v5, %v5258_v25  ;;  %v5265_v63 = vsel %vm30_vm3, %v5183_v43, 0.0 }
 0x5cf   :  { %v5261_v18 = vsel %vm30_vm3, %v5181_v56, 0.0 }
 0x5d0   :  { %v5262_v37 = vadd.f32 %v5261_v18, %v5260_v53  ;;  %v10988_v18 = vpop.permute.xlu1 %5053 }
 0x5d1   :  { %v10970_v22 = vpop.f32.mrb[20].mxu1  ;;  %13096 = vst [vmem:[#allocation89_spill] sm:$0xff] %v10988_v18 }
 0x5d2   :  { %13092 = vst [vmem:[#allocation81_spill] sm:$0xff] %v10970_v22  ;;  %v5264_v41 = vadd.f32 %v5263_v8, %v5262_v37  ;;  %v10974_v58 = vpop.f32.mrb[21].mxu1  ;;  %v5186_v48 = vmul.f32 %v10970_v22, %v10853_v45 }
 0x5d3   :  { %13094 = vst [vmem:[#allocation94_spill] sm:$0xff] %v10974_v58  ;;  %v5184_v25 = vmul.f32 %v10841_v44, %v10974_v58  ;;  %v10979_v5 = vpop.f32.mrb[22].mxu1  ;;  %v10993_v58 = vpop.permute.xlu0 %5057 }
 0x5d4   :  { %13095 = vst [vmem:[#allocation85_spill] sm:$0xff] %v10979_v5  ;;  %v5266_v56 = vadd.f32 %v5265_v63, %v5264_v41  ;;  %v10981_v1 = vpop.f32.mrb[23].mxu1  ;;  %v5187_v43 = vmul.f32 %v10979_v5, %v10861_v9  ;;  %13097 = vst [vmem:[#allocation90_spill] sm:$0xff] %v10993_v58  ;;  %v5271_v41 = vsel %vm30_vm3, %v5186_v48, 0.0  ;;  %v11005_v9 = vpop.permute.xlu1 %5061 }
 0x5d5   :  { %v5267_v53 = vsel %vm30_vm3, %v5184_v25, 0.0  ;;  %v5185_v37 = vmul.f32 %v10843_v23, %v10981_v1  ;;  %13101 = vst [vmem:[#allocation48_spill] sm:$0xff] %v11005_v9 }
 0x5d6   :  { %v5268_v8 = vadd.f32 %v5267_v53, %v5266_v56  ;;  %v5273_v23 = vsel %vm30_vm3, %v5187_v43, 0.0 }
 0x5d7   :  { %v5269_v44 = vsel %vm30_vm3, %v5185_v37, 0.0 }
 0x5d8   :  { %v5270_v63 = vadd.f32 %v5269_v44, %v5268_v8  ;;  %v11022_v22 = vpop.permute.xlu1 %5069 }
 0x5d9   :  { %v10996_v35 = vpop.f32.mrb[24].mxu1  ;;  %13103 = vst [vmem:[#allocation52_spill] sm:$0xff] %v11022_v22 }
 0x5da   :  { %13098 = vst [vmem:[#allocation93_spill] sm:$0xff] %v10996_v35  ;;  %v5272_v45 = vadd.f32 %v5271_v41, %v5270_v63  ;;  %v10998_v25 = vpop.f32.mrb[25].mxu1  ;;  %v5190_v44 = vmul.f32 %v10996_v35, %v10891_v10  ;;  %v11014_v63 = vpop.permute.xlu0 %5065 }
 0x5db   :  { %13099 = vst [vmem:[#allocation38_spill] sm:$0xff] %v10998_v25  ;;  %v5188_v56 = vmul.f32 %v10870_v28, %v10998_v25  ;;  %v11003_v53 = vpop.f32.mrb[26].mxu1  ;;  %13102 = vst [vmem:[#allocation44_spill] sm:$0xff] %v11014_v63 }
 0x5dc   :  { %13100 = vst [vmem:[#allocation46_spill] sm:$0xff] %v11003_v53  ;;  %v5274_v37 = vadd.f32 %v5273_v23, %v5272_v45  ;;  %v11007_v5 = vpop.f32.mrb[27].mxu1  ;;  %v5191_v41 = vmul.f32 %v11003_v53, %v10896_v54  ;;  %v5279_v23 = vsel %vm30_vm3, %v5190_v44, 0.0 }
 0x5dd   :  { %v5275_v48 = vsel %vm30_vm3, %v5188_v56, 0.0  ;;  %v5189_v8 = vmul.f32 %v10879_v19, %v11007_v5 }
 0x5de   :  { %v5276_v43 = vadd.f32 %v5275_v48, %v5274_v37  ;;  %v5281_v19 = vsel %vm30_vm3, %v5191_v41, 0.0  ;;  %v11031_v54 = vpop.permute.xlu0 %5073 }
 0x5df   :  { %v5277_v28 = vsel %vm30_vm3, %v5189_v8, 0.0  ;;  %13106 = vst [vmem:[#allocation62_spill] sm:$0xff] %v11031_v54 }
 0x5e0   :  { %v5278_v25 = vadd.f32 %v5277_v28, %v5276_v43 }
 0x5e1   :  { %v11020_v45 = vpop.f32.mrb[28].mxu1 }
 0x5e2   :  { %v5280_v10 = vadd.f32 %v5279_v23, %v5278_v25  ;;  %v11024_v56 = vpop.f32.mrb[29].mxu1  ;;  %v5194_v44 = vmul.f32 %v11020_v45, %v10929_v57  ;;  %v11048_v35 = vpop.permute.xlu0 %5081 }
 0x5e3   :  { %13104 = vst [vmem:[#allocation55_spill] sm:$0xff] %v11024_v56  ;;  %v5192_v37 = vmul.f32 %v10912_v47, %v11024_v56  ;;  %v11029_v48 = vpop.f32.mrb[30].mxu1  ;;  %v11043_v56 = vpop.permute.xlu1 %5077  ;;  %13109 = vst [vmem:[#allocation68_spill] sm:$0xff] %v11048_v35 }
 0x5e4   :  { %13105 = vst [vmem:[#allocation51_spill] sm:$0xff] %v11029_v48  ;;  %v5282_v8 = vadd.f32 %v5281_v19, %v5280_v10  ;;  %v11033_v28 = vpop.f32.mrb[31].mxu1  ;;  %v5195_v41 = vmul.f32 %v11029_v48, %v10938_v6  ;;  %13107 = vst [vmem:[#allocation57_spill] sm:$0xff] %v11043_v56  ;;  %v5287_v19 = vsel %vm30_vm3, %v5194_v44, 0.0 }
 0x5e5   :  { %v5283_v43 = vsel %vm30_vm3, %v5192_v37, 0.0  ;;  %v5193_v25 = vmul.f32 %v10917_v13, %v11033_v28 }
 0x5e6   :  { %v5284_v23 = vadd.f32 %v5283_v43, %v5282_v8  ;;  %v5289_v13 = vsel %vm30_vm3, %v5195_v41, 0.0 }
 0x5e7   :  { %v5285_v47 = vsel %vm30_vm3, %v5193_v25, 0.0 }
 0x5e8   :  { %v5286_v53 = vadd.f32 %v5285_v47, %v5284_v23  ;;  %v11064_v23 = vpop.permute.xlu1 %5085 }
 0x5e9   :  { %v11046_v10 = vpop.f32.mrb[32].mxu1  ;;  %13113 = vst [vmem:[#allocation71_spill] sm:$0xff] %v11064_v23 }
 0x5ea   :  { %13108 = vst [vmem:[#allocation66_spill] sm:$0xff] %v11046_v10  ;;  %v5288_v57 = vadd.f32 %v5287_v19, %v5286_v53  ;;  %v11050_v37 = vpop.f32.mrb[33].mxu1  ;;  %v5198_v47 = vmul.f32 %v11046_v10, %v10967_v31 }
 0x5eb   :  { %13110 = vst [vmem:[#allocation64_spill] sm:$0xff] %v11050_v37  ;;  %v5196_v8 = vmul.f32 %v10946_v36, %v11050_v37  ;;  %v11055_v43 = vpop.f32.mrb[34].mxu1  ;;  %v11069_v37 = vpop.permute.xlu0 %5089 }
 0x5ec   :  { %13111 = vst [vmem:[#allocation72_spill] sm:$0xff] %v11055_v43  ;;  %v5290_v25 = vadd.f32 %v5289_v13, %v5288_v57  ;;  %v11057_v6 = vpop.f32.mrb[35].mxu1  ;;  %v5199_v41 = vmul.f32 %v11055_v43, %v10972_v51  ;;  %13114 = vst [vmem:[#allocation73_spill] sm:$0xff] %v11069_v37  ;;  %v5295_v57 = vsel %vm30_vm3, %v5198_v47, 0.0  ;;  %v11081_v51 = vpop.permute.xlu1 %5093 }
 0x5ed   :  { %13112 = vst [vmem:[#allocation75_spill] sm:$0xff] %v11057_v6  ;;  %v5291_v44 = vsel %vm30_vm3, %v5196_v8, 0.0  ;;  %v5197_v53 = vmul.f32 %v10955_v29, %v11057_v6  ;;  %13118 = vst [vmem:[#allocation80_spill] sm:$0xff] %v11081_v51 }
 0x5ee   :  { %v5292_v19 = vadd.f32 %v5291_v44, %v5290_v25  ;;  %v5297_v29 = vsel %vm30_vm3, %v5199_v41, 0.0 }
 0x5ef   :  { %v5293_v36 = vsel %vm30_vm3, %v5197_v53, 0.0 }
 0x5f0   :  { %v5294_v13 = vadd.f32 %v5293_v36, %v5292_v19  ;;  %v11098_v10 = vpop.permute.xlu1 %5101 }
 0x5f1   :  { %v11072_v48 = vpop.f32.mrb[36].mxu1  ;;  %13122 = vst [vmem:[#allocation87_spill] sm:$0xff] %v11098_v10 }
 0x5f2   :  { %13115 = vst [vmem:[#allocation79_spill] sm:$0xff] %v11072_v48  ;;  %v5296_v31 = vadd.f32 %v5295_v57, %v5294_v13  ;;  %v11074_v8 = vpop.f32.mrb[37].mxu1  ;;  %v5202_v36 = vmul.f32 %v11072_v48, %v11005_v9  ;;  %v11090_v13 = vpop.permute.xlu0 %5097 }
 0x5f3   :  { %13116 = vst [vmem:[#allocation82_spill] sm:$0xff] %v11074_v8  ;;  %v5200_v25 = vmul.f32 %v10988_v18, %v11074_v8  ;;  %v11079_v44 = vpop.f32.mrb[38].mxu1  ;;  %13120 = vst [vmem:[#allocation88_spill] sm:$0xff] %v11090_v13 }
 0x5f4   :  { %13117 = vst [vmem:[#allocation77_spill] sm:$0xff] %v11079_v44  ;;  %v5298_v53 = vadd.f32 %v5297_v29, %v5296_v31  ;;  %v11083_v43 = vpop.f32.mrb[39].mxu1  ;;  %v5203_v57 = vmul.f32 %v11079_v44, %v11014_v63  ;;  %v5303_v31 = vsel %vm30_vm3, %v5202_v36, 0.0 }
 0x5f5   :  { %13119 = vst [vmem:[#allocation86_spill] sm:$0xff] %v11083_v43  ;;  %v5299_v47 = vsel %vm30_vm3, %v5200_v25, 0.0  ;;  %v5201_v19 = vmul.f32 %v10993_v58, %v11083_v43 }
 0x5f6   :  { %v5300_v41 = vadd.f32 %v5299_v47, %v5298_v53  ;;  %v5305_v58 = vsel %vm30_vm3, %v5203_v57, 0.0  ;;  %v11107_v63 = vpop.permute.xlu0 %5105 }
 0x5f7   :  { %v5301_v18 = vsel %vm30_vm3, %v5201_v19, 0.0  ;;  %13125 = vst [vmem:[#allocation7_spill] sm:$0xff] %v11107_v63 }
 0x5f8   :  { %v5302_v8 = vadd.f32 %v5301_v18, %v5300_v41 }
 0x5f9   :  { %v11096_v29 = vpop.f32.mrb[40].mxu1 }
 0x5fa   :  { %13121 = vst [vmem:[#allocation84_spill] sm:$0xff] %v11096_v29  ;;  %v5304_v9 = vadd.f32 %v5303_v31, %v5302_v8  ;;  %v11100_v25 = vpop.f32.mrb[41].mxu1  ;;  %v5206_v36 = vmul.f32 %v11096_v29, %v11043_v56  ;;  %v11124_v48 = vpop.permute.xlu0 %5113 }
 0x5fb   :  { %13123 = vst [vmem:[#allocation92_spill] sm:$0xff] %v11100_v25  ;;  %v5204_v53 = vmul.f32 %v11022_v22, %v11100_v25  ;;  %v11105_v47 = vpop.f32.mrb[42].mxu1  ;;  %v11119_v25 = vpop.permute.xlu1 %5109  ;;  %13129 = vst [vmem:[#allocation9_spill] sm:$0xff] %v11124_v48 }
 0x5fc   :  { %13124 = vst [vmem:[#allocation91_spill] sm:$0xff] %v11105_v47  ;;  %v5306_v19 = vadd.f32 %v5305_v58, %v5304_v9  ;;  %v11109_v18 = vpop.f32.mrb[43].mxu1  ;;  %v5207_v57 = vmul.f32 %v11105_v47, %v11048_v35  ;;  %13127 = vst [vmem:[#allocation8_spill] sm:$0xff] %v11119_v25  ;;  %v5311_v9 = vsel %vm30_vm3, %v5206_v36, 0.0 }
 0x5fd   :  { %13126 = vst [vmem:[#allocation24_spill] sm:$0xff] %v11109_v18  ;;  %v5307_v41 = vsel %vm30_vm3, %v5204_v53, 0.0  ;;  %v5205_v8 = vmul.f32 %v11031_v54, %v11109_v18 }
 0x5fe   :  { %v5308_v31 = vadd.f32 %v5307_v41, %v5306_v19  ;;  %v5313_v54 = vsel %vm30_vm3, %v5207_v57, 0.0 }
 0x5ff   :  { %v5309_v22 = vsel %vm30_vm3, %v5205_v8, 0.0 }
 0x600   :  { %v5310_v44 = vadd.f32 %v5309_v22, %v5308_v31  ;;  %v11140_v31 = vpop.permute.xlu1 %5117 }
 0x601   :  { %v11122_v58 = vpop.f32.mrb[44].mxu1  ;;  %13133 = vst [vmem:[#allocation11_spill] sm:$0xff] %v11140_v31 }
 0x602   :  { %13128 = vst [vmem:[#allocation29_spill] sm:$0xff] %v11122_v58  ;;  %v5312_v56 = vadd.f32 %v5311_v9, %v5310_v44  ;;  %v11126_v53 = vpop.f32.mrb[45].mxu1  ;;  %v5210_v22 = vmul.f32 %v11122_v58, %v11081_v51 }
 0x603   :  { %13130 = vst [vmem:[#allocation10_spill] sm:$0xff] %v11126_v53  ;;  %v5208_v19 = vmul.f32 %v11064_v23, %v11126_v53  ;;  %v11131_v41 = vpop.f32.mrb[46].mxu1  ;;  %v11145_v53 = vpop.permute.xlu0 %5121 }
 0x604   :  { %13131 = vst [vmem:[#allocation27_spill] sm:$0xff] %v11131_v41  ;;  %v5314_v8 = vadd.f32 %v5313_v54, %v5312_v56  ;;  %v11133_v35 = vpop.f32.mrb[47].mxu1  ;;  %v5211_v57 = vmul.f32 %v11131_v41, %v11090_v13  ;;  %13134 = vst [vmem:[#allocation12_spill] sm:$0xff] %v11145_v53  ;;  %v5319_v56 = vsel %vm30_vm3, %v5210_v22, 0.0  ;;  %v11157_v13 = vpop.permute.xlu1 %5125 }
 0x605   :  { %13132 = vst [vmem:[#allocation30_spill] sm:$0xff] %v11133_v35  ;;  %v5315_v36 = vsel %vm30_vm3, %v5208_v19, 0.0  ;;  %v5209_v44 = vmul.f32 %v11069_v37, %v11133_v35  ;;  %13138 = vst [vmem:[#allocation33_spill] sm:$0xff] %v11157_v13 }
 0x606   :  { %v5316_v9 = vadd.f32 %v5315_v36, %v5314_v8  ;;  %v5321_v37 = vsel %vm30_vm3, %v5211_v57, 0.0 }
 0x607   :  { %v5317_v23 = vsel %vm30_vm3, %v5209_v44, 0.0 }
 0x608   :  { %v5318_v54 = vadd.f32 %v5317_v23, %v5316_v9  ;;  %v11174_v58 = vpop.permute.xlu1 %5133 }
 0x609   :  { %v11148_v47 = vpop.f32.mrb[48].mxu1  ;;  %13142 = vst [vmem:[#allocation16_spill] sm:$0xff] %v11174_v58 }
 0x60a   :  { %13135 = vst [vmem:[#allocation14_spill] sm:$0xff] %v11148_v47  ;;  %v5320_v51 = vadd.f32 %v5319_v56, %v5318_v54  ;;  %v11150_v19 = vpop.f32.mrb[49].mxu1  ;;  %v5214_v23 = vmul.f32 %v11148_v47, %v11119_v25  ;;  %v11166_v54 = vpop.permute.xlu0 %5129 }
 0x60b   :  { %13136 = vst [vmem:[#allocation35_spill] sm:$0xff] %v11150_v19  ;;  %v5212_v8 = vmul.f32 %v11098_v10, %v11150_v19  ;;  %v11155_v36 = vpop.f32.mrb[50].mxu1  ;;  %13140 = vst [vmem:[#allocation17_spill] sm:$0xff] %v11166_v54 }
 0x60c   :  { %13137 = vst [vmem:[#allocation15_spill] sm:$0xff] %v11155_v36  ;;  %v5322_v44 = vadd.f32 %v5321_v37, %v5320_v51  ;;  %v11159_v41 = vpop.f32.mrb[51].mxu1  ;;  %v5215_v56 = vmul.f32 %v11155_v36, %v11124_v48  ;;  %v5327_v51 = vsel %vm30_vm3, %v5214_v23, 0.0 }
 0x60d   :  { %13139 = vst [vmem:[#allocation18_spill] sm:$0xff] %v11159_v41  ;;  %v5323_v22 = vsel %vm30_vm3, %v5212_v8, 0.0  ;;  %v5213_v9 = vmul.f32 %v11107_v63, %v11159_v41 }
 0x60e   :  { %v5324_v57 = vadd.f32 %v5323_v22, %v5322_v44  ;;  %v5329_v63 = vsel %vm30_vm3, %v5215_v56, 0.0  ;;  %v11183_v48 = vpop.permute.xlu0 %5137 }
 0x60f   :  { %v5325_v10 = vsel %vm30_vm3, %v5213_v9, 0.0  ;;  %13145 = vst [vmem:[#allocation41_spill] sm:$0xff] %v11183_v48 }
 0x610   :  { %v5326_v19 = vadd.f32 %v5325_v10, %v5324_v57 }
 0x611   :  { %v11172_v37 = vpop.f32.mrb[52].mxu1 }
 0x612   :  { %13141 = vst [vmem:[#allocation40_spill] sm:$0xff] %v11172_v37  ;;  %v5328_v25 = vadd.f32 %v5327_v51, %v5326_v19  ;;  %v11176_v8 = vpop.f32.mrb[53].mxu1  ;;  %v5218_v23 = vmul.f32 %v11172_v37, %v11157_v13  ;;  %v11200_v47 = vpop.permute.xlu0 %5145 }
 0x613   :  { %13143 = vst [vmem:[#allocation21_spill] sm:$0xff] %v11176_v8  ;;  %v5216_v44 = vmul.f32 %v11140_v31, %v11176_v8  ;;  %v11181_v22 = vpop.f32.mrb[54].mxu1  ;;  %v11195_v8 = vpop.permute.xlu1 %5141  ;;  %13149 = vst [vmem:[#allocation23_spill] sm:$0xff] %v11200_v47 }
 0x614   :  { %13144 = vst [vmem:[#allocation20_spill] sm:$0xff] %v11181_v22  ;;  %v5330_v9 = vadd.f32 %v5329_v63, %v5328_v25  ;;  %v11185_v10 = vpop.f32.mrb[55].mxu1  ;;  %v5219_v56 = vmul.f32 %v11181_v22, %v11166_v54  ;;  %13147 = vst [vmem:[#allocation25_spill] sm:$0xff] %v11195_v8  ;;  %v5335_v63 = vsel %vm30_vm3, %v5218_v23, 0.0 }
 0x615   :  { %13146 = vst [vmem:[#allocation19_spill] sm:$0xff] %v11185_v10  ;;  %v5331_v57 = vsel %vm30_vm3, %v5216_v44, 0.0  ;;  %v5217_v19 = vmul.f32 %v11145_v53, %v11185_v10 }
 0x616   :  { %v5332_v51 = vadd.f32 %v5331_v57, %v5330_v9  ;;  %v5337_v53 = vsel %vm30_vm3, %v5219_v56, 0.0 }
 0x617   :  { %v5333_v31 = vsel %vm30_vm3, %v5217_v19, 0.0 }
 0x618   :  { %v5334_v36 = vadd.f32 %v5333_v31, %v5332_v51  ;;  %v11216_v51 = vpop.permute.xlu1 %5149 }
 0x619   :  { %v11198_v25 = vpop.f32.mrb[56].mxu1  ;;  %13153 = vst [vmem:[#allocation28_spill] sm:$0xff] %v11216_v51 }
 0x61a   :  { %13148 = vst [vmem:[#allocation47_spill] sm:$0xff] %v11198_v25  ;;  %v5336_v13 = vadd.f32 %v5335_v63, %v5334_v36  ;;  %v11202_v44 = vpop.f32.mrb[57].mxu1  ;;  %v5222_v31 = vmul.f32 %v11198_v25, %v11195_v8 }
 0x61b   :  { %13150 = vst [vmem:[#allocation22_spill] sm:$0xff] %v11202_v44  ;;  %v5220_v9 = vmul.f32 %v11174_v58, %v11202_v44  ;;  %v11207_v57 = vpop.f32.mrb[58].mxu1  ;;  %v11221_v44 = vpop.permute.xlu0 %5153 }
 0x61c   :  { %13151 = vst [vmem:[#allocation6_spill] sm:$0xff] %v11207_v57  ;;  %v5338_v19 = vadd.f32 %v5337_v53, %v5336_v13  ;;  %v11209_v54 = vpop.f32.mrb[59].mxu1  ;;  %v5223_v56 = vmul.f32 %v11207_v57, %v11200_v47  ;;  %13154 = vst [vmem:[#allocation26_spill] sm:$0xff] %v11221_v44  ;;  %v5343_v53 = vsel %vm30_vm3, %v5222_v31, 0.0  ;;  %v5158_v47 = vpop.permute.xlu1 %5157 }
 0x61d   :  { %13152 = vst [vmem:[#allocation31_spill] sm:$0xff] %v11209_v54  ;;  %v5339_v23 = vsel %vm30_vm3, %v5220_v9, 0.0  ;;  %v5221_v36 = vmul.f32 %v11183_v48, %v11209_v54 }
 0x61e   :  { %v5340_v63 = vadd.f32 %v5339_v23, %v5338_v19  ;;  %v5345_v48 = vsel %vm30_vm3, %v5223_v56, 0.0 }
 0x61f   :  { %v5341_v58 = vsel %vm30_vm3, %v5221_v36, 0.0 }
 0x620   :  { %v5342_v13 = vadd.f32 %v5341_v58, %v5340_v63 }
 0x621   :  { %v11224_v22 = vpop.f32.mrb[60].mxu1 }
 0x622   :  { %13155 = vst [vmem:[#allocation32_spill] sm:$0xff] %v11224_v22  ;;  %v5344_v8 = vadd.f32 %v5343_v53, %v5342_v13  ;;  %v11226_v9 = vpop.f32.mrb[61].mxu1  ;;  %v5226_v58 = vmul.f32 %v11224_v22, %v5158_v47  ;;  %v5162_v13 = vpop.permute.xlu0 %5161 }
 0x623   :  { %13156 = vst [vmem:[#allocation53_spill] sm:$0xff] %v11226_v9  ;;  %v5224_v19 = vmul.f32 %v11216_v51, %v11226_v9  ;;  %v11231_v23 = vpop.f32.mrb[62].mxu1 }
 0x624   :  { %13157 = vst [vmem:[#allocation13_spill] sm:$0xff] %v11231_v23  ;;  %v5346_v57 = vadd.f32 %v5345_v48, %v5344_v8  ;;  %v11233_v36 = vpop.f32.mrb[63].mxu1  ;;  %v5227_v56 = vmul.f32 %v11231_v23, %v5162_v13  ;;  %v5351_v9 = vsel %vm30_vm3, %v5226_v58, 0.0 }
 0x625   :  { %13158 = vst [vmem:[#allocation34_spill] sm:$0xff] %v11233_v36  ;;  %v5347_v31 = vsel %vm30_vm3, %v5224_v19, 0.0  ;;  %v5225_v63 = vmul.f32 %v11221_v44, %v11233_v36 }
 0x626   :  { %v5348_v53 = vadd.f32 %v5347_v31, %v5346_v57  ;;  %v5353_v48 = vsel %vm30_vm3, %v5227_v56, 0.0 }
 0x627   :  { %v5349_v25 = vsel %vm30_vm3, %v5225_v63, 0.0 }
 0x628   :  { %v5350_v51 = vadd.f32 %v5349_v25, %v5348_v53 }
 0x62a   :  { %v5352_v54 = vadd.f32 %v5351_v9, %v5350_v51 }
 0x62c   :  { %v5354_v8 = vadd.f32 %v5353_v48, %v5352_v54 }
 0x62e   :  { %v5355_v37 = vrot.slane %v5354_v8, 4 }
 0x630   :  { %v5356_v10 = vadd.f32 %v5355_v37, %v5354_v8 }
 0x632   :  { %v5357_v41 = vrot.slane %v5356_v10, 2 }
 0x634   :  { %v5358_v19 = vadd.f32 %v5357_v41, %v5356_v10 }
 0x636   :  { %v5359_v35 = vrot.slane %v5358_v19, 1 }
 0x638   :  { %v5360_v29 = vadd.f32 %v5359_v35, %v5358_v19 }
 0x63a   :  { %v11243_v44 = vmul.f32 0.0034722222, %v5360_v29 }
 0x63c   :  { %v5425_v57 = vsub.f32 %v11224_v22, %v11243_v44  ;;  %v5426_v25 = vsub.f32 %v11231_v23, %v11243_v44  ;;  %v5363_v54 = vsub.f32 %v10847_v38, %v11243_v44  ;;  %v5364_v41 = vsub.f32 %v10855_v59, %v11243_v44 }
 0x63d   :  { %v5365_v35 = vsub.f32 %v10845_v12, %v11243_v44  ;;  %v5366_v29 = vsub.f32 %v10851_v27, %v11243_v44  ;;  %v5368_v58 = vsub.f32 %v10881_v60, %v11243_v44  ;;  %v5369_v56 = vsub.f32 %v10868_v50, %v11243_v44 }
 0x63e   :  { %v11249_v31 = vmul.f32 %v5425_v57, %v5158_v47  ;;  %v11251_v51 = vmul.f32 %v5426_v25, %v5162_v13  ;;  %v5427_v37 = vmul.f32 %v5363_v54, %v10803_v24  ;;  %v5428_v10 = vmul.f32 %v5364_v41, %v10801_v21 }
 0x63f   :  { %v5367_v47 = vsub.f32 %v10872_v17, %v11243_v44  ;;  %v5429_v9 = vmul.f32 %v5365_v35, %v10805_v33  ;;  %v5430_v63 = vmul.f32 %v5366_v29, %v10807_v0  ;;  %v5370_v21 = vsub.f32 %v10877_v42, %v11243_v44 }
 0x640   :  { %v5491_v13 = vmul.f32 %v5427_v37, %v5427_v37  ;;  %v5492_v53 = vmul.f32 %v5428_v10, %v5428_v10  ;;  %v5432_v8 = vmul.f32 %v5368_v58, %v10811_v7  ;;  %v5371_v0 = vsub.f32 %v10898_v16, %v11243_v44 }
 0x641   :  { %v5431_v48 = vmul.f32 %v5367_v47, %v10809_v62  ;;  %v5493_v24 = vmul.f32 %v5429_v9, %v5429_v9  ;;  %v5494_v19 = vmul.f32 %v5430_v63, %v5430_v63  ;;  %v5433_v54 = vmul.f32 %v5369_v56, %v10813_v34 }
 0x642   :  { %v5555_v33 = vsel %vm30_vm3, %v5491_v13, 0.0  ;;  %v5556_v57 = vsel %vm30_vm3, %v5492_v53, 0.0  ;;  %v5372_v29 = vsub.f32 %v10905_v4, %v11243_v44  ;;  %v5434_v7 = vmul.f32 %v5370_v21, %v10815_v61 }
 0x643   :  { %v5557_v25 = vadd.f32 %v5556_v57, %v5555_v33  ;;  %v5495_v41 = vmul.f32 %v5431_v48, %v5431_v48  ;;  %v5558_v62 = vsel %vm30_vm3, %v5493_v24, 0.0  ;;  %v5496_v37 = vmul.f32 %v5432_v8, %v5432_v8 }
 0x644   :  { %v5560_v10 = vsel %vm30_vm3, %v5494_v19, 0.0  ;;  %v5373_v9 = vsub.f32 %v10894_v46, %v11243_v44  ;;  %v5435_v58 = vmul.f32 %v5371_v0, %v10817_v52  ;;  %v5497_v63 = vmul.f32 %v5433_v54, %v5433_v54 }
 0x645   :  { %v5559_v35 = vadd.f32 %v5558_v62, %v5557_v25  ;;  %v5562_v34 = vsel %vm30_vm3, %v5495_v41, 0.0  ;;  %v5374_v53 = vsub.f32 %v10903_v20, %v11243_v44  ;;  %v5436_v56 = vmul.f32 %v5372_v29, %v10819_v3 }
 0x646   :  { %v5498_v48 = vmul.f32 %v5434_v7, %v5434_v7  ;;  %v5564_v61 = vsel %vm30_vm3, %v5496_v37, 0.0  ;;  %v5375_v21 = vsub.f32 %v10922_v15, %v11243_v44  ;;  %v5437_v8 = vmul.f32 %v5373_v9, %v10821_v2 }
 0x647   :  { %v5561_v47 = vadd.f32 %v5560_v10, %v5559_v35  ;;  %v5499_v19 = vmul.f32 %v5435_v58, %v5435_v58  ;;  %v5566_v52 = vsel %vm30_vm3, %v5497_v63, 0.0  ;;  %v5376_v57 = vsub.f32 %v10931_v55, %v11243_v44  ;;  %v13159_v58 = vld [vmem:[#allocation59_spill] sm:$0xff] }
 0x648   :  { %v5438_v25 = vmul.f32 %v5374_v53, %v10823_v40  ;;  %v5500_v0 = vmul.f32 %v5436_v56, %v5436_v56  ;;  %v5568_v3 = vsel %vm30_vm3, %v5498_v48, 0.0  ;;  %v5377_v41 = vsub.f32 %v10920_v30, %v11243_v44  ;;  %v13160_v56 = vld [vmem:[#allocation36_spill] sm:$0xff] }
 0x649   :  { %v5563_v13 = vadd.f32 %v5562_v34, %v5561_v47  ;;  %v5439_v62 = vmul.f32 %v5375_v21, %v10825_v49  ;;  %v5501_v35 = vmul.f32 %v5437_v8, %v5437_v8  ;;  %v5570_v2 = vsel %vm30_vm3, %v5499_v19, 0.0  ;;  %v13161_v8 = vld [vmem:[#allocation37_spill] sm:$0xff] }
 0x64a   :  { %v5378_v7 = vsub.f32 %v10927_v39, %v11243_v44  ;;  %v5440_v37 = vmul.f32 %v5376_v57, %v10827_v11  ;;  %v5502_v10 = vmul.f32 %v5438_v25, %v5438_v25  ;;  %v5572_v40 = vsel %vm30_vm3, %v5500_v0, 0.0  ;;  %v13162_v25 = vld [vmem:[#allocation74_spill] sm:$0xff] }
 0x64b   :  { %v5565_v24 = vadd.f32 %v5564_v61, %v5563_v13  ;;  %v5379_v9 = vsub.f32 %v10948_v32, %v11243_v44  ;;  %v5441_v63 = vmul.f32 %v5377_v41, %v13159_v58  ;;  %v5503_v34 = vmul.f32 %v5439_v62, %v5439_v62  ;;  %v13166_v58 = vld [vmem:[#allocation42_spill] sm:$0xff] }
 0x64c   :  { %v5574_v49 = vsel %vm30_vm3, %v5501_v35, 0.0  ;;  %v5380_v53 = vsub.f32 %v10957_v14, %v11243_v44  ;;  %v5442_v48 = vmul.f32 %v5378_v7, %v13160_v56  ;;  %v5504_v61 = vmul.f32 %v5440_v37, %v5440_v37  ;;  %v13165_v7 = vld [vmem:[#allocation60_spill] sm:$0xff] }
 0x64d   :  { %v5567_v33 = vadd.f32 %v5566_v52, %v5565_v24  ;;  %v5576_v11 = vsel %vm30_vm3, %v5502_v10, 0.0  ;;  %v5381_v21 = vsub.f32 %v10944_v26, %v11243_v44  ;;  %v5443_v19 = vmul.f32 %v5379_v9, %v13161_v8  ;;  %v13169_v8 = vld [vmem:[#allocation85_spill] sm:$0xff] }
 0x64e   :  { %v5505_v52 = vmul.f32 %v5441_v63, %v5441_v63  ;;  %v5382_v0 = vsub.f32 %v13162_v25, %v11243_v44  ;;  %v5506_v41 = vmul.f32 %v5442_v48, %v5442_v48  ;;  %v5580_v62 = vsel %vm30_vm3, %v5504_v61, 0.0  ;;  %v13168_v48 = vld [vmem:[#allocation43_spill] sm:$0xff] }
 0x64f   :  { %v5569_v54 = vadd.f32 %v5568_v3, %v5567_v33  ;;  %v5578_v33 = vsel %vm30_vm3, %v5503_v34, 0.0  ;;  %v13163_v3 = vld [vmem:[#allocation39_spill] sm:$0xff]  ;;  %v5445_v37 = vmul.f32 %v5381_v21, %v13165_v7  ;;  %v5507_v10 = vmul.f32 %v5443_v19, %v5443_v19 }
 0x650   :  { %v5384_v9 = vsub.f32 %v10981_v1, %v11243_v44  ;;  %v5446_v63 = vmul.f32 %v5382_v0, %v13166_v58  ;;  %v5386_v19 = vsub.f32 %v13169_v8, %v11243_v44 }
 0x651   :  { %v5571_v29 = vadd.f32 %v5570_v2, %v5569_v54  ;;  %v5444_v54 = vmul.f32 %v5380_v53, %v13163_v3  ;;  %v13164_v2 = vld [vmem:[#allocation94_spill] sm:$0xff]  ;;  %v13167_v53 = vld [vmem:[#allocation81_spill] sm:$0xff] }
 0x652   :  { %v5385_v56 = vsub.f32 %v13167_v53, %v11243_v44 }
 0x653   :  { %v5573_v47 = vadd.f32 %v5572_v40, %v5571_v29  ;;  %v5383_v29 = vsub.f32 %v13164_v2, %v11243_v44  ;;  %v5582_v40 = vsel %vm30_vm3, %v5505_v52, 0.0  ;;  %v5508_v34 = vmul.f32 %v5444_v54, %v5444_v54  ;;  %v13170_v52 = vld [vmem:[#allocation45_spill] sm:$0xff]  ;;  %v13171_v54 = vld [vmem:[#allocation38_spill] sm:$0xff] }
 0x655   :  { %v5575_v13 = vadd.f32 %v5574_v49, %v5573_v47  ;;  %v5584_v49 = vsel %vm30_vm3, %v5506_v41, 0.0  ;;  %v5447_v61 = vmul.f32 %v5383_v29, %v13168_v48  ;;  %v5588_v0 = vsel %vm30_vm3, %v5508_v34, 0.0  ;;  %v13174_v34 = vld [vmem:[#allocation93_spill] sm:$0xff] }
 0x656   :  { %v5387_v41 = vsub.f32 %v13171_v54, %v11243_v44 }
 0x657   :  { %v5577_v24 = vadd.f32 %v5576_v11, %v5575_v13  ;;  %v5509_v11 = vmul.f32 %v5445_v37, %v5445_v37  ;;  %v5511_v7 = vmul.f32 %v5447_v61, %v5447_v61 }
 0x659   :  { %v5579_v57 = vadd.f32 %v5578_v33, %v5577_v24  ;;  %v5586_v24 = vsel %vm30_vm3, %v5507_v10, 0.0  ;;  %v5448_v33 = vmul.f32 %v5384_v9, %v13170_v52  ;;  %v5590_v29 = vsel %vm30_vm3, %v5509_v11, 0.0  ;;  %v13176_v11 = vld [vmem:[#allocation46_spill] sm:$0xff] }
 0x65a   :  { %v5388_v10 = vsub.f32 %v11007_v5, %v11243_v44  ;;  %v13177_v52 = vld [vmem:[#allocation54_spill] sm:$0xff] }
 0x65b   :  { %v5581_v35 = vadd.f32 %v5580_v62, %v5579_v57  ;;  %v5510_v57 = vmul.f32 %v5446_v63, %v5446_v63  ;;  %v13172_v62 = vld [vmem:[#allocation49_spill] sm:$0xff]  ;;  %v5512_v58 = vmul.f32 %v5448_v33, %v5448_v33 }
 0x65d   :  { %v5583_v47 = vadd.f32 %v5582_v40, %v5581_v35  ;;  %v5449_v35 = vmul.f32 %v5385_v56, %v13172_v62  ;;  %v13173_v40 = vld [vmem:[#allocation67_spill] sm:$0xff]  ;;  %v5592_v9 = vsel %vm30_vm3, %v5510_v57, 0.0  ;;  %v5594_v56 = vsel %vm30_vm3, %v5511_v7, 0.0 }
 0x65e   :  { %v13178_v57 = vld [vmem:[#allocation55_spill] sm:$0xff]  ;;  %v5392_v7 = vsub.f32 %v11033_v28, %v11243_v44 }
 0x65f   :  { %v5585_v13 = vadd.f32 %v5584_v49, %v5583_v47  ;;  %v5450_v47 = vmul.f32 %v5386_v19, %v13173_v40  ;;  %v5389_v49 = vsub.f32 %v13174_v34, %v11243_v44  ;;  %v5596_v19 = vsel %vm30_vm3, %v5512_v58, 0.0 }
 0x660   :  { %v5391_v62 = vsub.f32 %v13178_v57, %v11243_v44  ;;  %v5393_v58 = vsub.f32 %v11020_v45, %v11243_v44 }
 0x661   :  { %v5587_v21 = vadd.f32 %v5586_v24, %v5585_v13  ;;  %v13175_v13 = vld [vmem:[#allocation50_spill] sm:$0xff]  ;;  %v5513_v24 = vmul.f32 %v5449_v35, %v5449_v35 }
 0x662   :  { %v5451_v48 = vmul.f32 %v5387_v41, %v13175_v13 }
 0x663   :  { %v5589_v3 = vadd.f32 %v5588_v0, %v5587_v21  ;;  %v5390_v21 = vsub.f32 %v13176_v11, %v11243_v44  ;;  %v5452_v0 = vmul.f32 %v5388_v10, %v13177_v52  ;;  %v5598_v41 = vsel %vm30_vm3, %v5513_v24, 0.0  ;;  %v13182_v24 = vld [vmem:[#allocation51_spill] sm:$0xff] }
 0x664   :  { %v5515_v40 = vmul.f32 %v5451_v48, %v5451_v48 }
 0x665   :  { %v5591_v37 = vadd.f32 %v5590_v29, %v5589_v3  ;;  %v5514_v3 = vmul.f32 %v5450_v47, %v5450_v47  ;;  %v13179_v29 = vld [vmem:[#allocation56_spill] sm:$0xff]  ;;  %v5516_v13 = vmul.f32 %v5452_v0, %v5452_v0 }
 0x667   :  { %v5593_v63 = vadd.f32 %v5592_v9, %v5591_v37  ;;  %v5453_v37 = vmul.f32 %v5389_v49, %v13179_v29  ;;  %v13180_v9 = vld [vmem:[#allocation58_spill] sm:$0xff]  ;;  %v5600_v10 = vsel %vm30_vm3, %v5514_v3, 0.0  ;;  %v5602_v49 = vsel %vm30_vm3, %v5515_v40, 0.0  ;;  %v13184_v3 = vld [vmem:[#allocation64_spill] sm:$0xff] }
 0x668   :  { %v5396_v40 = vsub.f32 %v11057_v6, %v11243_v44 }
 0x669   :  { %v5595_v61 = vadd.f32 %v5594_v56, %v5593_v63  ;;  %v5454_v63 = vmul.f32 %v5390_v21, %v13180_v9  ;;  %v13181_v56 = vld [vmem:[#allocation61_spill] sm:$0xff]  ;;  %v5517_v52 = vmul.f32 %v5453_v37, %v5453_v37  ;;  %v5604_v21 = vsel %vm30_vm3, %v5516_v13, 0.0  ;;  %v13187_v13 = vld [vmem:[#allocation66_spill] sm:$0xff] }
 0x66a   :  { %v13185_v9 = vld [vmem:[#allocation65_spill] sm:$0xff] }
 0x66b   :  { %v5597_v33 = vadd.f32 %v5596_v19, %v5595_v61  ;;  %v5455_v61 = vmul.f32 %v5391_v62, %v13181_v56  ;;  %v5394_v19 = vsub.f32 %v13182_v24, %v11243_v44  ;;  %v5606_v62 = vsel %vm30_vm3, %v5517_v52, 0.0  ;;  %v13189_v52 = vld [vmem:[#allocation72_spill] sm:$0xff] }
 0x66d   :  { %v5599_v35 = vadd.f32 %v5598_v41, %v5597_v33  ;;  %v13183_v33 = vld [vmem:[#allocation63_spill] sm:$0xff]  ;;  %v5518_v41 = vmul.f32 %v5454_v63, %v5454_v63  ;;  %v5519_v23 = vmul.f32 %v5455_v61, %v5455_v61 }
 0x66e   :  { %v5456_v29 = vmul.f32 %v5392_v7, %v13183_v33  ;;  %v13188_v33 = vld [vmem:[#allocation70_spill] sm:$0xff] }
 0x66f   :  { %v5601_v47 = vadd.f32 %v5600_v10, %v5599_v35  ;;  %v5395_v35 = vsub.f32 %v13184_v3, %v11243_v44  ;;  %v5457_v10 = vmul.f32 %v5393_v58, %v13185_v9  ;;  %v5608_v7 = vsel %vm30_vm3, %v5518_v41, 0.0  ;;  %v13190_v9 = vld [vmem:[#allocation76_spill] sm:$0xff]  ;;  %v13191_v41 = vld [vmem:[#allocation82_spill] sm:$0xff] }
 0x670   :  { %v5610_v58 = vsel %vm30_vm3, %v5519_v23, 0.0  ;;  %v5400_v23 = vsub.f32 %v11083_v43, %v11243_v44 }
 0x671   :  { %v5603_v48 = vadd.f32 %v5602_v49, %v5601_v47  ;;  %v13186_v47 = vld [vmem:[#allocation69_spill] sm:$0xff]  ;;  %v5520_v49 = vmul.f32 %v5456_v29, %v5456_v29  ;;  %v5521_v22 = vmul.f32 %v5457_v10, %v5457_v10 }
 0x672   :  { %v5458_v56 = vmul.f32 %v5394_v19, %v13186_v47  ;;  %v13192_v47 = vld [vmem:[#allocation78_spill] sm:$0xff] }
 0x673   :  { %v5605_v0 = vadd.f32 %v5604_v21, %v5603_v48  ;;  %v5397_v48 = vsub.f32 %v13187_v13, %v11243_v44  ;;  %v5459_v21 = vmul.f32 %v5395_v35, %v13188_v33  ;;  %v5612_v19 = vsel %vm30_vm3, %v5520_v49, 0.0  ;;  %v13194_v49 = vld [vmem:[#allocation79_spill] sm:$0xff] }
 0x674   :  { %v5522_v6 = vmul.f32 %v5458_v56, %v5458_v56  ;;  %v5614_v35 = vsel %vm30_vm3, %v5521_v22, 0.0  ;;  %v13196_v22 = vld [vmem:[#allocation77_spill] sm:$0xff] }
 0x675   :  { %v5607_v37 = vadd.f32 %v5606_v62, %v5605_v0  ;;  %v5398_v0 = vsub.f32 %v13189_v52, %v11243_v44  ;;  %v5460_v62 = vmul.f32 %v5396_v40, %v13190_v9  ;;  %v5523_v13 = vmul.f32 %v5459_v21, %v5459_v21  ;;  %v13195_v9 = vld [vmem:[#allocation89_spill] sm:$0xff] }
 0x676   :  { %v5616_v40 = vsel %vm30_vm3, %v5522_v6, 0.0  ;;  %v13198_v6 = vld [vmem:[#allocation92_spill] sm:$0xff] }
 0x677   :  { %v5609_v63 = vadd.f32 %v5608_v7, %v5607_v37  ;;  %v5399_v37 = vsub.f32 %v13191_v41, %v11243_v44  ;;  %v5461_v7 = vmul.f32 %v5397_v48, %v13192_v47  ;;  %v5618_v48 = vsel %vm30_vm3, %v5523_v13, 0.0  ;;  %v13197_v47 = vld [vmem:[#allocation90_spill] sm:$0xff] }
 0x678   :  { %v5404_v13 = vsub.f32 %v11109_v18, %v11243_v44 }
 0x679   :  { %v5611_v61 = vadd.f32 %v5610_v58, %v5609_v63  ;;  %v13193_v63 = vld [vmem:[#allocation83_spill] sm:$0xff]  ;;  %v5524_v58 = vmul.f32 %v5460_v62, %v5460_v62  ;;  %v5525_v41 = vmul.f32 %v5461_v7, %v5461_v7 }
 0x67a   :  { %v5462_v33 = vmul.f32 %v5398_v0, %v13193_v63  ;;  %v13199_v63 = vld [vmem:[#allocation48_spill] sm:$0xff] }
 0x67b   :  { %v5613_v29 = vadd.f32 %v5612_v19, %v5611_v61  ;;  %v5401_v61 = vsub.f32 %v13194_v49, %v11243_v44  ;;  %v5463_v19 = vmul.f32 %v5399_v37, %v13195_v9  ;;  %v5620_v0 = vsel %vm30_vm3, %v5524_v58, 0.0  ;;  %v13201_v58 = vld [vmem:[#allocation84_spill] sm:$0xff] }
 0x67c   :  { %v5526_v43 = vmul.f32 %v5462_v33, %v5462_v33  ;;  %v5622_v37 = vsel %vm30_vm3, %v5525_v41, 0.0  ;;  %v13203_v41 = vld [vmem:[#allocation91_spill] sm:$0xff] }
 0x67d   :  { %v5615_v10 = vadd.f32 %v5614_v35, %v5613_v29  ;;  %v5402_v29 = vsub.f32 %v13196_v22, %v11243_v44  ;;  %v5464_v35 = vmul.f32 %v5400_v23, %v13197_v47  ;;  %v5527_v49 = vmul.f32 %v5463_v19, %v5463_v19  ;;  %v13202_v47 = vld [vmem:[#allocation52_spill] sm:$0xff] }
 0x67e   :  { %v5624_v23 = vsel %vm30_vm3, %v5526_v43, 0.0  ;;  %v13205_v43 = vld [vmem:[#allocation10_spill] sm:$0xff] }
 0x67f   :  { %v5617_v56 = vadd.f32 %v5616_v40, %v5615_v10  ;;  %v5403_v10 = vsub.f32 %v13198_v6, %v11243_v44  ;;  %v5465_v40 = vmul.f32 %v5401_v61, %v13199_v63  ;;  %v5626_v61 = vsel %vm30_vm3, %v5527_v49, 0.0  ;;  %v13204_v63 = vld [vmem:[#allocation62_spill] sm:$0xff] }
 0x680   :  { %v13207_v49 = vld [vmem:[#allocation30_spill] sm:$0xff] }
 0x681   :  { %v5619_v21 = vadd.f32 %v5618_v48, %v5617_v56  ;;  %v13200_v56 = vld [vmem:[#allocation44_spill] sm:$0xff]  ;;  %v5528_v48 = vmul.f32 %v5464_v35, %v5464_v35  ;;  %v5529_v6 = vmul.f32 %v5465_v40, %v5465_v40 }
 0x682   :  { %v5466_v9 = vmul.f32 %v5402_v29, %v13200_v56  ;;  %v13206_v56 = vld [vmem:[#allocation57_spill] sm:$0xff] }
 0x683   :  { %v5621_v62 = vadd.f32 %v5620_v0, %v5619_v21  ;;  %v5405_v21 = vsub.f32 %v13201_v58, %v11243_v44  ;;  %v5467_v0 = vmul.f32 %v5403_v10, %v13202_v47  ;;  %v5628_v29 = vsel %vm30_vm3, %v5528_v48, 0.0  ;;  %v13208_v47 = vld [vmem:[#allocation68_spill] sm:$0xff]  ;;  %v13209_v48 = vld [vmem:[#allocation29_spill] sm:$0xff] }
 0x684   :  { %v5530_v18 = vmul.f32 %v5466_v9, %v5466_v9  ;;  %v5630_v10 = vsel %vm30_vm3, %v5529_v6, 0.0  ;;  %v13211_v6 = vld [vmem:[#allocation27_spill] sm:$0xff] }
 0x685   :  { %v5623_v7 = vadd.f32 %v5622_v37, %v5621_v62  ;;  %v5406_v62 = vsub.f32 %v13203_v41, %v11243_v44  ;;  %v5468_v37 = vmul.f32 %v5404_v13, %v13204_v63  ;;  %v5531_v58 = vmul.f32 %v5467_v0, %v5467_v0  ;;  %v13210_v63 = vld [vmem:[#allocation71_spill] sm:$0xff] }
 0x686   :  { %v5632_v13 = vsel %vm30_vm3, %v5530_v18, 0.0  ;;  %v13213_v18 = vld [vmem:[#allocation35_spill] sm:$0xff] }
 0x687   :  { %v5625_v33 = vadd.f32 %v5624_v23, %v5623_v7  ;;  %v5407_v7 = vsub.f32 %v13205_v43, %v11243_v44  ;;  %v5469_v23 = vmul.f32 %v5405_v21, %v13206_v56  ;;  %v5532_v41 = vmul.f32 %v5468_v37, %v5468_v37  ;;  %v13212_v56 = vld [vmem:[#allocation73_spill] sm:$0xff] }
 0x688   :  { %v5634_v21 = vsel %vm30_vm3, %v5531_v58, 0.0  ;;  %v13215_v58 = vld [vmem:[#allocation18_spill] sm:$0xff] }
 0x689   :  { %v5627_v19 = vadd.f32 %v5626_v61, %v5625_v33  ;;  %v5408_v33 = vsub.f32 %v13207_v49, %v11243_v44  ;;  %v5470_v61 = vmul.f32 %v5406_v62, %v13208_v47  ;;  %v5533_v43 = vmul.f32 %v5469_v23, %v5469_v23  ;;  %v13214_v47 = vld [vmem:[#allocation80_spill] sm:$0xff] }
 0x68a   :  { %v5636_v62 = vsel %vm30_vm3, %v5532_v41, 0.0  ;;  %v13217_v41 = vld [vmem:[#allocation14_spill] sm:$0xff] }
 0x68b   :  { %v5629_v35 = vadd.f32 %v5628_v29, %v5627_v19  ;;  %v5409_v19 = vsub.f32 %v13209_v48, %v11243_v44  ;;  %v5471_v29 = vmul.f32 %v5407_v7, %v13210_v63  ;;  %v5534_v49 = vmul.f32 %v5470_v61, %v5470_v61  ;;  %v13216_v63 = vld [vmem:[#allocation88_spill] sm:$0xff] }
 0x68c   :  { %v5638_v7 = vsel %vm30_vm3, %v5533_v43, 0.0  ;;  %v13219_v43 = vld [vmem:[#allocation15_spill] sm:$0xff] }
 0x68d   :  { %v5631_v40 = vadd.f32 %v5630_v10, %v5629_v35  ;;  %v5410_v35 = vsub.f32 %v13211_v6, %v11243_v44  ;;  %v5472_v10 = vmul.f32 %v5408_v33, %v13212_v56  ;;  %v5535_v48 = vmul.f32 %v5471_v29, %v5471_v29  ;;  %v13218_v56 = vld [vmem:[#allocation87_spill] sm:$0xff] }
 0x68e   :  { %v5640_v33 = vsel %vm30_vm3, %v5534_v49, 0.0  ;;  %v13221_v49 = vld [vmem:[#allocation21_spill] sm:$0xff] }
 0x68f   :  { %v5633_v9 = vadd.f32 %v5632_v13, %v5631_v40  ;;  %v5411_v40 = vsub.f32 %v13213_v18, %v11243_v44  ;;  %v5473_v13 = vmul.f32 %v5409_v19, %v13214_v47  ;;  %v5536_v6 = vmul.f32 %v5472_v10, %v5472_v10  ;;  %v13220_v47 = vld [vmem:[#allocation7_spill] sm:$0xff] }
 0x690   :  { %v5642_v19 = vsel %vm30_vm3, %v5535_v48, 0.0  ;;  %v13223_v48 = vld [vmem:[#allocation19_spill] sm:$0xff] }
 0x691   :  { %v5635_v0 = vadd.f32 %v5634_v21, %v5633_v9  ;;  %v5412_v9 = vsub.f32 %v13215_v58, %v11243_v44  ;;  %v5474_v21 = vmul.f32 %v5410_v35, %v13216_v63  ;;  %v5537_v18 = vmul.f32 %v5473_v13, %v5473_v13  ;;  %v13222_v63 = vld [vmem:[#allocation8_spill] sm:$0xff] }
 0x692   :  { %v5644_v35 = vsel %vm30_vm3, %v5536_v6, 0.0  ;;  %v13225_v6 = vld [vmem:[#allocation40_spill] sm:$0xff] }
 0x693   :  { %v5637_v37 = vadd.f32 %v5636_v62, %v5635_v0  ;;  %v5413_v0 = vsub.f32 %v13217_v41, %v11243_v44  ;;  %v5475_v62 = vmul.f32 %v5411_v40, %v13218_v56  ;;  %v5538_v58 = vmul.f32 %v5474_v21, %v5474_v21  ;;  %v13224_v56 = vld [vmem:[#allocation9_spill] sm:$0xff] }
 0x694   :  { %v5646_v40 = vsel %vm30_vm3, %v5537_v18, 0.0  ;;  %v13227_v18 = vld [vmem:[#allocation20_spill] sm:$0xff] }
 0x695   :  { %v5639_v23 = vadd.f32 %v5638_v7, %v5637_v37  ;;  %v5414_v37 = vsub.f32 %v13219_v43, %v11243_v44  ;;  %v5476_v7 = vmul.f32 %v5412_v9, %v13220_v47  ;;  %v5539_v41 = vmul.f32 %v5475_v62, %v5475_v62  ;;  %v13226_v47 = vld [vmem:[#allocation11_spill] sm:$0xff] }
 0x696   :  { %v5648_v9 = vsel %vm30_vm3, %v5538_v58, 0.0  ;;  %v13229_v58 = vld [vmem:[#allocation22_spill] sm:$0xff] }
 0x697   :  { %v5641_v61 = vadd.f32 %v5640_v33, %v5639_v23  ;;  %v5415_v23 = vsub.f32 %v13221_v49, %v11243_v44  ;;  %v5477_v33 = vmul.f32 %v5413_v0, %v13222_v63  ;;  %v5540_v43 = vmul.f32 %v5476_v7, %v5476_v7  ;;  %v13228_v63 = vld [vmem:[#allocation12_spill] sm:$0xff] }
 0x698   :  { %v5650_v0 = vsel %vm30_vm3, %v5539_v41, 0.0  ;;  %v13231_v41 = vld [vmem:[#allocation31_spill] sm:$0xff] }
 0x699   :  { %v5643_v29 = vadd.f32 %v5642_v19, %v5641_v61  ;;  %v5416_v61 = vsub.f32 %v13223_v48, %v11243_v44  ;;  %v5478_v19 = vmul.f32 %v5414_v37, %v13224_v56  ;;  %v5541_v49 = vmul.f32 %v5477_v33, %v5477_v33  ;;  %v13230_v56 = vld [vmem:[#allocation33_spill] sm:$0xff] }
 0x69a   :  { %v5652_v37 = vsel %vm30_vm3, %v5540_v43, 0.0  ;;  %v13233_v43 = vld [vmem:[#allocation47_spill] sm:$0xff] }
 0x69b   :  { %v5645_v10 = vadd.f32 %v5644_v35, %v5643_v29  ;;  %v5417_v29 = vsub.f32 %v13225_v6, %v11243_v44  ;;  %v5479_v35 = vmul.f32 %v5415_v23, %v13226_v47  ;;  %v5542_v48 = vmul.f32 %v5478_v19, %v5478_v19  ;;  %v13232_v47 = vld [vmem:[#allocation17_spill] sm:$0xff] }
 0x69c   :  { %v5654_v23 = vsel %vm30_vm3, %v5541_v49, 0.0  ;;  %v13235_v49 = vld [vmem:[#allocation6_spill] sm:$0xff] }
 0x69d   :  { %v5647_v13 = vadd.f32 %v5646_v40, %v5645_v10  ;;  %v5418_v10 = vsub.f32 %v13227_v18, %v11243_v44  ;;  %v5480_v40 = vmul.f32 %v5416_v61, %v13228_v63  ;;  %v5543_v6 = vmul.f32 %v5479_v35, %v5479_v35  ;;  %v13234_v63 = vld [vmem:[#allocation16_spill] sm:$0xff] }
 0x69e   :  { %v5656_v61 = vsel %vm30_vm3, %v5542_v48, 0.0  ;;  %v13237_v48 = vld [vmem:[#allocation53_spill] sm:$0xff] }
 0x69f   :  { %v5649_v21 = vadd.f32 %v5648_v9, %v5647_v13  ;;  %v5419_v13 = vsub.f32 %v13229_v58, %v11243_v44  ;;  %v5481_v9 = vmul.f32 %v5417_v29, %v13230_v56  ;;  %v5544_v18 = vmul.f32 %v5480_v40, %v5480_v40  ;;  %v13236_v56 = vld [vmem:[#allocation41_spill] sm:$0xff] }
 0x6a0   :  { %v5658_v29 = vsel %vm30_vm3, %v5543_v6, 0.0  ;;  %v5424_v6 = vsub.f32 %v11233_v36, %v11243_v44 }
 0x6a1   :  { %v5651_v62 = vadd.f32 %v5650_v0, %v5649_v21  ;;  %v5420_v21 = vsub.f32 %v13231_v41, %v11243_v44  ;;  %v5482_v0 = vmul.f32 %v5418_v10, %v13232_v47  ;;  %v5545_v58 = vmul.f32 %v5481_v9, %v5481_v9  ;;  %v13238_v47 = vld [vmem:[#allocation25_spill] sm:$0xff] }
 0x6a2   :  { %v5660_v10 = vsel %vm30_vm3, %v5544_v18, 0.0  ;;  %v13240_v18 = vld [vmem:[#allocation28_spill] sm:$0xff] }
 0x6a3   :  { %v5653_v7 = vadd.f32 %v5652_v37, %v5651_v62  ;;  %v5421_v62 = vsub.f32 %v13233_v43, %v11243_v44  ;;  %v5483_v37 = vmul.f32 %v5419_v13, %v13234_v63  ;;  %v5546_v41 = vmul.f32 %v5482_v0, %v5482_v0 }
 0x6a4   :  { %v5662_v13 = vsel %vm30_vm3, %v5545_v58, 0.0 }
 0x6a5   :  { %v5655_v33 = vadd.f32 %v5654_v23, %v5653_v7  ;;  %v5422_v7 = vsub.f32 %v13235_v49, %v11243_v44  ;;  %v5484_v23 = vmul.f32 %v5420_v21, %v13236_v56  ;;  %v5547_v43 = vmul.f32 %v5483_v37, %v5483_v37 }
 0x6a6   :  { %v5664_v21 = vsel %vm30_vm3, %v5546_v41, 0.0 }
 0x6a7   :  { %v5657_v19 = vadd.f32 %v5656_v61, %v5655_v33  ;;  %v5423_v33 = vsub.f32 %v13237_v48, %v11243_v44  ;;  %v5485_v61 = vmul.f32 %v5421_v62, %v13238_v47  ;;  %v13241_v62 = vld [vmem:[#allocation26_spill] sm:$0xff] }
 0x6a8   :  { %v5488_v37 = vmul.f32 %v5424_v6, %v13241_v62  ;;  %v5554_v6 = vmul.f32 %v11251_v51, %v11251_v51  ;;  %v5689_v51 = vld [vmem:[%s12384_s6] sm:$0x1] }
 0x6a9   :  { %v5659_v35 = vadd.f32 %v5658_v29, %v5657_v19  ;;  %v13239_v19 = vld [vmem:[#allocation23_spill] sm:$0xff]  ;;  %v5548_v29 = vmul.f32 %v5484_v23, %v5484_v23  ;;  %v5549_v56 = vmul.f32 %v5485_v61, %v5485_v61 }
 0x6aa   :  { %v5486_v63 = vmul.f32 %v5422_v7, %v13239_v19  ;;  %v5552_v23 = vmul.f32 %v5488_v37, %v5488_v37 }
 0x6ab   :  { %v5661_v40 = vadd.f32 %v5660_v10, %v5659_v35  ;;  %v5487_v35 = vmul.f32 %v5423_v33, %v13240_v18  ;;  %v5666_v10 = vsel %vm30_vm3, %v5547_v43, 0.0  ;;  %v5668_v58 = vsel %vm30_vm3, %v5548_v29, 0.0 }
 0x6ac   :  { %v5550_v47 = vmul.f32 %v5486_v63, %v5486_v63  ;;  %v5670_v36 = vsel %vm30_vm3, %v5549_v56, 0.0  ;;  %v5553_v33 = vmul.f32 %v11249_v31, %v11249_v31  ;;  %v5676_v19 = vsel %vm30_vm3, %v5552_v23, 0.0 }
 0x6ad   :  { %v5663_v9 = vadd.f32 %v5662_v13, %v5661_v40  ;;  %v5551_v13 = vmul.f32 %v5487_v35, %v5487_v35 }
 0x6ae   :  { %v5672_v41 = vsel %vm30_vm3, %v5550_v47, 0.0  ;;  %v5678_v63 = vsel %vm30_vm3, %v5553_v33, 0.0 }
 0x6af   :  { %v5665_v0 = vadd.f32 %v5664_v21, %v5663_v9  ;;  %v5674_v43 = vsel %vm30_vm3, %v5551_v13, 0.0 }
 0x6b1   :  { %v5667_v48 = vadd.f32 %v5666_v10, %v5665_v0 }
 0x6b3   :  { %v5669_v40 = vadd.f32 %v5668_v58, %v5667_v48 }
 0x6b5   :  { %v5671_v7 = vadd.f32 %v5670_v36, %v5669_v40  ;;  %v5680_v36 = vsel %vm30_vm3, %v5554_v6, 0.0  ;;  %v11513_v40 = vld [vmem:[%s12385_s7] sm:$0x1]  ;;  %v13243_v6 = vld [vmem:[#allocation75_spill] sm:$0xff] }
 0x6b7   :  { %v5673_v9 = vadd.f32 %v5672_v41, %v5671_v7  ;;  %v13242_v7 = vld [vmem:[#allocation5_spill] sm:$0xff]  ;;  %v13266_v41 = vld [vmem:[#allocation19_spill] sm:$0xff] }
 0x6b9   :  { %v5675_v61 = vadd.f32 %v5674_v43, %v5673_v9 }
 0x6bb   :  { %v5677_v48 = vadd.f32 %v5676_v19, %v5675_v61  ;;  %v13244_v19 = vld [vmem:[#allocation66_spill] sm:$0xff] }
 0x6bd   :  { %v5679_v29 = vadd.f32 %v5678_v63, %v5677_v48  ;;  %v13245_v48 = vld [vmem:[#allocation82_spill] sm:$0xff] }
 0x6be   :  { %v13246_v63 = vld [vmem:[#allocation86_spill] sm:$0xff] }
 0x6bf   :  { %v5681_v21 = vadd.f32 %v5680_v36, %v5679_v29  ;;  %v13247_v29 = vld [vmem:[#allocation79_spill] sm:$0xff] }
 0x6c1   :  { %v5682_v0 = vrot.slane %v5681_v21, 4 }
 0x6c3   :  { %v5683_v18 = vadd.f32 %v5682_v0, %v5681_v21  ;;  %v13248_v0 = vld [vmem:[#allocation92_spill] sm:$0xff] }
 0x6c5   :  { %v5684_v35 = vrot.slane %v5683_v18, 2 }
 0x6c7   :  { %v5685_v56 = vadd.f32 %v5684_v35, %v5683_v18  ;;  %v13249_v18 = vld [vmem:[#allocation24_spill] sm:$0xff] }
 0x6c9   :  { %v5686_v31 = vrot.slane %v5685_v56, 1 }
 0x6cb   :  { %v5687_v10 = vadd.f32 %v5686_v31, %v5685_v56  ;;  %v13250_v56 = vld [vmem:[#allocation84_spill] sm:$0xff] }
 0x6cd   :  { %v5688_v62 = vmul.f32 0.0034722222, %v5687_v10  ;;  %v13251_v10 = vld [vmem:[#allocation91_spill] sm:$0xff] }
 0x6cf   :  { %v5690_v37 = vadd.f32 1e-05, %v5688_v62 }
 0x6d1   :  { %7742 = vrsqrt.f32 %v5690_v37  ;;  %v13252_v37 = vld [vmem:[#allocation10_spill] sm:$0xff] }
 0x6db   :  { %v7743_v47 = vpop.eup %7742 }
 0x6dc   :  { %v5692_v58 = vmul.f32 %v7743_v47, %v5689_v51  ;;  %v13253_v51 = vld [vmem:[#allocation30_spill] sm:$0xff] }
 0x6de   :  { %v11516_v13 = vmul.f32 %v5692_v58, %v11243_v44  ;;  %v11519_v23 = vrot.slane %v5692_v58, %v13242_v7  ;;  %v13254_v58 = vld [vmem:[#allocation29_spill] sm:$0xff] }
 0x6e0   :  { %v11525_v9 = vmul.f32 %v11519_v23, %v10847_v38  ;;  %v11529_v33 = vmul.f32 %v11519_v23, %v10855_v59  ;;  %v11533_v43 = vmul.f32 %v10845_v12, %v11519_v23  ;;  %v11537_v44 = vmul.f32 %v10851_v27, %v11519_v23 }
 0x6e1   :  { %v11541_v61 = vmul.f32 %v11519_v23, %v10872_v17  ;;  %v11545_v38 = vmul.f32 %v11519_v23, %v10881_v60  ;;  %v11549_v59 = vmul.f32 %v10868_v50, %v11519_v23  ;;  %v11553_v12 = vmul.f32 %v10877_v42, %v11519_v23 }
 0x6e2   :  { %v11557_v27 = vmul.f32 %v11519_v23, %v10898_v16  ;;  %v11561_v17 = vmul.f32 %v11519_v23, %v10905_v4  ;;  %v11565_v60 = vmul.f32 %v10894_v46, %v11519_v23  ;;  %v11569_v50 = vmul.f32 %v10903_v20, %v11519_v23 }
 0x6e3   :  { %v11573_v42 = vmul.f32 %v11519_v23, %v10922_v15  ;;  %v11577_v16 = vmul.f32 %v11519_v23, %v10931_v55  ;;  %v11581_v4 = vmul.f32 %v10920_v30, %v11519_v23  ;;  %v11585_v46 = vmul.f32 %v10927_v39, %v11519_v23 }
 0x6e4   :  { %v11589_v20 = vmul.f32 %v11519_v23, %v10948_v32  ;;  %v11593_v15 = vmul.f32 %v11519_v23, %v10957_v14  ;;  %v11597_v55 = vmul.f32 %v10944_v26, %v11519_v23  ;;  %v11601_v30 = vmul.f32 %v13162_v25, %v11519_v23 }
 0x6e5   :  { %v11605_v39 = vmul.f32 %v11519_v23, %v13164_v2  ;;  %v11609_v32 = vmul.f32 %v11519_v23, %v10981_v1  ;;  %v11613_v14 = vmul.f32 %v13167_v53, %v11519_v23  ;;  %v11617_v26 = vmul.f32 %v13169_v8, %v11519_v23 }
 0x6e6   :  { %v11621_v25 = vmul.f32 %v11519_v23, %v13171_v54  ;;  %v11625_v2 = vmul.f32 %v11519_v23, %v11007_v5  ;;  %v11629_v1 = vmul.f32 %v13174_v34, %v11519_v23  ;;  %v11633_v53 = vmul.f32 %v13176_v11, %v11519_v23 }
 0x6e7   :  { %v11637_v8 = vmul.f32 %v11519_v23, %v13178_v57  ;;  %v11641_v54 = vmul.f32 %v11519_v23, %v11033_v28  ;;  %v11645_v5 = vmul.f32 %v11020_v45, %v11519_v23  ;;  %v11649_v34 = vmul.f32 %v13182_v24, %v11519_v23 }
 0x6e8   :  { %v11653_v11 = vmul.f32 %v11519_v23, %v13184_v3  ;;  %v11657_v57 = vmul.f32 %v11519_v23, %v13243_v6  ;;  %v11661_v28 = vmul.f32 %v13244_v19, %v11519_v23  ;;  %v11665_v45 = vmul.f32 %v13189_v52, %v11519_v23  ;;  %v13255_v19 = vld [vmem:[#allocation27_spill] sm:$0xff] }
 0x6e9   :  { %v11669_v24 = vmul.f32 %v11519_v23, %v13245_v48  ;;  %v11673_v3 = vmul.f32 %v11519_v23, %v13246_v63  ;;  %v11677_v36 = vmul.f32 %v13247_v29, %v11519_v23  ;;  %v11681_v21 = vmul.f32 %v13196_v22, %v11519_v23  ;;  %v13256_v63 = vld [vmem:[#allocation35_spill] sm:$0xff] }
 0x6ea   :  { %v11685_v52 = vmul.f32 %v11519_v23, %v13248_v0  ;;  %v11689_v35 = vmul.f32 %v11519_v23, %v13249_v18  ;;  %v11693_v31 = vmul.f32 %v13250_v56, %v11519_v23  ;;  %v11697_v62 = vmul.f32 %v13251_v10, %v11519_v23  ;;  %v13258_v0 = vld [vmem:[#allocation18_spill] sm:$0xff] }
 0x6eb   :  { %v11701_v22 = vmul.f32 %v11519_v23, %v13252_v37  ;;  %v11705_v47 = vmul.f32 %v11519_v23, %v13253_v51  ;;  %v11709_v6 = vmul.f32 %v13254_v58, %v11519_v23  ;;  %v11713_v48 = vmul.f32 %v13255_v19, %v11519_v23  ;;  %v13260_v56 = vld [vmem:[#allocation14_spill] sm:$0xff]  ;;  %v13262_v37 = vld [vmem:[#allocation15_spill] sm:$0xff]  ;;  %v13264_v58 = vld [vmem:[#allocation21_spill] sm:$0xff] }
 0x6ec   :  { %v11717_v29 = vmul.f32 %v11519_v23, %v13256_v63  ;;  %v11721_v18 = vmul.f32 %v11519_v23, %v13258_v0  ;;  %v11725_v10 = vmul.f32 %v13260_v56, %v11519_v23  ;;  %v11729_v51 = vmul.f32 %v13262_v37, %v11519_v23 }
 0x6ed   :  { %v11733_v19 = vmul.f32 %v11519_v23, %v13264_v58  ;;  %v11737_v63 = vmul.f32 %v11519_v23, %v13266_v41 }
 0x6ee   :  { %13257 = vst [vmem:[#allocation59_spill] sm:$0xff] %v11717_v29  ;;  %13259 = vst [vmem:[#allocation36_spill] sm:$0xff] %v11721_v18  ;;  %v13267_v29 = vld [vmem:[#allocation40_spill] sm:$0xff] }
 0x6ef   :  { %13261 = vst [vmem:[#allocation37_spill] sm:$0xff] %v11725_v10  ;;  %13263 = vst [vmem:[#allocation74_spill] sm:$0xff] %v11729_v51  ;;  %v11741_v0 = vmul.f32 %v13267_v29, %v11519_v23  ;;  %v13269_v18 = vld [vmem:[#allocation20_spill] sm:$0xff]  ;;  %v13271_v10 = vld [vmem:[#allocation22_spill] sm:$0xff]  ;;  %v11761_v29 = vmul.f32 %v13235_v49, %v11519_v23  ;;  %v13281_v49 = vsub.f32 %v11513_v40, %v11516_v13 }
 0x6f0   :  { %13265 = vst [vmem:[#allocation39_spill] sm:$0xff] %v11733_v19  ;;  %v11745_v56 = vmul.f32 %v13269_v18, %v11519_v23  ;;  %v11749_v37 = vmul.f32 %v11519_v23, %v13271_v10  ;;  %v13273_v51 = vld [vmem:[#allocation31_spill] sm:$0xff] }
 0x6f1   :  { %13268 = vst [vmem:[#allocation94_spill] sm:$0xff] %v11741_v0  ;;  %v11753_v58 = vmul.f32 %v11519_v23, %v13273_v51  ;;  %v13275_v19 = vld [vmem:[#allocation47_spill] sm:$0xff]  ;;  %13276 = vst [vmem:[#allocation43_spill] sm:$0xff] %v11761_v29  ;;  %v13277_v0 = vld [vmem:[#allocation53_spill] sm:$0xff]  ;;  %v11783_v29 = vrot.slane %v13281_v49, %v13242_v7 }
 0x6f2   :  { %13270 = vst [vmem:[#allocation60_spill] sm:$0xff] %v11745_v56  ;;  %13272 = vst [vmem:[#allocation42_spill] sm:$0xff] %v11749_v37  ;;  %v11757_v41 = vmul.f32 %v13275_v19, %v11519_v23  ;;  %v11765_v18 = vmul.f32 %v11519_v23, %v13277_v0  ;;  %v13278_v56 = vld [vmem:[#allocation34_spill] sm:$0xff]  ;;  %v13279_v37 = vld [vmem:[#allocation32_spill] sm:$0xff] }
 0x6f3   :  { %13274 = vst [vmem:[#allocation81_spill] sm:$0xff] %v11753_v58  ;;  %v11769_v10 = vmul.f32 %v11519_v23, %v13278_v56  ;;  %v11773_v51 = vmul.f32 %v13279_v37, %v11519_v23  ;;  %v13280_v58 = vld [vmem:[#allocation13_spill] sm:$0xff]  ;;  %v11787_v0 = vadd.f32 %v11783_v29, %v11525_v9  ;;  %v11791_v56 = vadd.f32 %v11783_v29, %v11529_v33 }
 0x6f4   :  { %v11777_v19 = vmul.f32 %v13280_v58, %v11519_v23  ;;  %v11795_v37 = vadd.f32 %v11783_v29, %v11533_v43  ;;  %v11799_v23 = vadd.f32 %v11783_v29, %v11537_v44  ;;  %v11803_v40 = vadd.f32 %v11783_v29, %v11541_v61 }
 0x6f5   :  { %v11807_v13 = vadd.f32 %v11783_v29, %v11545_v38  ;;  %v11811_v7 = vadd.f32 %v11783_v29, %v11549_v59  ;;  %v11815_v9 = vadd.f32 %v11783_v29, %v11553_v12  ;;  %v11819_v33 = vadd.f32 %v11783_v29, %v11557_v27 }
 0x6f6   :  { %v11823_v43 = vadd.f32 %v11783_v29, %v11561_v17  ;;  %v11827_v44 = vadd.f32 %v11783_v29, %v11565_v60  ;;  %v11831_v61 = vadd.f32 %v11783_v29, %v11569_v50  ;;  %v11835_v38 = vadd.f32 %v11783_v29, %v11573_v42  ;;  %v13287_v58 = vld [vmem:[#allocation37_spill] sm:$0xff]  ;;  %v13289_v49 = vld [vmem:[#allocation74_spill] sm:$0xff] }
 0x6f7   :  { %v11839_v59 = vadd.f32 %v11783_v29, %v11577_v16  ;;  %v11843_v12 = vadd.f32 %v11783_v29, %v11581_v4  ;;  %v11847_v27 = vadd.f32 %v11783_v29, %v11585_v46  ;;  %v11851_v17 = vadd.f32 %v11783_v29, %v11589_v20 }
 0x6f8   :  { %v11855_v60 = vadd.f32 %v11783_v29, %v11593_v15  ;;  %v11859_v50 = vadd.f32 %v11783_v29, %v11597_v55  ;;  %v11863_v42 = vadd.f32 %v11783_v29, %v11601_v30  ;;  %v11867_v16 = vadd.f32 %v11783_v29, %v11605_v39 }
 0x6f9   :  { %v11871_v4 = vadd.f32 %v11783_v29, %v11609_v32  ;;  %v11875_v46 = vadd.f32 %v11783_v29, %v11613_v14  ;;  %v11879_v20 = vadd.f32 %v11783_v29, %v11617_v26  ;;  %v11883_v15 = vadd.f32 %v11783_v29, %v11621_v25 }
 0x6fa   :  { %v11887_v55 = vadd.f32 %v11783_v29, %v11625_v2  ;;  %v11891_v30 = vadd.f32 %v11783_v29, %v11629_v1  ;;  %v11895_v39 = vadd.f32 %v11783_v29, %v11633_v53  ;;  %v11899_v32 = vadd.f32 %v11783_v29, %v11637_v8 }
 0x6fb   :  { %v11903_v14 = vadd.f32 %v11783_v29, %v11641_v54  ;;  %v11907_v26 = vadd.f32 %v11783_v29, %v11645_v5  ;;  %v11911_v25 = vadd.f32 %v11783_v29, %v11649_v34  ;;  %v11915_v2 = vadd.f32 %v11783_v29, %v11653_v11 }
 0x6fc   :  { %v11919_v1 = vadd.f32 %v11783_v29, %v11657_v57  ;;  %v11923_v53 = vadd.f32 %v11783_v29, %v11661_v28  ;;  %v11927_v8 = vadd.f32 %v11783_v29, %v11665_v45  ;;  %v11931_v54 = vadd.f32 %v11783_v29, %v11669_v24 }
 0x6fd   :  { %v11935_v5 = vadd.f32 %v11783_v29, %v11673_v3  ;;  %v11939_v34 = vadd.f32 %v11783_v29, %v11677_v36  ;;  %v11943_v11 = vadd.f32 %v11783_v29, %v11681_v21  ;;  %v11947_v57 = vadd.f32 %v11783_v29, %v11685_v52 }
 0x6fe   :  { %v11951_v28 = vadd.f32 %v11783_v29, %v11689_v35  ;;  %v11955_v45 = vadd.f32 %v11783_v29, %v11693_v31  ;;  %v11959_v24 = vadd.f32 %v11783_v29, %v11697_v62  ;;  %v11963_v3 = vadd.f32 %v11783_v29, %v11701_v22  ;;  %v13283_v35 = vld [vmem:[#allocation59_spill] sm:$0xff]  ;;  %v13285_v62 = vld [vmem:[#allocation36_spill] sm:$0xff] }
 0x6ff   :  { %v11967_v36 = vadd.f32 %v11783_v29, %v11705_v47  ;;  %v11971_v21 = vadd.f32 %v11783_v29, %v11709_v6  ;;  %v11975_v52 = vadd.f32 %v11783_v29, %v11713_v48  ;;  %v11979_v31 = vadd.f32 %v11783_v29, %v13283_v35 }
 0x700   :  { %v11983_v22 = vadd.f32 %v11783_v29, %v13285_v62  ;;  %v11987_v47 = vadd.f32 %v11783_v29, %v13287_v58  ;;  %v11991_v6 = vadd.f32 %v11783_v29, %v13289_v49  ;;  %v11999_v35 = vadd.f32 %v11783_v29, %v11737_v63 }
 0x701   :  { %13282 = vst [vmem:[#allocation85_spill] sm:$0xff] %v11971_v21  ;;  %13284 = vst [vmem:[#allocation45_spill] sm:$0xff] %v11979_v31  ;;  %v13291_v21 = vld [vmem:[#allocation39_spill] sm:$0xff]  ;;  %v13293_v31 = vld [vmem:[#allocation94_spill] sm:$0xff]  ;;  %v12019_v63 = vadd.f32 %v11783_v29, %v11757_v41  ;;  %v12039_v41 = vadd.f32 %v11783_v29, %v11777_v19  ;;  %v5846_v19 = vmax.f32 %v11827_v44, 0.0  ;;  %v5857_v44 = vmax.f32 %v11871_v4, 0.0 }
 0x702   :  { %13286 = vst [vmem:[#allocation38_spill] sm:$0xff] %v11983_v22  ;;  %13288 = vst [vmem:[#allocation49_spill] sm:$0xff] %v11987_v47  ;;  %v11995_v48 = vadd.f32 %v11783_v29, %v13291_v21  ;;  %v12003_v62 = vadd.f32 %v11783_v29, %v13293_v31  ;;  %v13294_v22 = vld [vmem:[#allocation60_spill] sm:$0xff]  ;;  %v13295_v47 = vld [vmem:[#allocation42_spill] sm:$0xff]  ;;  %v5868_v4 = vmax.f32 %v11915_v2, 0.0  ;;  %v5879_v2 = vmax.f32 %v11959_v24, 0.0 }
 0x703   :  { %13290 = vst [vmem:[#allocation67_spill] sm:$0xff] %v11991_v6  ;;  %13292 = vst [vmem:[#allocation93_spill] sm:$0xff] %v11999_v35  ;;  %v12007_v58 = vadd.f32 %v11783_v29, %v13294_v22  ;;  %v12011_v49 = vadd.f32 %v11783_v29, %v13295_v47  ;;  %v13296_v6 = vld [vmem:[#allocation81_spill] sm:$0xff]  ;;  %v13298_v35 = vld [vmem:[#allocation43_spill] sm:$0xff]  ;;  %v12027_v22 = vadd.f32 %v11783_v29, %v11765_v18  ;;  %v5839_v18 = vmax.f32 %v11799_v23, 0.0 }
 0x704   :  { %v12015_v21 = vadd.f32 %v11783_v29, %v13296_v6  ;;  %13297 = vst [vmem:[#allocation50_spill] sm:$0xff] %v12019_v63  ;;  %v12023_v31 = vadd.f32 %v11783_v29, %v13298_v35  ;;  %v12031_v47 = vadd.f32 %v11783_v29, %v11769_v10  ;;  %v12035_v6 = vadd.f32 %v11783_v29, %v11773_v51 }
 0x705   :  { %13300 = vst [vmem:[#allocation54_spill] sm:$0xff] %v12027_v22  ;;  %v5836_v63 = vmax.f32 %v11787_v0, 0.0  ;;  %v5837_v35 = vmax.f32 %v11791_v56, 0.0  ;;  %v5840_v22 = vmax.f32 %v11803_v40, 0.0  ;;  %v5841_v10 = vmax.f32 %v11807_v13, 0.0  ;;  %5903 = vst.msk [vmem:[#allocation4 + $0x18] sm:$0xff] %vm30_vm3, %v5839_v18 }
 0x706   :  { %13299 = vst [vmem:[#allocation46_spill] sm:$0xff] %v12023_v31  ;;  %13301 = vst [vmem:[#allocation55_spill] sm:$0xff] %v12031_v47  ;;  %v5838_v31 = vmax.f32 %v11795_v37, 0.0  ;;  %v5842_v47 = vmax.f32 %v11811_v7, 0.0  ;;  %v5843_v51 = vmax.f32 %v11815_v9, 0.0  ;;  %v5845_v29 = vmax.f32 %v11823_v43, 0.0 }
 0x707   :  { %13302 = vst [vmem:[#allocation56_spill] sm:$0xff] %v12035_v6  ;;  %v5844_v6 = vmax.f32 %v11819_v33, 0.0  ;;  %v5847_v0 = vmax.f32 %v11831_v61, 0.0  ;;  %5900 = vst.msk [vmem:[#allocation4] sm:$0xff] %vm30_vm3, %v5836_v63  ;;  %v5848_v56 = vmax.f32 %v11835_v38, 0.0  ;;  %v5849_v37 = vmax.f32 %v11839_v59, 0.0 }
 0x708   :  { %5901 = vst.msk [vmem:[#allocation4 + $0x8] sm:$0xff] %vm30_vm3, %v5837_v35  ;;  %5902 = vst.msk [vmem:[#allocation4 + $0x10] sm:$0xff] %vm30_vm3, %v5838_v31  ;;  %v5850_v23 = vmax.f32 %v11843_v12, 0.0  ;;  %v5851_v40 = vmax.f32 %v11847_v27, 0.0  ;;  %v5852_v13 = vmax.f32 %v11851_v17, 0.0  ;;  %v5853_v7 = vmax.f32 %v11855_v60, 0.0 }
 0x709   :  { %5904 = vst.msk [vmem:[#allocation4 + $0x20] sm:$0xff] %vm30_vm3, %v5840_v22  ;;  %5905 = vst.msk [vmem:[#allocation4 + $0x28] sm:$0xff] %vm30_vm3, %v5841_v10  ;;  %v5854_v9 = vmax.f32 %v11859_v50, 0.0  ;;  %v5855_v33 = vmax.f32 %v11863_v42, 0.0  ;;  %v5856_v43 = vmax.f32 %v11867_v16, 0.0  ;;  %v5858_v61 = vmax.f32 %v11875_v46, 0.0 }
 0x70a   :  { %5906 = vst.msk [vmem:[#allocation4 + $0x30] sm:$0xff] %vm30_vm3, %v5842_v47  ;;  %5907 = vst.msk [vmem:[#allocation4 + $0x38] sm:$0xff] %vm30_vm3, %v5843_v51  ;;  %v5859_v38 = vmax.f32 %v11879_v20, 0.0  ;;  %v5860_v59 = vmax.f32 %v11883_v15, 0.0  ;;  %v5861_v12 = vmax.f32 %v11887_v55, 0.0  ;;  %v5862_v27 = vmax.f32 %v11891_v30, 0.0 }
 0x70b   :  { %5908 = vst.msk [vmem:[#allocation4 + $0x40] sm:$0xff] %vm30_vm3, %v5844_v6  ;;  %5909 = vst.msk [vmem:[#allocation4 + $0x48] sm:$0xff] %vm30_vm3, %v5845_v29  ;;  %v5863_v17 = vmax.f32 %v11895_v39, 0.0  ;;  %v5864_v60 = vmax.f32 %v11899_v32, 0.0  ;;  %v5865_v50 = vmax.f32 %v11903_v14, 0.0  ;;  %v5866_v42 = vmax.f32 %v11907_v26, 0.0 }
 0x70c   :  { %5910 = vst.msk [vmem:[#allocation4 + $0x50] sm:$0xff] %vm30_vm3, %v5846_v19  ;;  %5911 = vst.msk [vmem:[#allocation4 + $0x58] sm:$0xff] %vm30_vm3, %v5847_v0  ;;  %v5867_v16 = vmax.f32 %v11911_v25, 0.0  ;;  %v5869_v46 = vmax.f32 %v11919_v1, 0.0  ;;  %v5870_v20 = vmax.f32 %v11923_v53, 0.0  ;;  %v5871_v15 = vmax.f32 %v11927_v8, 0.0 }
 0x70d   :  { %5912 = vst.msk [vmem:[#allocation4 + $0x60] sm:$0xff] %vm30_vm3, %v5848_v56  ;;  %5913 = vst.msk [vmem:[#allocation4 + $0x68] sm:$0xff] %vm30_vm3, %v5849_v37  ;;  %v5872_v55 = vmax.f32 %v11931_v54, 0.0  ;;  %v5873_v30 = vmax.f32 %v11935_v5, 0.0  ;;  %v5874_v39 = vmax.f32 %v11939_v34, 0.0  ;;  %v5875_v32 = vmax.f32 %v11943_v11, 0.0 }
 0x70e   :  { %5914 = vst.msk [vmem:[#allocation4 + $0x70] sm:$0xff] %vm30_vm3, %v5850_v23  ;;  %5915 = vst.msk [vmem:[#allocation4 + $0x78] sm:$0xff] %vm30_vm3, %v5851_v40  ;;  %v5876_v14 = vmax.f32 %v11947_v57, 0.0  ;;  %v5877_v26 = vmax.f32 %v11951_v28, 0.0  ;;  %v5878_v25 = vmax.f32 %v11955_v45, 0.0  ;;  %v5880_v1 = vmax.f32 %v11963_v3, 0.0 }
 0x70f   :  { %5916 = vst.msk [vmem:[#allocation4 + $0x80] sm:$0xff] %vm30_vm3, %v5852_v13  ;;  %5917 = vst.msk [vmem:[#allocation4 + $0x88] sm:$0xff] %vm30_vm3, %v5853_v7  ;;  %v5881_v53 = vmax.f32 %v11967_v36, 0.0  ;;  %v13303_v8 = vld [vmem:[#allocation85_spill] sm:$0xff]  ;;  %v5883_v5 = vmax.f32 %v11975_v52, 0.0  ;;  %v13305_v57 = vld [vmem:[#allocation38_spill] sm:$0xff] }
 0x710   :  { %5918 = vst.msk [vmem:[#allocation4 + $0x90] sm:$0xff] %vm30_vm3, %v5854_v9  ;;  %5919 = vst.msk [vmem:[#allocation4 + $0x98] sm:$0xff] %vm30_vm3, %v5855_v33  ;;  %v5882_v54 = vmax.f32 %v13303_v8, 0.0  ;;  %v13304_v34 = vld [vmem:[#allocation45_spill] sm:$0xff]  ;;  %v5885_v28 = vmax.f32 %v13305_v57, 0.0  ;;  %v13307_v3 = vld [vmem:[#allocation67_spill] sm:$0xff] }
 0x711   :  { %5920 = vst.msk [vmem:[#allocation4 + $0xa0] sm:$0xff] %vm30_vm3, %v5856_v43  ;;  %5921 = vst.msk [vmem:[#allocation4 + $0xa8] sm:$0xff] %vm30_vm3, %v5857_v44  ;;  %v5884_v11 = vmax.f32 %v13304_v34, 0.0  ;;  %v13306_v45 = vld [vmem:[#allocation49_spill] sm:$0xff]  ;;  %v5887_v36 = vmax.f32 %v13307_v3, 0.0  ;;  %v5888_v52 = vmax.f32 %v11995_v48, 0.0 }
 0x712   :  { %5922 = vst.msk [vmem:[#allocation4 + $0xb0] sm:$0xff] %vm30_vm3, %v5858_v61  ;;  %5923 = vst.msk [vmem:[#allocation4 + $0xb8] sm:$0xff] %vm30_vm3, %v5859_v38  ;;  %v5886_v24 = vmax.f32 %v13306_v45, 0.0  ;;  %v13308_v63 = vld [vmem:[#allocation93_spill] sm:$0xff]  ;;  %v5890_v22 = vmax.f32 %v12003_v62, 0.0  ;;  %v5891_v47 = vmax.f32 %v12007_v58, 0.0 }
 0x713   :  { %5924 = vst.msk [vmem:[#allocation4 + $0xc0] sm:$0xff] %vm30_vm3, %v5860_v59  ;;  %5925 = vst.msk [vmem:[#allocation4 + $0xc8] sm:$0xff] %vm30_vm3, %v5861_v12  ;;  %v5889_v31 = vmax.f32 %v13308_v63, 0.0  ;;  %v5892_v6 = vmax.f32 %v12011_v49, 0.0  ;;  %v5893_v35 = vmax.f32 %v12015_v21, 0.0  ;;  %v13309_v18 = vld [vmem:[#allocation50_spill] sm:$0xff] }
 0x714   :  { %5926 = vst.msk [vmem:[#allocation4 + $0xd0] sm:$0xff] %vm30_vm3, %v5862_v27  ;;  %5927 = vst.msk [vmem:[#allocation4 + $0xd8] sm:$0xff] %vm30_vm3, %v5863_v17  ;;  %v5894_v48 = vmax.f32 %v13309_v18, 0.0  ;;  %v13310_v10 = vld [vmem:[#allocation46_spill] sm:$0xff]  ;;  %v13312_v29 = vld [vmem:[#allocation55_spill] sm:$0xff]  ;;  %v5899_v21 = vmax.f32 %v12039_v41, 0.0 }
 0x715   :  { %5928 = vst.msk [vmem:[#allocation4 + $0xe0] sm:$0xff] %vm30_vm3, %v5864_v60  ;;  %5929 = vst.msk [vmem:[#allocation4 + $0xe8] sm:$0xff] %vm30_vm3, %v5865_v50  ;;  %v5895_v51 = vmax.f32 %v13310_v10, 0.0  ;;  %v13311_v62 = vld [vmem:[#allocation54_spill] sm:$0xff]  ;;  %v5897_v19 = vmax.f32 %v13312_v29, 0.0  ;;  %v13313_v0 = vld [vmem:[#allocation56_spill] sm:$0xff] }
 0x716   :  { %5930 = vst.msk [vmem:[#allocation4 + $0xf0] sm:$0xff] %vm30_vm3, %v5866_v42  ;;  %5931 = vst.msk [vmem:[#allocation4 + $0xf8] sm:$0xff] %vm30_vm3, %v5867_v16  ;;  %v5896_v58 = vmax.f32 %v13311_v62, 0.0  ;;  %v5898_v49 = vmax.f32 %v13313_v0, 0.0  ;;  %v5964_v41 = vld [vmem:[#allocation4] ss:$2 sm:$0xff] }
 0x717   :  { %5932 = vst.msk [vmem:[#allocation4 + $0x100] sm:$0xff] %vm30_vm3, %v5868_v4  ;;  %5933 = vst.msk [vmem:[#allocation4 + $0x108] sm:$0xff] %vm30_vm3, %v5869_v46  ;;  %v5966_v56 = vld [vmem:[#allocation4 + $0x10] ss:$2 sm:$0xff]  ;;  %v5968_v37 = vld [vmem:[#allocation4 + $0x20] ss:$2 sm:$0xff] }
 0x718   :  { %5934 = vst.msk [vmem:[#allocation4 + $0x110] sm:$0xff] %vm30_vm3, %v5870_v20  ;;  %5935 = vst.msk [vmem:[#allocation4 + $0x118] sm:$0xff] %vm30_vm3, %v5871_v15  ;;  %v5970_v23 = vld [vmem:[#allocation4 + $0x30] ss:$2 sm:$0xff]  ;;  %v5972_v40 = vld [vmem:[#allocation4 + $0x40] ss:$2 sm:$0xff] }
 0x719   :  { %5936 = vst.msk [vmem:[#allocation4 + $0x120] sm:$0xff] %vm30_vm3, %v5872_v55  ;;  %5937 = vst.msk [vmem:[#allocation4 + $0x128] sm:$0xff] %vm30_vm3, %v5873_v30  ;;  %v12169_v13 = vld [vmem:[#allocation4 + $0x200] ss:$2 sm:$0xff]  ;;  %v12171_v7 = vld [vmem:[#allocation4 + $0x201] ss:$2 sm:$0xff] }
 0x71a   :  { %5938 = vst.msk [vmem:[#allocation4 + $0x130] sm:$0xff] %vm30_vm3, %v5874_v39  ;;  %5939 = vst.msk [vmem:[#allocation4 + $0x138] sm:$0xff] %vm30_vm3, %v5875_v32  ;;  %v5974_v9 = vld [vmem:[#allocation4 + $0x50] ss:$2 sm:$0xff]  ;;  %v5976_v33 = vld [vmem:[#allocation4 + $0x60] ss:$2 sm:$0xff]  ;;  %v6127_v8 = vmax.f32 %v12169_v13, %v12171_v7 }
 0x71b   :  { %5940 = vst.msk [vmem:[#allocation4 + $0x140] sm:$0xff] %vm30_vm3, %v5876_v14  ;;  %5941 = vst.msk [vmem:[#allocation4 + $0x148] sm:$0xff] %vm30_vm3, %v5877_v26  ;;  %v5978_v43 = vld [vmem:[#allocation4 + $0x70] ss:$2 sm:$0xff]  ;;  %v5980_v44 = vld [vmem:[#allocation4 + $0x80] ss:$2 sm:$0xff] }
 0x71c   :  { %5942 = vst.msk [vmem:[#allocation4 + $0x150] sm:$0xff] %vm30_vm3, %v5878_v25  ;;  %5943 = vst.msk [vmem:[#allocation4 + $0x158] sm:$0xff] %vm30_vm3, %v5879_v2  ;;  %v5982_v61 = vld [vmem:[#allocation4 + $0x90] ss:$2 sm:$0xff]  ;;  %v5984_v38 = vld [vmem:[#allocation4 + $0xa0] ss:$2 sm:$0xff] }
 0x71d   :  { %5944 = vst.msk [vmem:[#allocation4 + $0x160] sm:$0xff] %vm30_vm3, %v5880_v1  ;;  %5945 = vst.msk [vmem:[#allocation4 + $0x168] sm:$0xff] %vm30_vm3, %v5881_v53  ;;  %v6028_v59 = vld [vmem:[#allocation4 + $0x1] ss:$2 sm:$0xff]  ;;  %v5986_v12 = vld [vmem:[#allocation4 + $0xb0] ss:$2 sm:$0xff] }
 0x71e   :  { %5946 = vst.msk [vmem:[#allocation4 + $0x170] sm:$0xff] %vm30_vm3, %v5882_v54  ;;  %5947 = vst.msk [vmem:[#allocation4 + $0x178] sm:$0xff] %vm30_vm3, %v5883_v5  ;;  %v5988_v27 = vld [vmem:[#allocation4 + $0xc0] ss:$2 sm:$0xff]  ;;  %v5990_v17 = vld [vmem:[#allocation4 + $0xd0] ss:$2 sm:$0xff]  ;;  %v6095_v50 = vmax.f32 %v5964_v41, %v6028_v59 }
 0x71f   :  { %5948 = vst.msk [vmem:[#allocation4 + $0x180] sm:$0xff] %vm30_vm3, %v5884_v11  ;;  %5949 = vst.msk [vmem:[#allocation4 + $0x188] sm:$0xff] %vm30_vm3, %v5885_v28  ;;  %v6030_v60 = vld [vmem:[#allocation4 + $0x11] ss:$2 sm:$0xff]  ;;  %v5992_v42 = vld [vmem:[#allocation4 + $0xe0] ss:$2 sm:$0xff] }
 0x720   :  { %5950 = vst.msk [vmem:[#allocation4 + $0x190] sm:$0xff] %vm30_vm3, %v5886_v24  ;;  %5951 = vst.msk [vmem:[#allocation4 + $0x198] sm:$0xff] %vm30_vm3, %v5887_v36  ;;  %v5994_v16 = vld [vmem:[#allocation4 + $0xf0] ss:$2 sm:$0xff]  ;;  %v5996_v4 = vld [vmem:[#allocation4 + $0x100] ss:$2 sm:$0xff]  ;;  %v6096_v55 = vmax.f32 %v5966_v56, %v6030_v60 }
 0x721   :  { %5952 = vst.msk [vmem:[#allocation4 + $0x1a0] sm:$0xff] %vm30_vm3, %v5888_v52  ;;  %5953 = vst.msk [vmem:[#allocation4 + $0x1a8] sm:$0xff] %vm30_vm3, %v5889_v31  ;;  %v6032_v46 = vld [vmem:[#allocation4 + $0x21] ss:$2 sm:$0xff]  ;;  %v6034_v20 = vld [vmem:[#allocation4 + $0x31] ss:$2 sm:$0xff] }
 0x722   :  { %5954 = vst.msk [vmem:[#allocation4 + $0x1b0] sm:$0xff] %vm30_vm3, %v5890_v22  ;;  %5955 = vst.msk [vmem:[#allocation4 + $0x1b8] sm:$0xff] %vm30_vm3, %v5891_v47  ;;  %v6036_v15 = vld [vmem:[#allocation4 + $0x41] ss:$2 sm:$0xff]  ;;  %v5998_v30 = vld [vmem:[#allocation4 + $0x110] ss:$2 sm:$0xff]  ;;  %v6097_v2 = vmax.f32 %v5968_v37, %v6032_v46  ;;  %v6098_v1 = vmax.f32 %v5970_v23, %v6034_v20  ;;  %v6128_v36 = vmax.f32 %v6095_v50, %v6096_v55 }
 0x723   :  { %5956 = vst.msk [vmem:[#allocation4 + $0x1c0] sm:$0xff] %vm30_vm3, %v5892_v6  ;;  %5957 = vst.msk [vmem:[#allocation4 + $0x1c8] sm:$0xff] %vm30_vm3, %v5893_v35  ;;  %v6000_v39 = vld [vmem:[#allocation4 + $0x120] ss:$2 sm:$0xff]  ;;  %v6002_v32 = vld [vmem:[#allocation4 + $0x130] ss:$2 sm:$0xff]  ;;  %v12173_v53 = vmax.f32 %v5972_v40, %v6036_v15 }
 0x724   :  { %5958 = vst.msk [vmem:[#allocation4 + $0x1d0] sm:$0xff] %vm30_vm3, %v5894_v48  ;;  %5959 = vst.msk [vmem:[#allocation4 + $0x1d8] sm:$0xff] %vm30_vm3, %v5895_v51  ;;  %v6038_v14 = vld [vmem:[#allocation4 + $0x51] ss:$2 sm:$0xff]  ;;  %v6040_v26 = vld [vmem:[#allocation4 + $0x61] ss:$2 sm:$0xff]  ;;  %v6129_v10 = vmax.f32 %v6096_v55, %v6097_v2  ;;  %v6130_v56 = vmax.f32 %v6097_v2, %v6098_v1 }
 0x725   :  { %5960 = vst.msk [vmem:[#allocation4 + $0x1e0] sm:$0xff] %vm30_vm3, %v5896_v58  ;;  %5961 = vst.msk [vmem:[#allocation4 + $0x1e8] sm:$0xff] %vm30_vm3, %v5897_v19  ;;  %v6042_v25 = vld [vmem:[#allocation4 + $0x71] ss:$2 sm:$0xff]  ;;  %v6004_v54 = vld [vmem:[#allocation4 + $0x140] ss:$2 sm:$0xff]  ;;  %v12177_v45 = vmax.f32 %v5974_v9, %v6038_v14  ;;  %v12179_v24 = vmax.f32 %v5976_v33, %v6040_v26  ;;  %v6131_v59 = vmax.f32 %v6098_v1, %v12173_v53 }
 0x726   :  { %5962 = vst.msk [vmem:[#allocation4 + $0x1f0] sm:$0xff] %vm30_vm3, %v5898_v49  ;;  %5963 = vst.msk [vmem:[#allocation4 + $0x1f8] sm:$0xff] %vm30_vm3, %v5899_v21  ;;  %v6006_v5 = vld [vmem:[#allocation4 + $0x150] ss:$2 sm:$0xff]  ;;  %v6008_v34 = vld [vmem:[#allocation4 + $0x160] ss:$2 sm:$0xff]  ;;  %v12181_v3 = vmax.f32 %v5978_v43, %v6042_v25 }
 0x727   :  { %v6044_v11 = vld [vmem:[#allocation4 + $0x81] ss:$2 sm:$0xff]  ;;  %v6046_v57 = vld [vmem:[#allocation4 + $0x91] ss:$2 sm:$0xff]  ;;  %v6010_v52 = vld [vmem:[#allocation4 + $0x170] ss:$2 sm:$0xff] }
 0x728   :  { %v6048_v28 = vld [vmem:[#allocation4 + $0xa1] ss:$2 sm:$0xff]  ;;  %v6012_v63 = vld [vmem:[#allocation4 + $0x180] ss:$2 sm:$0xff]  ;;  %v6014_v31 = vld [vmem:[#allocation4 + $0x190] ss:$2 sm:$0xff]  ;;  %v12183_v35 = vmax.f32 %v5980_v44, %v6044_v11  ;;  %v12185_v18 = vmax.f32 %v5982_v61, %v6046_v57 }
 0x729   :  { %v6050_v22 = vld [vmem:[#allocation4 + $0xb1] ss:$2 sm:$0xff]  ;;  %v6052_v47 = vld [vmem:[#allocation4 + $0xc1] ss:$2 sm:$0xff]  ;;  %v12187_v48 = vmax.f32 %v5984_v38, %v6048_v28  ;;  %v6016_v51 = vld [vmem:[#allocation4 + $0x1a0] ss:$2 sm:$0xff] }
 0x72a   :  { %v6054_v6 = vld [vmem:[#allocation4 + $0xd1] ss:$2 sm:$0xff]  ;;  %v6018_v62 = vld [vmem:[#allocation4 + $0x1b0] ss:$2 sm:$0xff]  ;;  %v6020_v58 = vld [vmem:[#allocation4 + $0x1c0] ss:$2 sm:$0xff]  ;;  %v12189_v49 = vmax.f32 %v5986_v12, %v6050_v22  ;;  %v12191_v21 = vmax.f32 %v5988_v27, %v6052_v47 }
 0x72b   :  { %v6056_v29 = vld [vmem:[#allocation4 + $0xe1] ss:$2 sm:$0xff]  ;;  %v6058_v19 = vld [vmem:[#allocation4 + $0xf1] ss:$2 sm:$0xff]  ;;  %v12193_v41 = vmax.f32 %v5990_v17, %v6054_v6  ;;  %6160 = vst.msk [vmem:[%s12386_s8] sm:$0xff] %vm30_vm3, %v6128_v36  ;;  %6161 = vst.msk [vmem:[%s12386_s8 + $0x8] sm:$0xff] %vm30_vm3, %v6129_v10 }
 0x72c   :  { %v6060_v0 = vld [vmem:[#allocation4 + $0x101] ss:$2 sm:$0xff]  ;;  %v6022_v37 = vld [vmem:[#allocation4 + $0x1d0] ss:$2 sm:$0xff]  ;;  %v6024_v23 = vld [vmem:[#allocation4 + $0x1e0] ss:$2 sm:$0xff]  ;;  %v12199_v44 = vmax.f32 %v5992_v42, %v6056_v29  ;;  %v12201_v61 = vmax.f32 %v5994_v16, %v6058_v19  ;;  %v6132_v16 = vmax.f32 %v12173_v53, %v12177_v45  ;;  %v6134_v53 = vmax.f32 %v12179_v24, %v12181_v3 }
 0x72d   :  { %v6026_v40 = vld [vmem:[#allocation4 + $0x1f0] ss:$2 sm:$0xff]  ;;  %v6062_v9 = vld [vmem:[#allocation4 + $0x111] ss:$2 sm:$0xff]  ;;  %v6064_v33 = vld [vmem:[#allocation4 + $0x121] ss:$2 sm:$0xff]  ;;  %v12203_v38 = vmax.f32 %v5996_v4, %v6060_v0  ;;  %v6139_v22 = vmax.f32 %v12189_v49, %v12191_v21  ;;  %v6140_v47 = vmax.f32 %v12191_v21, %v12193_v41 }
 0x72e   :  { %v6066_v43 = vld [vmem:[#allocation4 + $0x131] ss:$2 sm:$0xff]  ;;  %v6068_v12 = vld [vmem:[#allocation4 + $0x141] ss:$2 sm:$0xff]  ;;  %v12210_v60 = vmax.f32 %v5998_v30, %v6062_v9  ;;  %v12212_v50 = vmax.f32 %v6000_v39, %v6064_v33  ;;  %6162 = vst.msk [vmem:[%s12386_s8 + $0x10] sm:$0xff] %vm30_vm3, %v6130_v56  ;;  %v6133_v39 = vmax.f32 %v12177_v45, %v12179_v24  ;;  %6163 = vst.msk [vmem:[%s12386_s8 + $0x18] sm:$0xff] %vm30_vm3, %v6131_v59 }
 0x72f   :  { %v6070_v27 = vld [vmem:[#allocation4 + $0x151] ss:$2 sm:$0xff]  ;;  %v6072_v17 = vld [vmem:[#allocation4 + $0x161] ss:$2 sm:$0xff]  ;;  %v12214_v42 = vmax.f32 %v6002_v32, %v6066_v43  ;;  %v6115_v15 = vmax.f32 %v6004_v54, %v6068_v12  ;;  %6164 = vst.msk [vmem:[%s12386_s8 + $0x20] sm:$0xff] %vm30_vm3, %v6132_v16  ;;  %v6135_v45 = vmax.f32 %v12181_v3, %v12183_v35  ;;  %6166 = vst.msk [vmem:[%s12386_s8 + $0x30] sm:$0xff] %vm30_vm3, %v6134_v53 }
 0x730   :  { %v6074_v4 = vld [vmem:[#allocation4 + $0x171] ss:$2 sm:$0xff]  ;;  %v6076_v46 = vld [vmem:[#allocation4 + $0x181] ss:$2 sm:$0xff]  ;;  %v12222_v55 = vmax.f32 %v6006_v5, %v6070_v27  ;;  %v12224_v30 = vmax.f32 %v6008_v34, %v6072_v17  ;;  %6165 = vst.msk [vmem:[%s12386_s8 + $0x28] sm:$0xff] %vm30_vm3, %v6133_v39  ;;  %v6138_v3 = vmax.f32 %v12187_v48, %v12189_v49  ;;  %v6141_v6 = vmax.f32 %v12193_v41, %v12199_v44 }
 0x731   :  { %v6078_v20 = vld [vmem:[#allocation4 + $0x191] ss:$2 sm:$0xff]  ;;  %v6080_v32 = vld [vmem:[#allocation4 + $0x1a1] ss:$2 sm:$0xff]  ;;  %v6118_v25 = vmax.f32 %v6010_v52, %v6074_v4  ;;  %v6119_v2 = vmax.f32 %v6012_v63, %v6076_v46  ;;  %v6136_v63 = vmax.f32 %v12183_v35, %v12185_v18  ;;  %6167 = vst.msk [vmem:[%s12386_s8 + $0x38] sm:$0xff] %vm30_vm3, %v6135_v45  ;;  %v6142_v35 = vmax.f32 %v12199_v44, %v12201_v61 }
 0x732   :  { %v6082_v14 = vld [vmem:[#allocation4 + $0x1b1] ss:$2 sm:$0xff]  ;;  %v6084_v26 = vld [vmem:[#allocation4 + $0x1c1] ss:$2 sm:$0xff]  ;;  %v6120_v1 = vmax.f32 %v6014_v31, %v6078_v20  ;;  %v6121_v11 = vmax.f32 %v6016_v51, %v6080_v32  ;;  %v6137_v31 = vmax.f32 %v12185_v18, %v12187_v48  ;;  %v6143_v18 = vmax.f32 %v12201_v61, %v12203_v38  ;;  %6170 = vst.msk [vmem:[%s12386_s8 + $0x50] sm:$0xff] %vm30_vm3, %v6138_v3 }
 0x733   :  { %v6086_v54 = vld [vmem:[#allocation4 + $0x1d1] ss:$2 sm:$0xff]  ;;  %v6088_v5 = vld [vmem:[#allocation4 + $0x1e1] ss:$2 sm:$0xff]  ;;  %v6122_v57 = vmax.f32 %v6018_v62, %v6082_v14  ;;  %v6123_v28 = vmax.f32 %v6020_v58, %v6084_v26  ;;  %v6144_v48 = vmax.f32 %v12203_v38, %v12210_v60  ;;  %6168 = vst.msk [vmem:[%s12386_s8 + $0x40] sm:$0xff] %vm30_vm3, %v6136_v63  ;;  %v6145_v10 = vmax.f32 %v12210_v60, %v12212_v50 }
 0x734   :  { %v6090_v34 = vld [vmem:[#allocation4 + $0x1f1] ss:$2 sm:$0xff]  ;;  %v6124_v24 = vmax.f32 %v6022_v37, %v6086_v54  ;;  %v6125_v36 = vmax.f32 %v6024_v23, %v6088_v5  ;;  %v6146_v51 = vmax.f32 %v12212_v50, %v12214_v42  ;;  %v6147_v62 = vmax.f32 %v12214_v42, %v6115_v15  ;;  %6169 = vst.msk [vmem:[%s12386_s8 + $0x48] sm:$0xff] %vm30_vm3, %v6137_v31 }
 0x735   :  { %v6126_v52 = vmax.f32 %v6026_v40, %v6090_v34  ;;  %v6148_v58 = vmax.f32 %v6115_v15, %v12222_v55  ;;  %6171 = vst.msk [vmem:[%s12386_s8 + $0x58] sm:$0xff] %vm30_vm3, %v6139_v22  ;;  %6172 = vst.msk [vmem:[%s12386_s8 + $0x60] sm:$0xff] %vm30_vm3, %v6140_v47  ;;  %v6149_v29 = vmax.f32 %v12222_v55, %v12224_v30 }
 0x736   :  { %v6150_v19 = vmax.f32 %v12224_v30, %v6118_v25  ;;  %v6151_v0 = vmax.f32 %v6118_v25, %v6119_v2  ;;  %v6152_v49 = vmax.f32 %v6119_v2, %v6120_v1  ;;  %6173 = vst.msk [vmem:[%s12386_s8 + $0x68] sm:$0xff] %vm30_vm3, %v6141_v6  ;;  %6174 = vst.msk [vmem:[%s12386_s8 + $0x70] sm:$0xff] %vm30_vm3, %v6142_v35 }
 0x737   :  { %6175 = vst.msk [vmem:[%s12386_s8 + $0x78] sm:$0xff] %vm30_vm3, %v6143_v18  ;;  %6176 = vst.msk [vmem:[%s12386_s8 + $0x80] sm:$0xff] %vm30_vm3, %v6144_v48  ;;  %v6153_v21 = vmax.f32 %v6120_v1, %v6121_v11  ;;  %v6154_v41 = vmax.f32 %v6121_v11, %v6122_v57  ;;  %v6155_v56 = vmax.f32 %v6122_v57, %v6123_v28 }
 0x738   :  { %v6156_v37 = vmax.f32 %v6123_v28, %v6124_v24  ;;  %6177 = vst.msk [vmem:[%s12386_s8 + $0x88] sm:$0xff] %vm30_vm3, %v6145_v10  ;;  %6178 = vst.msk [vmem:[%s12386_s8 + $0x90] sm:$0xff] %vm30_vm3, %v6146_v51  ;;  %v6157_v23 = vmax.f32 %v6124_v24, %v6125_v36  ;;  %v6158_v40 = vmax.f32 %v6125_v36, %v6126_v52 }
 0x739   :  { %6179 = vst.msk [vmem:[%s12386_s8 + $0x98] sm:$0xff] %vm30_vm3, %v6147_v62  ;;  %6180 = vst.msk [vmem:[%s12386_s8 + $0xa0] sm:$0xff] %vm30_vm3, %v6148_v58  ;;  %v6159_v9 = vmax.f32 %v6126_v52, %v6127_v8 }
 0x73a   :  { %6181 = vst.msk [vmem:[%s12386_s8 + $0xa8] sm:$0xff] %vm30_vm3, %v6149_v29  ;;  %6182 = vst.msk [vmem:[%s12386_s8 + $0xb0] sm:$0xff] %vm30_vm3, %v6150_v19 }
 0x73b   :  { %6183 = vst.msk [vmem:[%s12386_s8 + $0xb8] sm:$0xff] %vm30_vm3, %v6151_v0  ;;  %6184 = vst.msk [vmem:[%s12386_s8 + $0xc0] sm:$0xff] %vm30_vm3, %v6152_v49 }
 0x73c   :  { %6185 = vst.msk [vmem:[%s12386_s8 + $0xc8] sm:$0xff] %vm30_vm3, %v6153_v21  ;;  %6186 = vst.msk [vmem:[%s12386_s8 + $0xd0] sm:$0xff] %vm30_vm3, %v6154_v41 }
 0x73d   :  { %6187 = vst.msk [vmem:[%s12386_s8 + $0xd8] sm:$0xff] %vm30_vm3, %v6155_v56  ;;  %6188 = vst.msk [vmem:[%s12386_s8 + $0xe0] sm:$0xff] %vm30_vm3, %v6156_v37 }
 0x73e   :  { %6189 = vst.msk [vmem:[%s12386_s8 + $0xe8] sm:$0xff] %vm30_vm3, %v6157_v23  ;;  %6190 = vst.msk [vmem:[%s12386_s8 + $0xf0] sm:$0xff] %vm30_vm3, %v6158_v40 }
 0x73f   :  { %6191 = vst.msk [vmem:[%s12386_s8 + $0xf8] sm:$0xff] %vm30_vm3, %v6159_v9 }

</bundles_post_ra>
